<compile_context>
chip_gen: v7x
topology: tpu7x:2x2x1
jax: 0.10.0
libtpu: 0.0.40
codegen_flags: <defaults>
</compile_context>

<pallas_src>
import jax
import jax.numpy as jnp
from jax.experimental import pallas as pl
from jax.experimental.pallas import tpu as pltpu


# ------------------------------- kernel helpers -------------------------------

def _zero_halo(pad_ref, H, W):
    """Zero only the 1-px border strips of a (bB, H+2, W+2, C) VMEM halo scratch."""
    bB, _, _, C = pad_ref.shape
    zrow = jnp.zeros((bB, 1, W + 2, C), jnp.float32)
    zcol = jnp.zeros((bB, H + 2, 1, C), jnp.float32)
    pad_ref[:, 0:1, :, :] = zrow
    pad_ref[:, H + 1:H + 2, :, :] = zrow
    pad_ref[:, :, 0:1, :] = zcol
    pad_ref[:, :, W + 1:W + 2, :] = zcol


def _assemble_patches(pad_ref, patch_ref, H, W):
    """im2col: scatter the 9 shifted tap views of the padded tile into (bB*H*W, 9*C).

    Column order is tap-major / channel-minor, matching the host-side weight reshape
    (3,3,I,O) -> (9*I, O).
    """
    src = pad_ref[...]                                  # (bB, H+2, W+2, C)
    bB, _, _, C = src.shape
    M = bB * H * W
    t = 0
    for dh in range(3):                                 # static unroll over the 9 taps
        for dw in range(3):
            tap = src[:, dh:dh + H, dw:dw + W, :].reshape(M, C)
            patch_ref[:, t * C:(t + 1) * C] = tap
            t += 1


# --------------------------------- kernels ------------------------------------

def _resblock_kernel_ds(x_ref, w1_ref, b1_ref, w2_ref, b2_ref, wd_ref, bd_ref,
                        out_ref, xpad_ref, rpad_ref, xpat_ref, rpat_ref):
    """indim != outdim: skip path goes through the 3x3 'downsample' conv."""
    bB, H, W, _ = x_ref.shape
    Cout = out_ref.shape[-1]

    # Halo invariant: borders zeroed every step, interiors fully overwritten below.
    _zero_halo(xpad_ref, H, W)
    _zero_halo(rpad_ref, H, W)

    xv = x_ref[...].astype(jnp.float32)
    xpad_ref[:, 1:H + 1, 1:W + 1, :] = xv
    _assemble_patches(xpad_ref, xpat_ref, H, W)
    p_raw = xpat_ref[...]                               # raw-x taps (shared with downsample)
    p_relu = jnp.maximum(p_raw, 0.0)                    # relu(x) taps for conv1

    r = jnp.dot(p_relu, w1_ref[...], preferred_element_type=jnp.float32) + b1_ref[...]
    r = jnp.maximum(r, 0.0)                             # relu(conv1(relu(x)))
    rpad_ref[:, 1:H + 1, 1:W + 1, :] = r.reshape(bB, H, W, Cout)
    _assemble_patches(rpad_ref, rpat_ref, H, W)
    r2 = jnp.dot(rpat_ref[...], w2_ref[...], preferred_element_type=jnp.float32) + b2_ref[...]

    skip = jnp.dot(p_raw, wd_ref[...], preferred_element_type=jnp.float32) + bd_ref[...]
    out_ref[...] = (skip + r2).reshape(bB, H, W, Cout).astype(out_ref.dtype)


def _resblock_kernel_id(x_ref, w1_ref, b1_ref, w2_ref, b2_ref,
                        out_ref, xpad_ref, rpad_ref, xpat_ref, rpat_ref):
    """indim == outdim: identity skip."""
    bB, H, W, _ = x_ref.shape
    Cout = out_ref.shape[-1]

    _zero_halo(xpad_ref, H, W)
    _zero_halo(rpad_ref, H, W)

    xv = x_ref[...].astype(jnp.float32)                 # raw x, reused for the skip add
    # relu applied before im2col (relu(0)=0, so the zero halo stays valid padding)
    xpad_ref[:, 1:H + 1, 1:W + 1, :] = jnp.maximum(xv, 0.0)
    _assemble_patches(xpad_ref, xpat_ref, H, W)

    r = jnp.dot(xpat_ref[...], w1_ref[...], preferred_element_type=jnp.float32) + b1_ref[...]
    r = jnp.maximum(r, 0.0)
    rpad_ref[:, 1:H + 1, 1:W + 1, :] = r.reshape(bB, H, W, Cout)
    _assemble_patches(rpad_ref, rpat_ref, H, W)
    r2 = jnp.dot(rpat_ref[...], w2_ref[...], preferred_element_type=jnp.float32) + b2_ref[...]

    out_ref[...] = (xv + r2.reshape(bB, H, W, Cout)).astype(out_ref.dtype)


# --------------------------------- wrapper -------------------------------------

def _pick_batch_tile(B, H, W, Cin, Cout, vmem_budget_bytes=8 * 1024 * 1024):
    """Largest divisor of B that keeps per-step VMEM modest while aiming for M >= 512."""
    per_elem = 4 * ((H + 2) * (W + 2) * (Cin + Cout)        # halo scratches
                    + H * W * (9 * Cin + 9 * Cout)          # patch matrices
                    + 2 * H * W * (Cin + Cout))             # double-buffered in/out tiles
    cap = max(1, vmem_budget_bytes // max(per_elem, 1))
    target = min(cap, max(1, -(-512 // (H * W))))           # ceil(512 / (H*W))
    bb = 1
    for d in range(1, B + 1):
        if B % d == 0 and d <= target:
            bb = d
    return bb


def resblock_forward(x_nchw, params):
    """ResBlock forward. x_nchw: (B, Cin, H, W) -> (B, Cout, H, W)."""
    w1, b1, w2, b2 = params["w1"], params["b1"], params["w2"], params["b2"]
    has_ds = "wd" in params
    Cin, Cout = w1.shape[2], w1.shape[3]
    B, _, H, W = x_nchw.shape
    out_dtype = jnp.result_type(x_nchw.dtype, w1.dtype)

    # NHWC, native dtype: no host-side pad or astype pass — padding/cast happen in-kernel.
    x = jnp.transpose(x_nchw, (0, 2, 3, 1))

    bB = _pick_batch_tile(B, H, W, Cin, Cout)
    grid = (B // bB,)
    M = bB * H * W

    def wspec(k):
        return pl.BlockSpec((k, Cout), lambda b: (0, 0))

    def bspec():
        return pl.BlockSpec((1, Cout), lambda b: (0, 0))

    in_specs = [
        pl.BlockSpec((bB, H, W, Cin), lambda b: (b, 0, 0, 0)),
        wspec(9 * Cin), bspec(),
        wspec(9 * Cout), bspec(),
    ]
    # Weights pre-reshaped on the host for the single im2col matmul: (3,3,I,O) -> (9*I, O).
    args = [x,
            w1.reshape(9 * Cin, Cout), b1.reshape(1, Cout),
            w2.reshape(9 * Cout, Cout), b2.reshape(1, Cout)]
    if has_ds:
        in_specs += [wspec(9 * Cin), bspec()]
        args += [params["wd"].reshape(9 * Cin, Cout), params["bd"].reshape(1, Cout)]
        kernel = _resblock_kernel_ds
    else:
        kernel = _resblock_kernel_id

    out = pl.pallas_call(
        kernel,
        out_shape=jax.ShapeDtypeStruct((B, H, W, Cout), out_dtype),
        grid=grid,
        in_specs=in_specs,
        out_specs=pl.BlockSpec((bB, H, W, Cout), lambda b: (b, 0, 0, 0)),
        scratch_shapes=[
            pltpu.VMEM((bB, H + 2, W + 2, Cin), jnp.float32),   # padded x halo tile
            pltpu.VMEM((bB, H + 2, W + 2, Cout), jnp.float32),  # padded r halo tile
            pltpu.VMEM((M, 9 * Cin), jnp.float32),              # im2col(x)
            pltpu.VMEM((M, 9 * Cout), jnp.float32),             # im2col(relu(conv1))
        ],
        compiler_params=pltpu.CompilerParams(
            dimension_semantics=("parallel",),   # batch tiles are independent (v7x 2-TC)
            vmem_limit_bytes=32 * 1024 * 1024,
        ),
    )(*args)
    return jnp.transpose(out, (0, 3, 1, 2))                     # back to NCHW


# ----------------------- pure-JAX reference (for verification) -----------------------

def _conv3x3_ref(x_nhwc, w, b):
    y = jax.lax.conv_general_dilated(
        x_nhwc, w, window_strides=(1, 1), padding="SAME",
        dimension_numbers=("NHWC", "HWIO", "NHWC"))
    return y + b.reshape(1, 1, 1, -1)


def resblock_ref(x_nchw, params):
    x = jnp.transpose(x_nchw, (0, 2, 3, 1)).astype(jnp.float32)
    r = _conv3x3_ref(jax.nn.relu(x), params["w1"], params["b1"])
    r = _conv3x3_ref(jax.nn.relu(r), params["w2"], params["b2"])
    if "wd" in params:
        x = _conv3x3_ref(x, params["wd"], params["bd"])
    return jnp.transpose(x + r, (0, 3, 1, 2))


if __name__ == "__main__":
    key = jax.random.PRNGKey(0)
    B, Cin, H, W = 2, 4, 16, 16
    Cout = 8  # indim != outdim -> exercises the downsample branch of ResBlock
    ks = jax.random.split(key, 10)
    x = jax.random.normal(ks[0], (B, Cin, H, W), jnp.float32)
    params_ds = {
        "w1": 0.1 * jax.random.normal(ks[1], (3, 3, Cin, Cout), jnp.float32),   # HWIO
        "b1": 0.1 * jax.random.normal(ks[2], (Cout,), jnp.float32),
        "w2": 0.1 * jax.random.normal(ks[3], (3, 3, Cout, Cout), jnp.float32),
        "b2": 0.1 * jax.random.normal(ks[4], (Cout,), jnp.float32),
        "wd": 0.1 * jax.random.normal(ks[5], (3, 3, Cin, Cout), jnp.float32),
        "bd": 0.1 * jax.random.normal(ks[6], (Cout,), jnp.float32),
    }

    out = resblock_forward(x, params_ds)
    jax.block_until_ready(out)
    ref = resblock_ref(x, params_ds)
    assert out.shape == (B, Cout, H, W), out.shape
    assert jnp.allclose(out, ref, atol=1e-4, rtol=1e-4), float(jnp.abs(out - ref).max())

    # identity-skip branch (indim == outdim)
    x2 = jax.random.normal(ks[7], (B, Cout, H, W), jnp.float32)
    params_id = {
        "w1": 0.1 * jax.random.normal(ks[8], (3, 3, Cout, Cout), jnp.float32),
        "b1": params_ds["b1"],
        "w2": 0.1 * jax.random.normal(ks[9], (3, 3, Cout, Cout), jnp.float32),
        "b2": params_ds["b2"],
    }
    out2 = resblock_forward(x2, params_id)
    jax.block_until_ready(out2)
    ref2 = resblock_ref(x2, params_id)
    assert out2.shape == (B, Cout, H, W), out2.shape
    assert jnp.allclose(out2, ref2, atol=1e-4, rtol=1e-4), float(jnp.abs(out2 - ref2).max())

    print("KERNEL_OK")
</pallas_src>

<mosaic_0001>
module attributes {stable_mosaic.version = 11 : i64} {
  func.func @_resblock_kernel_ds(%arg0: i32, %arg1: memref<2x16x16x4xf32, #tpu.memory_space<vmem>>, %arg2: memref<36x8xf32, #tpu.memory_space<vmem>>, %arg3: memref<1x8xf32, #tpu.memory_space<vmem>>, %arg4: memref<72x8xf32, #tpu.memory_space<vmem>>, %arg5: memref<1x8xf32, #tpu.memory_space<vmem>>, %arg6: memref<36x8xf32, #tpu.memory_space<vmem>>, %arg7: memref<1x8xf32, #tpu.memory_space<vmem>>, %arg8: memref<2x16x16x8xf32, #tpu.memory_space<vmem>>, %arg9: memref<2x18x18x4xf32, #tpu.memory_space<vmem>>, %arg10: memref<2x18x18x8xf32, #tpu.memory_space<vmem>>, %arg11: memref<512x36xf32, #tpu.memory_space<vmem>>, %arg12: memref<512x72xf32, #tpu.memory_space<vmem>>) attributes {dimension_semantics = [#tpu.dimension_semantics<parallel>], iteration_bounds = array<i64: 1>, scalar_prefetch = 0 : i64, scratch_operands = 4 : i64, tpu.core_type = #tpu.core_type<tc>, window_params = [{transform_indices = @transform_0, window_bounds = array<i64: 2, 16, 16, 4>}, {pipeline_mode = #tpu.pipeline_mode<synchronous>, transform_indices = @transform_1, window_bounds = array<i64: 36, 8>}, {pipeline_mode = #tpu.pipeline_mode<synchronous>, transform_indices = @transform_2, window_bounds = array<i64: 1, 8>}, {pipeline_mode = #tpu.pipeline_mode<synchronous>, transform_indices = @transform_3, window_bounds = array<i64: 72, 8>}, {pipeline_mode = #tpu.pipeline_mode<synchronous>, transform_indices = @transform_4, window_bounds = array<i64: 1, 8>}, {pipeline_mode = #tpu.pipeline_mode<synchronous>, transform_indices = @transform_5, window_bounds = array<i64: 36, 8>}, {pipeline_mode = #tpu.pipeline_mode<synchronous>, transform_indices = @transform_6, window_bounds = array<i64: 1, 8>}, {transform_indices = @transform_7, window_bounds = array<i64: 2, 16, 16, 8>}]} {
    %cst = arith.constant 0.000000e+00 : f32
    %0 = vector.broadcast %cst : f32 to vector<2x1x18x4xf32>
    %cst_0 = arith.constant 0.000000e+00 : f32
    %1 = vector.broadcast %cst_0 : f32 to vector<2x18x1x4xf32>
    %c0 = arith.constant 0 : index
    %c0_1 = arith.constant 0 : index
    %c0_2 = arith.constant 0 : index
    %c0_3 = arith.constant 0 : index
    %2 = vector.load %arg9[%c0, %c0_1, %c0_2, %c0_3] : memref<2x18x18x4xf32, #tpu.memory_space<vmem>>, vector<2x1x18x4xf32>
    tpu.vector_store %arg9[%c0, %c0_1, %c0_2, %c0_3], %0 {strides = array<i32>} : memref<2x18x18x4xf32, #tpu.memory_space<vmem>>, vector<2x1x18x4xf32>,
    %c0_4 = arith.constant 0 : index
    %c17 = arith.constant 17 : index
    %c0_5 = arith.constant 0 : index
    %c0_6 = arith.constant 0 : index
    %3 = vector.load %arg9[%c0_4, %c17, %c0_5, %c0_6] : memref<2x18x18x4xf32, #tpu.memory_space<vmem>>, vector<2x1x18x4xf32>
    tpu.vector_store %arg9[%c0_4, %c17, %c0_5, %c0_6], %0 {strides = array<i32>} : memref<2x18x18x4xf32, #tpu.memory_space<vmem>>, vector<2x1x18x4xf32>,
    %c0_7 = arith.constant 0 : index
    %c0_8 = arith.constant 0 : index
    %c0_9 = arith.constant 0 : index
    %c0_10 = arith.constant 0 : index
    %4 = vector.load %arg9[%c0_7, %c0_8, %c0_9, %c0_10] : memref<2x18x18x4xf32, #tpu.memory_space<vmem>>, vector<2x18x1x4xf32>
    tpu.vector_store %arg9[%c0_7, %c0_8, %c0_9, %c0_10], %1 {strides = array<i32>} : memref<2x18x18x4xf32, #tpu.memory_space<vmem>>, vector<2x18x1x4xf32>,
    %c0_11 = arith.constant 0 : index
    %c0_12 = arith.constant 0 : index
    %c17_13 = arith.constant 17 : index
    %c0_14 = arith.constant 0 : index
    %5 = vector.load %arg9[%c0_11, %c0_12, %c17_13, %c0_14] : memref<2x18x18x4xf32, #tpu.memory_space<vmem>>, vector<2x18x1x4xf32>
    tpu.vector_store %arg9[%c0_11, %c0_12, %c17_13, %c0_14], %1 {strides = array<i32>} : memref<2x18x18x4xf32, #tpu.memory_space<vmem>>, vector<2x18x1x4xf32>,
    %cst_15 = arith.constant 0.000000e+00 : f32
    %6 = vector.broadcast %cst_15 : f32 to vector<2x1x18x8xf32>
    %cst_16 = arith.constant 0.000000e+00 : f32
    %7 = vector.broadcast %cst_16 : f32 to vector<2x18x1x8xf32>
    %c0_17 = arith.constant 0 : index
    %c0_18 = arith.constant 0 : index
    %c0_19 = arith.constant 0 : index
    %c0_20 = arith.constant 0 : index
    %8 = vector.load %arg10[%c0_17, %c0_18, %c0_19, %c0_20] : memref<2x18x18x8xf32, #tpu.memory_space<vmem>>, vector<2x1x18x8xf32>
    tpu.vector_store %arg10[%c0_17, %c0_18, %c0_19, %c0_20], %6 {strides = array<i32>} : memref<2x18x18x8xf32, #tpu.memory_space<vmem>>, vector<2x1x18x8xf32>,
    %c0_21 = arith.constant 0 : index
    %c17_22 = arith.constant 17 : index
    %c0_23 = arith.constant 0 : index
    %c0_24 = arith.constant 0 : index
    %9 = vector.load %arg10[%c0_21, %c17_22, %c0_23, %c0_24] : memref<2x18x18x8xf32, #tpu.memory_space<vmem>>, vector<2x1x18x8xf32>
    tpu.vector_store %arg10[%c0_21, %c17_22, %c0_23, %c0_24], %6 {strides = array<i32>} : memref<2x18x18x8xf32, #tpu.memory_space<vmem>>, vector<2x1x18x8xf32>,
    %c0_25 = arith.constant 0 : index
    %c0_26 = arith.constant 0 : index
    %c0_27 = arith.constant 0 : index
    %c0_28 = arith.constant 0 : index
    %10 = vector.load %arg10[%c0_25, %c0_26, %c0_27, %c0_28] : memref<2x18x18x8xf32, #tpu.memory_space<vmem>>, vector<2x18x1x8xf32>
    tpu.vector_store %arg10[%c0_25, %c0_26, %c0_27, %c0_28], %7 {strides = array<i32>} : memref<2x18x18x8xf32, #tpu.memory_space<vmem>>, vector<2x18x1x8xf32>,
    %c0_29 = arith.constant 0 : index
    %c0_30 = arith.constant 0 : index
    %c17_31 = arith.constant 17 : index
    %c0_32 = arith.constant 0 : index
    %11 = vector.load %arg10[%c0_29, %c0_30, %c17_31, %c0_32] : memref<2x18x18x8xf32, #tpu.memory_space<vmem>>, vector<2x18x1x8xf32>
    tpu.vector_store %arg10[%c0_29, %c0_30, %c17_31, %c0_32], %7 {strides = array<i32>} : memref<2x18x18x8xf32, #tpu.memory_space<vmem>>, vector<2x18x1x8xf32>,
    %c0_33 = arith.constant 0 : index
    %c0_34 = arith.constant 0 : index
    %c0_35 = arith.constant 0 : index
    %c0_36 = arith.constant 0 : index
    %12 = vector.load %arg1[%c0_33, %c0_34, %c0_35, %c0_36] : memref<2x16x16x4xf32, #tpu.memory_space<vmem>>, vector<2x16x16x4xf32>
    %c0_37 = arith.constant 0 : index
    %c1 = arith.constant 1 : index
    %c1_38 = arith.constant 1 : index
    %c0_39 = arith.constant 0 : index
    %13 = vector.load %arg9[%c0_37, %c1, %c1_38, %c0_39] : memref<2x18x18x4xf32, #tpu.memory_space<vmem>>, vector<2x16x16x4xf32>
    tpu.vector_store %arg9[%c0_37, %c1, %c1_38, %c0_39], %12 {strides = array<i32>} : memref<2x18x18x4xf32, #tpu.memory_space<vmem>>, vector<2x16x16x4xf32>,
    %c0_40 = arith.constant 0 : index
    %c0_41 = arith.constant 0 : index
    %c0_42 = arith.constant 0 : index
    %c0_43 = arith.constant 0 : index
    %14 = vector.load %arg9[%c0_40, %c0_41, %c0_42, %c0_43] : memref<2x18x18x4xf32, #tpu.memory_space<vmem>>, vector<2x18x18x4xf32>
    %15 = vector.extract_strided_slice %14 {offsets = [0, 0, 0, 0], sizes = [2, 16, 16, 4], strides = [1, 1, 1, 1]} : vector<2x18x18x4xf32> to vector<2x16x16x4xf32>
    %16 = vector.shape_cast %15 : vector<2x16x16x4xf32> to vector<512x4xf32>
    %c0_44 = arith.constant 0 : index
    %c0_45 = arith.constant 0 : index
    %17 = vector.load %arg11[%c0_44, %c0_45] : memref<512x36xf32, #tpu.memory_space<vmem>>, vector<512x4xf32>
    tpu.vector_store %arg11[%c0_44, %c0_45], %16 {strides = array<i32>} : memref<512x36xf32, #tpu.memory_space<vmem>>, vector<512x4xf32>,
    %18 = vector.extract_strided_slice %14 {offsets = [0, 0, 1, 0], sizes = [2, 16, 16, 4], strides = [1, 1, 1, 1]} : vector<2x18x18x4xf32> to vector<2x16x16x4xf32>
    %19 = vector.shape_cast %18 : vector<2x16x16x4xf32> to vector<512x4xf32>
    %c0_46 = arith.constant 0 : index
    %c4 = arith.constant 4 : index
    %20 = vector.load %arg11[%c0_46, %c4] : memref<512x36xf32, #tpu.memory_space<vmem>>, vector<512x4xf32>
    tpu.vector_store %arg11[%c0_46, %c4], %19 {strides = array<i32>} : memref<512x36xf32, #tpu.memory_space<vmem>>, vector<512x4xf32>,
    %21 = vector.extract_strided_slice %14 {offsets = [0, 0, 2, 0], sizes = [2, 16, 16, 4], strides = [1, 1, 1, 1]} : vector<2x18x18x4xf32> to vector<2x16x16x4xf32>
    %22 = vector.shape_cast %21 : vector<2x16x16x4xf32> to vector<512x4xf32>
    %c0_47 = arith.constant 0 : index
    %c8 = arith.constant 8 : index
    %23 = vector.load %arg11[%c0_47, %c8] : memref<512x36xf32, #tpu.memory_space<vmem>>, vector<512x4xf32>
    tpu.vector_store %arg11[%c0_47, %c8], %22 {strides = array<i32>} : memref<512x36xf32, #tpu.memory_space<vmem>>, vector<512x4xf32>,
    %24 = vector.extract_strided_slice %14 {offsets = [0, 1, 0, 0], sizes = [2, 16, 16, 4], strides = [1, 1, 1, 1]} : vector<2x18x18x4xf32> to vector<2x16x16x4xf32>
    %25 = vector.shape_cast %24 : vector<2x16x16x4xf32> to vector<512x4xf32>
    %c0_48 = arith.constant 0 : index
    %c12 = arith.constant 12 : index
    %26 = vector.load %arg11[%c0_48, %c12] : memref<512x36xf32, #tpu.memory_space<vmem>>, vector<512x4xf32>
    tpu.vector_store %arg11[%c0_48, %c12], %25 {strides = array<i32>} : memref<512x36xf32, #tpu.memory_space<vmem>>, vector<512x4xf32>,
    %27 = vector.extract_strided_slice %14 {offsets = [0, 1, 1, 0], sizes = [2, 16, 16, 4], strides = [1, 1, 1, 1]} : vector<2x18x18x4xf32> to vector<2x16x16x4xf32>
    %28 = vector.shape_cast %27 : vector<2x16x16x4xf32> to vector<512x4xf32>
    %c0_49 = arith.constant 0 : index
    %c16 = arith.constant 16 : index
    %29 = vector.load %arg11[%c0_49, %c16] : memref<512x36xf32, #tpu.memory_space<vmem>>, vector<512x4xf32>
    tpu.vector_store %arg11[%c0_49, %c16], %28 {strides = array<i32>} : memref<512x36xf32, #tpu.memory_space<vmem>>, vector<512x4xf32>,
    %30 = vector.extract_strided_slice %14 {offsets = [0, 1, 2, 0], sizes = [2, 16, 16, 4], strides = [1, 1, 1, 1]} : vector<2x18x18x4xf32> to vector<2x16x16x4xf32>
    %31 = vector.shape_cast %30 : vector<2x16x16x4xf32> to vector<512x4xf32>
    %c0_50 = arith.constant 0 : index
    %c20 = arith.constant 20 : index
    %32 = vector.load %arg11[%c0_50, %c20] : memref<512x36xf32, #tpu.memory_space<vmem>>, vector<512x4xf32>
    tpu.vector_store %arg11[%c0_50, %c20], %31 {strides = array<i32>} : memref<512x36xf32, #tpu.memory_space<vmem>>, vector<512x4xf32>,
    %33 = vector.extract_strided_slice %14 {offsets = [0, 2, 0, 0], sizes = [2, 16, 16, 4], strides = [1, 1, 1, 1]} : vector<2x18x18x4xf32> to vector<2x16x16x4xf32>
    %34 = vector.shape_cast %33 : vector<2x16x16x4xf32> to vector<512x4xf32>
    %c0_51 = arith.constant 0 : index
    %c24 = arith.constant 24 : index
    %35 = vector.load %arg11[%c0_51, %c24] : memref<512x36xf32, #tpu.memory_space<vmem>>, vector<512x4xf32>
    tpu.vector_store %arg11[%c0_51, %c24], %34 {strides = array<i32>} : memref<512x36xf32, #tpu.memory_space<vmem>>, vector<512x4xf32>,
    %36 = vector.extract_strided_slice %14 {offsets = [0, 2, 1, 0], sizes = [2, 16, 16, 4], strides = [1, 1, 1, 1]} : vector<2x18x18x4xf32> to vector<2x16x16x4xf32>
    %37 = vector.shape_cast %36 : vector<2x16x16x4xf32> to vector<512x4xf32>
    %c0_52 = arith.constant 0 : index
    %c28 = arith.constant 28 : index
    %38 = vector.load %arg11[%c0_52, %c28] : memref<512x36xf32, #tpu.memory_space<vmem>>, vector<512x4xf32>
    tpu.vector_store %arg11[%c0_52, %c28], %37 {strides = array<i32>} : memref<512x36xf32, #tpu.memory_space<vmem>>, vector<512x4xf32>,
    %39 = vector.extract_strided_slice %14 {offsets = [0, 2, 2, 0], sizes = [2, 16, 16, 4], strides = [1, 1, 1, 1]} : vector<2x18x18x4xf32> to vector<2x16x16x4xf32>
    %40 = vector.shape_cast %39 : vector<2x16x16x4xf32> to vector<512x4xf32>
    %c0_53 = arith.constant 0 : index
    %c32 = arith.constant 32 : index
    %41 = vector.load %arg11[%c0_53, %c32] : memref<512x36xf32, #tpu.memory_space<vmem>>, vector<512x4xf32>
    tpu.vector_store %arg11[%c0_53, %c32], %40 {strides = array<i32>} : memref<512x36xf32, #tpu.memory_space<vmem>>, vector<512x4xf32>,
    %c0_54 = arith.constant 0 : index
    %c0_55 = arith.constant 0 : index
    %42 = vector.load %arg11[%c0_54, %c0_55] : memref<512x36xf32, #tpu.memory_space<vmem>>, vector<512x36xf32>
    %cst_56 = arith.constant 0.000000e+00 : f32
    %43 = vector.broadcast %cst_56 : f32 to vector<512x36xf32>
    %44 = arith.maximumf %42, %43 : vector<512x36xf32>
    %c0_57 = arith.constant 0 : index
    %c0_58 = arith.constant 0 : index
    %45 = vector.load %arg2[%c0_57, %c0_58] : memref<36x8xf32, #tpu.memory_space<vmem>>, vector<36x8xf32>
    %cst_59 = arith.constant dense<0.000000e+00> : vector<512x8xf32>
    %46 = tpu.matmul %44, %45, %cst_59 {dimension_numbers = #tpu.dot_dimension_numbers<[1], [0], [0], [1], [0, 0, 1, 1], [], []>} : vector<512x36xf32>, vector<36x8xf32>, vector<512x8xf32> -> vector<512x8xf32>
    %c0_60 = arith.constant 0 : index
    %c0_61 = arith.constant 0 : index
    %47 = vector.load %arg3[%c0_60, %c0_61] : memref<1x8xf32, #tpu.memory_space<vmem>>, vector<1x8xf32>
    %48 = vector.broadcast %47 : vector<1x8xf32> to vector<512x8xf32>
    %49 = arith.addf %46, %48 : vector<512x8xf32>
    %cst_62 = arith.constant 0.000000e+00 : f32
    %50 = vector.broadcast %cst_62 : f32 to vector<512x8xf32>
    %51 = arith.maximumf %49, %50 : vector<512x8xf32>
    %52 = vector.shape_cast %51 : vector<512x8xf32> to vector<2x16x16x8xf32>
    %c0_63 = arith.constant 0 : index
    %c1_64 = arith.constant 1 : index
    %c1_65 = arith.constant 1 : index
    %c0_66 = arith.constant 0 : index
    %53 = vector.load %arg10[%c0_63, %c1_64, %c1_65, %c0_66] : memref<2x18x18x8xf32, #tpu.memory_space<vmem>>, vector<2x16x16x8xf32>
    tpu.vector_store %arg10[%c0_63, %c1_64, %c1_65, %c0_66], %52 {strides = array<i32>} : memref<2x18x18x8xf32, #tpu.memory_space<vmem>>, vector<2x16x16x8xf32>,
    %c0_67 = arith.constant 0 : index
    %c0_68 = arith.constant 0 : index
    %c0_69 = arith.constant 0 : index
    %c0_70 = arith.constant 0 : index
    %54 = vector.load %arg10[%c0_67, %c0_68, %c0_69, %c0_70] : memref<2x18x18x8xf32, #tpu.memory_space<vmem>>, vector<2x18x18x8xf32>
    %55 = vector.extract_strided_slice %54 {offsets = [0, 0, 0, 0], sizes = [2, 16, 16, 8], strides = [1, 1, 1, 1]} : vector<2x18x18x8xf32> to vector<2x16x16x8xf32>
    %56 = vector.shape_cast %55 : vector<2x16x16x8xf32> to vector<512x8xf32>
    %c0_71 = arith.constant 0 : index
    %c0_72 = arith.constant 0 : index
    %57 = vector.load %arg12[%c0_71, %c0_72] : memref<512x72xf32, #tpu.memory_space<vmem>>, vector<512x8xf32>
    tpu.vector_store %arg12[%c0_71, %c0_72], %56 {strides = array<i32>} : memref<512x72xf32, #tpu.memory_space<vmem>>, vector<512x8xf32>,
    %58 = vector.extract_strided_slice %54 {offsets = [0, 0, 1, 0], sizes = [2, 16, 16, 8], strides = [1, 1, 1, 1]} : vector<2x18x18x8xf32> to vector<2x16x16x8xf32>
    %59 = vector.shape_cast %58 : vector<2x16x16x8xf32> to vector<512x8xf32>
    %c0_73 = arith.constant 0 : index
    %c8_74 = arith.constant 8 : index
    %60 = vector.load %arg12[%c0_73, %c8_74] : memref<512x72xf32, #tpu.memory_space<vmem>>, vector<512x8xf32>
    tpu.vector_store %arg12[%c0_73, %c8_74], %59 {strides = array<i32>} : memref<512x72xf32, #tpu.memory_space<vmem>>, vector<512x8xf32>,
    %61 = vector.extract_strided_slice %54 {offsets = [0, 0, 2, 0], sizes = [2, 16, 16, 8], strides = [1, 1, 1, 1]} : vector<2x18x18x8xf32> to vector<2x16x16x8xf32>
    %62 = vector.shape_cast %61 : vector<2x16x16x8xf32> to vector<512x8xf32>
    %c0_75 = arith.constant 0 : index
    %c16_76 = arith.constant 16 : index
    %63 = vector.load %arg12[%c0_75, %c16_76] : memref<512x72xf32, #tpu.memory_space<vmem>>, vector<512x8xf32>
    tpu.vector_store %arg12[%c0_75, %c16_76], %62 {strides = array<i32>} : memref<512x72xf32, #tpu.memory_space<vmem>>, vector<512x8xf32>,
    %64 = vector.extract_strided_slice %54 {offsets = [0, 1, 0, 0], sizes = [2, 16, 16, 8], strides = [1, 1, 1, 1]} : vector<2x18x18x8xf32> to vector<2x16x16x8xf32>
    %65 = vector.shape_cast %64 : vector<2x16x16x8xf32> to vector<512x8xf32>
    %c0_77 = arith.constant 0 : index
    %c24_78 = arith.constant 24 : index
    %66 = vector.load %arg12[%c0_77, %c24_78] : memref<512x72xf32, #tpu.memory_space<vmem>>, vector<512x8xf32>
    tpu.vector_store %arg12[%c0_77, %c24_78], %65 {strides = array<i32>} : memref<512x72xf32, #tpu.memory_space<vmem>>, vector<512x8xf32>,
    %67 = vector.extract_strided_slice %54 {offsets = [0, 1, 1, 0], sizes = [2, 16, 16, 8], strides = [1, 1, 1, 1]} : vector<2x18x18x8xf32> to vector<2x16x16x8xf32>
    %68 = vector.shape_cast %67 : vector<2x16x16x8xf32> to vector<512x8xf32>
    %c0_79 = arith.constant 0 : index
    %c32_80 = arith.constant 32 : index
    %69 = vector.load %arg12[%c0_79, %c32_80] : memref<512x72xf32, #tpu.memory_space<vmem>>, vector<512x8xf32>
    tpu.vector_store %arg12[%c0_79, %c32_80], %68 {strides = array<i32>} : memref<512x72xf32, #tpu.memory_space<vmem>>, vector<512x8xf32>,
    %70 = vector.extract_strided_slice %54 {offsets = [0, 1, 2, 0], sizes = [2, 16, 16, 8], strides = [1, 1, 1, 1]} : vector<2x18x18x8xf32> to vector<2x16x16x8xf32>
    %71 = vector.shape_cast %70 : vector<2x16x16x8xf32> to vector<512x8xf32>
    %c0_81 = arith.constant 0 : index
    %c40 = arith.constant 40 : index
    %72 = vector.load %arg12[%c0_81, %c40] : memref<512x72xf32, #tpu.memory_space<vmem>>, vector<512x8xf32>
    tpu.vector_store %arg12[%c0_81, %c40], %71 {strides = array<i32>} : memref<512x72xf32, #tpu.memory_space<vmem>>, vector<512x8xf32>,
    %73 = vector.extract_strided_slice %54 {offsets = [0, 2, 0, 0], sizes = [2, 16, 16, 8], strides = [1, 1, 1, 1]} : vector<2x18x18x8xf32> to vector<2x16x16x8xf32>
    %74 = vector.shape_cast %73 : vector<2x16x16x8xf32> to vector<512x8xf32>
    %c0_82 = arith.constant 0 : index
    %c48 = arith.constant 48 : index
    %75 = vector.load %arg12[%c0_82, %c48] : memref<512x72xf32, #tpu.memory_space<vmem>>, vector<512x8xf32>
    tpu.vector_store %arg12[%c0_82, %c48], %74 {strides = array<i32>} : memref<512x72xf32, #tpu.memory_space<vmem>>, vector<512x8xf32>,
    %76 = vector.extract_strided_slice %54 {offsets = [0, 2, 1, 0], sizes = [2, 16, 16, 8], strides = [1, 1, 1, 1]} : vector<2x18x18x8xf32> to vector<2x16x16x8xf32>
    %77 = vector.shape_cast %76 : vector<2x16x16x8xf32> to vector<512x8xf32>
    %c0_83 = arith.constant 0 : index
    %c56 = arith.constant 56 : index
    %78 = vector.load %arg12[%c0_83, %c56] : memref<512x72xf32, #tpu.memory_space<vmem>>, vector<512x8xf32>
    tpu.vector_store %arg12[%c0_83, %c56], %77 {strides = array<i32>} : memref<512x72xf32, #tpu.memory_space<vmem>>, vector<512x8xf32>,
    %79 = vector.extract_strided_slice %54 {offsets = [0, 2, 2, 0], sizes = [2, 16, 16, 8], strides = [1, 1, 1, 1]} : vector<2x18x18x8xf32> to vector<2x16x16x8xf32>
    %80 = vector.shape_cast %79 : vector<2x16x16x8xf32> to vector<512x8xf32>
    %c0_84 = arith.constant 0 : index
    %c64 = arith.constant 64 : index
    %81 = vector.load %arg12[%c0_84, %c64] : memref<512x72xf32, #tpu.memory_space<vmem>>, vector<512x8xf32>
    tpu.vector_store %arg12[%c0_84, %c64], %80 {strides = array<i32>} : memref<512x72xf32, #tpu.memory_space<vmem>>, vector<512x8xf32>,
    %c0_85 = arith.constant 0 : index
    %c0_86 = arith.constant 0 : index
    %82 = vector.load %arg12[%c0_85, %c0_86] : memref<512x72xf32, #tpu.memory_space<vmem>>, vector<512x72xf32>
    %c0_87 = arith.constant 0 : index
    %c0_88 = arith.constant 0 : index
    %83 = vector.load %arg4[%c0_87, %c0_88] : memref<72x8xf32, #tpu.memory_space<vmem>>, vector<72x8xf32>
    %cst_89 = arith.constant dense<0.000000e+00> : vector<512x8xf32>
    %84 = tpu.matmul %82, %83, %cst_89 {dimension_numbers = #tpu.dot_dimension_numbers<[1], [0], [0], [1], [0, 0, 1, 1], [], []>} : vector<512x72xf32>, vector<72x8xf32>, vector<512x8xf32> -> vector<512x8xf32>
    %c0_90 = arith.constant 0 : index
    %c0_91 = arith.constant 0 : index
    %85 = vector.load %arg5[%c0_90, %c0_91] : memref<1x8xf32, #tpu.memory_space<vmem>>, vector<1x8xf32>
    %86 = vector.broadcast %85 : vector<1x8xf32> to vector<512x8xf32>
    %87 = arith.addf %84, %86 : vector<512x8xf32>
    %c0_92 = arith.constant 0 : index
    %c0_93 = arith.constant 0 : index
    %88 = vector.load %arg6[%c0_92, %c0_93] : memref<36x8xf32, #tpu.memory_space<vmem>>, vector<36x8xf32>
    %cst_94 = arith.constant dense<0.000000e+00> : vector<512x8xf32>
    %89 = tpu.matmul %42, %88, %cst_94 {dimension_numbers = #tpu.dot_dimension_numbers<[1], [0], [0], [1], [0, 0, 1, 1], [], []>} : vector<512x36xf32>, vector<36x8xf32>, vector<512x8xf32> -> vector<512x8xf32>
    %c0_95 = arith.constant 0 : index
    %c0_96 = arith.constant 0 : index
    %90 = vector.load %arg7[%c0_95, %c0_96] : memref<1x8xf32, #tpu.memory_space<vmem>>, vector<1x8xf32>
    %91 = vector.broadcast %90 : vector<1x8xf32> to vector<512x8xf32>
    %92 = arith.addf %89, %91 : vector<512x8xf32>
    %93 = arith.addf %92, %87 : vector<512x8xf32>
    %94 = vector.shape_cast %93 : vector<512x8xf32> to vector<2x16x16x8xf32>
    %c0_97 = arith.constant 0 : index
    %c0_98 = arith.constant 0 : index
    %c0_99 = arith.constant 0 : index
    %c0_100 = arith.constant 0 : index
    %95 = vector.load %arg8[%c0_97, %c0_98, %c0_99, %c0_100] : memref<2x16x16x8xf32, #tpu.memory_space<vmem>>, vector<2x16x16x8xf32>
    tpu.vector_store %arg8[%c0_97, %c0_98, %c0_99, %c0_100], %94 {strides = array<i32>} : memref<2x16x16x8xf32, #tpu.memory_space<vmem>>, vector<2x16x16x8xf32>,
    return
  }
  func.func @transform_0(%arg0: i32) -> (i32, i32, i32, i32) {
    %c0_i32 = arith.constant 0 : i32
    %c0_i32_0 = arith.constant 0 : i32
    %c0_i32_1 = arith.constant 0 : i32
    %c0_i32_2 = arith.constant 0 : i32
    return %arg0, %c0_i32, %c0_i32_0, %c0_i32_1 : i32, i32, i32, i32
  }
  func.func @transform_1(%arg0: i32) -> (i32, i32) {
    %c0_i32 = arith.constant 0 : i32
    %c0_i32_0 = arith.constant 0 : i32
    %c0_i32_1 = arith.constant 0 : i32
    return %c0_i32, %c0_i32_0 : i32, i32
  }
  func.func @transform_2(%arg0: i32) -> (i32, i32) {
    %c0_i32 = arith.constant 0 : i32
    %c0_i32_0 = arith.constant 0 : i32
    %c0_i32_1 = arith.constant 0 : i32
    return %c0_i32, %c0_i32_0 : i32, i32
  }
  func.func @transform_3(%arg0: i32) -> (i32, i32) {
    %c0_i32 = arith.constant 0 : i32
    %c0_i32_0 = arith.constant 0 : i32
    %c0_i32_1 = arith.constant 0 : i32
    return %c0_i32, %c0_i32_0 : i32, i32
  }
  func.func @transform_4(%arg0: i32) -> (i32, i32) {
    %c0_i32 = arith.constant 0 : i32
    %c0_i32_0 = arith.constant 0 : i32
    %c0_i32_1 = arith.constant 0 : i32
    return %c0_i32, %c0_i32_0 : i32, i32
  }
  func.func @transform_5(%arg0: i32) -> (i32, i32) {
    %c0_i32 = arith.constant 0 : i32
    %c0_i32_0 = arith.constant 0 : i32
    %c0_i32_1 = arith.constant 0 : i32
    return %c0_i32, %c0_i32_0 : i32, i32
  }
  func.func @transform_6(%arg0: i32) -> (i32, i32) {
    %c0_i32 = arith.constant 0 : i32
    %c0_i32_0 = arith.constant 0 : i32
    %c0_i32_1 = arith.constant 0 : i32
    return %c0_i32, %c0_i32_0 : i32, i32
  }
  func.func @transform_7(%arg0: i32) -> (i32, i32, i32, i32) {
    %c0_i32 = arith.constant 0 : i32
    %c0_i32_0 = arith.constant 0 : i32
    %c0_i32_1 = arith.constant 0 : i32
    %c0_i32_2 = arith.constant 0 : i32
    return %arg0, %c0_i32, %c0_i32_0, %c0_i32_1 : i32, i32, i32, i32
  }
}

</mosaic_0001>

<bundles_post_ra>
// kernel: tpu_custom_call.1
= control target key start
LH: loop header
LB: loop body
LE: loop exit
PB: predicated region body
PF: predicated region fallthrough
CT: control target
= control target key end

     0   :  { %vm26_vm0 = vcmask 31744   ;;  %vm41_vm1 = vcmask 24576   ;;  %v15368_v0 = vmov 0.0   ;;  %vm29_vm2 = vcmask 25600   ;;  %s9029_s24 = smov 4   ;;  %s9030_s10 = smov 8   ;;  %s15360_s0 = inlined_call_operand.vmem [shape: f32[2,16,16,4], index: 0, kind: input, shape index: {}]   ;;  %s15361_s1 = inlined_call_operand.vmem [shape: f32[36,8], index: 1, kind: input, shape index: {}]   ;;  %s15362_s2 = inlined_call_operand.vmem [shape: f32[1,8], index: 2, kind: input, shape index: {}]   ;;  %s15363_s3 = inlined_call_operand.vmem [shape: f32[72,8], index: 3, kind: input, shape index: {}]   ;;  %s15364_s5 = inlined_call_operand.vmem [shape: f32[36,8], index: 5, kind: input, shape index: {}]   ;;  %s15365_s4 = inlined_call_operand.vmem [shape: f32[1,8], index: 4, kind: input, shape index: {}]   ;;  %s15366_s6 = inlined_call_operand.vmem [shape: f32[1,8], index: 6, kind: input, shape index: {}]   ;;  %s15367_s7 = inlined_call_operand.vmem [shape: f32[2,16,16,8], index: 7, kind: output, shape index: {}]  }
   0x1   :  { %27 = vst.msk [vmem:[#allocation2] sm:$0xff] %vm26_vm0, %v15368_v0  ;;  %28 = vst.msk [vmem:[#allocation2 + $0x8] sm:$0xff] %vm26_vm0, %v15368_v0  ;;  %v202_v1 = vld [vmem:[%s15360_s0] sm:$0xff]  ;;  %v203_v2 = vld [vmem:[%s15360_s0 + $0x8] sm:$0xff]  ;;  %vm599_vm3 = vcmask 1046528   ;;  %vm1017_vm4 = vcmask 1045504  }
   0x2   :  { %31 = vst.msk [vmem:[#allocation2 + $0x1b0] sm:$0xff] %vm26_vm0, %v15368_v0  ;;  %32 = vst.msk [vmem:[#allocation2 + $0x1b8] sm:$0xff] %vm26_vm0, %v15368_v0  ;;  %v204_v3 = vld [vmem:[%s15360_s0 + $0x10] sm:$0xff]  ;;  %v205_v4 = vld [vmem:[%s15360_s0 + $0x18] sm:$0xff]  ;;  %vm952_vm5 = vcmask 64544   ;;  %vm1370_vm6 = vcmask 97344  }
   0x3   :  { %35 = vst.msk [vmem:[#allocation2 + $0x198] sm:$0xff] %vm26_vm0, %v15368_v0  ;;  %36 = vst.msk [vmem:[#allocation2 + $0x1a0] sm:$0xff] %vm26_vm0, %v15368_v0  ;;  %v206_v5 = vld [vmem:[%s15360_s0 + $0x20] sm:$0xff]  ;;  %v207_v6 = vld [vmem:[%s15360_s0 + $0x28] sm:$0xff]  ;;  %vm1631_vm7 = vcmask 130144   ;;  %s9032_s18 = smov 16  }
   0x4   :  { %38 = vst.msk [vmem:[#allocation2 + $0x348] sm:$0xff] %vm26_vm0, %v15368_v0  ;;  %39 = vst.msk [vmem:[#allocation2 + $0x350] sm:$0xff] %vm26_vm0, %v15368_v0  ;;  %v208_v7 = vld [vmem:[%s15360_s0 + $0x30] sm:$0xff]  ;;  %v209_v8 = vld [vmem:[%s15360_s0 + $0x38] sm:$0xff]  ;;  %vm1900_vm8 = vcmask 162944   ;;  %s9033_s19 = smov 20  }
   0x5   :  { %43 = vst.msk [vmem:[#allocation2 + $0x18] sm:$0x1] %vm41_vm1, %v15368_v0  ;;  %44 = vst.msk [vmem:[#allocation2 + $0x30] sm:$0x1] %vm41_vm1, %v15368_v0  ;;  %v210_v9 = vld [vmem:[%s15360_s0 + $0x40] sm:$0xff]  ;;  %v211_v10 = vld [vmem:[%s15360_s0 + $0x48] sm:$0xff] }
   0x6   :  { %45 = vst.msk [vmem:[#allocation2 + $0x48] sm:$0x1] %vm41_vm1, %v15368_v0  ;;  %46 = vst.msk [vmem:[#allocation2 + $0x60] sm:$0x1] %vm41_vm1, %v15368_v0  ;;  %v212_v11 = vld [vmem:[%s15360_s0 + $0x50] sm:$0xff]  ;;  %v213_v12 = vld [vmem:[%s15360_s0 + $0x58] sm:$0xff] }
   0x7   :  { %47 = vst.msk [vmem:[#allocation2 + $0x78] sm:$0x1] %vm41_vm1, %v15368_v0  ;;  %48 = vst.msk [vmem:[#allocation2 + $0x90] sm:$0x1] %vm41_vm1, %v15368_v0  ;;  %v214_v13 = vld [vmem:[%s15360_s0 + $0x60] sm:$0xff]  ;;  %v215_v14 = vld [vmem:[%s15360_s0 + $0x68] sm:$0xff] }
   0x8   :  { %49 = vst.msk [vmem:[#allocation2 + $0xa8] sm:$0x1] %vm41_vm1, %v15368_v0  ;;  %50 = vst.msk [vmem:[#allocation2 + $0xc0] sm:$0x1] %vm41_vm1, %v15368_v0  ;;  %v216_v15 = vld [vmem:[%s15360_s0 + $0x70] sm:$0xff]  ;;  %v217_v16 = vld [vmem:[%s15360_s0 + $0x78] sm:$0xff] }
   0x9   :  { %51 = vst.msk [vmem:[#allocation2 + $0xd8] sm:$0x1] %vm41_vm1, %v15368_v0  ;;  %52 = vst.msk [vmem:[#allocation2 + $0xf0] sm:$0x1] %vm41_vm1, %v15368_v0  ;;  %v218_v17 = vld [vmem:[%s15360_s0 + $0x80] sm:$0xff]  ;;  %v219_v18 = vld [vmem:[%s15360_s0 + $0x88] sm:$0xff] }
   0xa   :  { %53 = vst.msk [vmem:[#allocation2 + $0x108] sm:$0x1] %vm41_vm1, %v15368_v0  ;;  %54 = vst.msk [vmem:[#allocation2 + $0x120] sm:$0x1] %vm41_vm1, %v15368_v0  ;;  %v220_v19 = vld [vmem:[%s15360_s0 + $0x90] sm:$0xff]  ;;  %v221_v20 = vld [vmem:[%s15360_s0 + $0x98] sm:$0xff] }
   0xb   :  { %55 = vst.msk [vmem:[#allocation2 + $0x138] sm:$0x1] %vm41_vm1, %v15368_v0  ;;  %56 = vst.msk [vmem:[#allocation2 + $0x150] sm:$0x1] %vm41_vm1, %v15368_v0  ;;  %v222_v21 = vld [vmem:[%s15360_s0 + $0xa0] sm:$0xff]  ;;  %v9326_v22 = vld [vmem:[#allocation2 + $0x8] sm:$0xff] }
   0xc   :  { %57 = vst.msk [vmem:[#allocation2 + $0x168] sm:$0x1] %vm41_vm1, %v15368_v0  ;;  %58 = vst.msk [vmem:[#allocation2 + $0x180] sm:$0x1] %vm41_vm1, %v15368_v0  ;;  %v223_v23 = vld [vmem:[%s15360_s0 + $0xa8] sm:$0xff]  ;;  %v224_v24 = vld [vmem:[%s15360_s0 + $0xb0] sm:$0xff] }
   0xd   :  { %61 = vst.msk [vmem:[#allocation2 + $0x1c8] sm:$0x1] %vm41_vm1, %v15368_v0  ;;  %62 = vst.msk [vmem:[#allocation2 + $0x1e0] sm:$0x1] %vm41_vm1, %v15368_v0  ;;  %v601_v26 = vrot.slane %v9326_v22, 1  ;;  %vm2167_vm9 = vcmask 195744  }
   0xe   :  { %63 = vst.msk [vmem:[#allocation2 + $0x1f8] sm:$0x1] %vm41_vm1, %v15368_v0  ;;  %64 = vst.msk [vmem:[#allocation2 + $0x210] sm:$0x1] %vm41_vm1, %v15368_v0  ;;  %s9034_s20 = smov 24   ;;  %vm2428_vm10 = vcmask 228544  }
   0xf   :  { %65 = vst.msk [vmem:[#allocation2 + $0x228] sm:$0x1] %vm41_vm1, %v15368_v0  ;;  %66 = vst.msk [vmem:[#allocation2 + $0x240] sm:$0x1] %vm41_vm1, %v15368_v0  ;;  %s9035_s21 = smov 28   ;;  %vm2697_vm11 = vcmask 261344  }
  0x10   :  { %67 = vst.msk [vmem:[#allocation2 + $0x258] sm:$0x1] %vm41_vm1, %v15368_v0  ;;  %68 = vst.msk [vmem:[#allocation2 + $0x270] sm:$0x1] %vm41_vm1, %v15368_v0  ;;  %vm3362_vm12 = vcmask 1043456   ;;  %vm2964_vm13 = vcmask 294144  }
  0x11   :  { %69 = vst.msk [vmem:[#allocation2 + $0x288] sm:$0x1] %vm41_vm1, %v15368_v0  ;;  %70 = vst.msk [vmem:[#allocation2 + $0x2a0] sm:$0x1] %vm41_vm1, %v15368_v0  ;;  %vm114_vm14 = vcmask 64512   ;;  %vm3169_vm15 = vcmask 293888  }
  0x12   :  { %71 = vst.msk [vmem:[#allocation2 + $0x2b8] sm:$0x1] %vm41_vm1, %v15368_v0  ;;  %72 = vst.msk [vmem:[#allocation2 + $0x2d0] sm:$0x1] %vm41_vm1, %v15368_v0  ;;  %s9038_s25 = smov 48   ;;  %s9039_s30 = smov 56  }
  0x13   :  { %73 = vst.msk [vmem:[#allocation2 + $0x2e8] sm:$0x1] %vm41_vm1, %v15368_v0  ;;  %74 = vst.msk [vmem:[#allocation2 + $0x300] sm:$0x1] %vm41_vm1, %v15368_v0 }
  0x14   :  { %75 = vst.msk [vmem:[#allocation2 + $0x318] sm:$0x1] %vm41_vm1, %v15368_v0  ;;  %76 = vst.msk [vmem:[#allocation2 + $0x330] sm:$0x1] %vm41_vm1, %v15368_v0 }
  0x15   :  { %79 = vst.msk [vmem:[#allocation2 + $0x29] sm:$0x1] %vm41_vm1, %v15368_v0  ;;  %80 = vst.msk [vmem:[#allocation2 + $0x41] sm:$0x1] %vm41_vm1, %v15368_v0 }
  0x16   :  { %81 = vst.msk [vmem:[#allocation2 + $0x59] sm:$0x1] %vm41_vm1, %v15368_v0  ;;  %82 = vst.msk [vmem:[#allocation2 + $0x71] sm:$0x1] %vm41_vm1, %v15368_v0 }
  0x17   :  { %83 = vst.msk [vmem:[#allocation2 + $0x89] sm:$0x1] %vm41_vm1, %v15368_v0  ;;  %84 = vst.msk [vmem:[#allocation2 + $0xa1] sm:$0x1] %vm41_vm1, %v15368_v0 }
  0x18   :  { %85 = vst.msk [vmem:[#allocation2 + $0xb9] sm:$0x1] %vm41_vm1, %v15368_v0  ;;  %86 = vst.msk [vmem:[#allocation2 + $0xd1] sm:$0x1] %vm41_vm1, %v15368_v0 }
  0x19   :  { %87 = vst.msk [vmem:[#allocation2 + $0xe9] sm:$0x1] %vm41_vm1, %v15368_v0  ;;  %88 = vst.msk [vmem:[#allocation2 + $0x101] sm:$0x1] %vm41_vm1, %v15368_v0 }
  0x1a   :  { %89 = vst.msk [vmem:[#allocation2 + $0x119] sm:$0x1] %vm41_vm1, %v15368_v0  ;;  %90 = vst.msk [vmem:[#allocation2 + $0x131] sm:$0x1] %vm41_vm1, %v15368_v0 }
  0x1b   :  { %91 = vst.msk [vmem:[#allocation2 + $0x149] sm:$0x1] %vm41_vm1, %v15368_v0  ;;  %92 = vst.msk [vmem:[#allocation2 + $0x161] sm:$0x1] %vm41_vm1, %v15368_v0 }
  0x1c   :  { %93 = vst.msk [vmem:[#allocation2 + $0x179] sm:$0x1] %vm41_vm1, %v15368_v0  ;;  %94 = vst.msk [vmem:[#allocation2 + $0x191] sm:$0x1] %vm41_vm1, %v15368_v0 }
  0x1d   :  { %97 = vst.msk [vmem:[#allocation2 + $0x1d9] sm:$0x1] %vm41_vm1, %v15368_v0  ;;  %98 = vst.msk [vmem:[#allocation2 + $0x1f1] sm:$0x1] %vm41_vm1, %v15368_v0 }
  0x1e   :  { %99 = vst.msk [vmem:[#allocation2 + $0x209] sm:$0x1] %vm41_vm1, %v15368_v0  ;;  %100 = vst.msk [vmem:[#allocation2 + $0x221] sm:$0x1] %vm41_vm1, %v15368_v0 }
  0x1f   :  { %101 = vst.msk [vmem:[#allocation2 + $0x239] sm:$0x1] %vm41_vm1, %v15368_v0  ;;  %102 = vst.msk [vmem:[#allocation2 + $0x251] sm:$0x1] %vm41_vm1, %v15368_v0 }
  0x20   :  { %103 = vst.msk [vmem:[#allocation2 + $0x269] sm:$0x1] %vm41_vm1, %v15368_v0  ;;  %104 = vst.msk [vmem:[#allocation2 + $0x281] sm:$0x1] %vm41_vm1, %v15368_v0 }
  0x21   :  { %105 = vst.msk [vmem:[#allocation2 + $0x299] sm:$0x1] %vm41_vm1, %v15368_v0  ;;  %106 = vst.msk [vmem:[#allocation2 + $0x2b1] sm:$0x1] %vm41_vm1, %v15368_v0 }
  0x22   :  { %107 = vst.msk [vmem:[#allocation2 + $0x2c9] sm:$0x1] %vm41_vm1, %v15368_v0  ;;  %108 = vst.msk [vmem:[#allocation2 + $0x2e1] sm:$0x1] %vm41_vm1, %v15368_v0 }
  0x23   :  { %109 = vst.msk [vmem:[#allocation2 + $0x2f9] sm:$0x1] %vm41_vm1, %v15368_v0  ;;  %110 = vst.msk [vmem:[#allocation2 + $0x311] sm:$0x1] %vm41_vm1, %v15368_v0 }
  0x24   :  { %111 = vst.msk [vmem:[#allocation2 + $0x329] sm:$0x1] %vm41_vm1, %v15368_v0  ;;  %112 = vst.msk [vmem:[#allocation2 + $0x341] sm:$0x1] %vm41_vm1, %v15368_v0 }
  0x25   :  { %42 = vst.msk [vmem:[#allocation2] sm:$0x1] %vm41_vm1, %v15368_v0  ;;  %59 = vst.msk [vmem:[#allocation2 + $0x198] sm:$0x1] %vm41_vm1, %v15368_v0 }
  0x26   :  { %267 = vst.msk [vmem:[#allocation2 + $0x19] sm:$0xff] %vm26_vm0, %v202_v1  ;;  %268 = vst.msk [vmem:[#allocation2 + $0x21] sm:$0xff] %vm26_vm0, %v203_v2 }
  0x27   :  { %60 = vst.msk [vmem:[#allocation2 + $0x1b0] sm:$0x1] %vm41_vm1, %v15368_v0  ;;  %77 = vst.msk [vmem:[#allocation2 + $0x348] sm:$0x1] %vm41_vm1, %v15368_v0 }
  0x28   :  { %30 = vst.msk [vmem:[#allocation2 + $0x10] sm:$0x3] %vm29_vm2, %v15368_v0  ;;  %33 = vst.msk [vmem:[#allocation2 + $0x1c0] sm:$0x3] %vm29_vm2, %v15368_v0 }
  0x29   :  { %37 = vst.msk [vmem:[#allocation2 + $0x1a8] sm:$0x3] %vm29_vm2, %v15368_v0  ;;  %40 = vst.msk [vmem:[#allocation2 + $0x358] sm:$0x3] %vm29_vm2, %v15368_v0  ;;  %vm4500_vm2 = vcmask 130112  }
  0x2a   :  { %269 = vst.msk [vmem:[#allocation2 + $0x31] sm:$0xff] %vm26_vm0, %v204_v3  ;;  %270 = vst.msk [vmem:[#allocation2 + $0x39] sm:$0xff] %vm26_vm0, %v205_v4 }
  0x2b   :  { %78 = vst.msk [vmem:[#allocation2 + $0x11] sm:$0x1] %vm41_vm1, %v15368_v0  ;;  %95 = vst.msk [vmem:[#allocation2 + $0x1a9] sm:$0x1] %vm41_vm1, %v15368_v0 }
  0x2c   :  { %96 = vst.msk [vmem:[#allocation2 + $0x1c1] sm:$0x1] %vm41_vm1, %v15368_v0  ;;  %113 = vst.msk [vmem:[#allocation2 + $0x359] sm:$0x1] %vm41_vm1, %v15368_v0  ;;  %v9337_v25 = vld [vmem:[#allocation2] sm:$0xff]  ;;  %vm129_vm1 = vcmask 57344  }
  0x2d   :  { %271 = vst.msk [vmem:[#allocation2 + $0x49] sm:$0xff] %vm26_vm0, %v206_v5  ;;  %272 = vst.msk [vmem:[#allocation2 + $0x51] sm:$0xff] %vm26_vm0, %v207_v6  ;;  %v9342_v27 = vld [vmem:[#allocation2 + $0x18] sm:$0xff]  ;;  %v9344_v28 = vld [vmem:[#allocation2 + $0x20] sm:$0xff]  ;;  %v600_v29 = vrot.slane %v9337_v25, 1 }
  0x2e   :  { %273 = vst.msk [vmem:[#allocation2 + $0x61] sm:$0xff] %vm26_vm0, %v208_v7  ;;  %274 = vst.msk [vmem:[#allocation2 + $0x69] sm:$0xff] %vm26_vm0, %v209_v8  ;;  %v605_v30 = vrot.slane %v9342_v27, 1  ;;  %v606_v31 = vrot.slane %v9344_v28, 1  ;;  %v9362_v35 = vld [vmem:[#allocation2 + $0x28] sm:$0x3] }
  0x2f   :  { %275 = vst.msk [vmem:[#allocation2 + $0x79] sm:$0xff] %vm26_vm0, %v210_v9  ;;  %276 = vst.msk [vmem:[#allocation2 + $0x81] sm:$0xff] %vm26_vm0, %v211_v10  ;;  %v602_v38 = vsel %vm599_vm3, %v600_v29, %v601_v26  ;;  %v608_v40 = vrot.slane %v9362_v35, 1  ;;  %v225_v9 = vld [vmem:[%s15360_s0 + $0xb8] sm:$0xff] }
  0x30   :  { %277 = vst.msk [vmem:[#allocation2 + $0x91] sm:$0xff] %vm26_vm0, %v212_v11  ;;  %278 = vst.msk [vmem:[#allocation2 + $0x99] sm:$0xff] %vm26_vm0, %v213_v12  ;;  %v9372_v39 = vsel %vm599_vm3, %v605_v30, %v606_v31  ;;  %760 = vrot.lane.b32.xlu0 %v602_v38, %s9029_s24  ;;  %v9532_v30 = vld [vmem:[#allocation2 + $0x1b8] sm:$0xff] }
  0x31   :  { %279 = vst.msk [vmem:[#allocation2 + $0xa9] sm:$0xff] %vm26_vm0, %v214_v13  ;;  %280 = vst.msk [vmem:[#allocation2 + $0xb1] sm:$0xff] %vm26_vm0, %v215_v14  ;;  %v9359_v33 = vld [vmem:[#allocation2 + $0x30] sm:$0xff]  ;;  %v9364_v36 = vld [vmem:[#allocation2 + $0x38] sm:$0xff]  ;;  %764 = vrot.lane.b32.xlu1 %v9372_v39, %s9029_s24  ;;  %v9397_v47 = vsel %vm599_vm3, %v606_v31, %v608_v40 }
  0x32   :  { %281 = vst.msk [vmem:[#allocation2 + $0xc1] sm:$0xff] %vm26_vm0, %v216_v15  ;;  %282 = vst.msk [vmem:[#allocation2 + $0xc9] sm:$0xff] %vm26_vm0, %v217_v16  ;;  %v9357_v32 = vld [vmem:[#allocation2 + $0x10] sm:$0x3]  ;;  %v9377_v41 = vld [vmem:[#allocation2 + $0x40] sm:$0x3] }
  0x33   :  { %283 = vst.msk [vmem:[#allocation2 + $0xd9] sm:$0xff] %vm26_vm0, %v218_v17  ;;  %284 = vst.msk [vmem:[#allocation2 + $0xe1] sm:$0xff] %vm26_vm0, %v219_v18  ;;  %v603_v34 = vrot.slane %v9357_v32, 1  ;;  %v610_v44 = vrot.slane %v9359_v33, 1  ;;  %v611_v48 = vrot.slane %v9364_v36, 1  ;;  %v613_v49 = vrot.slane %v9377_v41, 1 }
  0x34   :  { %285 = vst.msk [vmem:[#allocation2 + $0xf1] sm:$0xff] %vm26_vm0, %v220_v19  ;;  %286 = vst.msk [vmem:[#allocation2 + $0xf9] sm:$0xff] %vm26_vm0, %v221_v20  ;;  %v9368_v37 = vld [vmem:[#allocation2 + $0x48] sm:$0xff]  ;;  %v9379_v42 = vld [vmem:[#allocation2 + $0x50] sm:$0xff] }
  0x35   :  { %287 = vst.msk [vmem:[#allocation2 + $0x109] sm:$0xff] %vm26_vm0, %v222_v21  ;;  %440 = vst.msk [vmem:[#allocation4 + $0x8] sm:$0xff] %vm26_vm0, %v9326_v22  ;;  %v9383_v43 = vld [vmem:[#allocation2 + $0x60] sm:$0xff]  ;;  %v9391_v45 = vld [vmem:[#allocation2 + $0x68] sm:$0xff]  ;;  %v604_v46 = vsel %vm599_vm3, %v601_v26, %v603_v34  ;;  %766 = vrot.lane.b32.xlu1 %v9397_v47, %s9029_s24  ;;  %v615_v56 = vrot.slane %v9368_v37, 1  ;;  %v9434_v59 = vsel %vm599_vm3, %v610_v44, %v611_v48  ;;  %v616_v61 = vrot.slane %v9379_v42, 1 }
  0x36   :  { %288 = vst.msk [vmem:[#allocation2 + $0x111] sm:$0xff] %vm26_vm0, %v223_v23  ;;  %289 = vst.msk [vmem:[#allocation2 + $0x121] sm:$0xff] %vm26_vm0, %v224_v24  ;;  %v9403_v50 = vld [vmem:[#allocation2 + $0x78] sm:$0xff]  ;;  %v9405_v51 = vld [vmem:[#allocation2 + $0x80] sm:$0xff]  ;;  %762 = vrot.lane.b32.xlu0 %v604_v46, %s9029_s24  ;;  %v9437_v60 = vsel %vm599_vm3, %v611_v48, %v613_v49  ;;  %v620_v7 = vrot.slane %v9383_v43, 1  ;;  %v621_v12 = vrot.slane %v9391_v45, 1 }
  0x37   :  { %439 = vst.msk [vmem:[#allocation4] sm:$0xff] %vm26_vm0, %v9337_v25  ;;  %441 = vst.msk [vmem:[#allocation4 + $0x10] sm:$0xff] %vm26_vm0, %v9342_v27  ;;  %v9407_v52 = vld [vmem:[#allocation2 + $0x58] sm:$0x3]  ;;  %v9413_v53 = vld [vmem:[#allocation2 + $0x90] sm:$0xff]  ;;  %v9482_v10 = vsel %vm599_vm3, %v615_v56, %v616_v61  ;;  %v625_v24 = vrot.slane %v9403_v50, 1 }
  0x38   :  { %442 = vst.msk [vmem:[#allocation4 + $0x18] sm:$0xff] %vm26_vm0, %v9344_v28  ;;  %443 = vst.msk [vmem:[#allocation4 + $0x20] sm:$0xff] %vm26_vm0, %v9359_v33  ;;  %v9415_v54 = vld [vmem:[#allocation2 + $0x98] sm:$0xff]  ;;  %v9421_v55 = vld [vmem:[#allocation2 + $0xa8] sm:$0xff]  ;;  %v618_v62 = vrot.slane %v9407_v52, 1  ;;  %v626_v26 = vrot.slane %v9405_v51, 1  ;;  %v9540_v34 = vsel %vm599_vm3, %v620_v7, %v621_v12 }
  0x39   :  { %15976 = vst [vmem:[#allocation6_spill] sm:$0xff] %v9372_v39  ;;  %444 = vst.msk [vmem:[#allocation4 + $0x28] sm:$0xff] %vm26_vm0, %v9364_v36  ;;  %v9427_v57 = vld [vmem:[#allocation2 + $0xb0] sm:$0xff]  ;;  %v9431_v58 = vld [vmem:[#allocation2 + $0xc0] sm:$0xff]  ;;  %770 = vrot.lane.b32.xlu1 %v9437_v60, %s9029_s24  ;;  %v1019_v7 = vrot.slane %v9326_v22, 2 }
  0x3a   :  { %445 = vst.msk [vmem:[#allocation4 + $0x30] sm:$0xff] %vm26_vm0, %v9368_v37  ;;  %446 = vst.msk [vmem:[#allocation4 + $0x38] sm:$0xff] %vm26_vm0, %v9379_v42  ;;  %v9443_v63 = vld [vmem:[#allocation2 + $0xc8] sm:$0xff]  ;;  %v9447_v1 = vld [vmem:[#allocation2 + $0xd8] sm:$0xff]  ;;  %768 = vrot.lane.b32.xlu0 %v9434_v59, %s9029_s24  ;;  %v9485_v11 = vsel %vm599_vm3, %v616_v61, %v618_v62  ;;  %v1018_v62 = vrot.slane %v9337_v25, 2  ;;  %v630_v25 = vrot.slane %v9413_v53, 1 }
  0x3b   :  { %447 = vst.msk [vmem:[#allocation4 + $0x40] sm:$0xff] %vm26_vm0, %v9383_v43  ;;  %15977 = vst [vmem:[#allocation7_spill] sm:$0xff] %v9397_v47  ;;  %v9449_v2 = vld [vmem:[#allocation2 + $0x70] sm:$0x3]  ;;  %v9453_v3 = vld [vmem:[#allocation2 + $0xe0] sm:$0xff]  ;;  %v640_v0 = vrot.slane %v9431_v58, 1 }
  0x3c   :  { %448 = vst.msk [vmem:[#allocation4 + $0x48] sm:$0xff] %vm26_vm0, %v9391_v45  ;;  %449 = vst.msk [vmem:[#allocation4 + $0x50] sm:$0xff] %vm26_vm0, %v9403_v50  ;;  %v9459_v4 = vld [vmem:[#allocation2 + $0xf0] sm:$0xff]  ;;  %v9461_v5 = vld [vmem:[#allocation2 + $0xf8] sm:$0xff]  ;;  %v623_v13 = vrot.slane %v9449_v2, 1 }
  0x3d   :  { %450 = vst.msk [vmem:[#allocation4 + $0x58] sm:$0xff] %vm26_vm0, %v9405_v51  ;;  %15978 = vst [vmem:[#allocation8_spill] sm:$0xff] %v9413_v53  ;;  %v9463_v6 = vld [vmem:[#allocation2 + $0x108] sm:$0xff]  ;;  %v9474_v8 = vld [vmem:[#allocation2 + $0x110] sm:$0xff]  ;;  %774 = vrot.lane.b32.xlu1 %v9485_v11, %s9029_s24 }
  0x3e   :  { %15979 = vst [vmem:[#allocation9_spill] sm:$0xff] %v9415_v54  ;;  %451 = vst.msk [vmem:[#allocation4 + $0x60] sm:$0xff] %vm26_vm0, %v9413_v53  ;;  %v9489_v14 = vld [vmem:[#allocation2 + $0x88] sm:$0x3]  ;;  %v9494_v15 = vld [vmem:[#allocation2 + $0x120] sm:$0xff]  ;;  %772 = vrot.lane.b32.xlu0 %v9482_v10, %s9029_s24  ;;  %v9543_v38 = vsel %vm599_vm3, %v621_v12, %v623_v13 }
  0x3f   :  { %452 = vst.msk [vmem:[#allocation4 + $0x68] sm:$0xff] %vm26_vm0, %v9415_v54  ;;  %15980 = vst [vmem:[#allocation10_spill] sm:$0xff] %v9421_v55  ;;  %v226_v16 = vld [vmem:[%s15360_s0 + $0xc0] sm:$0xff]  ;;  %v227_v17 = vld [vmem:[%s15360_s0 + $0xc8] sm:$0xff]  ;;  %v628_v40 = vrot.slane %v9489_v14, 1 }
  0x40   :  { %15981 = vst [vmem:[#allocation11_spill] sm:$0xff] %v9427_v57  ;;  %453 = vst.msk [vmem:[#allocation4 + $0x70] sm:$0xff] %vm26_vm0, %v9421_v55  ;;  %v228_v18 = vld [vmem:[%s15360_s0 + $0xd0] sm:$0xff]  ;;  %v229_v19 = vld [vmem:[%s15360_s0 + $0xd8] sm:$0xff] }
  0x41   :  { %15982 = vst [vmem:[#allocation12_spill] sm:$0xff] %v9431_v58  ;;  %15983 = vst [vmem:[#allocation13_spill] sm:$0xff] %v9434_v59  ;;  %v230_v20 = vld [vmem:[%s15360_s0 + $0xe0] sm:$0xff]  ;;  %v231_v21 = vld [vmem:[%s15360_s0 + $0xe8] sm:$0xff]  ;;  %778 = vrot.lane.b32.xlu1 %v9543_v38, %s9029_s24  ;;  %v645_v59 = vrot.slane %v9447_v1, 1 }
  0x42   :  { %15984 = vst [vmem:[#allocation14_spill] sm:$0xff] %v9437_v60  ;;  %454 = vst.msk [vmem:[#allocation4 + $0x78] sm:$0xff] %vm26_vm0, %v9427_v57  ;;  %v9520_v23 = vld [vmem:[#allocation2 + $0x1b0] sm:$0xff]  ;;  %v9528_v29 = vld [vmem:[#allocation2 + $0xa0] sm:$0x3]  ;;  %776 = vrot.lane.b32.xlu0 %v9540_v34, %s9029_s24 }
  0x43   :  { %15985 = vst [vmem:[#allocation15_spill] sm:$0xff] %v9443_v63  ;;  %455 = vst.msk [vmem:[#allocation4 + $0x80] sm:$0xff] %vm26_vm0, %v9431_v58  ;;  %v234_v31 = vld [vmem:[%s15360_s0 + $0x100] sm:$0xff]  ;;  %v235_v44 = vld [vmem:[%s15360_s0 + $0x108] sm:$0xff] }
  0x44   :  { %15986 = vst [vmem:[#allocation16_spill] sm:$0xff] %v9447_v1  ;;  %456 = vst.msk [vmem:[#allocation4 + $0x88] sm:$0xff] %vm26_vm0, %v9443_v63  ;;  %v236_v46 = vld [vmem:[%s15360_s0 + $0x110] sm:$0xff]  ;;  %v237_v48 = vld [vmem:[%s15360_s0 + $0x118] sm:$0xff] }
  0x45   :  { %15987 = vst [vmem:[#allocation17_spill] sm:$0xff] %v9453_v3  ;;  %457 = vst.msk [vmem:[#allocation4 + $0x90] sm:$0xff] %vm26_vm0, %v9447_v1  ;;  %v238_v49 = vld [vmem:[%s15360_s0 + $0x120] sm:$0xff]  ;;  %v239_v56 = vld [vmem:[%s15360_s0 + $0x128] sm:$0xff] }
  0x46   :  { %458 = vst.msk [vmem:[#allocation4 + $0x98] sm:$0xff] %vm26_vm0, %v9453_v3  ;;  %15988 = vst [vmem:[#allocation18_spill] sm:$0xff] %v9459_v4  ;;  %v240_v61 = vld [vmem:[%s15360_s0 + $0x130] sm:$0xff]  ;;  %v241_v12 = vld [vmem:[%s15360_s0 + $0x138] sm:$0xff] }
  0x47   :  { %15989 = vst [vmem:[#allocation19_spill] sm:$0xff] %v9461_v5  ;;  %15990 = vst [vmem:[#allocation20_spill] sm:$0xff] %v9463_v6  ;;  %v242_v13 = vld [vmem:[%s15360_s0 + $0x140] sm:$0xff]  ;;  %v243_v22 = vld [vmem:[%s15360_s0 + $0x148] sm:$0xff] }
  0x48   :  { %459 = vst.msk [vmem:[#allocation4 + $0xa0] sm:$0xff] %vm26_vm0, %v9459_v4  ;;  %460 = vst.msk [vmem:[#allocation4 + $0xa8] sm:$0xff] %vm26_vm0, %v9461_v5  ;;  %v9713_v60 = vld [vmem:[#allocation2 + $0xe8] sm:$0x3]  ;;  %v9733_v47 = vld [vmem:[#allocation2 + $0x100] sm:$0x3] }
  0x49   :  { %15991 = vst [vmem:[#allocation21_spill] sm:$0xff] %v9474_v8  ;;  %461 = vst.msk [vmem:[#allocation4 + $0xb0] sm:$0xff] %vm26_vm0, %v9463_v6  ;;  %v250_v58 = vld [vmem:[%s15360_s0 + $0x180] sm:$0xff] }
  0x4a   :  { %15992 = vst [vmem:[#allocation22_spill] sm:$0xff] %v9482_v10  ;;  %15993 = vst [vmem:[#allocation23_spill] sm:$0xff] %v9485_v11 }
  0x4b   :  { %15994 = vst [vmem:[#allocation24_spill] sm:$0xff] %v9489_v14  ;;  %462 = vst.msk [vmem:[#allocation4 + $0xb8] sm:$0xff] %vm26_vm0, %v9474_v8 }
  0x4c   :  { %290 = vst.msk [vmem:[#allocation2 + $0x129] sm:$0xff] %vm26_vm0, %v225_v9  ;;  %15995 = vst [vmem:[#allocation25_spill] sm:$0xff] %v9494_v15  ;;  %v1021_v9 = vrot.slane %v9357_v32, 2 }
  0x4d   :  { %463 = vst.msk [vmem:[#allocation4 + $0xc0] sm:$0xff] %vm26_vm0, %v9494_v15  ;;  %291 = vst.msk [vmem:[#allocation2 + $0x139] sm:$0xff] %vm26_vm0, %v226_v16  ;;  %v244_v16 = vld [vmem:[%s15360_s0 + $0x150] sm:$0xff] }
  0x4e   :  { %292 = vst.msk [vmem:[#allocation2 + $0x141] sm:$0xff] %vm26_vm0, %v227_v17  ;;  %293 = vst.msk [vmem:[#allocation2 + $0x151] sm:$0xff] %vm26_vm0, %v228_v18  ;;  %v9599_v17 = vsel %vm1017_vm4, %v1018_v62, %v1019_v7  ;;  %v9602_v18 = vsel %vm1017_vm4, %v1019_v7, %v1021_v9 }
  0x4f   :  { %294 = vst.msk [vmem:[#allocation2 + $0x159] sm:$0xff] %vm26_vm0, %v229_v19  ;;  %15996 = vst [vmem:[#allocation26_spill] sm:$0xff] %v9528_v29  ;;  %v9605_v19 = vsel %vm599_vm3, %v625_v24, %v626_v26  ;;  %v246_v24 = vld [vmem:[%s15360_s0 + $0x160] sm:$0xff] }
  0x50   :  { %295 = vst.msk [vmem:[#allocation2 + $0x169] sm:$0xff] %vm26_vm0, %v230_v20  ;;  %296 = vst.msk [vmem:[#allocation2 + $0x171] sm:$0xff] %vm26_vm0, %v231_v21  ;;  %v9608_v20 = vsel %vm599_vm3, %v626_v26, %v628_v40  ;;  %v631_v21 = vrot.slane %v9415_v54, 1  ;;  %v9623_v26 = vld [vmem:[#allocation2 + $0xb8] sm:$0x3]  ;;  %780 = vrot.lane.b32.xlu0 %v9605_v19, %s9029_s24 }
  0x51   :  { %471 = vst.msk [vmem:[#allocation4 + $0x100] sm:$0xff] %vm26_vm0, %v9520_v23  ;;  %15997 = vst [vmem:[#allocation27_spill] sm:$0xff] %v9540_v34  ;;  %782 = vrot.lane.b32.xlu1 %v9608_v20, %s9029_s24 }
  0x52   :  { %15998 = vst [vmem:[#allocation28_spill] sm:$0xff] %v9543_v38  ;;  %472 = vst.msk [vmem:[#allocation4 + $0x108] sm:$0xff] %vm26_vm0, %v9532_v30  ;;  %v9655_v9 = vsel %vm599_vm3, %v630_v25, %v631_v21 }
  0x53   :  { %299 = vst.msk [vmem:[#allocation2 + $0x1c9] sm:$0xff] %vm26_vm0, %v234_v31  ;;  %300 = vst.msk [vmem:[#allocation2 + $0x1d1] sm:$0xff] %vm26_vm0, %v235_v44  ;;  %v9590_v32 = vld [vmem:[#allocation2 + $0x128] sm:$0xff]  ;;  %v633_v31 = vrot.slane %v9528_v29, 1 }
  0x54   :  { %301 = vst.msk [vmem:[#allocation2 + $0x1e1] sm:$0xff] %vm26_vm0, %v236_v46  ;;  %302 = vst.msk [vmem:[#allocation2 + $0x1e9] sm:$0xff] %vm26_vm0, %v237_v48  ;;  %v9614_v44 = vld [vmem:[#allocation2 + $0x138] sm:$0xff]  ;;  %784 = vrot.lane.b32.xlu0 %v9655_v9, %s9029_s24 }
  0x55   :  { %303 = vst.msk [vmem:[#allocation2 + $0x1f9] sm:$0xff] %vm26_vm0, %v238_v49  ;;  %304 = vst.msk [vmem:[#allocation2 + $0x201] sm:$0xff] %vm26_vm0, %v239_v56  ;;  %v245_v46 = vld [vmem:[%s15360_s0 + $0x158] sm:$0xff]  ;;  %v9625_v40 = vld [vmem:[#allocation2 + $0x140] sm:$0xff] }
  0x56   :  { %305 = vst.msk [vmem:[#allocation2 + $0x211] sm:$0xff] %vm26_vm0, %v240_v61  ;;  %15999 = vst [vmem:[#allocation29_spill] sm:$0xff] %v9590_v32  ;;  %v9629_v48 = vld [vmem:[#allocation2 + $0x150] sm:$0xff]  ;;  %v9635_v49 = vld [vmem:[#allocation2 + $0x158] sm:$0xff]  ;;  %v635_v61 = vrot.slane %v9421_v55, 1 }
  0x57   :  { %306 = vst.msk [vmem:[#allocation2 + $0x219] sm:$0xff] %vm26_vm0, %v241_v12  ;;  %307 = vst.msk [vmem:[#allocation2 + $0x229] sm:$0xff] %vm26_vm0, %v242_v13  ;;  %v9639_v56 = vld [vmem:[#allocation2 + $0x168] sm:$0xff]  ;;  %v9648_v62 = vld [vmem:[#allocation2 + $0x170] sm:$0xff]  ;;  %v9658_v12 = vsel %vm599_vm3, %v631_v21, %v633_v31  ;;  %v636_v13 = vrot.slane %v9427_v57, 1 }
  0x58   :  { %308 = vst.msk [vmem:[#allocation2 + $0x231] sm:$0xff] %vm26_vm0, %v243_v22  ;;  %16000 = vst [vmem:[#allocation30_spill] sm:$0xff] %v9605_v19  ;;  %v638_v22 = vrot.slane %v9623_v26, 1  ;;  %786 = vrot.lane.b32.xlu1 %v9658_v12, %s9029_s24  ;;  %v9903_v55 = vld [vmem:[#allocation2 + $0x148] sm:$0x3] }
  0x59   :  { %16001 = vst [vmem:[#allocation31_spill] sm:$0xff] %v9608_v20  ;;  %464 = vst.msk [vmem:[#allocation4 + $0xc8] sm:$0xff] %vm26_vm0, %v9590_v32  ;;  %v9698_v38 = vsel %vm599_vm3, %v635_v61, %v636_v13  ;;  %v9955_v14 = vld [vmem:[#allocation2 + $0x178] sm:$0x3] }
  0x5a   :  { %16002 = vst [vmem:[#allocation32_spill] sm:$0xff] %v9614_v44  ;;  %309 = vst.msk [vmem:[#allocation2 + $0x241] sm:$0xff] %vm26_vm0, %v244_v16  ;;  %v9652_v7 = vld [vmem:[#allocation2 + $0x1c8] sm:$0xff]  ;;  %v9664_v16 = vld [vmem:[#allocation2 + $0x1d0] sm:$0xff]  ;;  %v9701_v34 = vsel %vm599_vm3, %v636_v13, %v638_v22  ;;  %788 = vrot.lane.b32.xlu0 %v9698_v38, %s9029_s24 }
  0x5b   :  { %16003 = vst [vmem:[#allocation33_spill] sm:$0xff] %v9623_v26  ;;  %16004 = vst [vmem:[#allocation34_spill] sm:$0xff] %v9625_v40  ;;  %v9674_v25 = vld [vmem:[#allocation2 + $0x1e8] sm:$0xff] }
  0x5c   :  { %465 = vst.msk [vmem:[#allocation4 + $0xd0] sm:$0xff] %vm26_vm0, %v9614_v44  ;;  %16005 = vst [vmem:[#allocation35_spill] sm:$0xff] %v9629_v48  ;;  %v9678_v21 = vld [vmem:[#allocation2 + $0x1f8] sm:$0xff]  ;;  %v9682_v31 = vld [vmem:[#allocation2 + $0x200] sm:$0xff]  ;;  %790 = vrot.lane.b32.xlu1 %v9701_v34, %s9029_s24 }
  0x5d   :  { %310 = vst.msk [vmem:[#allocation2 + $0x249] sm:$0xff] %vm26_vm0, %v245_v46  ;;  %311 = vst.msk [vmem:[#allocation2 + $0x259] sm:$0xff] %vm26_vm0, %v246_v24  ;;  %v9668_v46 = vld [vmem:[#allocation2 + $0x1e0] sm:$0xff]  ;;  %v9670_v24 = vld [vmem:[#allocation2 + $0xd0] sm:$0x3] }
  0x5e   :  { %466 = vst.msk [vmem:[#allocation4 + $0xd8] sm:$0xff] %vm26_vm0, %v9625_v40  ;;  %16006 = vst [vmem:[#allocation36_spill] sm:$0xff] %v9635_v49  ;;  %v9693_v20 = vld [vmem:[#allocation2 + $0x210] sm:$0xff]  ;;  %v9695_v19 = vld [vmem:[#allocation2 + $0x218] sm:$0xff]  ;;  %v643_v11 = vrot.slane %v9670_v24, 1 }
  0x5f   :  { %467 = vst.msk [vmem:[#allocation4 + $0xe0] sm:$0xff] %vm26_vm0, %v9629_v48  ;;  %16007 = vst [vmem:[#allocation37_spill] sm:$0xff] %v9639_v56  ;;  %v9711_v10 = vld [vmem:[#allocation2 + $0x230] sm:$0xff]  ;;  %v247_v22 = vld [vmem:[%s15360_s0 + $0x168] sm:$0xff] }
  0x60   :  { %468 = vst.msk [vmem:[#allocation4 + $0xe8] sm:$0xff] %vm26_vm0, %v9635_v49  ;;  %16008 = vst [vmem:[#allocation38_spill] sm:$0xff] %v9648_v62 }
  0x61   :  { %469 = vst.msk [vmem:[#allocation4 + $0xf0] sm:$0xff] %vm26_vm0, %v9639_v56  ;;  %16009 = vst [vmem:[#allocation39_spill] sm:$0xff] %v9655_v9  ;;  %v641_v9 = vrot.slane %v9443_v63, 1  ;;  %v9719_v61 = vld [vmem:[#allocation2 + $0x240] sm:$0xff]  ;;  %v646_v63 = vrot.slane %v9453_v3, 1 }
  0x62   :  { %16010 = vst [vmem:[#allocation40_spill] sm:$0xff] %v9658_v12  ;;  %470 = vst.msk [vmem:[#allocation4 + $0xf8] sm:$0xff] %vm26_vm0, %v9648_v62  ;;  %v9709_v12 = vld [vmem:[#allocation2 + $0x228] sm:$0xff] }
  0x63   :  { %473 = vst.msk [vmem:[#allocation4 + $0x110] sm:$0xff] %vm26_vm0, %v9652_v7  ;;  %16011 = vst [vmem:[#allocation41_spill] sm:$0xff] %v9670_v24  ;;  %v248_v24 = vld [vmem:[%s15360_s0 + $0x170] sm:$0xff]  ;;  %v9750_v1 = vsel %vm599_vm3, %v641_v9, %v643_v11 }
  0x64   :  { %474 = vst.msk [vmem:[#allocation4 + $0x118] sm:$0xff] %vm26_vm0, %v9664_v16  ;;  %475 = vst.msk [vmem:[#allocation4 + $0x120] sm:$0xff] %vm26_vm0, %v9668_v46  ;;  %v9721_v13 = vld [vmem:[#allocation2 + $0x248] sm:$0xff]  ;;  %v9738_v39 = vld [vmem:[#allocation2 + $0x258] sm:$0xff]  ;;  %794 = vrot.lane.b32.xlu1 %v9750_v1, %s9029_s24 }
  0x65   :  { %476 = vst.msk [vmem:[#allocation4 + $0x128] sm:$0xff] %vm26_vm0, %v9674_v25  ;;  %477 = vst.msk [vmem:[#allocation4 + $0x130] sm:$0xff] %vm26_vm0, %v9678_v21  ;;  %v252_v11 = vld [vmem:[%s15360_s0 + $0x190] sm:$0xff] }
  0x66   :  { %478 = vst.msk [vmem:[#allocation4 + $0x138] sm:$0xff] %vm26_vm0, %v9682_v31  ;;  %16012 = vst [vmem:[#allocation42_spill] sm:$0xff] %v9698_v38  ;;  %v249_v38 = vld [vmem:[%s15360_s0 + $0x178] sm:$0xff] }
  0x67   :  { %16013 = vst [vmem:[#allocation43_spill] sm:$0xff] %v9701_v34  ;;  %479 = vst.msk [vmem:[#allocation4 + $0x140] sm:$0xff] %vm26_vm0, %v9693_v20  ;;  %v9747_v34 = vsel %vm599_vm3, %v640_v0, %v641_v9  ;;  %v251_v0 = vld [vmem:[%s15360_s0 + $0x188] sm:$0xff]  ;;  %v254_v9 = vld [vmem:[%s15360_s0 + $0x1a0] sm:$0xff] }
  0x68   :  { %480 = vst.msk [vmem:[#allocation4 + $0x148] sm:$0xff] %vm26_vm0, %v9695_v19  ;;  %16014 = vst [vmem:[#allocation44_spill] sm:$0xff] %v9713_v60  ;;  %792 = vrot.lane.b32.xlu0 %v9747_v34, %s9029_s24 }
  0x69   :  { %481 = vst.msk [vmem:[#allocation4 + $0x150] sm:$0xff] %vm26_vm0, %v9709_v12  ;;  %482 = vst.msk [vmem:[#allocation4 + $0x158] sm:$0xff] %vm26_vm0, %v9711_v10 }
  0x6a   :  { %483 = vst.msk [vmem:[#allocation4 + $0x160] sm:$0xff] %vm26_vm0, %v9719_v61  ;;  %16015 = vst [vmem:[#allocation45_spill] sm:$0xff] %v9733_v47 }
  0x6b   :  { %484 = vst.msk [vmem:[#allocation4 + $0x168] sm:$0xff] %vm26_vm0, %v9721_v13  ;;  %312 = vst.msk [vmem:[#allocation2 + $0x261] sm:$0xff] %vm26_vm0, %v247_v22  ;;  %v648_v22 = vrot.slane %v9713_v60, 1  ;;  %v660_v60 = vrot.slane %v9494_v15, 1 }
  0x6c   :  { %16016 = vst [vmem:[#allocation46_spill] sm:$0xff] %v9747_v34  ;;  %16017 = vst [vmem:[#allocation47_spill] sm:$0xff] %v9750_v1  ;;  %v9806_v34 = vsel %vm599_vm3, %v645_v59, %v646_v63  ;;  %v262_v59 = vld [vmem:[%s15360_s0 + $0x1e0] sm:$0xff] }
  0x6d   :  { %485 = vst.msk [vmem:[#allocation4 + $0x170] sm:$0xff] %vm26_vm0, %v9738_v39  ;;  %313 = vst.msk [vmem:[#allocation2 + $0x271] sm:$0xff] %vm26_vm0, %v248_v24  ;;  %v255_v24 = vld [vmem:[%s15360_s0 + $0x1a8] sm:$0xff]  ;;  %v9809_v1 = vsel %vm599_vm3, %v646_v63, %v648_v22  ;;  %v9824_v22 = vld [vmem:[#allocation2 + $0x118] sm:$0x3]  ;;  %796 = vrot.lane.b32.xlu0 %v9806_v34, %s9029_s24 }
  0x6e   :  { %314 = vst.msk [vmem:[#allocation2 + $0x279] sm:$0xff] %vm26_vm0, %v249_v38  ;;  %315 = vst.msk [vmem:[#allocation2 + $0x289] sm:$0xff] %vm26_vm0, %v250_v58  ;;  %v253_v38 = vld [vmem:[%s15360_s0 + $0x198] sm:$0xff]  ;;  %v256_v58 = vld [vmem:[%s15360_s0 + $0x1b0] sm:$0xff]  ;;  %798 = vrot.lane.b32.xlu1 %v9809_v1, %s9029_s24 }
  0x6f   :  { %316 = vst.msk [vmem:[#allocation2 + $0x291] sm:$0xff] %vm26_vm0, %v251_v0  ;;  %317 = vst.msk [vmem:[#allocation2 + $0x2a1] sm:$0xff] %vm26_vm0, %v252_v11  ;;  %v257_v0 = vld [vmem:[%s15360_s0 + $0x1b8] sm:$0xff]  ;;  %v258_v11 = vld [vmem:[%s15360_s0 + $0x1c0] sm:$0xff] }
  0x70   :  { %318 = vst.msk [vmem:[#allocation2 + $0x2a9] sm:$0xff] %vm26_vm0, %v253_v38  ;;  %319 = vst.msk [vmem:[#allocation2 + $0x2b9] sm:$0xff] %vm26_vm0, %v254_v9  ;;  %v650_v38 = vrot.slane %v9459_v4, 1  ;;  %v259_v9 = vld [vmem:[%s15360_s0 + $0x1c8] sm:$0xff] }
  0x71   :  { %320 = vst.msk [vmem:[#allocation2 + $0x2c1] sm:$0xff] %vm26_vm0, %v255_v24  ;;  %321 = vst.msk [vmem:[#allocation2 + $0x2d1] sm:$0xff] %vm26_vm0, %v256_v58  ;;  %v260_v24 = vld [vmem:[%s15360_s0 + $0x1d0] sm:$0xff]  ;;  %v651_v58 = vrot.slane %v9461_v5, 1  ;;  %v263_v63 = vld [vmem:[%s15360_s0 + $0x1e8] sm:$0xff]  ;;  %v658_v5 = vrot.slane %v9824_v22, 1 }
  0x72   :  { %322 = vst.msk [vmem:[#allocation2 + $0x2d9] sm:$0xff] %vm26_vm0, %v257_v0  ;;  %323 = vst.msk [vmem:[#allocation2 + $0x2e9] sm:$0xff] %vm26_vm0, %v258_v11  ;;  %v653_v0 = vrot.slane %v9733_v47, 1  ;;  %v261_v11 = vld [vmem:[%s15360_s0 + $0x1d8] sm:$0xff] }
  0x73   :  { %16018 = vst [vmem:[#allocation48_spill] sm:$0xff] %v9806_v34  ;;  %16019 = vst [vmem:[#allocation49_spill] sm:$0xff] %v9809_v1  ;;  %v656_v34 = vrot.slane %v9474_v8, 1 }
  0x74   :  { %324 = vst.msk [vmem:[#allocation2 + $0x2f1] sm:$0xff] %vm26_vm0, %v259_v9  ;;  %325 = vst.msk [vmem:[#allocation2 + $0x301] sm:$0xff] %vm26_vm0, %v260_v24  ;;  %v9829_v9 = vld [vmem:[#allocation2 + $0x260] sm:$0xff]  ;;  %v655_v24 = vrot.slane %v9463_v6, 1  ;;  %v9838_v47 = vld [vmem:[#allocation2 + $0x270] sm:$0xff] }
  0x75   :  { %16020 = vst [vmem:[#allocation50_spill] sm:$0xff] %v9824_v22  ;;  %326 = vst.msk [vmem:[#allocation2 + $0x309] sm:$0xff] %vm26_vm0, %v261_v11  ;;  %v9840_v11 = vld [vmem:[#allocation2 + $0x278] sm:$0xff]  ;;  %v9854_v1 = vld [vmem:[#allocation2 + $0x288] sm:$0xff]  ;;  %v9895_v57 = vsel %vm599_vm3, %v656_v34, %v658_v5 }
  0x76   :  { %327 = vst.msk [vmem:[#allocation2 + $0x319] sm:$0xff] %vm26_vm0, %v262_v59  ;;  %328 = vst.msk [vmem:[#allocation2 + $0x321] sm:$0xff] %vm26_vm0, %v263_v63  ;;  %v9843_v59 = vsel %vm599_vm3, %v650_v38, %v651_v58  ;;  %v9846_v63 = vsel %vm599_vm3, %v651_v58, %v653_v0  ;;  %v9856_v6 = vld [vmem:[#allocation2 + $0x290] sm:$0xff]  ;;  %v9858_v4 = vld [vmem:[#allocation2 + $0x2a0] sm:$0xff]  ;;  %v9892_v26 = vsel %vm599_vm3, %v655_v24, %v656_v34 }
  0x77   :  { %486 = vst.msk [vmem:[#allocation4 + $0x178] sm:$0xff] %vm26_vm0, %v9829_v9  ;;  %16021 = vst [vmem:[#allocation51_spill] sm:$0xff] %v9843_v59  ;;  %v9860_v38 = vld [vmem:[#allocation2 + $0x130] sm:$0x3]  ;;  %v9866_v58 = vld [vmem:[#allocation2 + $0x2a8] sm:$0xff]  ;;  %800 = vrot.lane.b32.xlu0 %v9843_v59, %s9029_s24  ;;  %802 = vrot.lane.b32.xlu1 %v9846_v63, %s9029_s24  ;;  %v661_v59 = vrot.slane %v9590_v32, 1 }
  0x78   :  { %16022 = vst [vmem:[#allocation52_spill] sm:$0xff] %v9846_v63  ;;  %487 = vst.msk [vmem:[#allocation4 + $0x180] sm:$0xff] %vm26_vm0, %v9838_v47  ;;  %v9870_v0 = vld [vmem:[#allocation2 + $0x2b8] sm:$0xff]  ;;  %v9874_v22 = vld [vmem:[#allocation2 + $0x2c0] sm:$0xff]  ;;  %v663_v63 = vrot.slane %v9860_v38, 1 }
  0x79   :  { %488 = vst.msk [vmem:[#allocation4 + $0x188] sm:$0xff] %vm26_vm0, %v9840_v11  ;;  %16023 = vst [vmem:[#allocation53_spill] sm:$0xff] %v9860_v38  ;;  %v9878_v8 = vld [vmem:[#allocation2 + $0x2d0] sm:$0xff]  ;;  %v9887_v3 = vld [vmem:[#allocation2 + $0x2d8] sm:$0xff]  ;;  %v665_v38 = vrot.slane %v9614_v44, 1  ;;  %v9931_v54 = vsel %vm599_vm3, %v660_v60, %v661_v59  ;;  %v670_v60 = vrot.slane %v9629_v48, 1 }
  0x7a   :  { %489 = vst.msk [vmem:[#allocation4 + $0x190] sm:$0xff] %vm26_vm0, %v9854_v1  ;;  %490 = vst.msk [vmem:[#allocation4 + $0x198] sm:$0xff] %vm26_vm0, %v9856_v6  ;;  %v9901_v15 = vld [vmem:[#allocation2 + $0x2e8] sm:$0xff]  ;;  %v9934_v53 = vsel %vm599_vm3, %v661_v59, %v663_v63  ;;  %v9940_v44 = vld [vmem:[#allocation2 + $0x160] sm:$0x3] }
  0x7b   :  { %491 = vst.msk [vmem:[#allocation4 + $0x1a0] sm:$0xff] %vm26_vm0, %v9858_v4  ;;  %492 = vst.msk [vmem:[#allocation4 + $0x1a8] sm:$0xff] %vm26_vm0, %v9866_v58  ;;  %v9905_v29 = vld [vmem:[#allocation2 + $0x2f0] sm:$0xff]  ;;  %v9909_v24 = vld [vmem:[#allocation2 + $0x300] sm:$0xff]  ;;  %804 = vrot.lane.b32.xlu0 %v9892_v26, %s9029_s24  ;;  %806 = vrot.lane.b32.xlu1 %v9895_v57, %s9029_s24 }
  0x7c   :  { %16024 = vst [vmem:[#allocation54_spill] sm:$0xff] %v9874_v22  ;;  %493 = vst.msk [vmem:[#allocation4 + $0x1b0] sm:$0xff] %vm26_vm0, %v9870_v0  ;;  %v9913_v5 = vld [vmem:[#allocation2 + $0x308] sm:$0xff] }
  0x7d   :  { %16025 = vst [vmem:[#allocation55_spill] sm:$0xff] %v9878_v8  ;;  %494 = vst.msk [vmem:[#allocation4 + $0x1b8] sm:$0xff] %vm26_vm0, %v9874_v22  ;;  %v9917_v34 = vld [vmem:[#allocation2 + $0x318] sm:$0xff]  ;;  %v9926_v32 = vld [vmem:[#allocation2 + $0x320] sm:$0xff] }
  0x7e   :  { %16026 = vst [vmem:[#allocation56_spill] sm:$0xff] %v9887_v3  ;;  %495 = vst.msk [vmem:[#allocation4 + $0x1c0] sm:$0xff] %vm26_vm0, %v9878_v8 }
  0x7f   :  { %16027 = vst [vmem:[#allocation57_spill] sm:$0xff] %v9892_v26  ;;  %16028 = vst [vmem:[#allocation58_spill] sm:$0xff] %v9895_v57  ;;  %v666_v26 = vrot.slane %v9625_v40, 1  ;;  %v668_v57 = vrot.slane %v9903_v55, 1  ;;  %808 = vrot.lane.b32.xlu0 %v9931_v54, %s9029_s24  ;;  %810 = vrot.lane.b32.xlu1 %v9934_v53, %s9029_s24  ;;  %v673_v40 = vrot.slane %v9940_v44, 1 }
  0x80   :  { %496 = vst.msk [vmem:[#allocation4 + $0x1c8] sm:$0xff] %vm26_vm0, %v9887_v3  ;;  %16029 = vst [vmem:[#allocation59_spill] sm:$0xff] %v9901_v15 }
  0x81   :  { %16030 = vst [vmem:[#allocation60_spill] sm:$0xff] %v9903_v55  ;;  %16031 = vst [vmem:[#allocation61_spill] sm:$0xff] %v9905_v29  ;;  %v9948_v59 = vsel %vm599_vm3, %v665_v38, %v666_v26  ;;  %v9951_v63 = vsel %vm599_vm3, %v666_v26, %v668_v57  ;;  %v671_v55 = vrot.slane %v9635_v49, 1  ;;  %v676_v26 = vrot.slane %v9648_v62, 1  ;;  %v9995_v49 = vld [vmem:[#allocation2 + $0x1f0] sm:$0x3] }
  0x82   :  { %497 = vst.msk [vmem:[#allocation4 + $0x1d0] sm:$0xff] %vm26_vm0, %v9901_v15  ;;  %16032 = vst [vmem:[#allocation62_spill] sm:$0xff] %v9909_v24 }
  0x83   :  { %498 = vst.msk [vmem:[#allocation4 + $0x1d8] sm:$0xff] %vm26_vm0, %v9905_v29  ;;  %16033 = vst [vmem:[#allocation63_spill] sm:$0xff] %v9913_v5  ;;  %812 = vrot.lane.b32.xlu0 %v9948_v59, %s9029_s24  ;;  %814 = vrot.lane.b32.xlu1 %v9951_v63, %s9029_s24  ;;  %v9963_v38 = vsel %vm599_vm3, %v670_v60, %v671_v55  ;;  %v9966_v57 = vsel %vm599_vm3, %v671_v55, %v673_v40  ;;  %v9982_v40 = vld [vmem:[#allocation2 + $0x1d8] sm:$0x3] }
  0x84   :  { %499 = vst.msk [vmem:[#allocation4 + $0x1e0] sm:$0xff] %vm26_vm0, %v9909_v24  ;;  %16034 = vst [vmem:[#allocation64_spill] sm:$0xff] %v9917_v34  ;;  %v688_v62 = vrot.slane %v9982_v40, 1 }
  0x85   :  { %500 = vst.msk [vmem:[#allocation4 + $0x1e8] sm:$0xff] %vm26_vm0, %v9913_v5  ;;  %16035 = vst [vmem:[#allocation65_spill] sm:$0xff] %v9926_v32 }
  0x86   :  { %501 = vst.msk [vmem:[#allocation4 + $0x1f0] sm:$0xff] %vm26_vm0, %v9917_v34  ;;  %16036 = vst [vmem:[#allocation66_spill] sm:$0xff] %v9931_v54  ;;  %v678_v54 = vrot.slane %v9955_v14, 1 }
  0x87   :  { %16037 = vst [vmem:[#allocation67_spill] sm:$0xff] %v9934_v53  ;;  %502 = vst.msk [vmem:[#allocation4 + $0x1f8] sm:$0xff] %vm26_vm0, %v9926_v32  ;;  %v675_v53 = vrot.slane %v9639_v56, 1  ;;  %816 = vrot.lane.b32.xlu0 %v9963_v38, %s9029_s24  ;;  %818 = vrot.lane.b32.xlu1 %v9966_v57, %s9029_s24 }
  0x88   :  { %16038 = vst [vmem:[#allocation68_spill] sm:$0xff] %v9940_v44  ;;  %16039 = vst [vmem:[#allocation69_spill] sm:$0xff] %v9948_v59  ;;  %v387_v44 = vld [vmem:[#allocation2 + $0x1c0] sm:$0x3]  ;;  %v681_v59 = vrot.slane %v9532_v30, 1  ;;  %v9980_v55 = vsel %vm599_vm3, %v676_v26, %v678_v54  ;;  %v1098_v54 = vrot.slane %v9520_v23, 2 }
  0x89   :  { %16040 = vst [vmem:[#allocation70_spill] sm:$0xff] %v9951_v63  ;;  %16041 = vst [vmem:[#allocation71_spill] sm:$0xff] %v9955_v14  ;;  %v680_v63 = vrot.slane %v9520_v23, 1  ;;  %v683_v60 = vrot.slane %v387_v44, 1  ;;  %v9977_v56 = vsel %vm599_vm3, %v675_v53, %v676_v26  ;;  %v685_v14 = vrot.slane %v9652_v7, 1 }
  0x8a   :  { %16042 = vst [vmem:[#allocation72_spill] sm:$0xff] %v9963_v38  ;;  %16043 = vst [vmem:[#allocation73_spill] sm:$0xff] %v9966_v57  ;;  %v686_v53 = vrot.slane %v9664_v16, 1  ;;  %v1099_v26 = vrot.slane %v9532_v30, 2  ;;  %v691_v30 = vrot.slane %v9674_v25, 1 }
  0x8b   :  { %16044 = vst [vmem:[#allocation74_spill] sm:$0xff] %v9977_v56  ;;  %16045 = vst [vmem:[#allocation75_spill] sm:$0xff] %v9980_v55  ;;  %820 = vrot.lane.b32.xlu0 %v9977_v56, %s9029_s24  ;;  %822 = vrot.lane.b32.xlu1 %v9980_v55, %s9029_s24  ;;  %v682_v57 = vsel %vm599_vm3, %v680_v63, %v681_v59  ;;  %v684_v38 = vsel %vm599_vm3, %v681_v59, %v683_v60  ;;  %v1101_v56 = vrot.slane %v387_v44, 2  ;;  %v10059_v55 = vld [vmem:[#allocation2 + $0x250] sm:$0x3] }
  0x8c   :  { %v9998_v48 = vsel %vm1017_vm4, %v1098_v54, %v1099_v26  ;;  %v690_v59 = vrot.slane %v9668_v46, 1  ;;  %v10007_v60 = vsel %vm599_vm3, %v685_v14, %v686_v53  ;;  %v10010_v23 = vsel %vm599_vm3, %v686_v53, %v688_v62  ;;  %v10014_v54 = vld [vmem:[#allocation2 + $0x208] sm:$0x3]  ;;  %v10029_v53 = vld [vmem:[#allocation2 + $0x220] sm:$0x3]  ;;  %16055 = vst [vmem:[#allocation85_spill] sm:$0xff] %v10059_v55 }
  0x8d   :  { %v10004_v63 = vsel %vm1017_vm4, %v1099_v26, %v1101_v56  ;;  %16046 = vst [vmem:[#allocation76_spill] sm:$0xff] %v10007_v60  ;;  %16047 = vst [vmem:[#allocation77_spill] sm:$0xff] %v10010_v23  ;;  %v693_v44 = vrot.slane %v9995_v49, 1  ;;  %v695_v56 = vrot.slane %v9678_v21, 1  ;;  %v700_v26 = vrot.slane %v9693_v20, 1 }
  0x8e   :  { %v10022_v14 = vsel %vm599_vm3, %v690_v59, %v691_v30 }
  0x8f   :  { %824 = vrot.lane.b32.xlu0 %v682_v57, %s9029_s24  ;;  %826 = vrot.lane.b32.xlu1 %v684_v38, %s9029_s24  ;;  %16048 = vst [vmem:[#allocation78_spill] sm:$0xff] %v10022_v14  ;;  %v10025_v62 = vsel %vm599_vm3, %v691_v30, %v693_v44  ;;  %v696_v38 = vrot.slane %v9682_v31, 1  ;;  %v698_v57 = vrot.slane %v10014_v54, 1  ;;  %v701_v44 = vrot.slane %v9695_v19, 1 }
  0x90   :  { %16049 = vst [vmem:[#allocation79_spill] sm:$0xff] %v10025_v62 }
  0x91   :  { %v10037_v59 = vsel %vm599_vm3, %v695_v56, %v696_v38  ;;  %v10040_v30 = vsel %vm599_vm3, %v696_v38, %v698_v57  ;;  %v10052_v56 = vsel %vm599_vm3, %v700_v26, %v701_v44  ;;  %v706_v57 = vrot.slane %v9711_v10, 1 }
  0x92   :  { %16050 = vst [vmem:[#allocation80_spill] sm:$0xff] %v10037_v59  ;;  %16051 = vst [vmem:[#allocation81_spill] sm:$0xff] %v10040_v30 }
  0x93   :  { %828 = vrot.lane.b32.xlu0 %v10007_v60, %s9029_s24  ;;  %830 = vrot.lane.b32.xlu1 %v10010_v23, %s9029_s24  ;;  %v703_v23 = vrot.slane %v10029_v53, 1  ;;  %v10044_v60 = vld [vmem:[#allocation2 + $0x238] sm:$0x3]  ;;  %16053 = vst [vmem:[#allocation83_spill] sm:$0xff] %v10052_v56 }
  0x94   :  { %16052 = vst [vmem:[#allocation82_spill] sm:$0xff] %v10044_v60 }
  0x95   :  { %v10055_v38 = vsel %vm599_vm3, %v701_v44, %v703_v23  ;;  %v711_v44 = vrot.slane %v9721_v13, 1 }
  0x96   :  { %16054 = vst [vmem:[#allocation84_spill] sm:$0xff] %v10055_v38 }
  0x97   :  { %832 = vrot.lane.b32.xlu0 %v10022_v14, %s9029_s24  ;;  %834 = vrot.lane.b32.xlu1 %v10025_v62, %s9029_s24  ;;  %v705_v62 = vrot.slane %v9709_v12, 1  ;;  %v708_v14 = vrot.slane %v10044_v60, 1  ;;  %v10074_v60 = vld [vmem:[#allocation2 + $0x268] sm:$0x3] }
  0x98   :  { %16058 = vst [vmem:[#allocation88_spill] sm:$0xff] %v10074_v60 }
  0x99   :  { %v10067_v26 = vsel %vm599_vm3, %v705_v62, %v706_v57  ;;  %v10070_v23 = vsel %vm599_vm3, %v706_v57, %v708_v14  ;;  %v716_v57 = vrot.slane %v9829_v9, 1 }
  0x9a   :  { %16056 = vst [vmem:[#allocation86_spill] sm:$0xff] %v10067_v26  ;;  %16057 = vst [vmem:[#allocation87_spill] sm:$0xff] %v10070_v23 }
  0x9b   :  { %836 = vrot.lane.b32.xlu0 %v10037_v59, %s9029_s24  ;;  %838 = vrot.lane.b32.xlu1 %v10040_v30, %s9029_s24  ;;  %v710_v30 = vrot.slane %v9719_v61, 1  ;;  %v713_v59 = vrot.slane %v10059_v55, 1  ;;  %v10089_v55 = vld [vmem:[#allocation2 + $0x280] sm:$0x3] }
  0x9c   :  { %16061 = vst [vmem:[#allocation91_spill] sm:$0xff] %v10089_v55 }
  0x9d   :  { %v10082_v62 = vsel %vm599_vm3, %v710_v30, %v711_v44  ;;  %v10085_v14 = vsel %vm599_vm3, %v711_v44, %v713_v59  ;;  %v721_v44 = vrot.slane %v9840_v11, 1 }
  0x9e   :  { %16059 = vst [vmem:[#allocation89_spill] sm:$0xff] %v10082_v62  ;;  %16060 = vst [vmem:[#allocation90_spill] sm:$0xff] %v10085_v14 }
  0x9f   :  { %840 = vrot.lane.b32.xlu0 %v10052_v56, %s9029_s24  ;;  %842 = vrot.lane.b32.xlu1 %v10055_v38, %s9029_s24  ;;  %v715_v38 = vrot.slane %v9738_v39, 1  ;;  %v718_v56 = vrot.slane %v10074_v60, 1  ;;  %v10104_v60 = vld [vmem:[#allocation2 + $0x298] sm:$0x3] }
  0xa0   :  { %16064 = vst [vmem:[#allocation94_spill] sm:$0xff] %v10104_v60 }
  0xa1   :  { %v10097_v30 = vsel %vm599_vm3, %v715_v38, %v716_v57  ;;  %v10100_v59 = vsel %vm599_vm3, %v716_v57, %v718_v56  ;;  %v726_v57 = vrot.slane %v9856_v6, 1 }
  0xa2   :  { %16062 = vst [vmem:[#allocation92_spill] sm:$0xff] %v10097_v30  ;;  %16063 = vst [vmem:[#allocation93_spill] sm:$0xff] %v10100_v59 }
  0xa3   :  { %844 = vrot.lane.b32.xlu0 %v10067_v26, %s9029_s24  ;;  %846 = vrot.lane.b32.xlu1 %v10070_v23, %s9029_s24  ;;  %v720_v23 = vrot.slane %v9838_v47, 1  ;;  %v723_v26 = vrot.slane %v10089_v55, 1  ;;  %v10119_v55 = vld [vmem:[#allocation2 + $0x2b0] sm:$0x3] }
  0xa4   :  { %16067 = vst [vmem:[#allocation97_spill] sm:$0xff] %v10119_v55 }
  0xa5   :  { %v10112_v38 = vsel %vm599_vm3, %v720_v23, %v721_v44  ;;  %v10115_v56 = vsel %vm599_vm3, %v721_v44, %v723_v26  ;;  %v731_v44 = vrot.slane %v9866_v58, 1 }
  0xa6   :  { %16065 = vst [vmem:[#allocation95_spill] sm:$0xff] %v10112_v38  ;;  %16066 = vst [vmem:[#allocation96_spill] sm:$0xff] %v10115_v56 }
  0xa7   :  { %848 = vrot.lane.b32.xlu0 %v10082_v62, %s9029_s24  ;;  %850 = vrot.lane.b32.xlu1 %v10085_v14, %s9029_s24  ;;  %v725_v14 = vrot.slane %v9854_v1, 1  ;;  %v728_v62 = vrot.slane %v10104_v60, 1  ;;  %v10134_v60 = vld [vmem:[#allocation2 + $0x2c8] sm:$0x3] }
  0xa8   :  { %16070 = vst [vmem:[#allocation100_spill] sm:$0xff] %v10134_v60 }
  0xa9   :  { %v10127_v23 = vsel %vm599_vm3, %v725_v14, %v726_v57  ;;  %v10130_v26 = vsel %vm599_vm3, %v726_v57, %v728_v62  ;;  %v736_v57 = vrot.slane %v9874_v22, 1 }
  0xaa   :  { %16068 = vst [vmem:[#allocation98_spill] sm:$0xff] %v10127_v23  ;;  %16069 = vst [vmem:[#allocation99_spill] sm:$0xff] %v10130_v26 }
  0xab   :  { %852 = vrot.lane.b32.xlu0 %v10097_v30, %s9029_s24  ;;  %854 = vrot.lane.b32.xlu1 %v10100_v59, %s9029_s24  ;;  %v730_v59 = vrot.slane %v9858_v4, 1  ;;  %v733_v30 = vrot.slane %v10119_v55, 1  ;;  %v10149_v55 = vld [vmem:[#allocation2 + $0x2e0] sm:$0x3] }
  0xac   :  { %16073 = vst [vmem:[#allocation103_spill] sm:$0xff] %v10149_v55 }
  0xad   :  { %v10142_v14 = vsel %vm599_vm3, %v730_v59, %v731_v44  ;;  %v10145_v62 = vsel %vm599_vm3, %v731_v44, %v733_v30  ;;  %v741_v44 = vrot.slane %v9887_v3, 1 }
  0xae   :  { %16071 = vst [vmem:[#allocation101_spill] sm:$0xff] %v10142_v14  ;;  %16072 = vst [vmem:[#allocation102_spill] sm:$0xff] %v10145_v62 }
  0xaf   :  { %856 = vrot.lane.b32.xlu0 %v10112_v38, %s9029_s24  ;;  %858 = vrot.lane.b32.xlu1 %v10115_v56, %s9029_s24  ;;  %v735_v56 = vrot.slane %v9870_v0, 1  ;;  %v738_v38 = vrot.slane %v10134_v60, 1  ;;  %v10164_v60 = vld [vmem:[#allocation2 + $0x2f8] sm:$0x3] }
  0xb0   :  { %16076 = vst [vmem:[#allocation106_spill] sm:$0xff] %v10164_v60 }
  0xb1   :  { %v10157_v59 = vsel %vm599_vm3, %v735_v56, %v736_v57  ;;  %v10160_v30 = vsel %vm599_vm3, %v736_v57, %v738_v38  ;;  %v746_v57 = vrot.slane %v9905_v29, 1  ;;  %v765_v29 = vpop.permute.xlu1 %764 }
  0xb2   :  { %16074 = vst [vmem:[#allocation104_spill] sm:$0xff] %v10157_v59  ;;  %16075 = vst [vmem:[#allocation105_spill] sm:$0xff] %v10160_v30 }
  0xb3   :  { %860 = vrot.lane.b32.xlu0 %v10127_v23, %s9029_s24  ;;  %862 = vrot.lane.b32.xlu1 %v10130_v26, %s9029_s24  ;;  %v740_v26 = vrot.slane %v9878_v8, 1  ;;  %v743_v23 = vrot.slane %v10149_v55, 1  ;;  %v10179_v55 = vld [vmem:[#allocation2 + $0x310] sm:$0x3]  ;;  %955 = vst.msk [vmem:[#allocation4 + $0x10] sm:$0xff] %vm952_vm5, %v765_v29 }
  0xb5   :  { %v10172_v56 = vsel %vm599_vm3, %v740_v26, %v741_v44  ;;  %v10175_v38 = vsel %vm599_vm3, %v741_v44, %v743_v23  ;;  %v751_v44 = vrot.slane %v9913_v5, 1  ;;  %v767_v29 = vpop.permute.xlu1 %766 }
  0xb6   :  { %16077 = vst [vmem:[#allocation107_spill] sm:$0xff] %v10172_v56  ;;  %16078 = vst [vmem:[#allocation108_spill] sm:$0xff] %v10175_v38 }
  0xb7   :  { %864 = vrot.lane.b32.xlu0 %v10142_v14, %s9029_s24  ;;  %866 = vrot.lane.b32.xlu1 %v10145_v62, %s9029_s24  ;;  %v745_v62 = vrot.slane %v9901_v15, 1  ;;  %v748_v14 = vrot.slane %v10164_v60, 1  ;;  %v761_v60 = vpop.permute.xlu0 %760  ;;  %v10194_v15 = vld [vmem:[#allocation2 + $0x328] sm:$0x3]  ;;  %956 = vst.msk [vmem:[#allocation4 + $0x18] sm:$0xff] %vm952_vm5, %v767_v29  ;;  %v1026_v29 = vrot.slane %v9362_v35, 2 }
  0xb8   :  { %953 = vst.msk [vmem:[#allocation4] sm:$0xff] %vm952_vm5, %v761_v60  ;;  %v758_v60 = vrot.slane %v10194_v15, 1 }
  0xb9   :  { %v10187_v26 = vsel %vm599_vm3, %v745_v62, %v746_v57  ;;  %v10190_v23 = vsel %vm599_vm3, %v746_v57, %v748_v14  ;;  %v755_v14 = vrot.slane %v9917_v34, 1 }
  0xba   :  { %16079 = vst [vmem:[#allocation109_spill] sm:$0xff] %v10187_v26  ;;  %16080 = vst [vmem:[#allocation110_spill] sm:$0xff] %v10190_v23 }
  0xbb   :  { %868 = vrot.lane.b32.xlu0 %v10157_v59, %s9029_s24  ;;  %870 = vrot.lane.b32.xlu1 %v10160_v30, %s9029_s24  ;;  %v750_v30 = vrot.slane %v9909_v24, 1  ;;  %v753_v59 = vrot.slane %v10179_v55, 1 }
  0xbd   :  { %v10204_v62 = vsel %vm599_vm3, %v750_v30, %v751_v44  ;;  %v10207_v57 = vsel %vm599_vm3, %v751_v44, %v753_v59 }
  0xbe   :  { %16081 = vst [vmem:[#allocation111_spill] sm:$0xff] %v10204_v62  ;;  %16082 = vst [vmem:[#allocation112_spill] sm:$0xff] %v10207_v57 }
  0xbf   :  { %872 = vrot.lane.b32.xlu0 %v10172_v56, %s9029_s24  ;;  %874 = vrot.lane.b32.xlu1 %v10175_v38, %s9029_s24  ;;  %v756_v38 = vrot.slane %v9926_v32, 1  ;;  %v763_v56 = vpop.permute.xlu0 %762 }
  0xc0   :  { %954 = vst.msk [vmem:[#allocation4 + $0x8] sm:$0xff] %vm952_vm5, %v763_v56  ;;  %v1023_v56 = vrot.slane %v9342_v27, 2 }
  0xc1   :  { %v10218_v30 = vsel %vm599_vm3, %v755_v14, %v756_v38  ;;  %v10221_v59 = vsel %vm599_vm3, %v756_v38, %v758_v60  ;;  %v1024_v14 = vrot.slane %v9344_v28, 2 }
  0xc2   :  { %16083 = vst [vmem:[#allocation113_spill] sm:$0xff] %v10218_v30  ;;  %16084 = vst [vmem:[#allocation114_spill] sm:$0xff] %v10221_v59 }
  0xc3   :  { %876 = vrot.lane.b32.xlu0 %v10187_v26, %s9029_s24  ;;  %878 = vrot.lane.b32.xlu1 %v10190_v23, %s9029_s24  ;;  %v769_v44 = vpop.permute.xlu0 %768  ;;  %v771_v23 = vpop.permute.xlu1 %770  ;;  %v10244_v35 = vsel %vm1017_vm4, %v1024_v14, %v1026_v29  ;;  %v16108_v26 = vld [vmem:[#allocation41_spill] sm:$0xff] }
  0xc4   :  { %957 = vst.msk [vmem:[#allocation4 + $0x20] sm:$0xff] %vm952_vm5, %v769_v44  ;;  %958 = vst.msk [vmem:[#allocation4 + $0x28] sm:$0xff] %vm952_vm5, %v771_v23  ;;  %v1028_v23 = vrot.slane %v9359_v33, 2  ;;  %v1029_v44 = vrot.slane %v9364_v36, 2 }
  0xc5   :  { %16086 = vst [vmem:[#allocation116_spill] sm:$0xff] %v10244_v35 }
  0xc7   :  { %880 = vrot.lane.b32.xlu0 %v10204_v62, %s9029_s24  ;;  %882 = vrot.lane.b32.xlu1 %v10207_v57, %s9029_s24  ;;  %v773_v38 = vpop.permute.xlu0 %772  ;;  %v775_v60 = vpop.permute.xlu1 %774  ;;  %v16103_v57 = vld [vmem:[#allocation33_spill] sm:$0xff] }
  0xc8   :  { %959 = vst.msk [vmem:[#allocation4 + $0x30] sm:$0xff] %vm952_vm5, %v773_v38  ;;  %960 = vst.msk [vmem:[#allocation4 + $0x38] sm:$0xff] %vm952_vm5, %v775_v60  ;;  %v1031_v38 = vrot.slane %v9377_v41, 2  ;;  %v1033_v41 = vrot.slane %v9368_v37, 2 }
  0xcb   :  { %884 = vrot.lane.b32.xlu0 %v10218_v30, %s9029_s24  ;;  %886 = vrot.lane.b32.xlu1 %v10221_v59, %s9029_s24  ;;  %v10241_v59 = vsel %vm1017_vm4, %v1023_v56, %v1024_v14  ;;  %v777_v60 = vpop.permute.xlu0 %776  ;;  %v779_v30 = vpop.permute.xlu1 %778  ;;  %v1034_v56 = vrot.slane %v9379_v42, 2  ;;  %v1036_v14 = vrot.slane %v9407_v52, 2  ;;  %v1039_v52 = vrot.slane %v9391_v45, 2  ;;  %s9036_s24 = smov 32  }
  0xcc   :  { %16085 = vst [vmem:[#allocation115_spill] sm:$0xff] %v10241_v59  ;;  %961 = vst.msk [vmem:[#allocation4 + $0x40] sm:$0xff] %vm952_vm5, %v777_v60  ;;  %v1041_v60 = vrot.slane %v9449_v2, 2  ;;  %v1044_v2 = vrot.slane %v9405_v51, 2 }
  0xcd   :  { %962 = vst.msk [vmem:[#allocation4 + $0x48] sm:$0xff] %vm952_vm5, %v779_v30 }
  0xcf   :  { %1178 = vrot.lane.b32.xlu0 %v9599_v17, %s9030_s10  ;;  %1180 = vrot.lane.b32.xlu1 %v9602_v18, %s9030_s10  ;;  %v10254_v17 = vsel %vm1017_vm4, %v1028_v23, %v1029_v44  ;;  %v10257_v18 = vsel %vm1017_vm4, %v1029_v44, %v1031_v38  ;;  %v781_v29 = vpop.permute.xlu0 %780  ;;  %v783_v30 = vpop.permute.xlu1 %782  ;;  %v1038_v23 = vrot.slane %v9383_v43, 2  ;;  %v10270_v44 = vsel %vm1017_vm4, %v1033_v41, %v1034_v56 }
  0xd0   :  { %16087 = vst [vmem:[#allocation117_spill] sm:$0xff] %v10254_v17  ;;  %16088 = vst [vmem:[#allocation118_spill] sm:$0xff] %v10257_v18  ;;  %v10273_v38 = vsel %vm1017_vm4, %v1034_v56, %v1036_v14  ;;  %v1043_v41 = vrot.slane %v9403_v50, 2  ;;  %v10288_v14 = vsel %vm1017_vm4, %v1039_v52, %v1041_v60 }
  0xd1   :  { %963 = vst.msk [vmem:[#allocation4 + $0x50] sm:$0xff] %vm952_vm5, %v781_v29  ;;  %964 = vst.msk [vmem:[#allocation4 + $0x58] sm:$0xff] %vm952_vm5, %v783_v30  ;;  %v10285_v56 = vsel %vm1017_vm4, %v1038_v23, %v1039_v52  ;;  %v16094_v23 = vld [vmem:[#allocation8_spill] sm:$0xff] }
  0xd2   :  { %16089 = vst [vmem:[#allocation119_spill] sm:$0xff] %v10270_v44  ;;  %16090 = vst [vmem:[#allocation120_spill] sm:$0xff] %v10273_v38  ;;  %v10300_v52 = vsel %vm1017_vm4, %v1043_v41, %v1044_v2  ;;  %v16099_v41 = vld [vmem:[#allocation10_spill] sm:$0xff] }
  0xd3   :  { %1182 = vrot.lane.b32.xlu0 %v10241_v59, %s9030_s10  ;;  %1184 = vrot.lane.b32.xlu1 %v10244_v35, %s9030_s10  ;;  %v785_v29 = vpop.permute.xlu0 %784  ;;  %v787_v30 = vpop.permute.xlu1 %786  ;;  %16091 = vst [vmem:[#allocation121_spill] sm:$0xff] %v10285_v56  ;;  %16092 = vst [vmem:[#allocation122_spill] sm:$0xff] %v10288_v14  ;;  %v16098_v35 = vld [vmem:[#allocation26_spill] sm:$0xff] }
  0xd4   :  { %965 = vst.msk [vmem:[#allocation4 + $0x60] sm:$0xff] %vm952_vm5, %v785_v29  ;;  %966 = vst.msk [vmem:[#allocation4 + $0x68] sm:$0xff] %vm952_vm5, %v787_v30 }
  0xd7   :  { %1186 = vrot.lane.b32.xlu0 %v10254_v17, %s9030_s10  ;;  %1188 = vrot.lane.b32.xlu1 %v10257_v18, %s9030_s10  ;;  %v16093_v18 = vld [vmem:[#allocation24_spill] sm:$0xff]  ;;  %v789_v17 = vpop.permute.xlu0 %788  ;;  %v791_v30 = vpop.permute.xlu1 %790 }
  0xd8   :  { %v1046_v29 = vrot.slane %v16093_v18, 2  ;;  %967 = vst.msk [vmem:[#allocation4 + $0x70] sm:$0xff] %vm952_vm5, %v789_v17  ;;  %968 = vst.msk [vmem:[#allocation4 + $0x78] sm:$0xff] %vm952_vm5, %v791_v30  ;;  %v16097_v18 = vld [vmem:[#allocation9_spill] sm:$0xff]  ;;  %v1051_v17 = vrot.slane %v16098_v35, 2  ;;  %v16102_v35 = vld [vmem:[#allocation11_spill] sm:$0xff] }
  0xd9   :  { %16095 = vst [vmem:[#allocation24_spill] sm:$0xff] %v10300_v52 }
  0xda   :  { %v10303_v60 = vsel %vm1017_vm4, %v1044_v2, %v1046_v29 }
  0xdb   :  { %1190 = vrot.lane.b32.xlu0 %v10270_v44, %s9030_s10  ;;  %1192 = vrot.lane.b32.xlu1 %v10273_v38, %s9030_s10  ;;  %v1048_v38 = vrot.slane %v16094_v23, 2  ;;  %16096 = vst [vmem:[#allocation8_spill] sm:$0xff] %v10303_v60  ;;  %v1049_v44 = vrot.slane %v16097_v18, 2  ;;  %v793_v59 = vpop.permute.xlu0 %792  ;;  %v795_v30 = vpop.permute.xlu1 %794 }
  0xdc   :  { %969 = vst.msk [vmem:[#allocation4 + $0x80] sm:$0xff] %vm952_vm5, %v793_v59  ;;  %970 = vst.msk [vmem:[#allocation4 + $0x88] sm:$0xff] %vm952_vm5, %v795_v30  ;;  %v1056_v59 = vrot.slane %v16103_v57, 2  ;;  %v16107_v57 = vld [vmem:[#allocation15_spill] sm:$0xff] }
  0xdd   :  { %v10315_v2 = vsel %vm1017_vm4, %v1048_v38, %v1049_v44  ;;  %v10318_v29 = vsel %vm1017_vm4, %v1049_v44, %v1051_v17  ;;  %v16104_v38 = vld [vmem:[#allocation12_spill] sm:$0xff] }
  0xde   :  { %16100 = vst [vmem:[#allocation9_spill] sm:$0xff] %v10315_v2  ;;  %16101 = vst [vmem:[#allocation26_spill] sm:$0xff] %v10318_v29 }
  0xdf   :  { %1194 = vrot.lane.b32.xlu0 %v10285_v56, %s9030_s10  ;;  %1196 = vrot.lane.b32.xlu1 %v10288_v14, %s9030_s10  ;;  %v1053_v14 = vrot.slane %v16099_v41, 2  ;;  %v1054_v56 = vrot.slane %v16102_v35, 2  ;;  %v797_v62 = vpop.permute.xlu0 %796 }
  0xe0   :  { %v799_v30 = vpop.permute.xlu1 %798  ;;  %971 = vst.msk [vmem:[#allocation4 + $0x90] sm:$0xff] %vm952_vm5, %v797_v62  ;;  %v1061_v62 = vrot.slane %v16108_v26, 2  ;;  %v16112_v26 = vld [vmem:[#allocation17_spill] sm:$0xff] }
  0xe1   :  { %972 = vst.msk [vmem:[#allocation4 + $0x98] sm:$0xff] %vm952_vm5, %v799_v30  ;;  %v10330_v44 = vsel %vm1017_vm4, %v1053_v14, %v1054_v56  ;;  %v10333_v17 = vsel %vm1017_vm4, %v1054_v56, %v1056_v59  ;;  %v16109_v14 = vld [vmem:[#allocation16_spill] sm:$0xff] }
  0xe2   :  { %16105 = vst [vmem:[#allocation10_spill] sm:$0xff] %v10330_v44  ;;  %16106 = vst [vmem:[#allocation33_spill] sm:$0xff] %v10333_v17 }
  0xe3   :  { %1198 = vrot.lane.b32.xlu0 %v10300_v52, %s9030_s10  ;;  %1200 = vrot.lane.b32.xlu1 %v10303_v60, %s9030_s10  ;;  %v1058_v60 = vrot.slane %v16104_v38, 2  ;;  %v1059_v52 = vrot.slane %v16107_v57, 2  ;;  %v16113_v57 = vld [vmem:[#allocation44_spill] sm:$0xff] }
  0xe5   :  { %v10345_v56 = vsel %vm1017_vm4, %v1058_v60, %v1059_v52  ;;  %v10348_v59 = vsel %vm1017_vm4, %v1059_v52, %v1061_v62  ;;  %v16114_v60 = vld [vmem:[#allocation18_spill] sm:$0xff] }
  0xe6   :  { %16110 = vst [vmem:[#allocation41_spill] sm:$0xff] %v10345_v56  ;;  %16111 = vst [vmem:[#allocation123_spill] sm:$0xff] %v10348_v59 }
  0xe7   :  { %1202 = vrot.lane.b32.xlu0 %v10315_v2, %s9030_s10  ;;  %1204 = vrot.lane.b32.xlu1 %v10318_v29, %s9030_s10  ;;  %v1063_v29 = vrot.slane %v16109_v14, 2  ;;  %v1064_v2 = vrot.slane %v16112_v26, 2  ;;  %v16118_v26 = vld [vmem:[#allocation45_spill] sm:$0xff] }
  0xe9   :  { %v801_v35 = vpop.permute.xlu0 %800  ;;  %v803_v30 = vpop.permute.xlu1 %802  ;;  %v10360_v52 = vsel %vm1017_vm4, %v1063_v29, %v1064_v2  ;;  %v16119_v29 = vld [vmem:[#allocation20_spill] sm:$0xff] }
  0xea   :  { %973 = vst.msk [vmem:[#allocation4 + $0xa0] sm:$0xff] %vm952_vm5, %v801_v35  ;;  %974 = vst.msk [vmem:[#allocation4 + $0xa8] sm:$0xff] %vm952_vm5, %v803_v30  ;;  %v1066_v35 = vrot.slane %v16113_v57, 2  ;;  %v16117_v57 = vld [vmem:[#allocation19_spill] sm:$0xff] }
  0xeb   :  { %1206 = vrot.lane.b32.xlu0 %v10330_v44, %s9030_s10  ;;  %1208 = vrot.lane.b32.xlu1 %v10333_v17, %s9030_s10  ;;  %v1068_v17 = vrot.slane %v16114_v60, 2  ;;  %16115 = vst [vmem:[#allocation44_spill] sm:$0xff] %v10360_v52  ;;  %v1069_v44 = vrot.slane %v16117_v57, 2  ;;  %v16123_v57 = vld [vmem:[#allocation50_spill] sm:$0xff] }
  0xec   :  { %v10363_v62 = vsel %vm1017_vm4, %v1064_v2, %v1066_v35 }
  0xed   :  { %v805_v38 = vpop.permute.xlu0 %804  ;;  %v807_v30 = vpop.permute.xlu1 %806  ;;  %16116 = vst [vmem:[#allocation124_spill] sm:$0xff] %v10363_v62  ;;  %v10375_v2 = vsel %vm1017_vm4, %v1068_v17, %v1069_v44  ;;  %v16124_v17 = vld [vmem:[#allocation25_spill] sm:$0xff] }
  0xee   :  { %975 = vst.msk [vmem:[#allocation4 + $0xb0] sm:$0xff] %vm952_vm5, %v805_v38  ;;  %976 = vst.msk [vmem:[#allocation4 + $0xb8] sm:$0xff] %vm952_vm5, %v807_v30  ;;  %v1071_v38 = vrot.slane %v16118_v26, 2  ;;  %v16122_v26 = vld [vmem:[#allocation21_spill] sm:$0xff] }
  0xef   :  { %1210 = vrot.lane.b32.xlu0 %v10345_v56, %s9030_s10  ;;  %1212 = vrot.lane.b32.xlu1 %v10348_v59, %s9030_s10  ;;  %v1073_v59 = vrot.slane %v16119_v29, 2  ;;  %16120 = vst [vmem:[#allocation45_spill] sm:$0xff] %v10375_v2  ;;  %v1074_v56 = vrot.slane %v16122_v26, 2  ;;  %v16128_v26 = vld [vmem:[#allocation53_spill] sm:$0xff] }
  0xf0   :  { %v10378_v35 = vsel %vm1017_vm4, %v1069_v44, %v1071_v38 }
  0xf1   :  { %v809_v14 = vpop.permute.xlu0 %808  ;;  %v811_v30 = vpop.permute.xlu1 %810  ;;  %16121 = vst [vmem:[#allocation125_spill] sm:$0xff] %v10378_v35  ;;  %v10390_v44 = vsel %vm1017_vm4, %v1073_v59, %v1074_v56  ;;  %v16129_v59 = vld [vmem:[#allocation32_spill] sm:$0xff] }
  0xf2   :  { %977 = vst.msk [vmem:[#allocation4 + $0xc0] sm:$0xff] %vm952_vm5, %v809_v14  ;;  %978 = vst.msk [vmem:[#allocation4 + $0xc8] sm:$0xff] %vm952_vm5, %v811_v30  ;;  %v1076_v14 = vrot.slane %v16123_v57, 2  ;;  %v16127_v57 = vld [vmem:[#allocation29_spill] sm:$0xff] }
  0xf3   :  { %1214 = vrot.lane.b32.xlu0 %v10360_v52, %s9030_s10  ;;  %1216 = vrot.lane.b32.xlu1 %v10363_v62, %s9030_s10  ;;  %v1078_v62 = vrot.slane %v16124_v17, 2  ;;  %16125 = vst [vmem:[#allocation50_spill] sm:$0xff] %v10390_v44  ;;  %v1079_v52 = vrot.slane %v16127_v57, 2  ;;  %v16133_v57 = vld [vmem:[#allocation60_spill] sm:$0xff] }
  0xf4   :  { %v10393_v38 = vsel %vm1017_vm4, %v1074_v56, %v1076_v14 }
  0xf5   :  { %v813_v60 = vpop.permute.xlu0 %812  ;;  %v815_v30 = vpop.permute.xlu1 %814  ;;  %16126 = vst [vmem:[#allocation126_spill] sm:$0xff] %v10393_v38  ;;  %v10405_v56 = vsel %vm1017_vm4, %v1078_v62, %v1079_v52  ;;  %v16134_v62 = vld [vmem:[#allocation35_spill] sm:$0xff] }
  0xf6   :  { %979 = vst.msk [vmem:[#allocation4 + $0xd0] sm:$0xff] %vm952_vm5, %v813_v60  ;;  %980 = vst.msk [vmem:[#allocation4 + $0xd8] sm:$0xff] %vm952_vm5, %v815_v30  ;;  %v1081_v60 = vrot.slane %v16128_v26, 2  ;;  %v16132_v26 = vld [vmem:[#allocation34_spill] sm:$0xff] }
  0xf7   :  { %1218 = vrot.lane.b32.xlu0 %v10375_v2, %s9030_s10  ;;  %1220 = vrot.lane.b32.xlu1 %v10378_v35, %s9030_s10  ;;  %v1083_v35 = vrot.slane %v16129_v59, 2  ;;  %16130 = vst [vmem:[#allocation53_spill] sm:$0xff] %v10405_v56  ;;  %v1084_v2 = vrot.slane %v16132_v26, 2  ;;  %v16138_v26 = vld [vmem:[#allocation68_spill] sm:$0xff] }
  0xf8   :  { %v10408_v14 = vsel %vm1017_vm4, %v1079_v52, %v1081_v60 }
  0xf9   :  { %v817_v29 = vpop.permute.xlu0 %816  ;;  %v819_v30 = vpop.permute.xlu1 %818  ;;  %16131 = vst [vmem:[#allocation127_spill] sm:$0xff] %v10408_v14  ;;  %v10420_v52 = vsel %vm1017_vm4, %v1083_v35, %v1084_v2 }
  0xfa   :  { %981 = vst.msk [vmem:[#allocation4 + $0xe0] sm:$0xff] %vm952_vm5, %v817_v29  ;;  %982 = vst.msk [vmem:[#allocation4 + $0xe8] sm:$0xff] %vm952_vm5, %v819_v30  ;;  %v1086_v29 = vrot.slane %v16133_v57, 2  ;;  %v16137_v57 = vld [vmem:[#allocation36_spill] sm:$0xff] }
  0xfb   :  { %1222 = vrot.lane.b32.xlu0 %v10390_v44, %s9030_s10  ;;  %1224 = vrot.lane.b32.xlu1 %v10393_v38, %s9030_s10  ;;  %v1088_v38 = vrot.slane %v16134_v62, 2  ;;  %16135 = vst [vmem:[#allocation60_spill] sm:$0xff] %v10420_v52  ;;  %v1089_v44 = vrot.slane %v16137_v57, 2 }
  0xfc   :  { %v10423_v60 = vsel %vm1017_vm4, %v1084_v2, %v1086_v29  ;;  %v16139_v2 = vld [vmem:[#allocation37_spill] sm:$0xff] }
  0xfd   :  { %v821_v17 = vpop.permute.xlu0 %820  ;;  %v823_v30 = vpop.permute.xlu1 %822  ;;  %16136 = vst [vmem:[#allocation128_spill] sm:$0xff] %v10423_v60  ;;  %v1093_v35 = vrot.slane %v16139_v2, 2 }
  0xfe   :  { %983 = vst.msk [vmem:[#allocation4 + $0xf0] sm:$0xff] %vm952_vm5, %v821_v17  ;;  %984 = vst.msk [vmem:[#allocation4 + $0xf8] sm:$0xff] %vm952_vm5, %v823_v30  ;;  %v1091_v17 = vrot.slane %v16138_v26, 2  ;;  %v10442_v26 = vsel %vm1017_vm4, %v1088_v38, %v1089_v44 }
  0xff   :  { %1226 = vrot.lane.b32.xlu0 %v10405_v56, %s9030_s10  ;;  %1228 = vrot.lane.b32.xlu1 %v10408_v14, %s9030_s10  ;;  %v232_v14 = vld [vmem:[%s15360_s0 + $0xf0] sm:$0xff] }
 0x100   :  { %297 = vst.msk [vmem:[#allocation2 + $0x181] sm:$0xff] %vm26_vm0, %v232_v14  ;;  %v10445_v29 = vsel %vm1017_vm4, %v1089_v44, %v1091_v17  ;;  %v1104_v17 = vrot.slane %v9664_v16, 2 }
 0x101   :  { %v825_v59 = vpop.permute.xlu0 %824  ;;  %v827_v30 = vpop.permute.xlu1 %826 }
 0x102   :  { %985 = vst.msk [vmem:[#allocation4 + $0x100] sm:$0xff] %vm952_vm5, %v825_v59  ;;  %986 = vst.msk [vmem:[#allocation4 + $0x108] sm:$0xff] %vm952_vm5, %v827_v30  ;;  %v233_v59 = vld [vmem:[%s15360_s0 + $0xf8] sm:$0xff]  ;;  %v16140_v30 = vld [vmem:[#allocation38_spill] sm:$0xff] }
 0x103   :  { %1230 = vrot.lane.b32.xlu0 %v10420_v52, %s9030_s10  ;;  %1232 = vrot.lane.b32.xlu1 %v10423_v60, %s9030_s10  ;;  %v1094_v56 = vrot.slane %v16140_v30, 2  ;;  %v16141_v52 = vld [vmem:[#allocation71_spill] sm:$0xff]  ;;  %298 = vst.msk [vmem:[#allocation2 + $0x189] sm:$0xff] %vm26_vm0, %v233_v59  ;;  %v1109_v59 = vrot.slane %v9674_v25, 2 }
 0x104   :  { %v1096_v57 = vrot.slane %v16141_v52, 2 }
 0x105   :  { %v829_v60 = vpop.permute.xlu0 %828  ;;  %v831_v2 = vpop.permute.xlu1 %830  ;;  %v10457_v44 = vsel %vm1017_vm4, %v1093_v35, %v1094_v56  ;;  %v1108_v35 = vrot.slane %v9668_v46, 2 }
 0x106   :  { %987 = vst.msk [vmem:[#allocation4 + $0x110] sm:$0xff] %vm952_vm5, %v829_v60  ;;  %988 = vst.msk [vmem:[#allocation4 + $0x118] sm:$0xff] %vm952_vm5, %v831_v2  ;;  %v10460_v38 = vsel %vm1017_vm4, %v1094_v56, %v1096_v57  ;;  %v1103_v60 = vrot.slane %v9652_v7, 2  ;;  %v1106_v2 = vrot.slane %v9982_v40, 2 }
 0x107   :  { %1234 = vrot.lane.b32.xlu0 %v10442_v26, %s9030_s10  ;;  %1236 = vrot.lane.b32.xlu1 %v10445_v29, %s9030_s10 }
 0x108   :  { %v10483_v40 = vsel %vm1017_vm4, %v1104_v17, %v1106_v2 }
 0x109   :  { %v833_v14 = vpop.permute.xlu0 %832  ;;  %v835_v52 = vpop.permute.xlu1 %834  ;;  %16143 = vst [vmem:[#allocation38_spill] sm:$0xff] %v10483_v40 }
 0x10a   :  { %989 = vst.msk [vmem:[#allocation4 + $0x120] sm:$0xff] %vm952_vm5, %v833_v14  ;;  %990 = vst.msk [vmem:[#allocation4 + $0x128] sm:$0xff] %vm952_vm5, %v835_v52  ;;  %v10480_v14 = vsel %vm1017_vm4, %v1103_v60, %v1104_v17  ;;  %v1111_v52 = vrot.slane %v9995_v49, 2  ;;  %v1113_v49 = vrot.slane %v9678_v21, 2  ;;  %v1114_v60 = vrot.slane %v9682_v31, 2 }
 0x10b   :  { %1238 = vrot.lane.b32.xlu0 %v10457_v44, %s9030_s10  ;;  %1240 = vrot.lane.b32.xlu1 %v10460_v38, %s9030_s10  ;;  %16142 = vst [vmem:[#allocation68_spill] sm:$0xff] %v10480_v14  ;;  %v1116_v17 = vrot.slane %v10014_v54, 2 }
 0x10d   :  { %v837_v56 = vpop.permute.xlu0 %836  ;;  %v839_v57 = vpop.permute.xlu1 %838  ;;  %v10513_v54 = vsel %vm1017_vm4, %v1114_v60, %v1116_v17  ;;  %v1124_v17 = vrot.slane %v9711_v10, 2 }
 0x10e   :  { %991 = vst.msk [vmem:[#allocation4 + $0x130] sm:$0xff] %vm952_vm5, %v837_v56  ;;  %992 = vst.msk [vmem:[#allocation4 + $0x138] sm:$0xff] %vm952_vm5, %v839_v57 }
 0x10f   :  { %1242 = vrot.lane.b32.xlu0 %v9998_v48, %s9030_s10  ;;  %1244 = vrot.lane.b32.xlu1 %v10004_v63, %s9030_s10  ;;  %v10493_v48 = vsel %vm1017_vm4, %v1108_v35, %v1109_v59  ;;  %v10496_v63 = vsel %vm1017_vm4, %v1109_v59, %v1111_v52  ;;  %v1118_v35 = vrot.slane %v9693_v20, 2  ;;  %v1119_v59 = vrot.slane %v9695_v19, 2  ;;  %16147 = vst [vmem:[#allocation131_spill] sm:$0xff] %v10513_v54 }
 0x110   :  { %16144 = vst [vmem:[#allocation71_spill] sm:$0xff] %v10493_v48  ;;  %16145 = vst [vmem:[#allocation129_spill] sm:$0xff] %v10496_v63  ;;  %v10510_v52 = vsel %vm1017_vm4, %v1113_v49, %v1114_v60 }
 0x111   :  { %v841_v56 = vpop.permute.xlu0 %840  ;;  %v843_v57 = vpop.permute.xlu1 %842  ;;  %16146 = vst [vmem:[#allocation130_spill] sm:$0xff] %v10510_v52  ;;  %v10523_v49 = vsel %vm1017_vm4, %v1118_v35, %v1119_v59  ;;  %v1128_v35 = vrot.slane %v9719_v61, 2 }
 0x112   :  { %993 = vst.msk [vmem:[#allocation4 + $0x140] sm:$0xff] %vm952_vm5, %v841_v56  ;;  %994 = vst.msk [vmem:[#allocation4 + $0x148] sm:$0xff] %vm952_vm5, %v843_v57  ;;  %v1121_v57 = vrot.slane %v10029_v53, 2  ;;  %v1123_v53 = vrot.slane %v9709_v12, 2 }
 0x113   :  { %1246 = vrot.lane.b32.xlu0 %v10480_v14, %s9030_s10  ;;  %1248 = vrot.lane.b32.xlu1 %v10483_v40, %s9030_s10  ;;  %16148 = vst [vmem:[#allocation132_spill] sm:$0xff] %v10523_v49  ;;  %v16174_v40 = vld [vmem:[#allocation106_spill] sm:$0xff] }
 0x114   :  { %v10526_v60 = vsel %vm1017_vm4, %v1119_v59, %v1121_v57  ;;  %v1129_v59 = vrot.slane %v9721_v13, 2  ;;  %v10540_v57 = vsel %vm1017_vm4, %v1123_v53, %v1124_v17 }
 0x115   :  { %v845_v2 = vpop.permute.xlu0 %844  ;;  %v847_v56 = vpop.permute.xlu1 %846  ;;  %16149 = vst [vmem:[#allocation133_spill] sm:$0xff] %v10526_v60 }
 0x116   :  { %995 = vst.msk [vmem:[#allocation4 + $0x150] sm:$0xff] %vm952_vm5, %v845_v2  ;;  %996 = vst.msk [vmem:[#allocation4 + $0x158] sm:$0xff] %vm952_vm5, %v847_v56  ;;  %v10553_v53 = vsel %vm1017_vm4, %v1128_v35, %v1129_v59  ;;  %v1138_v35 = vrot.slane %v9838_v47, 2 }
 0x117   :  { %1250 = vrot.lane.b32.xlu0 %v10493_v48, %s9030_s10  ;;  %1252 = vrot.lane.b32.xlu1 %v10496_v63, %s9030_s10  ;;  %v16150_v63 = vld [vmem:[#allocation82_spill] sm:$0xff] }
 0x118   :  { %16151 = vst [vmem:[#allocation82_spill] sm:$0xff] %v10540_v57 }
 0x119   :  { %v849_v2 = vpop.permute.xlu0 %848  ;;  %v851_v56 = vpop.permute.xlu1 %850 }
 0x11a   :  { %997 = vst.msk [vmem:[#allocation4 + $0x160] sm:$0xff] %vm952_vm5, %v849_v2  ;;  %998 = vst.msk [vmem:[#allocation4 + $0x168] sm:$0xff] %vm952_vm5, %v851_v56  ;;  %v1126_v2 = vrot.slane %v16150_v63, 2 }
 0x11b   :  { %1254 = vrot.lane.b32.xlu0 %v10510_v52, %s9030_s10  ;;  %1256 = vrot.lane.b32.xlu1 %v10513_v54, %s9030_s10  ;;  %v16153_v54 = vld [vmem:[#allocation85_spill] sm:$0xff] }
 0x11c   :  { %v10543_v63 = vsel %vm1017_vm4, %v1124_v17, %v1126_v2  ;;  %16154 = vst [vmem:[#allocation85_spill] sm:$0xff] %v10553_v53  ;;  %v1134_v2 = vrot.slane %v9829_v9, 2 }
 0x11d   :  { %v853_v48 = vpop.permute.xlu0 %852  ;;  %v855_v56 = vpop.permute.xlu1 %854  ;;  %16152 = vst [vmem:[#allocation134_spill] sm:$0xff] %v10543_v63 }
 0x11e   :  { %999 = vst.msk [vmem:[#allocation4 + $0x170] sm:$0xff] %vm952_vm5, %v853_v48  ;;  %1000 = vst.msk [vmem:[#allocation4 + $0x178] sm:$0xff] %vm952_vm5, %v855_v56  ;;  %v1131_v48 = vrot.slane %v16153_v54, 2  ;;  %v1133_v54 = vrot.slane %v9738_v39, 2 }
 0x11f   :  { %1258 = vrot.lane.b32.xlu0 %v10523_v49, %s9030_s10  ;;  %1260 = vrot.lane.b32.xlu1 %v10526_v60, %s9030_s10  ;;  %v16156_v60 = vld [vmem:[#allocation88_spill] sm:$0xff] }
 0x120   :  { %v10556_v17 = vsel %vm1017_vm4, %v1129_v59, %v1131_v48  ;;  %v1139_v59 = vrot.slane %v9840_v11, 2  ;;  %v10570_v48 = vsel %vm1017_vm4, %v1133_v54, %v1134_v2 }
 0x121   :  { %v857_v52 = vpop.permute.xlu0 %856  ;;  %v859_v56 = vpop.permute.xlu1 %858  ;;  %16155 = vst [vmem:[#allocation135_spill] sm:$0xff] %v10556_v17  ;;  %16157 = vst [vmem:[#allocation88_spill] sm:$0xff] %v10570_v48 }
 0x122   :  { %1001 = vst.msk [vmem:[#allocation4 + $0x180] sm:$0xff] %vm952_vm5, %v857_v52  ;;  %1002 = vst.msk [vmem:[#allocation4 + $0x188] sm:$0xff] %vm952_vm5, %v859_v56  ;;  %v1136_v52 = vrot.slane %v16156_v60, 2  ;;  %v10583_v54 = vsel %vm1017_vm4, %v1138_v35, %v1139_v59  ;;  %v1148_v35 = vrot.slane %v9858_v4, 2 }
 0x123   :  { %1262 = vrot.lane.b32.xlu0 %v10540_v57, %s9030_s10  ;;  %1264 = vrot.lane.b32.xlu1 %v10543_v63, %s9030_s10  ;;  %v16159_v63 = vld [vmem:[#allocation91_spill] sm:$0xff] }
 0x124   :  { %v10573_v60 = vsel %vm1017_vm4, %v1134_v2, %v1136_v52  ;;  %16160 = vst [vmem:[#allocation91_spill] sm:$0xff] %v10583_v54  ;;  %v1144_v52 = vrot.slane %v9856_v6, 2 }
 0x125   :  { %v861_v49 = vpop.permute.xlu0 %860  ;;  %v863_v56 = vpop.permute.xlu1 %862  ;;  %16158 = vst [vmem:[#allocation136_spill] sm:$0xff] %v10573_v60 }
 0x126   :  { %1003 = vst.msk [vmem:[#allocation4 + $0x190] sm:$0xff] %vm952_vm5, %v861_v49  ;;  %1004 = vst.msk [vmem:[#allocation4 + $0x198] sm:$0xff] %vm952_vm5, %v863_v56  ;;  %v1141_v49 = vrot.slane %v16159_v63, 2  ;;  %v1143_v63 = vrot.slane %v9854_v1, 2 }
 0x127   :  { %1266 = vrot.lane.b32.xlu0 %v10553_v53, %s9030_s10  ;;  %1268 = vrot.lane.b32.xlu1 %v10556_v17, %s9030_s10  ;;  %v16162_v17 = vld [vmem:[#allocation94_spill] sm:$0xff] }
 0x128   :  { %v10586_v2 = vsel %vm1017_vm4, %v1139_v59, %v1141_v49  ;;  %v1149_v59 = vrot.slane %v9866_v58, 2  ;;  %v10600_v49 = vsel %vm1017_vm4, %v1143_v63, %v1144_v52 }
 0x129   :  { %v865_v57 = vpop.permute.xlu0 %864  ;;  %v867_v56 = vpop.permute.xlu1 %866  ;;  %16161 = vst [vmem:[#allocation137_spill] sm:$0xff] %v10586_v2  ;;  %16163 = vst [vmem:[#allocation94_spill] sm:$0xff] %v10600_v49 }
 0x12a   :  { %1005 = vst.msk [vmem:[#allocation4 + $0x1a0] sm:$0xff] %vm952_vm5, %v865_v57  ;;  %1006 = vst.msk [vmem:[#allocation4 + $0x1a8] sm:$0xff] %vm952_vm5, %v867_v56  ;;  %v1146_v57 = vrot.slane %v16162_v17, 2  ;;  %v10613_v63 = vsel %vm1017_vm4, %v1148_v35, %v1149_v59  ;;  %v1158_v35 = vrot.slane %v9878_v8, 2 }
 0x12b   :  { %1270 = vrot.lane.b32.xlu0 %v10570_v48, %s9030_s10  ;;  %1272 = vrot.lane.b32.xlu1 %v10573_v60, %s9030_s10  ;;  %v16165_v60 = vld [vmem:[#allocation97_spill] sm:$0xff] }
 0x12c   :  { %v10603_v17 = vsel %vm1017_vm4, %v1144_v52, %v1146_v57  ;;  %16166 = vst [vmem:[#allocation97_spill] sm:$0xff] %v10613_v63  ;;  %v1154_v57 = vrot.slane %v9874_v22, 2 }
 0x12d   :  { %v869_v53 = vpop.permute.xlu0 %868  ;;  %v871_v56 = vpop.permute.xlu1 %870  ;;  %16164 = vst [vmem:[#allocation138_spill] sm:$0xff] %v10603_v17 }
 0x12e   :  { %1007 = vst.msk [vmem:[#allocation4 + $0x1b0] sm:$0xff] %vm952_vm5, %v869_v53  ;;  %1008 = vst.msk [vmem:[#allocation4 + $0x1b8] sm:$0xff] %vm952_vm5, %v871_v56  ;;  %v1151_v53 = vrot.slane %v16165_v60, 2  ;;  %v1153_v60 = vrot.slane %v9870_v0, 2 }
 0x12f   :  { %1274 = vrot.lane.b32.xlu0 %v10583_v54, %s9030_s10  ;;  %1276 = vrot.lane.b32.xlu1 %v10586_v2, %s9030_s10  ;;  %v16168_v2 = vld [vmem:[#allocation100_spill] sm:$0xff] }
 0x130   :  { %v10616_v52 = vsel %vm1017_vm4, %v1149_v59, %v1151_v53  ;;  %v1159_v59 = vrot.slane %v9887_v3, 2  ;;  %v10630_v53 = vsel %vm1017_vm4, %v1153_v60, %v1154_v57 }
 0x131   :  { %v873_v48 = vpop.permute.xlu0 %872  ;;  %v875_v56 = vpop.permute.xlu1 %874  ;;  %16167 = vst [vmem:[#allocation139_spill] sm:$0xff] %v10616_v52 }
 0x132   :  { %1009 = vst.msk [vmem:[#allocation4 + $0x1c0] sm:$0xff] %vm952_vm5, %v873_v48  ;;  %1010 = vst.msk [vmem:[#allocation4 + $0x1c8] sm:$0xff] %vm952_vm5, %v875_v56  ;;  %v1156_v48 = vrot.slane %v16168_v2, 2  ;;  %v10643_v60 = vsel %vm1017_vm4, %v1158_v35, %v1159_v59  ;;  %v1168_v35 = vrot.slane %v9909_v24, 2 }
 0x133   :  { %1278 = vrot.lane.b32.xlu0 %v10600_v49, %s9030_s10  ;;  %1280 = vrot.lane.b32.xlu1 %v10603_v17, %s9030_s10  ;;  %v16170_v17 = vld [vmem:[#allocation103_spill] sm:$0xff] }
 0x134   :  { %v10633_v2 = vsel %vm1017_vm4, %v1154_v57, %v1156_v48  ;;  %v16172_v48 = vld [vmem:[#allocation59_spill] sm:$0xff] }
 0x135   :  { %v877_v54 = vpop.permute.xlu0 %876  ;;  %v879_v56 = vpop.permute.xlu1 %878  ;;  %16169 = vst [vmem:[#allocation100_spill] sm:$0xff] %v10633_v2 }
 0x136   :  { %1011 = vst.msk [vmem:[#allocation4 + $0x1d0] sm:$0xff] %vm952_vm5, %v877_v54  ;;  %1012 = vst.msk [vmem:[#allocation4 + $0x1d8] sm:$0xff] %vm952_vm5, %v879_v56  ;;  %v1161_v54 = vrot.slane %v16170_v17, 2  ;;  %v1163_v17 = vrot.slane %v16172_v48, 2 }
 0x137   :  { %1282 = vrot.lane.b32.xlu0 %v10613_v63, %s9030_s10  ;;  %1284 = vrot.lane.b32.xlu1 %v10616_v52, %s9030_s10  ;;  %v16173_v52 = vld [vmem:[#allocation61_spill] sm:$0xff] }
 0x138   :  { %v10646_v57 = vsel %vm1017_vm4, %v1159_v59, %v1161_v54  ;;  %v1164_v63 = vrot.slane %v16173_v52, 2  ;;  %v1169_v59 = vrot.slane %v9913_v5, 2 }
 0x139   :  { %v881_v49 = vpop.permute.xlu0 %880  ;;  %v883_v56 = vpop.permute.xlu1 %882  ;;  %16171 = vst [vmem:[#allocation103_spill] sm:$0xff] %v10646_v57 }
 0x13a   :  { %1013 = vst.msk [vmem:[#allocation4 + $0x1e0] sm:$0xff] %vm952_vm5, %v881_v49  ;;  %1014 = vst.msk [vmem:[#allocation4 + $0x1e8] sm:$0xff] %vm952_vm5, %v883_v56  ;;  %v1166_v49 = vrot.slane %v16174_v40, 2  ;;  %v10660_v54 = vsel %vm1017_vm4, %v1163_v17, %v1164_v63  ;;  %v1173_v17 = vrot.slane %v9917_v34, 2 }
 0x13b   :  { %1286 = vrot.lane.b32.xlu0 %v10630_v53, %s9030_s10  ;;  %1288 = vrot.lane.b32.xlu1 %v10633_v2, %s9030_s10  ;;  %16175 = vst [vmem:[#allocation106_spill] sm:$0xff] %v10660_v54 }
 0x13c   :  { %v10663_v40 = vsel %vm1017_vm4, %v1164_v63, %v1166_v49  ;;  %v10676_v63 = vsel %vm1017_vm4, %v1168_v35, %v1169_v59  ;;  %v1174_v49 = vrot.slane %v9926_v32, 2 }
 0x13d   :  { %v885_v14 = vpop.permute.xlu0 %884  ;;  %v887_v56 = vpop.permute.xlu1 %886  ;;  %16176 = vst [vmem:[#allocation140_spill] sm:$0xff] %v10663_v40 }
 0x13e   :  { %1015 = vst.msk [vmem:[#allocation4 + $0x1f0] sm:$0xff] %vm952_vm5, %v885_v14  ;;  %1016 = vst.msk [vmem:[#allocation4 + $0x1f8] sm:$0xff] %vm952_vm5, %v887_v56  ;;  %v1171_v14 = vrot.slane %v10179_v55, 2  ;;  %v265_v55 = vld [vmem:[%s15360_s0 + $0x1f8] sm:$0xff]  ;;  %vm4917_vm5 = vcmask 195712  }
 0x13f   :  { %1290 = vrot.lane.b32.xlu0 %v10643_v60, %s9030_s10  ;;  %1292 = vrot.lane.b32.xlu1 %v10646_v57, %s9030_s10  ;;  %v264_v57 = vld [vmem:[%s15360_s0 + $0x1f0] sm:$0xff]  ;;  %330 = vst.msk [vmem:[#allocation2 + $0x339] sm:$0xff] %vm26_vm0, %v265_v55  ;;  %s9031_s0 = smov 12  }
 0x140   :  { %329 = vst.msk [vmem:[#allocation2 + $0x331] sm:$0xff] %vm26_vm0, %v264_v57  ;;  %v10696_v57 = vsel %vm1017_vm4, %v1173_v17, %v1174_v49  ;;  %vm117_vm0 = vcmask 58368  }
 0x141   :  { %v1179_v56 = vpop.permute.xlu0 %1178  ;;  %v1181_v2 = vpop.permute.xlu1 %1180 }
 0x142   :  { %1371 = vst.msk [vmem:[#allocation4] sm:$0xff] %vm1370_vm6, %v1179_v56  ;;  %1372 = vst.msk [vmem:[#allocation4 + $0x8] sm:$0xff] %vm1370_vm6, %v1181_v2  ;;  %v10683_v2 = vsel %vm1017_vm4, %v1169_v59, %v1171_v14  ;;  %v1176_v56 = vrot.slane %v10194_v15, 2 }
 0x143   :  { %1294 = vrot.lane.b32.xlu0 %v10660_v54, %s9030_s10  ;;  %1296 = vrot.lane.b32.xlu1 %v10663_v40, %s9030_s10 }
 0x144   :  { %v10699_v59 = vsel %vm1017_vm4, %v1174_v49, %v1176_v56 }
 0x145   :  { %v1183_v40 = vpop.permute.xlu0 %1182  ;;  %v1185_v35 = vpop.permute.xlu1 %1184 }
 0x146   :  { %1373 = vst.msk [vmem:[#allocation4 + $0x10] sm:$0xff] %vm1370_vm6, %v1183_v40  ;;  %1374 = vst.msk [vmem:[#allocation4 + $0x18] sm:$0xff] %vm1370_vm6, %v1185_v35 }
 0x147   :  { %1298 = vrot.lane.b32.xlu0 %v10676_v63, %s9030_s10  ;;  %1300 = vrot.lane.b32.xlu1 %v10683_v2, %s9030_s10 }
 0x149   :  { %v1187_v15 = vpop.permute.xlu0 %1186  ;;  %v1189_v14 = vpop.permute.xlu1 %1188 }
 0x14a   :  { %1375 = vst.msk [vmem:[#allocation4 + $0x20] sm:$0xff] %vm1370_vm6, %v1187_v15  ;;  %1376 = vst.msk [vmem:[#allocation4 + $0x28] sm:$0xff] %vm1370_vm6, %v1189_v14 }
 0x14b   :  { %1302 = vrot.lane.b32.xlu0 %v10696_v57, %s9030_s10  ;;  %1304 = vrot.lane.b32.xlu1 %v10699_v59, %s9030_s10 }
 0x14d   :  { %v1191_v40 = vpop.permute.xlu0 %1190  ;;  %v1193_v55 = vpop.permute.xlu1 %1192 }
 0x14e   :  { %1377 = vst.msk [vmem:[#allocation4 + $0x30] sm:$0xff] %vm1370_vm6, %v1191_v40  ;;  %1378 = vst.msk [vmem:[#allocation4 + $0x38] sm:$0xff] %vm1370_vm6, %v1193_v55 }
 0x14f   :  { %1439 = vrot.lane.b32.xlu0 %v9342_v27, %s9031_s0  ;;  %1441 = vrot.lane.b32.xlu1 %v9344_v28, %s9031_s0 }
 0x151   :  { %v1195_v17 = vpop.permute.xlu0 %1194  ;;  %v1197_v49 = vpop.permute.xlu1 %1196 }
 0x152   :  { %1379 = vst.msk [vmem:[#allocation4 + $0x40] sm:$0xff] %vm1370_vm6, %v1195_v17  ;;  %1380 = vst.msk [vmem:[#allocation4 + $0x48] sm:$0xff] %vm1370_vm6, %v1197_v49 }
 0x153   :  { %1443 = vrot.lane.b32.xlu0 %v9359_v33, %s9031_s0  ;;  %1445 = vrot.lane.b32.xlu1 %v9364_v36, %s9031_s0 }
 0x155   :  { %v1199_v56 = vpop.permute.xlu0 %1198  ;;  %v1201_v35 = vpop.permute.xlu1 %1200 }
 0x156   :  { %1381 = vst.msk [vmem:[#allocation4 + $0x50] sm:$0xff] %vm1370_vm6, %v1199_v56  ;;  %1382 = vst.msk [vmem:[#allocation4 + $0x58] sm:$0xff] %vm1370_vm6, %v1201_v35  ;;  %v16177_v56 = vld [vmem:[#allocation11_spill] sm:$0xff] }
 0x157   :  { %1447 = vrot.lane.b32.xlu0 %v9368_v37, %s9031_s0  ;;  %1449 = vrot.lane.b32.xlu1 %v9379_v42, %s9031_s0 }
 0x159   :  { %v1203_v27 = vpop.permute.xlu0 %1202  ;;  %v1205_v28 = vpop.permute.xlu1 %1204 }
 0x15a   :  { %1383 = vst.msk [vmem:[#allocation4 + $0x60] sm:$0xff] %vm1370_vm6, %v1203_v27  ;;  %1384 = vst.msk [vmem:[#allocation4 + $0x68] sm:$0xff] %vm1370_vm6, %v1205_v28  ;;  %v16178_v28 = vld [vmem:[#allocation12_spill] sm:$0xff] }
 0x15b   :  { %1451 = vrot.lane.b32.xlu0 %v9383_v43, %s9031_s0  ;;  %1453 = vrot.lane.b32.xlu1 %v9391_v45, %s9031_s0 }
 0x15d   :  { %v1207_v15 = vpop.permute.xlu0 %1206  ;;  %v1209_v14 = vpop.permute.xlu1 %1208 }
 0x15e   :  { %1385 = vst.msk [vmem:[#allocation4 + $0x70] sm:$0xff] %vm1370_vm6, %v1207_v15  ;;  %1386 = vst.msk [vmem:[#allocation4 + $0x78] sm:$0xff] %vm1370_vm6, %v1209_v14  ;;  %v16179_v15 = vld [vmem:[#allocation15_spill] sm:$0xff] }
 0x15f   :  { %1455 = vrot.lane.b32.xlu0 %v9403_v50, %s9031_s0  ;;  %1457 = vrot.lane.b32.xlu1 %v9405_v51, %s9031_s0 }
 0x161   :  { %v1211_v40 = vpop.permute.xlu0 %1210  ;;  %v1213_v55 = vpop.permute.xlu1 %1212 }
 0x162   :  { %1387 = vst.msk [vmem:[#allocation4 + $0x80] sm:$0xff] %vm1370_vm6, %v1211_v40  ;;  %1388 = vst.msk [vmem:[#allocation4 + $0x88] sm:$0xff] %vm1370_vm6, %v1213_v55  ;;  %v16180_v55 = vld [vmem:[#allocation16_spill] sm:$0xff] }
 0x163   :  { %1459 = vrot.lane.b32.xlu0 %v16094_v23, %s9031_s0  ;;  %1461 = vrot.lane.b32.xlu1 %v16097_v18, %s9031_s0 }
 0x165   :  { %v1215_v17 = vpop.permute.xlu0 %1214  ;;  %v1217_v49 = vpop.permute.xlu1 %1216 }
 0x166   :  { %1389 = vst.msk [vmem:[#allocation4 + $0x90] sm:$0xff] %vm1370_vm6, %v1215_v17  ;;  %1390 = vst.msk [vmem:[#allocation4 + $0x98] sm:$0xff] %vm1370_vm6, %v1217_v49  ;;  %v16181_v17 = vld [vmem:[#allocation17_spill] sm:$0xff] }
 0x167   :  { %1463 = vrot.lane.b32.xlu0 %v16099_v41, %s9031_s0  ;;  %1465 = vrot.lane.b32.xlu1 %v16177_v56, %s9031_s0 }
 0x169   :  { %v1219_v35 = vpop.permute.xlu0 %1218  ;;  %v1221_v27 = vpop.permute.xlu1 %1220 }
 0x16a   :  { %1391 = vst.msk [vmem:[#allocation4 + $0xa0] sm:$0xff] %vm1370_vm6, %v1219_v35  ;;  %1392 = vst.msk [vmem:[#allocation4 + $0xa8] sm:$0xff] %vm1370_vm6, %v1221_v27  ;;  %v16182_v27 = vld [vmem:[#allocation18_spill] sm:$0xff] }
 0x16b   :  { %1467 = vrot.lane.b32.xlu0 %v16178_v28, %s9031_s0  ;;  %1469 = vrot.lane.b32.xlu1 %v16179_v15, %s9031_s0  ;;  %v16183_v15 = vld [vmem:[#allocation19_spill] sm:$0xff] }
 0x16d   :  { %v1223_v14 = vpop.permute.xlu0 %1222  ;;  %v1225_v40 = vpop.permute.xlu1 %1224 }
 0x16e   :  { %1393 = vst.msk [vmem:[#allocation4 + $0xb0] sm:$0xff] %vm1370_vm6, %v1223_v14  ;;  %1394 = vst.msk [vmem:[#allocation4 + $0xb8] sm:$0xff] %vm1370_vm6, %v1225_v40 }
 0x16f   :  { %1471 = vrot.lane.b32.xlu0 %v16180_v55, %s9031_s0  ;;  %1473 = vrot.lane.b32.xlu1 %v16181_v17, %s9031_s0  ;;  %v16184_v17 = vld [vmem:[#allocation20_spill] sm:$0xff]  ;;  %v16185_v55 = vld [vmem:[#allocation21_spill] sm:$0xff] }
 0x171   :  { %v1227_v49 = vpop.permute.xlu0 %1226  ;;  %v1229_v35 = vpop.permute.xlu1 %1228 }
 0x172   :  { %1395 = vst.msk [vmem:[#allocation4 + $0xc0] sm:$0xff] %vm1370_vm6, %v1227_v49  ;;  %1396 = vst.msk [vmem:[#allocation4 + $0xc8] sm:$0xff] %vm1370_vm6, %v1229_v35 }
 0x173   :  { %1475 = vrot.lane.b32.xlu0 %v16182_v27, %s9031_s0  ;;  %1477 = vrot.lane.b32.xlu1 %v16183_v15, %s9031_s0  ;;  %v16186_v15 = vld [vmem:[#allocation25_spill] sm:$0xff] }
 0x174   :  { %v16187_v27 = vld [vmem:[#allocation29_spill] sm:$0xff] }
 0x175   :  { %v1231_v14 = vpop.permute.xlu0 %1230  ;;  %v1233_v40 = vpop.permute.xlu1 %1232 }
 0x176   :  { %1397 = vst.msk [vmem:[#allocation4 + $0xd0] sm:$0xff] %vm1370_vm6, %v1231_v14  ;;  %1398 = vst.msk [vmem:[#allocation4 + $0xd8] sm:$0xff] %vm1370_vm6, %v1233_v40 }
 0x177   :  { %1479 = vrot.lane.b32.xlu0 %v16184_v17, %s9031_s0  ;;  %1481 = vrot.lane.b32.xlu1 %v16185_v55, %s9031_s0  ;;  %v16188_v55 = vld [vmem:[#allocation32_spill] sm:$0xff]  ;;  %v16189_v17 = vld [vmem:[#allocation34_spill] sm:$0xff] }
 0x179   :  { %v1235_v49 = vpop.permute.xlu0 %1234  ;;  %v1237_v35 = vpop.permute.xlu1 %1236 }
 0x17a   :  { %1399 = vst.msk [vmem:[#allocation4 + $0xe0] sm:$0xff] %vm1370_vm6, %v1235_v49  ;;  %1400 = vst.msk [vmem:[#allocation4 + $0xe8] sm:$0xff] %vm1370_vm6, %v1237_v35 }
 0x17b   :  { %1483 = vrot.lane.b32.xlu0 %v16186_v15, %s9031_s0  ;;  %1485 = vrot.lane.b32.xlu1 %v16187_v27, %s9031_s0  ;;  %v16190_v27 = vld [vmem:[#allocation36_spill] sm:$0xff] }
 0x17d   :  { %v1239_v14 = vpop.permute.xlu0 %1238  ;;  %v1241_v40 = vpop.permute.xlu1 %1240 }
 0x17e   :  { %1401 = vst.msk [vmem:[#allocation4 + $0xf0] sm:$0xff] %vm1370_vm6, %v1239_v14  ;;  %1402 = vst.msk [vmem:[#allocation4 + $0xf8] sm:$0xff] %vm1370_vm6, %v1241_v40 }
 0x17f   :  { %1487 = vrot.lane.b32.xlu0 %v16188_v55, %s9031_s0  ;;  %1489 = vrot.lane.b32.xlu1 %v16189_v17, %s9031_s0  ;;  %v16191_v17 = vld [vmem:[#allocation37_spill] sm:$0xff] }
 0x181   :  { %v1243_v49 = vpop.permute.xlu0 %1242  ;;  %v1245_v35 = vpop.permute.xlu1 %1244 }
 0x182   :  { %1403 = vst.msk [vmem:[#allocation4 + $0x100] sm:$0xff] %vm1370_vm6, %v1243_v49  ;;  %1404 = vst.msk [vmem:[#allocation4 + $0x108] sm:$0xff] %vm1370_vm6, %v1245_v35  ;;  %v10797_v49 = vld [vmem:[#allocation2 + $0x180] sm:$0xff]  ;;  %v10799_v35 = vld [vmem:[#allocation2 + $0x188] sm:$0xff] }
 0x183   :  { %1491 = vrot.lane.b32.xlu0 %v16134_v62, %s9031_s0  ;;  %1493 = vrot.lane.b32.xlu1 %v16190_v27, %s9031_s0 }
 0x185   :  { %v1247_v14 = vpop.permute.xlu0 %1246  ;;  %v1249_v40 = vpop.permute.xlu1 %1248 }
 0x186   :  { %1405 = vst.msk [vmem:[#allocation4 + $0x110] sm:$0xff] %vm1370_vm6, %v1247_v14  ;;  %1406 = vst.msk [vmem:[#allocation4 + $0x118] sm:$0xff] %vm1370_vm6, %v1249_v40 }
 0x187   :  { %1495 = vrot.lane.b32.xlu0 %v16191_v17, %s9031_s0  ;;  %1497 = vrot.lane.b32.xlu1 %v16140_v30, %s9031_s0 }
 0x189   :  { %v1251_v62 = vpop.permute.xlu0 %1250  ;;  %v1253_v55 = vpop.permute.xlu1 %1252 }
 0x18a   :  { %1407 = vst.msk [vmem:[#allocation4 + $0x120] sm:$0xff] %vm1370_vm6, %v1251_v62  ;;  %1408 = vst.msk [vmem:[#allocation4 + $0x128] sm:$0xff] %vm1370_vm6, %v1253_v55 }
 0x18b   :  { %1499 = vrot.lane.b32.xlu0 %v10797_v49, %s9031_s0  ;;  %1501 = vrot.lane.b32.xlu1 %v10799_v35, %s9031_s0 }
 0x18d   :  { %v1255_v14 = vpop.permute.xlu0 %1254  ;;  %v1257_v40 = vpop.permute.xlu1 %1256 }
 0x18e   :  { %1409 = vst.msk [vmem:[#allocation4 + $0x130] sm:$0xff] %vm1370_vm6, %v1255_v14  ;;  %1410 = vst.msk [vmem:[#allocation4 + $0x138] sm:$0xff] %vm1370_vm6, %v1257_v40 }
 0x18f   :  { %1503 = vrot.lane.b32.xlu0 %v9652_v7, %s9031_s0  ;;  %1505 = vrot.lane.b32.xlu1 %v9664_v16, %s9031_s0 }
 0x191   :  { %v1259_v62 = vpop.permute.xlu0 %1258  ;;  %v1261_v55 = vpop.permute.xlu1 %1260 }
 0x192   :  { %1411 = vst.msk [vmem:[#allocation4 + $0x140] sm:$0xff] %vm1370_vm6, %v1259_v62  ;;  %1412 = vst.msk [vmem:[#allocation4 + $0x148] sm:$0xff] %vm1370_vm6, %v1261_v55 }
 0x193   :  { %1507 = vrot.lane.b32.xlu0 %v9668_v46, %s9031_s0  ;;  %1509 = vrot.lane.b32.xlu1 %v9674_v25, %s9031_s0 }
 0x195   :  { %v1263_v14 = vpop.permute.xlu0 %1262  ;;  %v1265_v40 = vpop.permute.xlu1 %1264 }
 0x196   :  { %1413 = vst.msk [vmem:[#allocation4 + $0x150] sm:$0xff] %vm1370_vm6, %v1263_v14  ;;  %1414 = vst.msk [vmem:[#allocation4 + $0x158] sm:$0xff] %vm1370_vm6, %v1265_v40 }
 0x197   :  { %1511 = vrot.lane.b32.xlu0 %v9678_v21, %s9031_s0  ;;  %1513 = vrot.lane.b32.xlu1 %v9682_v31, %s9031_s0 }
 0x199   :  { %v1267_v7 = vpop.permute.xlu0 %1266  ;;  %v1269_v16 = vpop.permute.xlu1 %1268 }
 0x19a   :  { %1415 = vst.msk [vmem:[#allocation4 + $0x160] sm:$0xff] %vm1370_vm6, %v1267_v7  ;;  %1416 = vst.msk [vmem:[#allocation4 + $0x168] sm:$0xff] %vm1370_vm6, %v1269_v16 }
 0x19b   :  { %1515 = vrot.lane.b32.xlu0 %v9693_v20, %s9031_s0  ;;  %1517 = vrot.lane.b32.xlu1 %v9695_v19, %s9031_s0 }
 0x19d   :  { %v1271_v62 = vpop.permute.xlu0 %1270  ;;  %v1273_v55 = vpop.permute.xlu1 %1272 }
 0x19e   :  { %1417 = vst.msk [vmem:[#allocation4 + $0x170] sm:$0xff] %vm1370_vm6, %v1271_v62  ;;  %1418 = vst.msk [vmem:[#allocation4 + $0x178] sm:$0xff] %vm1370_vm6, %v1273_v55 }
 0x19f   :  { %1519 = vrot.lane.b32.xlu0 %v9709_v12, %s9031_s0  ;;  %1521 = vrot.lane.b32.xlu1 %v9711_v10, %s9031_s0 }
 0x1a1   :  { %v1275_v14 = vpop.permute.xlu0 %1274  ;;  %v1277_v40 = vpop.permute.xlu1 %1276 }
 0x1a2   :  { %1419 = vst.msk [vmem:[#allocation4 + $0x180] sm:$0xff] %vm1370_vm6, %v1275_v14  ;;  %1420 = vst.msk [vmem:[#allocation4 + $0x188] sm:$0xff] %vm1370_vm6, %v1277_v40 }
 0x1a3   :  { %1523 = vrot.lane.b32.xlu0 %v9719_v61, %s9031_s0  ;;  %1525 = vrot.lane.b32.xlu1 %v9721_v13, %s9031_s0 }
 0x1a5   :  { %v1279_v7 = vpop.permute.xlu0 %1278  ;;  %v1281_v16 = vpop.permute.xlu1 %1280 }
 0x1a6   :  { %1421 = vst.msk [vmem:[#allocation4 + $0x190] sm:$0xff] %vm1370_vm6, %v1279_v7  ;;  %1422 = vst.msk [vmem:[#allocation4 + $0x198] sm:$0xff] %vm1370_vm6, %v1281_v16 }
 0x1a7   :  { %1527 = vrot.lane.b32.xlu0 %v9738_v39, %s9031_s0  ;;  %1529 = vrot.lane.b32.xlu1 %v9829_v9, %s9031_s0 }
 0x1a9   :  { %v1283_v62 = vpop.permute.xlu0 %1282  ;;  %v1285_v55 = vpop.permute.xlu1 %1284 }
 0x1aa   :  { %1423 = vst.msk [vmem:[#allocation4 + $0x1a0] sm:$0xff] %vm1370_vm6, %v1283_v62  ;;  %1424 = vst.msk [vmem:[#allocation4 + $0x1a8] sm:$0xff] %vm1370_vm6, %v1285_v55 }
 0x1ab   :  { %1531 = vrot.lane.b32.xlu0 %v9838_v47, %s9031_s0  ;;  %1533 = vrot.lane.b32.xlu1 %v9840_v11, %s9031_s0 }
 0x1ad   :  { %v1287_v14 = vpop.permute.xlu0 %1286  ;;  %v1289_v40 = vpop.permute.xlu1 %1288 }
 0x1ae   :  { %1425 = vst.msk [vmem:[#allocation4 + $0x1b0] sm:$0xff] %vm1370_vm6, %v1287_v14  ;;  %1426 = vst.msk [vmem:[#allocation4 + $0x1b8] sm:$0xff] %vm1370_vm6, %v1289_v40 }
 0x1af   :  { %1535 = vrot.lane.b32.xlu0 %v9854_v1, %s9031_s0  ;;  %1537 = vrot.lane.b32.xlu1 %v9856_v6, %s9031_s0 }
 0x1b1   :  { %v1291_v7 = vpop.permute.xlu0 %1290  ;;  %v1293_v16 = vpop.permute.xlu1 %1292 }
 0x1b2   :  { %1427 = vst.msk [vmem:[#allocation4 + $0x1c0] sm:$0xff] %vm1370_vm6, %v1291_v7  ;;  %1428 = vst.msk [vmem:[#allocation4 + $0x1c8] sm:$0xff] %vm1370_vm6, %v1293_v16 }
 0x1b3   :  { %1539 = vrot.lane.b32.xlu0 %v9858_v4, %s9031_s0  ;;  %1541 = vrot.lane.b32.xlu1 %v9866_v58, %s9031_s0 }
 0x1b5   :  { %v1295_v62 = vpop.permute.xlu0 %1294  ;;  %v1297_v55 = vpop.permute.xlu1 %1296 }
 0x1b6   :  { %1429 = vst.msk [vmem:[#allocation4 + $0x1d0] sm:$0xff] %vm1370_vm6, %v1295_v62  ;;  %1430 = vst.msk [vmem:[#allocation4 + $0x1d8] sm:$0xff] %vm1370_vm6, %v1297_v55 }
 0x1b7   :  { %1543 = vrot.lane.b32.xlu0 %v9870_v0, %s9031_s0  ;;  %1545 = vrot.lane.b32.xlu1 %v9874_v22, %s9031_s0 }
 0x1b9   :  { %v1299_v14 = vpop.permute.xlu0 %1298  ;;  %v1301_v40 = vpop.permute.xlu1 %1300 }
 0x1ba   :  { %1431 = vst.msk [vmem:[#allocation4 + $0x1e0] sm:$0xff] %vm1370_vm6, %v1299_v14  ;;  %1432 = vst.msk [vmem:[#allocation4 + $0x1e8] sm:$0xff] %vm1370_vm6, %v1301_v40 }
 0x1bb   :  { %1547 = vrot.lane.b32.xlu0 %v9878_v8, %s9031_s0  ;;  %1549 = vrot.lane.b32.xlu1 %v9887_v3, %s9031_s0 }
 0x1bd   :  { %v1303_v7 = vpop.permute.xlu0 %1302  ;;  %v1305_v16 = vpop.permute.xlu1 %1304 }
 0x1be   :  { %1433 = vst.msk [vmem:[#allocation4 + $0x1f0] sm:$0xff] %vm1370_vm6, %v1303_v7  ;;  %1434 = vst.msk [vmem:[#allocation4 + $0x1f8] sm:$0xff] %vm1370_vm6, %v1305_v16  ;;  %v10897_v7 = vld [vmem:[#allocation2 + $0x330] sm:$0xff]  ;;  %v10899_v16 = vld [vmem:[#allocation2 + $0x338] sm:$0xff]  ;;  %vm5178_vm6 = vcmask 261312  }
 0x1bf   :  { %1551 = vrot.lane.b32.xlu0 %v16172_v48, %s9031_s0  ;;  %1553 = vrot.lane.b32.xlu1 %v16173_v52, %s9031_s0  ;;  %v10985_v52 = vld [vmem:[#allocation2 + $0x190] sm:$0x3] }
 0x1c1   :  { %v1440_v62 = vpop.permute.xlu0 %1439  ;;  %v1442_v55 = vpop.permute.xlu1 %1441 }
 0x1c2   :  { %1632 = vst.msk [vmem:[#allocation4] sm:$0xff] %vm1631_vm7, %v1440_v62  ;;  %1633 = vst.msk [vmem:[#allocation4 + $0x8] sm:$0xff] %vm1631_vm7, %v1442_v55 }
 0x1c3   :  { %1555 = vrot.lane.b32.xlu0 %v9909_v24, %s9031_s0  ;;  %1557 = vrot.lane.b32.xlu1 %v9913_v5, %s9031_s0  ;;  %v16194_v5 = vld [vmem:[#allocation13_spill] sm:$0xff] }
 0x1c5   :  { %v1444_v14 = vpop.permute.xlu0 %1443  ;;  %v1446_v40 = vpop.permute.xlu1 %1445 }
 0x1c6   :  { %1634 = vst.msk [vmem:[#allocation4 + $0x10] sm:$0xff] %vm1631_vm7, %v1444_v14  ;;  %1635 = vst.msk [vmem:[#allocation4 + $0x18] sm:$0xff] %vm1631_vm7, %v1446_v40 }
 0x1c7   :  { %1559 = vrot.lane.b32.xlu0 %v9917_v34, %s9031_s0  ;;  %1561 = vrot.lane.b32.xlu1 %v9926_v32, %s9031_s0  ;;  %v16192_v32 = vld [vmem:[#allocation6_spill] sm:$0xff] }
 0x1c9   :  { %v1448_v62 = vpop.permute.xlu0 %1447  ;;  %v1450_v55 = vpop.permute.xlu1 %1449 }
 0x1ca   :  { %1636 = vst.msk [vmem:[#allocation4 + $0x20] sm:$0xff] %vm1631_vm7, %v1448_v62  ;;  %1637 = vst.msk [vmem:[#allocation4 + $0x28] sm:$0xff] %vm1631_vm7, %v1450_v55  ;;  %v16193_v62 = vld [vmem:[#allocation7_spill] sm:$0xff] }
 0x1cb   :  { %1563 = vrot.lane.b32.xlu0 %v10897_v7, %s9031_s0  ;;  %1565 = vrot.lane.b32.xlu1 %v10899_v16, %s9031_s0 }
 0x1cd   :  { %v1452_v14 = vpop.permute.xlu0 %1451  ;;  %v1454_v40 = vpop.permute.xlu1 %1453 }
 0x1ce   :  { %1638 = vst.msk [vmem:[#allocation4 + $0x30] sm:$0xff] %vm1631_vm7, %v1452_v14  ;;  %1639 = vst.msk [vmem:[#allocation4 + $0x38] sm:$0xff] %vm1631_vm7, %v1454_v40  ;;  %v16195_v14 = vld [vmem:[#allocation14_spill] sm:$0xff] }
 0x1cf   :  { %1708 = vrot.lane.b32.xlu0 %v16192_v32, %s9032_s18  ;;  %1710 = vrot.lane.b32.xlu1 %v16193_v62, %s9032_s18  ;;  %v16196_v32 = vld [vmem:[#allocation22_spill] sm:$0xff]  ;;  %v16197_v62 = vld [vmem:[#allocation23_spill] sm:$0xff] }
 0x1d1   :  { %v1456_v55 = vpop.permute.xlu0 %1455  ;;  %v1458_v34 = vpop.permute.xlu1 %1457 }
 0x1d2   :  { %1640 = vst.msk [vmem:[#allocation4 + $0x40] sm:$0xff] %vm1631_vm7, %v1456_v55  ;;  %1641 = vst.msk [vmem:[#allocation4 + $0x48] sm:$0xff] %vm1631_vm7, %v1458_v34 }
 0x1d3   :  { %1712 = vrot.lane.b32.xlu0 %v16194_v5, %s9032_s18  ;;  %1714 = vrot.lane.b32.xlu1 %v16195_v14, %s9032_s18  ;;  %v16198_v14 = vld [vmem:[#allocation27_spill] sm:$0xff]  ;;  %v16199_v5 = vld [vmem:[#allocation28_spill] sm:$0xff] }
 0x1d5   :  { %v1460_v40 = vpop.permute.xlu0 %1459  ;;  %v1462_v24 = vpop.permute.xlu1 %1461 }
 0x1d6   :  { %1642 = vst.msk [vmem:[#allocation4 + $0x50] sm:$0xff] %vm1631_vm7, %v1460_v40  ;;  %1643 = vst.msk [vmem:[#allocation4 + $0x58] sm:$0xff] %vm1631_vm7, %v1462_v24 }
 0x1d7   :  { %1716 = vrot.lane.b32.xlu0 %v16196_v32, %s9032_s18  ;;  %1718 = vrot.lane.b32.xlu1 %v16197_v62, %s9032_s18  ;;  %v16200_v62 = vld [vmem:[#allocation30_spill] sm:$0xff]  ;;  %v16201_v32 = vld [vmem:[#allocation31_spill] sm:$0xff] }
 0x1d9   :  { %v1464_v55 = vpop.permute.xlu0 %1463  ;;  %v1466_v34 = vpop.permute.xlu1 %1465 }
 0x1da   :  { %1644 = vst.msk [vmem:[#allocation4 + $0x60] sm:$0xff] %vm1631_vm7, %v1464_v55  ;;  %1645 = vst.msk [vmem:[#allocation4 + $0x68] sm:$0xff] %vm1631_vm7, %v1466_v34 }
 0x1db   :  { %1720 = vrot.lane.b32.xlu0 %v16198_v14, %s9032_s18  ;;  %1722 = vrot.lane.b32.xlu1 %v16199_v5, %s9032_s18  ;;  %v16202_v5 = vld [vmem:[#allocation39_spill] sm:$0xff]  ;;  %v16203_v14 = vld [vmem:[#allocation40_spill] sm:$0xff] }
 0x1dd   :  { %v1468_v40 = vpop.permute.xlu0 %1467  ;;  %v1470_v24 = vpop.permute.xlu1 %1469 }
 0x1de   :  { %1646 = vst.msk [vmem:[#allocation4 + $0x70] sm:$0xff] %vm1631_vm7, %v1468_v40  ;;  %1647 = vst.msk [vmem:[#allocation4 + $0x78] sm:$0xff] %vm1631_vm7, %v1470_v24 }
 0x1df   :  { %1724 = vrot.lane.b32.xlu0 %v16200_v62, %s9032_s18  ;;  %1726 = vrot.lane.b32.xlu1 %v16201_v32, %s9032_s18  ;;  %v16204_v32 = vld [vmem:[#allocation42_spill] sm:$0xff]  ;;  %v16205_v62 = vld [vmem:[#allocation43_spill] sm:$0xff] }
 0x1e1   :  { %v1472_v55 = vpop.permute.xlu0 %1471  ;;  %v1474_v34 = vpop.permute.xlu1 %1473 }
 0x1e2   :  { %1648 = vst.msk [vmem:[#allocation4 + $0x80] sm:$0xff] %vm1631_vm7, %v1472_v55  ;;  %1649 = vst.msk [vmem:[#allocation4 + $0x88] sm:$0xff] %vm1631_vm7, %v1474_v34 }
 0x1e3   :  { %1728 = vrot.lane.b32.xlu0 %v16202_v5, %s9032_s18  ;;  %1730 = vrot.lane.b32.xlu1 %v16203_v14, %s9032_s18  ;;  %v16206_v14 = vld [vmem:[#allocation46_spill] sm:$0xff]  ;;  %v16207_v5 = vld [vmem:[#allocation47_spill] sm:$0xff] }
 0x1e5   :  { %v1476_v40 = vpop.permute.xlu0 %1475  ;;  %v1478_v24 = vpop.permute.xlu1 %1477 }
 0x1e6   :  { %1650 = vst.msk [vmem:[#allocation4 + $0x90] sm:$0xff] %vm1631_vm7, %v1476_v40  ;;  %1651 = vst.msk [vmem:[#allocation4 + $0x98] sm:$0xff] %vm1631_vm7, %v1478_v24 }
 0x1e7   :  { %1732 = vrot.lane.b32.xlu0 %v16204_v32, %s9032_s18  ;;  %1734 = vrot.lane.b32.xlu1 %v16205_v62, %s9032_s18  ;;  %v16208_v62 = vld [vmem:[#allocation48_spill] sm:$0xff]  ;;  %v16209_v32 = vld [vmem:[#allocation49_spill] sm:$0xff] }
 0x1e9   :  { %v1480_v55 = vpop.permute.xlu0 %1479  ;;  %v1482_v34 = vpop.permute.xlu1 %1481 }
 0x1ea   :  { %1652 = vst.msk [vmem:[#allocation4 + $0xa0] sm:$0xff] %vm1631_vm7, %v1480_v55  ;;  %1653 = vst.msk [vmem:[#allocation4 + $0xa8] sm:$0xff] %vm1631_vm7, %v1482_v34 }
 0x1eb   :  { %1736 = vrot.lane.b32.xlu0 %v16206_v14, %s9032_s18  ;;  %1738 = vrot.lane.b32.xlu1 %v16207_v5, %s9032_s18  ;;  %v16210_v5 = vld [vmem:[#allocation51_spill] sm:$0xff]  ;;  %v16211_v14 = vld [vmem:[#allocation52_spill] sm:$0xff] }
 0x1ed   :  { %v1484_v40 = vpop.permute.xlu0 %1483  ;;  %v1486_v24 = vpop.permute.xlu1 %1485 }
 0x1ee   :  { %1654 = vst.msk [vmem:[#allocation4 + $0xb0] sm:$0xff] %vm1631_vm7, %v1484_v40  ;;  %1655 = vst.msk [vmem:[#allocation4 + $0xb8] sm:$0xff] %vm1631_vm7, %v1486_v24 }
 0x1ef   :  { %1740 = vrot.lane.b32.xlu0 %v16208_v62, %s9032_s18  ;;  %1742 = vrot.lane.b32.xlu1 %v16209_v32, %s9032_s18  ;;  %v16212_v32 = vld [vmem:[#allocation57_spill] sm:$0xff]  ;;  %v16213_v62 = vld [vmem:[#allocation58_spill] sm:$0xff] }
 0x1f1   :  { %v1488_v55 = vpop.permute.xlu0 %1487  ;;  %v1490_v34 = vpop.permute.xlu1 %1489 }
 0x1f2   :  { %1656 = vst.msk [vmem:[#allocation4 + $0xc0] sm:$0xff] %vm1631_vm7, %v1488_v55  ;;  %1657 = vst.msk [vmem:[#allocation4 + $0xc8] sm:$0xff] %vm1631_vm7, %v1490_v34 }
 0x1f3   :  { %1744 = vrot.lane.b32.xlu0 %v16210_v5, %s9032_s18  ;;  %1746 = vrot.lane.b32.xlu1 %v16211_v14, %s9032_s18  ;;  %v16214_v14 = vld [vmem:[#allocation66_spill] sm:$0xff]  ;;  %v16215_v5 = vld [vmem:[#allocation67_spill] sm:$0xff] }
 0x1f5   :  { %v1492_v40 = vpop.permute.xlu0 %1491  ;;  %v1494_v24 = vpop.permute.xlu1 %1493 }
 0x1f6   :  { %1658 = vst.msk [vmem:[#allocation4 + $0xd0] sm:$0xff] %vm1631_vm7, %v1492_v40  ;;  %1659 = vst.msk [vmem:[#allocation4 + $0xd8] sm:$0xff] %vm1631_vm7, %v1494_v24 }
 0x1f7   :  { %1748 = vrot.lane.b32.xlu0 %v16212_v32, %s9032_s18  ;;  %1750 = vrot.lane.b32.xlu1 %v16213_v62, %s9032_s18  ;;  %v16216_v62 = vld [vmem:[#allocation69_spill] sm:$0xff]  ;;  %v16217_v32 = vld [vmem:[#allocation70_spill] sm:$0xff] }
 0x1f9   :  { %v1496_v55 = vpop.permute.xlu0 %1495  ;;  %v1498_v34 = vpop.permute.xlu1 %1497 }
 0x1fa   :  { %1660 = vst.msk [vmem:[#allocation4 + $0xe0] sm:$0xff] %vm1631_vm7, %v1496_v55  ;;  %1661 = vst.msk [vmem:[#allocation4 + $0xe8] sm:$0xff] %vm1631_vm7, %v1498_v34 }
 0x1fb   :  { %1752 = vrot.lane.b32.xlu0 %v16214_v14, %s9032_s18  ;;  %1754 = vrot.lane.b32.xlu1 %v16215_v5, %s9032_s18  ;;  %v16218_v5 = vld [vmem:[#allocation72_spill] sm:$0xff] }
 0x1fd   :  { %v1500_v40 = vpop.permute.xlu0 %1499  ;;  %v1502_v24 = vpop.permute.xlu1 %1501 }
 0x1fe   :  { %1662 = vst.msk [vmem:[#allocation4 + $0xf0] sm:$0xff] %vm1631_vm7, %v1500_v40  ;;  %1663 = vst.msk [vmem:[#allocation4 + $0xf8] sm:$0xff] %vm1631_vm7, %v1502_v24  ;;  %v16219_v40 = vld [vmem:[#allocation73_spill] sm:$0xff]  ;;  %v1698_v24 = vrot.slane %v10797_v49, 1 }
 0x1ff   :  { %1756 = vrot.lane.b32.xlu0 %v16216_v62, %s9032_s18  ;;  %1758 = vrot.lane.b32.xlu1 %v16217_v32, %s9032_s18  ;;  %v1699_v62 = vrot.slane %v10799_v35, 1  ;;  %v1701_v32 = vrot.slane %v10985_v52, 1 }
 0x201   :  { %v1504_v55 = vpop.permute.xlu0 %1503  ;;  %v1506_v34 = vpop.permute.xlu1 %1505 }
 0x202   :  { %1664 = vst.msk [vmem:[#allocation4 + $0x100] sm:$0xff] %vm1631_vm7, %v1504_v55  ;;  %1665 = vst.msk [vmem:[#allocation4 + $0x108] sm:$0xff] %vm1631_vm7, %v1506_v34  ;;  %v16220_v55 = vld [vmem:[#allocation74_spill] sm:$0xff]  ;;  %v16221_v34 = vld [vmem:[#allocation75_spill] sm:$0xff] }
 0x203   :  { %1760 = vrot.lane.b32.xlu0 %v16218_v5, %s9032_s18  ;;  %1762 = vrot.lane.b32.xlu1 %v16219_v40, %s9032_s18  ;;  %v11003_v40 = vsel %vm599_vm3, %v1698_v24, %v1699_v62  ;;  %v11006_v5 = vsel %vm599_vm3, %v1699_v62, %v1701_v32  ;;  %v16224_v32 = vld [vmem:[#allocation76_spill] sm:$0xff]  ;;  %v16225_v62 = vld [vmem:[#allocation77_spill] sm:$0xff]  ;;  %v16226_v24 = vld [vmem:[#allocation78_spill] sm:$0xff] }
 0x204   :  { %16222 = vst [vmem:[#allocation11_spill] sm:$0xff] %v11003_v40  ;;  %16223 = vst [vmem:[#allocation12_spill] sm:$0xff] %v11006_v5 }
 0x205   :  { %v1508_v14 = vpop.permute.xlu0 %1507  ;;  %v1510_v48 = vpop.permute.xlu1 %1509 }
 0x206   :  { %1666 = vst.msk [vmem:[#allocation4 + $0x110] sm:$0xff] %vm1631_vm7, %v1508_v14  ;;  %1667 = vst.msk [vmem:[#allocation4 + $0x118] sm:$0xff] %vm1631_vm7, %v1510_v48 }
 0x207   :  { %1764 = vrot.lane.b32.xlu0 %v16220_v55, %s9032_s18  ;;  %1766 = vrot.lane.b32.xlu1 %v16221_v34, %s9032_s18 }
 0x209   :  { %v1512_v3 = vpop.permute.xlu0 %1511  ;;  %v1514_v8 = vpop.permute.xlu1 %1513 }
 0x20a   :  { %1668 = vst.msk [vmem:[#allocation4 + $0x120] sm:$0xff] %vm1631_vm7, %v1512_v3  ;;  %1669 = vst.msk [vmem:[#allocation4 + $0x128] sm:$0xff] %vm1631_vm7, %v1514_v8 }
 0x20b   :  { %1768 = vrot.lane.b32.xlu0 %v11003_v40, %s9032_s18  ;;  %1770 = vrot.lane.b32.xlu1 %v11006_v5, %s9032_s18  ;;  %v16227_v5 = vld [vmem:[#allocation79_spill] sm:$0xff]  ;;  %v11092_v40 = vld [vmem:[#allocation2 + $0x340] sm:$0x3] }
 0x20d   :  { %v1516_v48 = vpop.permute.xlu0 %1515  ;;  %v1518_v14 = vpop.permute.xlu1 %1517 }
 0x20e   :  { %1670 = vst.msk [vmem:[#allocation4 + $0x130] sm:$0xff] %vm1631_vm7, %v1516_v48  ;;  %1671 = vst.msk [vmem:[#allocation4 + $0x138] sm:$0xff] %vm1631_vm7, %v1518_v14 }
 0x20f   :  { %1772 = vrot.lane.b32.xlu0 %v16224_v32, %s9032_s18  ;;  %1774 = vrot.lane.b32.xlu1 %v16225_v62, %s9032_s18  ;;  %v16228_v32 = vld [vmem:[#allocation80_spill] sm:$0xff]  ;;  %v16229_v62 = vld [vmem:[#allocation81_spill] sm:$0xff] }
 0x211   :  { %v1520_v3 = vpop.permute.xlu0 %1519  ;;  %v1522_v8 = vpop.permute.xlu1 %1521 }
 0x212   :  { %1672 = vst.msk [vmem:[#allocation4 + $0x140] sm:$0xff] %vm1631_vm7, %v1520_v3  ;;  %1673 = vst.msk [vmem:[#allocation4 + $0x148] sm:$0xff] %vm1631_vm7, %v1522_v8 }
 0x213   :  { %1776 = vrot.lane.b32.xlu0 %v16226_v24, %s9032_s18  ;;  %1778 = vrot.lane.b32.xlu1 %v16227_v5, %s9032_s18  ;;  %v16230_v5 = vld [vmem:[#allocation83_spill] sm:$0xff]  ;;  %v16231_v24 = vld [vmem:[#allocation84_spill] sm:$0xff] }
 0x215   :  { %v1524_v48 = vpop.permute.xlu0 %1523  ;;  %v1526_v14 = vpop.permute.xlu1 %1525 }
 0x216   :  { %1674 = vst.msk [vmem:[#allocation4 + $0x150] sm:$0xff] %vm1631_vm7, %v1524_v48  ;;  %1675 = vst.msk [vmem:[#allocation4 + $0x158] sm:$0xff] %vm1631_vm7, %v1526_v14 }
 0x217   :  { %1780 = vrot.lane.b32.xlu0 %v16228_v32, %s9032_s18  ;;  %1782 = vrot.lane.b32.xlu1 %v16229_v62, %s9032_s18  ;;  %v16232_v62 = vld [vmem:[#allocation86_spill] sm:$0xff]  ;;  %v16233_v32 = vld [vmem:[#allocation87_spill] sm:$0xff] }
 0x219   :  { %v1528_v3 = vpop.permute.xlu0 %1527  ;;  %v1530_v8 = vpop.permute.xlu1 %1529 }
 0x21a   :  { %1676 = vst.msk [vmem:[#allocation4 + $0x160] sm:$0xff] %vm1631_vm7, %v1528_v3  ;;  %1677 = vst.msk [vmem:[#allocation4 + $0x168] sm:$0xff] %vm1631_vm7, %v1530_v8 }
 0x21b   :  { %1784 = vrot.lane.b32.xlu0 %v16230_v5, %s9032_s18  ;;  %1786 = vrot.lane.b32.xlu1 %v16231_v24, %s9032_s18  ;;  %v16234_v24 = vld [vmem:[#allocation89_spill] sm:$0xff]  ;;  %v16235_v5 = vld [vmem:[#allocation90_spill] sm:$0xff] }
 0x21d   :  { %v1532_v48 = vpop.permute.xlu0 %1531  ;;  %v1534_v14 = vpop.permute.xlu1 %1533 }
 0x21e   :  { %1678 = vst.msk [vmem:[#allocation4 + $0x170] sm:$0xff] %vm1631_vm7, %v1532_v48  ;;  %1679 = vst.msk [vmem:[#allocation4 + $0x178] sm:$0xff] %vm1631_vm7, %v1534_v14 }
 0x21f   :  { %1788 = vrot.lane.b32.xlu0 %v16232_v62, %s9032_s18  ;;  %1790 = vrot.lane.b32.xlu1 %v16233_v32, %s9032_s18  ;;  %v16236_v32 = vld [vmem:[#allocation92_spill] sm:$0xff]  ;;  %v16237_v62 = vld [vmem:[#allocation93_spill] sm:$0xff] }
 0x221   :  { %v1536_v3 = vpop.permute.xlu0 %1535  ;;  %v1538_v8 = vpop.permute.xlu1 %1537 }
 0x222   :  { %1680 = vst.msk [vmem:[#allocation4 + $0x180] sm:$0xff] %vm1631_vm7, %v1536_v3  ;;  %1681 = vst.msk [vmem:[#allocation4 + $0x188] sm:$0xff] %vm1631_vm7, %v1538_v8 }
 0x223   :  { %1792 = vrot.lane.b32.xlu0 %v16234_v24, %s9032_s18  ;;  %1794 = vrot.lane.b32.xlu1 %v16235_v5, %s9032_s18  ;;  %v16238_v5 = vld [vmem:[#allocation95_spill] sm:$0xff]  ;;  %v16239_v24 = vld [vmem:[#allocation96_spill] sm:$0xff] }
 0x225   :  { %v1540_v48 = vpop.permute.xlu0 %1539  ;;  %v1542_v14 = vpop.permute.xlu1 %1541 }
 0x226   :  { %1682 = vst.msk [vmem:[#allocation4 + $0x190] sm:$0xff] %vm1631_vm7, %v1540_v48  ;;  %1683 = vst.msk [vmem:[#allocation4 + $0x198] sm:$0xff] %vm1631_vm7, %v1542_v14 }
 0x227   :  { %1796 = vrot.lane.b32.xlu0 %v16236_v32, %s9032_s18  ;;  %1798 = vrot.lane.b32.xlu1 %v16237_v62, %s9032_s18  ;;  %v16240_v62 = vld [vmem:[#allocation98_spill] sm:$0xff]  ;;  %v16241_v32 = vld [vmem:[#allocation99_spill] sm:$0xff] }
 0x229   :  { %v1544_v3 = vpop.permute.xlu0 %1543  ;;  %v1546_v8 = vpop.permute.xlu1 %1545 }
 0x22a   :  { %1684 = vst.msk [vmem:[#allocation4 + $0x1a0] sm:$0xff] %vm1631_vm7, %v1544_v3  ;;  %1685 = vst.msk [vmem:[#allocation4 + $0x1a8] sm:$0xff] %vm1631_vm7, %v1546_v8 }
 0x22b   :  { %1800 = vrot.lane.b32.xlu0 %v16238_v5, %s9032_s18  ;;  %1802 = vrot.lane.b32.xlu1 %v16239_v24, %s9032_s18  ;;  %v16242_v24 = vld [vmem:[#allocation101_spill] sm:$0xff]  ;;  %v16243_v5 = vld [vmem:[#allocation102_spill] sm:$0xff] }
 0x22d   :  { %v1548_v48 = vpop.permute.xlu0 %1547  ;;  %v1550_v14 = vpop.permute.xlu1 %1549 }
 0x22e   :  { %1686 = vst.msk [vmem:[#allocation4 + $0x1b0] sm:$0xff] %vm1631_vm7, %v1548_v48  ;;  %1687 = vst.msk [vmem:[#allocation4 + $0x1b8] sm:$0xff] %vm1631_vm7, %v1550_v14 }
 0x22f   :  { %1804 = vrot.lane.b32.xlu0 %v16240_v62, %s9032_s18  ;;  %1806 = vrot.lane.b32.xlu1 %v16241_v32, %s9032_s18  ;;  %v16244_v32 = vld [vmem:[#allocation104_spill] sm:$0xff]  ;;  %v16245_v62 = vld [vmem:[#allocation105_spill] sm:$0xff] }
 0x231   :  { %v1552_v3 = vpop.permute.xlu0 %1551  ;;  %v1554_v8 = vpop.permute.xlu1 %1553 }
 0x232   :  { %1688 = vst.msk [vmem:[#allocation4 + $0x1c0] sm:$0xff] %vm1631_vm7, %v1552_v3  ;;  %1689 = vst.msk [vmem:[#allocation4 + $0x1c8] sm:$0xff] %vm1631_vm7, %v1554_v8 }
 0x233   :  { %1808 = vrot.lane.b32.xlu0 %v16242_v24, %s9032_s18  ;;  %1810 = vrot.lane.b32.xlu1 %v16243_v5, %s9032_s18  ;;  %v16246_v5 = vld [vmem:[#allocation107_spill] sm:$0xff]  ;;  %v16247_v24 = vld [vmem:[#allocation108_spill] sm:$0xff] }
 0x235   :  { %v1556_v48 = vpop.permute.xlu0 %1555  ;;  %v1558_v14 = vpop.permute.xlu1 %1557 }
 0x236   :  { %1690 = vst.msk [vmem:[#allocation4 + $0x1d0] sm:$0xff] %vm1631_vm7, %v1556_v48  ;;  %1691 = vst.msk [vmem:[#allocation4 + $0x1d8] sm:$0xff] %vm1631_vm7, %v1558_v14 }
 0x237   :  { %1812 = vrot.lane.b32.xlu0 %v16244_v32, %s9032_s18  ;;  %1814 = vrot.lane.b32.xlu1 %v16245_v62, %s9032_s18  ;;  %v16248_v62 = vld [vmem:[#allocation109_spill] sm:$0xff]  ;;  %v16249_v32 = vld [vmem:[#allocation110_spill] sm:$0xff] }
 0x239   :  { %v1560_v3 = vpop.permute.xlu0 %1559  ;;  %v1562_v8 = vpop.permute.xlu1 %1561 }
 0x23a   :  { %1692 = vst.msk [vmem:[#allocation4 + $0x1e0] sm:$0xff] %vm1631_vm7, %v1560_v3  ;;  %1693 = vst.msk [vmem:[#allocation4 + $0x1e8] sm:$0xff] %vm1631_vm7, %v1562_v8 }
 0x23b   :  { %1816 = vrot.lane.b32.xlu0 %v16246_v5, %s9032_s18  ;;  %1818 = vrot.lane.b32.xlu1 %v16247_v24, %s9032_s18  ;;  %v16250_v24 = vld [vmem:[#allocation111_spill] sm:$0xff] }
 0x23d   :  { %v1564_v48 = vpop.permute.xlu0 %1563  ;;  %v1566_v14 = vpop.permute.xlu1 %1565 }
 0x23e   :  { %1694 = vst.msk [vmem:[#allocation4 + $0x1f0] sm:$0xff] %vm1631_vm7, %v1564_v48  ;;  %1695 = vst.msk [vmem:[#allocation4 + $0x1f8] sm:$0xff] %vm1631_vm7, %v1566_v14  ;;  %v16251_v48 = vld [vmem:[#allocation112_spill] sm:$0xff]  ;;  %v1703_v14 = vrot.slane %v10897_v7, 1  ;;  %vm5447_vm7 = vcmask 326912  }
 0x23f   :  { %1820 = vrot.lane.b32.xlu0 %v16248_v62, %s9032_s18  ;;  %1822 = vrot.lane.b32.xlu1 %v16249_v32, %s9032_s18  ;;  %v1704_v62 = vrot.slane %v10899_v16, 1  ;;  %v1706_v32 = vrot.slane %v11092_v40, 1 }
 0x241   :  { %v1709_v3 = vpop.permute.xlu0 %1708  ;;  %v1711_v8 = vpop.permute.xlu1 %1710 }
 0x242   :  { %1901 = vst.msk [vmem:[#allocation4] sm:$0xff] %vm1900_vm8, %v1709_v3  ;;  %1902 = vst.msk [vmem:[#allocation4 + $0x8] sm:$0xff] %vm1900_vm8, %v1711_v8  ;;  %v16252_v3 = vld [vmem:[#allocation113_spill] sm:$0xff]  ;;  %v16253_v8 = vld [vmem:[#allocation114_spill] sm:$0xff] }
 0x243   :  { %1824 = vrot.lane.b32.xlu0 %v16250_v24, %s9032_s18  ;;  %1826 = vrot.lane.b32.xlu1 %v16251_v48, %s9032_s18  ;;  %v11110_v48 = vsel %vm599_vm3, %v1703_v14, %v1704_v62  ;;  %v11113_v24 = vsel %vm599_vm3, %v1704_v62, %v1706_v32  ;;  %v16255_v32 = vld [vmem:[#allocation115_spill] sm:$0xff]  ;;  %v16257_v14 = vld [vmem:[#allocation117_spill] sm:$0xff] }
 0x244   :  { %16254 = vst [vmem:[#allocation25_spill] sm:$0xff] %v11113_v24 }
 0x245   :  { %v1713_v5 = vpop.permute.xlu0 %1712  ;;  %v1715_v34 = vpop.permute.xlu1 %1714 }
 0x246   :  { %1903 = vst.msk [vmem:[#allocation4 + $0x10] sm:$0xff] %vm1900_vm8, %v1713_v5  ;;  %1904 = vst.msk [vmem:[#allocation4 + $0x18] sm:$0xff] %vm1900_vm8, %v1715_v34 }
 0x247   :  { %1828 = vrot.lane.b32.xlu0 %v16252_v3, %s9032_s18  ;;  %1830 = vrot.lane.b32.xlu1 %v16253_v8, %s9032_s18 }
 0x249   :  { %v1717_v55 = vpop.permute.xlu0 %1716  ;;  %v1719_v22 = vpop.permute.xlu1 %1718 }
 0x24a   :  { %1905 = vst.msk [vmem:[#allocation4 + $0x20] sm:$0xff] %vm1900_vm8, %v1717_v55  ;;  %1906 = vst.msk [vmem:[#allocation4 + $0x28] sm:$0xff] %vm1900_vm8, %v1719_v22  ;;  %v16256_v55 = vld [vmem:[#allocation116_spill] sm:$0xff] }
 0x24b   :  { %1832 = vrot.lane.b32.xlu0 %v11110_v48, %s9032_s18  ;;  %1834 = vrot.lane.b32.xlu1 %v11113_v24, %s9032_s18 }
 0x24d   :  { %v1721_v5 = vpop.permute.xlu0 %1720  ;;  %v1723_v34 = vpop.permute.xlu1 %1722 }
 0x24e   :  { %1907 = vst.msk [vmem:[#allocation4 + $0x30] sm:$0xff] %vm1900_vm8, %v1721_v5  ;;  %1908 = vst.msk [vmem:[#allocation4 + $0x38] sm:$0xff] %vm1900_vm8, %v1723_v34  ;;  %v16258_v5 = vld [vmem:[#allocation118_spill] sm:$0xff] }
 0x24f   :  { %1975 = vrot.lane.b32.xlu0 %v16255_v32, %s9033_s19  ;;  %1977 = vrot.lane.b32.xlu1 %v16256_v55, %s9033_s19  ;;  %v16259_v32 = vld [vmem:[#allocation119_spill] sm:$0xff]  ;;  %v16260_v55 = vld [vmem:[#allocation120_spill] sm:$0xff] }
 0x251   :  { %v1725_v22 = vpop.permute.xlu0 %1724  ;;  %v1727_v62 = vpop.permute.xlu1 %1726 }
 0x252   :  { %1909 = vst.msk [vmem:[#allocation4 + $0x40] sm:$0xff] %vm1900_vm8, %v1725_v22  ;;  %1910 = vst.msk [vmem:[#allocation4 + $0x48] sm:$0xff] %vm1900_vm8, %v1727_v62 }
 0x253   :  { %1979 = vrot.lane.b32.xlu0 %v16257_v14, %s9033_s19  ;;  %1981 = vrot.lane.b32.xlu1 %v16258_v5, %s9033_s19  ;;  %v16261_v5 = vld [vmem:[#allocation121_spill] sm:$0xff]  ;;  %v16262_v14 = vld [vmem:[#allocation122_spill] sm:$0xff] }
 0x255   :  { %v1729_v34 = vpop.permute.xlu0 %1728  ;;  %v1731_v24 = vpop.permute.xlu1 %1730 }
 0x256   :  { %1911 = vst.msk [vmem:[#allocation4 + $0x50] sm:$0xff] %vm1900_vm8, %v1729_v34  ;;  %1912 = vst.msk [vmem:[#allocation4 + $0x58] sm:$0xff] %vm1900_vm8, %v1731_v24 }
 0x257   :  { %1983 = vrot.lane.b32.xlu0 %v16259_v32, %s9033_s19  ;;  %1985 = vrot.lane.b32.xlu1 %v16260_v55, %s9033_s19  ;;  %v16263_v55 = vld [vmem:[#allocation24_spill] sm:$0xff] }
 0x258   :  { %v16264_v32 = vld [vmem:[#allocation8_spill] sm:$0xff] }
 0x259   :  { %v1733_v22 = vpop.permute.xlu0 %1732  ;;  %v1735_v62 = vpop.permute.xlu1 %1734 }
 0x25a   :  { %1913 = vst.msk [vmem:[#allocation4 + $0x60] sm:$0xff] %vm1900_vm8, %v1733_v22  ;;  %1914 = vst.msk [vmem:[#allocation4 + $0x68] sm:$0xff] %vm1900_vm8, %v1735_v62 }
 0x25b   :  { %1987 = vrot.lane.b32.xlu0 %v16261_v5, %s9033_s19  ;;  %1989 = vrot.lane.b32.xlu1 %v16262_v14, %s9033_s19  ;;  %v16265_v14 = vld [vmem:[#allocation9_spill] sm:$0xff]  ;;  %v16266_v5 = vld [vmem:[#allocation26_spill] sm:$0xff] }
 0x25d   :  { %v1737_v34 = vpop.permute.xlu0 %1736  ;;  %v1739_v24 = vpop.permute.xlu1 %1738 }
 0x25e   :  { %1915 = vst.msk [vmem:[#allocation4 + $0x70] sm:$0xff] %vm1900_vm8, %v1737_v34  ;;  %1916 = vst.msk [vmem:[#allocation4 + $0x78] sm:$0xff] %vm1900_vm8, %v1739_v24 }
 0x25f   :  { %1991 = vrot.lane.b32.xlu0 %v16263_v55, %s9033_s19  ;;  %1993 = vrot.lane.b32.xlu1 %v16264_v32, %s9033_s19  ;;  %v16267_v32 = vld [vmem:[#allocation10_spill] sm:$0xff]  ;;  %v16268_v55 = vld [vmem:[#allocation33_spill] sm:$0xff] }
 0x261   :  { %v1741_v22 = vpop.permute.xlu0 %1740  ;;  %v1743_v62 = vpop.permute.xlu1 %1742 }
 0x262   :  { %1917 = vst.msk [vmem:[#allocation4 + $0x80] sm:$0xff] %vm1900_vm8, %v1741_v22  ;;  %1918 = vst.msk [vmem:[#allocation4 + $0x88] sm:$0xff] %vm1900_vm8, %v1743_v62 }
 0x263   :  { %1995 = vrot.lane.b32.xlu0 %v16265_v14, %s9033_s19  ;;  %1997 = vrot.lane.b32.xlu1 %v16266_v5, %s9033_s19  ;;  %v16269_v5 = vld [vmem:[#allocation41_spill] sm:$0xff]  ;;  %v16270_v14 = vld [vmem:[#allocation123_spill] sm:$0xff] }
 0x265   :  { %v1745_v34 = vpop.permute.xlu0 %1744  ;;  %v1747_v24 = vpop.permute.xlu1 %1746 }
 0x266   :  { %1919 = vst.msk [vmem:[#allocation4 + $0x90] sm:$0xff] %vm1900_vm8, %v1745_v34  ;;  %1920 = vst.msk [vmem:[#allocation4 + $0x98] sm:$0xff] %vm1900_vm8, %v1747_v24 }
 0x267   :  { %1999 = vrot.lane.b32.xlu0 %v16267_v32, %s9033_s19  ;;  %2001 = vrot.lane.b32.xlu1 %v16268_v55, %s9033_s19  ;;  %v16271_v55 = vld [vmem:[#allocation44_spill] sm:$0xff] }
 0x268   :  { %v16272_v32 = vld [vmem:[#allocation124_spill] sm:$0xff] }
 0x269   :  { %v1749_v22 = vpop.permute.xlu0 %1748  ;;  %v1751_v62 = vpop.permute.xlu1 %1750 }
 0x26a   :  { %1921 = vst.msk [vmem:[#allocation4 + $0xa0] sm:$0xff] %vm1900_vm8, %v1749_v22  ;;  %1922 = vst.msk [vmem:[#allocation4 + $0xa8] sm:$0xff] %vm1900_vm8, %v1751_v62 }
 0x26b   :  { %2003 = vrot.lane.b32.xlu0 %v16269_v5, %s9033_s19  ;;  %2005 = vrot.lane.b32.xlu1 %v16270_v14, %s9033_s19  ;;  %v16273_v14 = vld [vmem:[#allocation45_spill] sm:$0xff] }
 0x26c   :  { %v16274_v5 = vld [vmem:[#allocation125_spill] sm:$0xff] }
 0x26d   :  { %v1753_v34 = vpop.permute.xlu0 %1752  ;;  %v1755_v24 = vpop.permute.xlu1 %1754 }
 0x26e   :  { %1923 = vst.msk [vmem:[#allocation4 + $0xb0] sm:$0xff] %vm1900_vm8, %v1753_v34  ;;  %1924 = vst.msk [vmem:[#allocation4 + $0xb8] sm:$0xff] %vm1900_vm8, %v1755_v24 }
 0x26f   :  { %2007 = vrot.lane.b32.xlu0 %v16271_v55, %s9033_s19  ;;  %2009 = vrot.lane.b32.xlu1 %v16272_v32, %s9033_s19  ;;  %v16275_v32 = vld [vmem:[#allocation50_spill] sm:$0xff] }
 0x270   :  { %v16276_v55 = vld [vmem:[#allocation126_spill] sm:$0xff] }
 0x271   :  { %v1757_v22 = vpop.permute.xlu0 %1756  ;;  %v1759_v62 = vpop.permute.xlu1 %1758 }
 0x272   :  { %1925 = vst.msk [vmem:[#allocation4 + $0xc0] sm:$0xff] %vm1900_vm8, %v1757_v22  ;;  %1926 = vst.msk [vmem:[#allocation4 + $0xc8] sm:$0xff] %vm1900_vm8, %v1759_v62 }
 0x273   :  { %2011 = vrot.lane.b32.xlu0 %v16273_v14, %s9033_s19  ;;  %2013 = vrot.lane.b32.xlu1 %v16274_v5, %s9033_s19  ;;  %v16277_v5 = vld [vmem:[#allocation53_spill] sm:$0xff]  ;;  %v16278_v14 = vld [vmem:[#allocation127_spill] sm:$0xff] }
 0x275   :  { %v1761_v34 = vpop.permute.xlu0 %1760  ;;  %v1763_v24 = vpop.permute.xlu1 %1762 }
 0x276   :  { %1927 = vst.msk [vmem:[#allocation4 + $0xd0] sm:$0xff] %vm1900_vm8, %v1761_v34  ;;  %1928 = vst.msk [vmem:[#allocation4 + $0xd8] sm:$0xff] %vm1900_vm8, %v1763_v24 }
 0x277   :  { %2015 = vrot.lane.b32.xlu0 %v16275_v32, %s9033_s19  ;;  %2017 = vrot.lane.b32.xlu1 %v16276_v55, %s9033_s19  ;;  %v16279_v55 = vld [vmem:[#allocation60_spill] sm:$0xff] }
 0x278   :  { %v16280_v32 = vld [vmem:[#allocation128_spill] sm:$0xff] }
 0x279   :  { %v1765_v22 = vpop.permute.xlu0 %1764  ;;  %v1767_v62 = vpop.permute.xlu1 %1766 }
 0x27a   :  { %1929 = vst.msk [vmem:[#allocation4 + $0xe0] sm:$0xff] %vm1900_vm8, %v1765_v22  ;;  %1930 = vst.msk [vmem:[#allocation4 + $0xe8] sm:$0xff] %vm1900_vm8, %v1767_v62 }
 0x27b   :  { %2019 = vrot.lane.b32.xlu0 %v16277_v5, %s9033_s19  ;;  %2021 = vrot.lane.b32.xlu1 %v16278_v14, %s9033_s19 }
 0x27d   :  { %v1769_v34 = vpop.permute.xlu0 %1768  ;;  %v1771_v24 = vpop.permute.xlu1 %1770 }
 0x27e   :  { %1931 = vst.msk [vmem:[#allocation4 + $0xf0] sm:$0xff] %vm1900_vm8, %v1769_v34  ;;  %1932 = vst.msk [vmem:[#allocation4 + $0xf8] sm:$0xff] %vm1900_vm8, %v1771_v24  ;;  %v1965_v34 = vrot.slane %v10797_v49, 2  ;;  %v1966_v24 = vrot.slane %v10799_v35, 2 }
 0x27f   :  { %2023 = vrot.lane.b32.xlu0 %v16279_v55, %s9033_s19  ;;  %2025 = vrot.lane.b32.xlu1 %v16280_v32, %s9033_s19  ;;  %v1968_v55 = vrot.slane %v10985_v52, 2 }
 0x281   :  { %v1773_v22 = vpop.permute.xlu0 %1772  ;;  %v1775_v62 = vpop.permute.xlu1 %1774  ;;  %v11218_v49 = vsel %vm1017_vm4, %v1966_v24, %v1968_v55  ;;  %v16281_v55 = vld [vmem:[#allocation68_spill] sm:$0xff] }
 0x282   :  { %1933 = vst.msk [vmem:[#allocation4 + $0x100] sm:$0xff] %vm1900_vm8, %v1773_v22  ;;  %1934 = vst.msk [vmem:[#allocation4 + $0x108] sm:$0xff] %vm1900_vm8, %v1775_v62  ;;  %v11215_v22 = vsel %vm1017_vm4, %v1965_v34, %v1966_v24  ;;  %v16282_v62 = vld [vmem:[#allocation38_spill] sm:$0xff] }
 0x283   :  { %2027 = vrot.lane.b32.xlu0 %v10442_v26, %s9033_s19  ;;  %2029 = vrot.lane.b32.xlu1 %v10445_v29, %s9033_s19 }
 0x285   :  { %v1777_v14 = vpop.permute.xlu0 %1776  ;;  %v1779_v32 = vpop.permute.xlu1 %1778 }
 0x286   :  { %1935 = vst.msk [vmem:[#allocation4 + $0x110] sm:$0xff] %vm1900_vm8, %v1777_v14  ;;  %1936 = vst.msk [vmem:[#allocation4 + $0x118] sm:$0xff] %vm1900_vm8, %v1779_v32 }
 0x287   :  { %2031 = vrot.lane.b32.xlu0 %v10457_v44, %s9033_s19  ;;  %2033 = vrot.lane.b32.xlu1 %v10460_v38, %s9033_s19 }
 0x289   :  { %v1781_v35 = vpop.permute.xlu0 %1780  ;;  %v1783_v52 = vpop.permute.xlu1 %1782 }
 0x28a   :  { %1937 = vst.msk [vmem:[#allocation4 + $0x120] sm:$0xff] %vm1900_vm8, %v1781_v35  ;;  %1938 = vst.msk [vmem:[#allocation4 + $0x128] sm:$0xff] %vm1900_vm8, %v1783_v52  ;;  %v16283_v35 = vld [vmem:[#allocation71_spill] sm:$0xff]  ;;  %v16284_v52 = vld [vmem:[#allocation129_spill] sm:$0xff] }
 0x28b   :  { %2035 = vrot.lane.b32.xlu0 %v11215_v22, %s9033_s19  ;;  %2037 = vrot.lane.b32.xlu1 %v11218_v49, %s9033_s19 }
 0x28d   :  { %v1785_v14 = vpop.permute.xlu0 %1784  ;;  %v1787_v32 = vpop.permute.xlu1 %1786 }
 0x28e   :  { %1939 = vst.msk [vmem:[#allocation4 + $0x130] sm:$0xff] %vm1900_vm8, %v1785_v14  ;;  %1940 = vst.msk [vmem:[#allocation4 + $0x138] sm:$0xff] %vm1900_vm8, %v1787_v32 }
 0x28f   :  { %2039 = vrot.lane.b32.xlu0 %v16281_v55, %s9033_s19  ;;  %2041 = vrot.lane.b32.xlu1 %v16282_v62, %s9033_s19  ;;  %v16285_v55 = vld [vmem:[#allocation130_spill] sm:$0xff]  ;;  %v16286_v62 = vld [vmem:[#allocation131_spill] sm:$0xff] }
 0x291   :  { %v1789_v34 = vpop.permute.xlu0 %1788  ;;  %v1791_v24 = vpop.permute.xlu1 %1790 }
 0x292   :  { %1941 = vst.msk [vmem:[#allocation4 + $0x140] sm:$0xff] %vm1900_vm8, %v1789_v34  ;;  %1942 = vst.msk [vmem:[#allocation4 + $0x148] sm:$0xff] %vm1900_vm8, %v1791_v24 }
 0x293   :  { %2043 = vrot.lane.b32.xlu0 %v16283_v35, %s9033_s19  ;;  %2045 = vrot.lane.b32.xlu1 %v16284_v52, %s9033_s19  ;;  %v16287_v52 = vld [vmem:[#allocation132_spill] sm:$0xff]  ;;  %v16288_v35 = vld [vmem:[#allocation133_spill] sm:$0xff] }
 0x295   :  { %v1793_v14 = vpop.permute.xlu0 %1792  ;;  %v1795_v32 = vpop.permute.xlu1 %1794 }
 0x296   :  { %1943 = vst.msk [vmem:[#allocation4 + $0x150] sm:$0xff] %vm1900_vm8, %v1793_v14  ;;  %1944 = vst.msk [vmem:[#allocation4 + $0x158] sm:$0xff] %vm1900_vm8, %v1795_v32 }
 0x297   :  { %2047 = vrot.lane.b32.xlu0 %v16285_v55, %s9033_s19  ;;  %2049 = vrot.lane.b32.xlu1 %v16286_v62, %s9033_s19  ;;  %v16289_v62 = vld [vmem:[#allocation82_spill] sm:$0xff] }
 0x298   :  { %v16290_v55 = vld [vmem:[#allocation134_spill] sm:$0xff] }
 0x299   :  { %v1797_v34 = vpop.permute.xlu0 %1796  ;;  %v1799_v24 = vpop.permute.xlu1 %1798 }
 0x29a   :  { %1945 = vst.msk [vmem:[#allocation4 + $0x160] sm:$0xff] %vm1900_vm8, %v1797_v34  ;;  %1946 = vst.msk [vmem:[#allocation4 + $0x168] sm:$0xff] %vm1900_vm8, %v1799_v24 }
 0x29b   :  { %2051 = vrot.lane.b32.xlu0 %v16287_v52, %s9033_s19  ;;  %2053 = vrot.lane.b32.xlu1 %v16288_v35, %s9033_s19  ;;  %v16291_v35 = vld [vmem:[#allocation85_spill] sm:$0xff]  ;;  %v16292_v52 = vld [vmem:[#allocation135_spill] sm:$0xff] }
 0x29d   :  { %v1801_v14 = vpop.permute.xlu0 %1800  ;;  %v1803_v32 = vpop.permute.xlu1 %1802 }
 0x29e   :  { %1947 = vst.msk [vmem:[#allocation4 + $0x170] sm:$0xff] %vm1900_vm8, %v1801_v14  ;;  %1948 = vst.msk [vmem:[#allocation4 + $0x178] sm:$0xff] %vm1900_vm8, %v1803_v32 }
 0x29f   :  { %2055 = vrot.lane.b32.xlu0 %v16289_v62, %s9033_s19  ;;  %2057 = vrot.lane.b32.xlu1 %v16290_v55, %s9033_s19  ;;  %v16293_v55 = vld [vmem:[#allocation88_spill] sm:$0xff] }
 0x2a0   :  { %v16294_v62 = vld [vmem:[#allocation136_spill] sm:$0xff] }
 0x2a1   :  { %v1805_v34 = vpop.permute.xlu0 %1804  ;;  %v1807_v24 = vpop.permute.xlu1 %1806 }
 0x2a2   :  { %1949 = vst.msk [vmem:[#allocation4 + $0x180] sm:$0xff] %vm1900_vm8, %v1805_v34  ;;  %1950 = vst.msk [vmem:[#allocation4 + $0x188] sm:$0xff] %vm1900_vm8, %v1807_v24 }
 0x2a3   :  { %2059 = vrot.lane.b32.xlu0 %v16291_v35, %s9033_s19  ;;  %2061 = vrot.lane.b32.xlu1 %v16292_v52, %s9033_s19  ;;  %v16295_v52 = vld [vmem:[#allocation91_spill] sm:$0xff]  ;;  %v16296_v35 = vld [vmem:[#allocation137_spill] sm:$0xff] }
 0x2a5   :  { %v1809_v14 = vpop.permute.xlu0 %1808  ;;  %v1811_v32 = vpop.permute.xlu1 %1810 }
 0x2a6   :  { %1951 = vst.msk [vmem:[#allocation4 + $0x190] sm:$0xff] %vm1900_vm8, %v1809_v14  ;;  %1952 = vst.msk [vmem:[#allocation4 + $0x198] sm:$0xff] %vm1900_vm8, %v1811_v32 }
 0x2a7   :  { %2063 = vrot.lane.b32.xlu0 %v16293_v55, %s9033_s19  ;;  %2065 = vrot.lane.b32.xlu1 %v16294_v62, %s9033_s19  ;;  %v16297_v62 = vld [vmem:[#allocation94_spill] sm:$0xff] }
 0x2a8   :  { %v16298_v55 = vld [vmem:[#allocation138_spill] sm:$0xff] }
 0x2a9   :  { %v1813_v34 = vpop.permute.xlu0 %1812  ;;  %v1815_v24 = vpop.permute.xlu1 %1814 }
 0x2aa   :  { %1953 = vst.msk [vmem:[#allocation4 + $0x1a0] sm:$0xff] %vm1900_vm8, %v1813_v34  ;;  %1954 = vst.msk [vmem:[#allocation4 + $0x1a8] sm:$0xff] %vm1900_vm8, %v1815_v24 }
 0x2ab   :  { %2067 = vrot.lane.b32.xlu0 %v16295_v52, %s9033_s19  ;;  %2069 = vrot.lane.b32.xlu1 %v16296_v35, %s9033_s19  ;;  %v16299_v35 = vld [vmem:[#allocation97_spill] sm:$0xff]  ;;  %v16300_v52 = vld [vmem:[#allocation139_spill] sm:$0xff] }
 0x2ad   :  { %v1817_v14 = vpop.permute.xlu0 %1816  ;;  %v1819_v32 = vpop.permute.xlu1 %1818 }
 0x2ae   :  { %1955 = vst.msk [vmem:[#allocation4 + $0x1b0] sm:$0xff] %vm1900_vm8, %v1817_v14  ;;  %1956 = vst.msk [vmem:[#allocation4 + $0x1b8] sm:$0xff] %vm1900_vm8, %v1819_v32 }
 0x2af   :  { %2071 = vrot.lane.b32.xlu0 %v16297_v62, %s9033_s19  ;;  %2073 = vrot.lane.b32.xlu1 %v16298_v55, %s9033_s19  ;;  %v16301_v55 = vld [vmem:[#allocation100_spill] sm:$0xff] }
 0x2b1   :  { %v1821_v34 = vpop.permute.xlu0 %1820  ;;  %v1823_v24 = vpop.permute.xlu1 %1822 }
 0x2b2   :  { %1957 = vst.msk [vmem:[#allocation4 + $0x1c0] sm:$0xff] %vm1900_vm8, %v1821_v34  ;;  %1958 = vst.msk [vmem:[#allocation4 + $0x1c8] sm:$0xff] %vm1900_vm8, %v1823_v24 }
 0x2b3   :  { %2075 = vrot.lane.b32.xlu0 %v16299_v35, %s9033_s19  ;;  %2077 = vrot.lane.b32.xlu1 %v16300_v52, %s9033_s19  ;;  %v16302_v52 = vld [vmem:[#allocation103_spill] sm:$0xff] }
 0x2b5   :  { %v1825_v14 = vpop.permute.xlu0 %1824  ;;  %v1827_v32 = vpop.permute.xlu1 %1826 }
 0x2b6   :  { %1959 = vst.msk [vmem:[#allocation4 + $0x1d0] sm:$0xff] %vm1900_vm8, %v1825_v14  ;;  %1960 = vst.msk [vmem:[#allocation4 + $0x1d8] sm:$0xff] %vm1900_vm8, %v1827_v32 }
 0x2b7   :  { %2079 = vrot.lane.b32.xlu0 %v10630_v53, %s9033_s19  ;;  %2081 = vrot.lane.b32.xlu1 %v16301_v55, %s9033_s19  ;;  %v16303_v55 = vld [vmem:[#allocation140_spill] sm:$0xff] }
 0x2b9   :  { %v1829_v34 = vpop.permute.xlu0 %1828  ;;  %v1831_v24 = vpop.permute.xlu1 %1830 }
 0x2ba   :  { %1961 = vst.msk [vmem:[#allocation4 + $0x1e0] sm:$0xff] %vm1900_vm8, %v1829_v34  ;;  %1962 = vst.msk [vmem:[#allocation4 + $0x1e8] sm:$0xff] %vm1900_vm8, %v1831_v24 }
 0x2bb   :  { %2083 = vrot.lane.b32.xlu0 %v10643_v60, %s9033_s19  ;;  %2085 = vrot.lane.b32.xlu1 %v16302_v52, %s9033_s19 }
 0x2bd   :  { %v1833_v14 = vpop.permute.xlu0 %1832  ;;  %v1835_v32 = vpop.permute.xlu1 %1834 }
 0x2be   :  { %1963 = vst.msk [vmem:[#allocation4 + $0x1f0] sm:$0xff] %vm1900_vm8, %v1833_v14  ;;  %1964 = vst.msk [vmem:[#allocation4 + $0x1f8] sm:$0xff] %vm1900_vm8, %v1835_v32  ;;  %v1970_v14 = vrot.slane %v10897_v7, 2  ;;  %v1971_v32 = vrot.slane %v10899_v16, 2  ;;  %vm5714_vm8 = vcmask 392512  }
 0x2bf   :  { %2087 = vrot.lane.b32.xlu0 %v10660_v54, %s9033_s19  ;;  %2089 = vrot.lane.b32.xlu1 %v16303_v55, %s9033_s19  ;;  %v1973_v54 = vrot.slane %v11092_v40, 2 }
 0x2c1   :  { %v1976_v34 = vpop.permute.xlu0 %1975  ;;  %v1978_v24 = vpop.permute.xlu1 %1977  ;;  %v11323_v7 = vsel %vm1017_vm4, %v1971_v32, %v1973_v54 }
 0x2c2   :  { %2168 = vst.msk [vmem:[#allocation4] sm:$0xff] %vm2167_vm9, %v1976_v34  ;;  %2169 = vst.msk [vmem:[#allocation4 + $0x8] sm:$0xff] %vm2167_vm9, %v1978_v24  ;;  %v11320_v34 = vsel %vm1017_vm4, %v1970_v14, %v1971_v32 }
 0x2c3   :  { %2091 = vrot.lane.b32.xlu0 %v10676_v63, %s9033_s19  ;;  %2093 = vrot.lane.b32.xlu1 %v10683_v2, %s9033_s19 }
 0x2c5   :  { %v1980_v55 = vpop.permute.xlu0 %1979  ;;  %v1982_v52 = vpop.permute.xlu1 %1981 }
 0x2c6   :  { %2170 = vst.msk [vmem:[#allocation4 + $0x10] sm:$0xff] %vm2167_vm9, %v1980_v55  ;;  %2171 = vst.msk [vmem:[#allocation4 + $0x18] sm:$0xff] %vm2167_vm9, %v1982_v52 }
 0x2c7   :  { %2095 = vrot.lane.b32.xlu0 %v10696_v57, %s9033_s19  ;;  %2097 = vrot.lane.b32.xlu1 %v10699_v59, %s9033_s19 }
 0x2c9   :  { %v1984_v16 = vpop.permute.xlu0 %1983  ;;  %v1986_v40 = vpop.permute.xlu1 %1985 }
 0x2ca   :  { %2172 = vst.msk [vmem:[#allocation4 + $0x20] sm:$0xff] %vm2167_vm9, %v1984_v16  ;;  %2173 = vst.msk [vmem:[#allocation4 + $0x28] sm:$0xff] %vm2167_vm9, %v1986_v40 }
 0x2cb   :  { %2099 = vrot.lane.b32.xlu0 %v11320_v34, %s9033_s19  ;;  %2101 = vrot.lane.b32.xlu1 %v11323_v7, %s9033_s19 }
 0x2cd   :  { %v1988_v52 = vpop.permute.xlu0 %1987  ;;  %v1990_v55 = vpop.permute.xlu1 %1989 }
 0x2ce   :  { %2174 = vst.msk [vmem:[#allocation4 + $0x30] sm:$0xff] %vm2167_vm9, %v1988_v52  ;;  %2175 = vst.msk [vmem:[#allocation4 + $0x38] sm:$0xff] %vm2167_vm9, %v1990_v55  ;;  %v16308_v55 = vld [vmem:[#allocation19_spill] sm:$0xff] }
 0x2cf   :  { %2236 = vrot.lane.b32.xlu0 %v9359_v33, %s9034_s20  ;;  %2238 = vrot.lane.b32.xlu1 %v9364_v36, %s9034_s20 }
 0x2d1   :  { %v1992_v54 = vpop.permute.xlu0 %1991  ;;  %v1994_v24 = vpop.permute.xlu1 %1993 }
 0x2d2   :  { %2176 = vst.msk [vmem:[#allocation4 + $0x40] sm:$0xff] %vm2167_vm9, %v1992_v54  ;;  %2177 = vst.msk [vmem:[#allocation4 + $0x48] sm:$0xff] %vm2167_vm9, %v1994_v24 }
 0x2d3   :  { %2240 = vrot.lane.b32.xlu0 %v9368_v37, %s9034_s20  ;;  %2242 = vrot.lane.b32.xlu1 %v9379_v42, %s9034_s20 }
 0x2d5   :  { %v1996_v14 = vpop.permute.xlu0 %1995  ;;  %v1998_v32 = vpop.permute.xlu1 %1997 }
 0x2d6   :  { %2178 = vst.msk [vmem:[#allocation4 + $0x50] sm:$0xff] %vm2167_vm9, %v1996_v14  ;;  %2179 = vst.msk [vmem:[#allocation4 + $0x58] sm:$0xff] %vm2167_vm9, %v1998_v32  ;;  %v16309_v14 = vld [vmem:[#allocation20_spill] sm:$0xff]  ;;  %v16310_v32 = vld [vmem:[#allocation21_spill] sm:$0xff] }
 0x2d7   :  { %2244 = vrot.lane.b32.xlu0 %v9383_v43, %s9034_s20  ;;  %2246 = vrot.lane.b32.xlu1 %v9391_v45, %s9034_s20 }
 0x2d9   :  { %v2000_v33 = vpop.permute.xlu0 %1999  ;;  %v2002_v36 = vpop.permute.xlu1 %2001 }
 0x2da   :  { %2180 = vst.msk [vmem:[#allocation4 + $0x60] sm:$0xff] %vm2167_vm9, %v2000_v33  ;;  %2181 = vst.msk [vmem:[#allocation4 + $0x68] sm:$0xff] %vm2167_vm9, %v2002_v36 }
 0x2db   :  { %2248 = vrot.lane.b32.xlu0 %v9403_v50, %s9034_s20  ;;  %2250 = vrot.lane.b32.xlu1 %v9405_v51, %s9034_s20 }
 0x2dd   :  { %v2004_v37 = vpop.permute.xlu0 %2003  ;;  %v2006_v42 = vpop.permute.xlu1 %2005 }
 0x2de   :  { %2182 = vst.msk [vmem:[#allocation4 + $0x70] sm:$0xff] %vm2167_vm9, %v2004_v37  ;;  %2183 = vst.msk [vmem:[#allocation4 + $0x78] sm:$0xff] %vm2167_vm9, %v2006_v42  ;;  %v16311_v37 = vld [vmem:[#allocation29_spill] sm:$0xff] }
 0x2df   :  { %2252 = vrot.lane.b32.xlu0 %v16094_v23, %s9034_s20  ;;  %2254 = vrot.lane.b32.xlu1 %v16097_v18, %s9034_s20  ;;  %v16304_v23 = vld [vmem:[#allocation15_spill] sm:$0xff] }
 0x2e1   :  { %v2008_v43 = vpop.permute.xlu0 %2007  ;;  %v2010_v45 = vpop.permute.xlu1 %2009 }
 0x2e2   :  { %2184 = vst.msk [vmem:[#allocation4 + $0x80] sm:$0xff] %vm2167_vm9, %v2008_v43  ;;  %2185 = vst.msk [vmem:[#allocation4 + $0x88] sm:$0xff] %vm2167_vm9, %v2010_v45  ;;  %v16312_v45 = vld [vmem:[#allocation32_spill] sm:$0xff] }
 0x2e3   :  { %2256 = vrot.lane.b32.xlu0 %v16099_v41, %s9034_s20  ;;  %2258 = vrot.lane.b32.xlu1 %v16177_v56, %s9034_s20  ;;  %v16305_v41 = vld [vmem:[#allocation16_spill] sm:$0xff]  ;;  %v16306_v56 = vld [vmem:[#allocation17_spill] sm:$0xff] }
 0x2e5   :  { %v2012_v50 = vpop.permute.xlu0 %2011  ;;  %v2014_v51 = vpop.permute.xlu1 %2013 }
 0x2e6   :  { %2186 = vst.msk [vmem:[#allocation4 + $0x90] sm:$0xff] %vm2167_vm9, %v2012_v50  ;;  %2187 = vst.msk [vmem:[#allocation4 + $0x98] sm:$0xff] %vm2167_vm9, %v2014_v51  ;;  %v16313_v50 = vld [vmem:[#allocation34_spill] sm:$0xff] }
 0x2e7   :  { %2260 = vrot.lane.b32.xlu0 %v16178_v28, %s9034_s20  ;;  %2262 = vrot.lane.b32.xlu1 %v16304_v23, %s9034_s20  ;;  %v16307_v28 = vld [vmem:[#allocation18_spill] sm:$0xff] }
 0x2e9   :  { %v2016_v18 = vpop.permute.xlu0 %2015  ;;  %v2018_v16 = vpop.permute.xlu1 %2017 }
 0x2ea   :  { %2188 = vst.msk [vmem:[#allocation4 + $0xa0] sm:$0xff] %vm2167_vm9, %v2016_v18  ;;  %2189 = vst.msk [vmem:[#allocation4 + $0xa8] sm:$0xff] %vm2167_vm9, %v2018_v16 }
 0x2eb   :  { %2264 = vrot.lane.b32.xlu0 %v16305_v41, %s9034_s20  ;;  %2266 = vrot.lane.b32.xlu1 %v16306_v56, %s9034_s20 }
 0x2ed   :  { %v2020_v40 = vpop.permute.xlu0 %2019  ;;  %v2022_v52 = vpop.permute.xlu1 %2021 }
 0x2ee   :  { %2190 = vst.msk [vmem:[#allocation4 + $0xb0] sm:$0xff] %vm2167_vm9, %v2020_v40  ;;  %2191 = vst.msk [vmem:[#allocation4 + $0xb8] sm:$0xff] %vm2167_vm9, %v2022_v52  ;;  %v8939_v40 = vld [vmem:[#allocation2 + $0x180] sm:$0xff]  ;;  %v11419_v52 = vld [vmem:[#allocation2 + $0x198] sm:$0xff] }
 0x2ef   :  { %2268 = vrot.lane.b32.xlu0 %v16307_v28, %s9034_s20  ;;  %2270 = vrot.lane.b32.xlu1 %v16308_v55, %s9034_s20  ;;  %v11421_v28 = vld [vmem:[#allocation2 + $0x1a0] sm:$0xff] }
 0x2f1   :  { %v2024_v54 = vpop.permute.xlu0 %2023  ;;  %v2026_v24 = vpop.permute.xlu1 %2025 }
 0x2f2   :  { %2192 = vst.msk [vmem:[#allocation4 + $0xc0] sm:$0xff] %vm2167_vm9, %v2024_v54  ;;  %2193 = vst.msk [vmem:[#allocation4 + $0xc8] sm:$0xff] %vm2167_vm9, %v2026_v24 }
 0x2f3   :  { %2272 = vrot.lane.b32.xlu0 %v16309_v14, %s9034_s20  ;;  %2274 = vrot.lane.b32.xlu1 %v16310_v32, %s9034_s20 }
 0x2f5   :  { %v2028_v33 = vpop.permute.xlu0 %2027  ;;  %v2030_v36 = vpop.permute.xlu1 %2029 }
 0x2f6   :  { %2194 = vst.msk [vmem:[#allocation4 + $0xd0] sm:$0xff] %vm2167_vm9, %v2028_v33  ;;  %2195 = vst.msk [vmem:[#allocation4 + $0xd8] sm:$0xff] %vm2167_vm9, %v2030_v36 }
 0x2f7   :  { %2276 = vrot.lane.b32.xlu0 %v16186_v15, %s9034_s20  ;;  %2278 = vrot.lane.b32.xlu1 %v16311_v37, %s9034_s20  ;;  %v16314_v15 = vld [vmem:[#allocation35_spill] sm:$0xff] }
 0x2f9   :  { %v2032_v42 = vpop.permute.xlu0 %2031  ;;  %v2034_v43 = vpop.permute.xlu1 %2033 }
 0x2fa   :  { %2196 = vst.msk [vmem:[#allocation4 + $0xe0] sm:$0xff] %vm2167_vm9, %v2032_v42  ;;  %2197 = vst.msk [vmem:[#allocation4 + $0xe8] sm:$0xff] %vm2167_vm9, %v2034_v43  ;;  %v16319_v43 = vld [vmem:[#allocation61_spill] sm:$0xff] }
 0x2fb   :  { %2280 = vrot.lane.b32.xlu0 %v16312_v45, %s9034_s20  ;;  %2282 = vrot.lane.b32.xlu1 %v16313_v50, %s9034_s20 }
 0x2fd   :  { %v2036_v51 = vpop.permute.xlu0 %2035  ;;  %v2038_v23 = vpop.permute.xlu1 %2037 }
 0x2fe   :  { %2198 = vst.msk [vmem:[#allocation4 + $0xf0] sm:$0xff] %vm2167_vm9, %v2036_v51  ;;  %2199 = vst.msk [vmem:[#allocation4 + $0xf8] sm:$0xff] %vm2167_vm9, %v2038_v23  ;;  %v16320_v51 = vld [vmem:[#allocation62_spill] sm:$0xff]  ;;  %v16321_v23 = vld [vmem:[#allocation63_spill] sm:$0xff] }
 0x2ff   :  { %2284 = vrot.lane.b32.xlu0 %v16314_v15, %s9034_s20  ;;  %2286 = vrot.lane.b32.xlu1 %v16190_v27, %s9034_s20  ;;  %v8940_v27 = vld [vmem:[#allocation2 + $0x188] sm:$0xff] }
 0x301   :  { %v2040_v18 = vpop.permute.xlu0 %2039  ;;  %v2042_v16 = vpop.permute.xlu1 %2041 }
 0x302   :  { %2200 = vst.msk [vmem:[#allocation4 + $0x100] sm:$0xff] %vm2167_vm9, %v2040_v18  ;;  %2201 = vst.msk [vmem:[#allocation4 + $0x108] sm:$0xff] %vm2167_vm9, %v2042_v16  ;;  %v16322_v16 = vld [vmem:[#allocation64_spill] sm:$0xff] }
 0x303   :  { %2288 = vrot.lane.b32.xlu0 %v16191_v17, %s9034_s20  ;;  %2290 = vrot.lane.b32.xlu1 %v16140_v30, %s9034_s20 }
 0x305   :  { %v2044_v41 = vpop.permute.xlu0 %2043  ;;  %v2046_v56 = vpop.permute.xlu1 %2045 }
 0x306   :  { %2202 = vst.msk [vmem:[#allocation4 + $0x110] sm:$0xff] %vm2167_vm9, %v2044_v41  ;;  %2203 = vst.msk [vmem:[#allocation4 + $0x118] sm:$0xff] %vm2167_vm9, %v2046_v56  ;;  %v16323_v41 = vld [vmem:[#allocation65_spill] sm:$0xff] }
 0x307   :  { %2292 = vrot.lane.b32.xlu0 %v8939_v40, %s9034_s20  ;;  %2294 = vrot.lane.b32.xlu1 %v8940_v27, %s9034_s20  ;;  %v8941_v27 = vld [vmem:[#allocation2 + $0x330] sm:$0xff] }
 0x309   :  { %v2048_v17 = vpop.permute.xlu0 %2047  ;;  %v2050_v55 = vpop.permute.xlu1 %2049 }
 0x30a   :  { %2204 = vst.msk [vmem:[#allocation4 + $0x120] sm:$0xff] %vm2167_vm9, %v2048_v17  ;;  %2205 = vst.msk [vmem:[#allocation4 + $0x128] sm:$0xff] %vm2167_vm9, %v2050_v55  ;;  %v8942_v17 = vld [vmem:[#allocation2 + $0x338] sm:$0xff]  ;;  %v11517_v55 = vld [vmem:[#allocation2 + $0x348] sm:$0xff] }
 0x30b   :  { %2296 = vrot.lane.b32.xlu0 %v11419_v52, %s9034_s20  ;;  %2298 = vrot.lane.b32.xlu1 %v11421_v28, %s9034_s20 }
 0x30d   :  { %v2052_v30 = vpop.permute.xlu0 %2051  ;;  %v2054_v54 = vpop.permute.xlu1 %2053 }
 0x30e   :  { %2206 = vst.msk [vmem:[#allocation4 + $0x130] sm:$0xff] %vm2167_vm9, %v2052_v30  ;;  %2207 = vst.msk [vmem:[#allocation4 + $0x138] sm:$0xff] %vm2167_vm9, %v2054_v54  ;;  %v11519_v30 = vld [vmem:[#allocation2 + $0x350] sm:$0xff] }
 0x30f   :  { %2300 = vrot.lane.b32.xlu0 %v9668_v46, %s9034_s20  ;;  %2302 = vrot.lane.b32.xlu1 %v9674_v25, %s9034_s20 }
 0x311   :  { %v2056_v24 = vpop.permute.xlu0 %2055  ;;  %v2058_v14 = vpop.permute.xlu1 %2057 }
 0x312   :  { %2208 = vst.msk [vmem:[#allocation4 + $0x140] sm:$0xff] %vm2167_vm9, %v2056_v24  ;;  %2209 = vst.msk [vmem:[#allocation4 + $0x148] sm:$0xff] %vm2167_vm9, %v2058_v14 }
 0x313   :  { %2304 = vrot.lane.b32.xlu0 %v9678_v21, %s9034_s20  ;;  %2306 = vrot.lane.b32.xlu1 %v9682_v31, %s9034_s20 }
 0x315   :  { %v2060_v32 = vpop.permute.xlu0 %2059  ;;  %v2062_v33 = vpop.permute.xlu1 %2061 }
 0x316   :  { %2210 = vst.msk [vmem:[#allocation4 + $0x150] sm:$0xff] %vm2167_vm9, %v2060_v32  ;;  %2211 = vst.msk [vmem:[#allocation4 + $0x158] sm:$0xff] %vm2167_vm9, %v2062_v33  ;;  %v16324_v33 = vld [vmem:[#allocation13_spill] sm:$0xff] }
 0x317   :  { %2308 = vrot.lane.b32.xlu0 %v9693_v20, %s9034_s20  ;;  %2310 = vrot.lane.b32.xlu1 %v9695_v19, %s9034_s20 }
 0x319   :  { %v2064_v46 = vpop.permute.xlu0 %2063  ;;  %v2066_v25 = vpop.permute.xlu1 %2065 }
 0x31a   :  { %2212 = vst.msk [vmem:[#allocation4 + $0x160] sm:$0xff] %vm2167_vm9, %v2064_v46  ;;  %2213 = vst.msk [vmem:[#allocation4 + $0x168] sm:$0xff] %vm2167_vm9, %v2066_v25  ;;  %v16325_v46 = vld [vmem:[#allocation14_spill] sm:$0xff] }
 0x31b   :  { %2312 = vrot.lane.b32.xlu0 %v9709_v12, %s9034_s20  ;;  %2314 = vrot.lane.b32.xlu1 %v9711_v10, %s9034_s20 }
 0x31d   :  { %v2068_v21 = vpop.permute.xlu0 %2067  ;;  %v2070_v31 = vpop.permute.xlu1 %2069 }
 0x31e   :  { %2214 = vst.msk [vmem:[#allocation4 + $0x170] sm:$0xff] %vm2167_vm9, %v2068_v21  ;;  %2215 = vst.msk [vmem:[#allocation4 + $0x178] sm:$0xff] %vm2167_vm9, %v2070_v31  ;;  %v16326_v31 = vld [vmem:[#allocation22_spill] sm:$0xff] }
 0x31f   :  { %2316 = vrot.lane.b32.xlu0 %v9719_v61, %s9034_s20  ;;  %2318 = vrot.lane.b32.xlu1 %v9721_v13, %s9034_s20 }
 0x321   :  { %v2072_v19 = vpop.permute.xlu0 %2071  ;;  %v2074_v20 = vpop.permute.xlu1 %2073 }
 0x322   :  { %2216 = vst.msk [vmem:[#allocation4 + $0x180] sm:$0xff] %vm2167_vm9, %v2072_v19  ;;  %2217 = vst.msk [vmem:[#allocation4 + $0x188] sm:$0xff] %vm2167_vm9, %v2074_v20  ;;  %v16327_v19 = vld [vmem:[#allocation23_spill] sm:$0xff] }
 0x323   :  { %2320 = vrot.lane.b32.xlu0 %v9738_v39, %s9034_s20  ;;  %2322 = vrot.lane.b32.xlu1 %v9829_v9, %s9034_s20 }
 0x325   :  { %v2076_v10 = vpop.permute.xlu0 %2075  ;;  %v2078_v12 = vpop.permute.xlu1 %2077 }
 0x326   :  { %2218 = vst.msk [vmem:[#allocation4 + $0x190] sm:$0xff] %vm2167_vm9, %v2076_v10  ;;  %2219 = vst.msk [vmem:[#allocation4 + $0x198] sm:$0xff] %vm2167_vm9, %v2078_v12  ;;  %v16328_v12 = vld [vmem:[#allocation27_spill] sm:$0xff] }
 0x327   :  { %2324 = vrot.lane.b32.xlu0 %v9838_v47, %s9034_s20  ;;  %2326 = vrot.lane.b32.xlu1 %v9840_v11, %s9034_s20 }
 0x329   :  { %v2080_v61 = vpop.permute.xlu0 %2079  ;;  %v2082_v13 = vpop.permute.xlu1 %2081 }
 0x32a   :  { %2220 = vst.msk [vmem:[#allocation4 + $0x1a0] sm:$0xff] %vm2167_vm9, %v2080_v61  ;;  %2221 = vst.msk [vmem:[#allocation4 + $0x1a8] sm:$0xff] %vm2167_vm9, %v2082_v13  ;;  %v16329_v61 = vld [vmem:[#allocation28_spill] sm:$0xff] }
 0x32b   :  { %2328 = vrot.lane.b32.xlu0 %v9854_v1, %s9034_s20  ;;  %2330 = vrot.lane.b32.xlu1 %v9856_v6, %s9034_s20  ;;  %v16315_v1 = vld [vmem:[#allocation54_spill] sm:$0xff] }
 0x32d   :  { %v2084_v39 = vpop.permute.xlu0 %2083  ;;  %v2086_v9 = vpop.permute.xlu1 %2085 }
 0x32e   :  { %2222 = vst.msk [vmem:[#allocation4 + $0x1b0] sm:$0xff] %vm2167_vm9, %v2084_v39  ;;  %2223 = vst.msk [vmem:[#allocation4 + $0x1b8] sm:$0xff] %vm2167_vm9, %v2086_v9  ;;  %v16330_v9 = vld [vmem:[#allocation30_spill] sm:$0xff] }
 0x32f   :  { %2332 = vrot.lane.b32.xlu0 %v9858_v4, %s9034_s20  ;;  %2334 = vrot.lane.b32.xlu1 %v9866_v58, %s9034_s20  ;;  %v16316_v4 = vld [vmem:[#allocation55_spill] sm:$0xff]  ;;  %v16317_v58 = vld [vmem:[#allocation56_spill] sm:$0xff] }
 0x331   :  { %v2088_v47 = vpop.permute.xlu0 %2087  ;;  %v2090_v11 = vpop.permute.xlu1 %2089 }
 0x332   :  { %2224 = vst.msk [vmem:[#allocation4 + $0x1c0] sm:$0xff] %vm2167_vm9, %v2088_v47  ;;  %2225 = vst.msk [vmem:[#allocation4 + $0x1c8] sm:$0xff] %vm2167_vm9, %v2090_v11  ;;  %v16331_v47 = vld [vmem:[#allocation31_spill] sm:$0xff] }
 0x333   :  { %2336 = vrot.lane.b32.xlu0 %v9870_v0, %s9034_s20  ;;  %2338 = vrot.lane.b32.xlu1 %v16315_v1, %s9034_s20  ;;  %v16318_v0 = vld [vmem:[#allocation59_spill] sm:$0xff] }
 0x335   :  { %v2092_v6 = vpop.permute.xlu0 %2091  ;;  %v2094_v36 = vpop.permute.xlu1 %2093 }
 0x336   :  { %2226 = vst.msk [vmem:[#allocation4 + $0x1d0] sm:$0xff] %vm2167_vm9, %v2092_v6  ;;  %2227 = vst.msk [vmem:[#allocation4 + $0x1d8] sm:$0xff] %vm2167_vm9, %v2094_v36  ;;  %v16332_v6 = vld [vmem:[#allocation39_spill] sm:$0xff]  ;;  %v16333_v36 = vld [vmem:[#allocation40_spill] sm:$0xff] }
 0x337   :  { %2340 = vrot.lane.b32.xlu0 %v16316_v4, %s9034_s20  ;;  %2342 = vrot.lane.b32.xlu1 %v16317_v58, %s9034_s20 }
 0x339   :  { %v2096_v37 = vpop.permute.xlu0 %2095  ;;  %v2098_v42 = vpop.permute.xlu1 %2097 }
 0x33a   :  { %2228 = vst.msk [vmem:[#allocation4 + $0x1e0] sm:$0xff] %vm2167_vm9, %v2096_v37  ;;  %2229 = vst.msk [vmem:[#allocation4 + $0x1e8] sm:$0xff] %vm2167_vm9, %v2098_v42  ;;  %v16334_v37 = vld [vmem:[#allocation42_spill] sm:$0xff]  ;;  %v16335_v42 = vld [vmem:[#allocation43_spill] sm:$0xff] }
 0x33b   :  { %2344 = vrot.lane.b32.xlu0 %v16318_v0, %s9034_s20  ;;  %2346 = vrot.lane.b32.xlu1 %v16319_v43, %s9034_s20 }
 0x33d   :  { %v2100_v45 = vpop.permute.xlu0 %2099  ;;  %v2102_v50 = vpop.permute.xlu1 %2101 }
 0x33e   :  { %2230 = vst.msk [vmem:[#allocation4 + $0x1f0] sm:$0xff] %vm2167_vm9, %v2100_v45  ;;  %2231 = vst.msk [vmem:[#allocation4 + $0x1f8] sm:$0xff] %vm2167_vm9, %v2102_v50  ;;  %v16336_v45 = vld [vmem:[#allocation46_spill] sm:$0xff]  ;;  %v16337_v50 = vld [vmem:[#allocation47_spill] sm:$0xff]  ;;  %vm5975_vm9 = vcmask 458112  }
 0x33f   :  { %2348 = vrot.lane.b32.xlu0 %v16320_v51, %s9034_s20  ;;  %2350 = vrot.lane.b32.xlu1 %v16321_v23, %s9034_s20 }
 0x341   :  { %v2237_v15 = vpop.permute.xlu0 %2236  ;;  %v2239_v18 = vpop.permute.xlu1 %2238 }
 0x342   :  { %2429 = vst.msk [vmem:[#allocation4] sm:$0xff] %vm2428_vm10, %v2237_v15  ;;  %2430 = vst.msk [vmem:[#allocation4 + $0x8] sm:$0xff] %vm2428_vm10, %v2239_v18  ;;  %v16338_v15 = vld [vmem:[#allocation48_spill] sm:$0xff]  ;;  %v16339_v18 = vld [vmem:[#allocation49_spill] sm:$0xff] }
 0x343   :  { %2352 = vrot.lane.b32.xlu0 %v16322_v16, %s9034_s20  ;;  %2354 = vrot.lane.b32.xlu1 %v16323_v41, %s9034_s20 }
 0x345   :  { %v2241_v56 = vpop.permute.xlu0 %2240  ;;  %v2243_v40 = vpop.permute.xlu1 %2242 }
 0x346   :  { %2431 = vst.msk [vmem:[#allocation4 + $0x10] sm:$0xff] %vm2428_vm10, %v2241_v56  ;;  %2432 = vst.msk [vmem:[#allocation4 + $0x18] sm:$0xff] %vm2428_vm10, %v2243_v40  ;;  %v16340_v56 = vld [vmem:[#allocation51_spill] sm:$0xff]  ;;  %v16341_v40 = vld [vmem:[#allocation52_spill] sm:$0xff] }
 0x347   :  { %2356 = vrot.lane.b32.xlu0 %v8941_v27, %s9034_s20  ;;  %2358 = vrot.lane.b32.xlu1 %v8942_v17, %s9034_s20 }
 0x349   :  { %v2245_v54 = vpop.permute.xlu0 %2244  ;;  %v2247_v24 = vpop.permute.xlu1 %2246 }
 0x34a   :  { %2433 = vst.msk [vmem:[#allocation4 + $0x20] sm:$0xff] %vm2428_vm10, %v2245_v54  ;;  %2434 = vst.msk [vmem:[#allocation4 + $0x28] sm:$0xff] %vm2428_vm10, %v2247_v24  ;;  %v16342_v54 = vld [vmem:[#allocation57_spill] sm:$0xff]  ;;  %v16343_v24 = vld [vmem:[#allocation58_spill] sm:$0xff] }
 0x34b   :  { %2360 = vrot.lane.b32.xlu0 %v11517_v55, %s9034_s20  ;;  %2362 = vrot.lane.b32.xlu1 %v11519_v30, %s9034_s20 }
 0x34d   :  { %v2249_v14 = vpop.permute.xlu0 %2248  ;;  %v2251_v32 = vpop.permute.xlu1 %2250 }
 0x34e   :  { %2435 = vst.msk [vmem:[#allocation4 + $0x30] sm:$0xff] %vm2428_vm10, %v2249_v14  ;;  %2436 = vst.msk [vmem:[#allocation4 + $0x38] sm:$0xff] %vm2428_vm10, %v2251_v32 }
 0x34f   :  { %2505 = vrot.lane.b32.xlu0 %v16324_v33, %s9035_s21  ;;  %2507 = vrot.lane.b32.xlu1 %v16325_v46, %s9035_s21  ;;  %v16344_v33 = vld [vmem:[#allocation66_spill] sm:$0xff]  ;;  %v16345_v46 = vld [vmem:[#allocation67_spill] sm:$0xff] }
 0x351   :  { %v2253_v25 = vpop.permute.xlu0 %2252  ;;  %v2255_v21 = vpop.permute.xlu1 %2254 }
 0x352   :  { %2437 = vst.msk [vmem:[#allocation4 + $0x40] sm:$0xff] %vm2428_vm10, %v2253_v25  ;;  %2438 = vst.msk [vmem:[#allocation4 + $0x48] sm:$0xff] %vm2428_vm10, %v2255_v21 }
 0x353   :  { %2509 = vrot.lane.b32.xlu0 %v16326_v31, %s9035_s21  ;;  %2511 = vrot.lane.b32.xlu1 %v16327_v19, %s9035_s21  ;;  %v16346_v31 = vld [vmem:[#allocation69_spill] sm:$0xff]  ;;  %v16347_v19 = vld [vmem:[#allocation70_spill] sm:$0xff] }
 0x355   :  { %v2257_v20 = vpop.permute.xlu0 %2256  ;;  %v2259_v10 = vpop.permute.xlu1 %2258 }
 0x356   :  { %2439 = vst.msk [vmem:[#allocation4 + $0x50] sm:$0xff] %vm2428_vm10, %v2257_v20  ;;  %2440 = vst.msk [vmem:[#allocation4 + $0x58] sm:$0xff] %vm2428_vm10, %v2259_v10 }
 0x357   :  { %2513 = vrot.lane.b32.xlu0 %v16328_v12, %s9035_s21  ;;  %2515 = vrot.lane.b32.xlu1 %v16329_v61, %s9035_s21  ;;  %v16348_v12 = vld [vmem:[#allocation72_spill] sm:$0xff]  ;;  %v16349_v61 = vld [vmem:[#allocation73_spill] sm:$0xff] }
 0x359   :  { %v2261_v13 = vpop.permute.xlu0 %2260  ;;  %v2263_v39 = vpop.permute.xlu1 %2262 }
 0x35a   :  { %2441 = vst.msk [vmem:[#allocation4 + $0x60] sm:$0xff] %vm2428_vm10, %v2261_v13  ;;  %2442 = vst.msk [vmem:[#allocation4 + $0x68] sm:$0xff] %vm2428_vm10, %v2263_v39 }
 0x35b   :  { %2517 = vrot.lane.b32.xlu0 %v16330_v9, %s9035_s21  ;;  %2519 = vrot.lane.b32.xlu1 %v16331_v47, %s9035_s21  ;;  %v11605_v9 = vld [vmem:[#allocation2 + $0x1a8] sm:$0x3]  ;;  %v16350_v47 = vld [vmem:[#allocation74_spill] sm:$0xff] }
 0x35d   :  { %v2265_v11 = vpop.permute.xlu0 %2264  ;;  %v2267_v1 = vpop.permute.xlu1 %2266 }
 0x35e   :  { %2443 = vst.msk [vmem:[#allocation4 + $0x70] sm:$0xff] %vm2428_vm10, %v2265_v11  ;;  %2444 = vst.msk [vmem:[#allocation4 + $0x78] sm:$0xff] %vm2428_vm10, %v2267_v1  ;;  %v16351_v11 = vld [vmem:[#allocation75_spill] sm:$0xff]  ;;  %v2495_v1 = vrot.slane %v11419_v52, 1 }
 0x35f   :  { %2521 = vrot.lane.b32.xlu0 %v16332_v6, %s9035_s21  ;;  %2523 = vrot.lane.b32.xlu1 %v16333_v36, %s9035_s21  ;;  %v2496_v6 = vrot.slane %v11421_v28, 1  ;;  %v2498_v36 = vrot.slane %v11605_v9, 1 }
 0x361   :  { %v2269_v4 = vpop.permute.xlu0 %2268  ;;  %v2271_v58 = vpop.permute.xlu1 %2270 }
 0x362   :  { %2445 = vst.msk [vmem:[#allocation4 + $0x80] sm:$0xff] %vm2428_vm10, %v2269_v4  ;;  %2446 = vst.msk [vmem:[#allocation4 + $0x88] sm:$0xff] %vm2428_vm10, %v2271_v58 }
 0x363   :  { %2525 = vrot.lane.b32.xlu0 %v16334_v37, %s9035_s21  ;;  %2527 = vrot.lane.b32.xlu1 %v16335_v42, %s9035_s21  ;;  %v16352_v37 = vld [vmem:[#allocation11_spill] sm:$0xff]  ;;  %v16353_v42 = vld [vmem:[#allocation12_spill] sm:$0xff] }
 0x365   :  { %v2273_v0 = vpop.permute.xlu0 %2272  ;;  %v2275_v43 = vpop.permute.xlu1 %2274 }
 0x366   :  { %2447 = vst.msk [vmem:[#allocation4 + $0x90] sm:$0xff] %vm2428_vm10, %v2273_v0  ;;  %2448 = vst.msk [vmem:[#allocation4 + $0x98] sm:$0xff] %vm2428_vm10, %v2275_v43  ;;  %v2497_v0 = vsel %vm599_vm3, %v2495_v1, %v2496_v6  ;;  %v2499_v43 = vsel %vm599_vm3, %v2496_v6, %v2498_v36  ;;  %v16368_v36 = vld [vmem:[#allocation98_spill] sm:$0xff] }
 0x367   :  { %2529 = vrot.lane.b32.xlu0 %v16336_v45, %s9035_s21  ;;  %2531 = vrot.lane.b32.xlu1 %v16337_v50, %s9035_s21 }
 0x369   :  { %v2277_v51 = vpop.permute.xlu0 %2276  ;;  %v2279_v23 = vpop.permute.xlu1 %2278 }
 0x36a   :  { %2449 = vst.msk [vmem:[#allocation4 + $0xa0] sm:$0xff] %vm2428_vm10, %v2277_v51  ;;  %2450 = vst.msk [vmem:[#allocation4 + $0xa8] sm:$0xff] %vm2428_vm10, %v2279_v23 }
 0x36b   :  { %2533 = vrot.lane.b32.xlu0 %v16338_v15, %s9035_s21  ;;  %2535 = vrot.lane.b32.xlu1 %v16339_v18, %s9035_s21  ;;  %v16354_v15 = vld [vmem:[#allocation78_spill] sm:$0xff]  ;;  %v16355_v18 = vld [vmem:[#allocation79_spill] sm:$0xff] }
 0x36d   :  { %v2281_v16 = vpop.permute.xlu0 %2280  ;;  %v2283_v41 = vpop.permute.xlu1 %2282 }
 0x36e   :  { %2451 = vst.msk [vmem:[#allocation4 + $0xb0] sm:$0xff] %vm2428_vm10, %v2281_v16  ;;  %2452 = vst.msk [vmem:[#allocation4 + $0xb8] sm:$0xff] %vm2428_vm10, %v2283_v41 }
 0x36f   :  { %2537 = vrot.lane.b32.xlu0 %v16340_v56, %s9035_s21  ;;  %2539 = vrot.lane.b32.xlu1 %v16341_v40, %s9035_s21  ;;  %v16356_v56 = vld [vmem:[#allocation80_spill] sm:$0xff]  ;;  %v16357_v40 = vld [vmem:[#allocation81_spill] sm:$0xff] }
 0x371   :  { %v2285_v27 = vpop.permute.xlu0 %2284  ;;  %v2287_v17 = vpop.permute.xlu1 %2286 }
 0x372   :  { %2453 = vst.msk [vmem:[#allocation4 + $0xc0] sm:$0xff] %vm2428_vm10, %v2285_v27  ;;  %2454 = vst.msk [vmem:[#allocation4 + $0xc8] sm:$0xff] %vm2428_vm10, %v2287_v17 }
 0x373   :  { %2541 = vrot.lane.b32.xlu0 %v16342_v54, %s9035_s21  ;;  %2543 = vrot.lane.b32.xlu1 %v16343_v24, %s9035_s21  ;;  %v16358_v54 = vld [vmem:[#allocation83_spill] sm:$0xff]  ;;  %v16359_v24 = vld [vmem:[#allocation84_spill] sm:$0xff] }
 0x375   :  { %v2289_v14 = vpop.permute.xlu0 %2288  ;;  %v2291_v32 = vpop.permute.xlu1 %2290 }
 0x376   :  { %2455 = vst.msk [vmem:[#allocation4 + $0xd0] sm:$0xff] %vm2428_vm10, %v2289_v14  ;;  %2456 = vst.msk [vmem:[#allocation4 + $0xd8] sm:$0xff] %vm2428_vm10, %v2291_v32 }
 0x377   :  { %2545 = vrot.lane.b32.xlu0 %v16344_v33, %s9035_s21  ;;  %2547 = vrot.lane.b32.xlu1 %v16345_v46, %s9035_s21  ;;  %v16360_v33 = vld [vmem:[#allocation86_spill] sm:$0xff]  ;;  %v16361_v46 = vld [vmem:[#allocation87_spill] sm:$0xff] }
 0x379   :  { %v2293_v25 = vpop.permute.xlu0 %2292  ;;  %v2295_v21 = vpop.permute.xlu1 %2294 }
 0x37a   :  { %2457 = vst.msk [vmem:[#allocation4 + $0xe0] sm:$0xff] %vm2428_vm10, %v2293_v25  ;;  %2458 = vst.msk [vmem:[#allocation4 + $0xe8] sm:$0xff] %vm2428_vm10, %v2295_v21 }
 0x37b   :  { %2549 = vrot.lane.b32.xlu0 %v16346_v31, %s9035_s21  ;;  %2551 = vrot.lane.b32.xlu1 %v16347_v19, %s9035_s21  ;;  %v16362_v31 = vld [vmem:[#allocation89_spill] sm:$0xff]  ;;  %v16363_v19 = vld [vmem:[#allocation90_spill] sm:$0xff] }
 0x37d   :  { %v2297_v20 = vpop.permute.xlu0 %2296  ;;  %v2299_v10 = vpop.permute.xlu1 %2298 }
 0x37e   :  { %2459 = vst.msk [vmem:[#allocation4 + $0xf0] sm:$0xff] %vm2428_vm10, %v2297_v20  ;;  %2460 = vst.msk [vmem:[#allocation4 + $0xf8] sm:$0xff] %vm2428_vm10, %v2299_v10 }
 0x37f   :  { %2553 = vrot.lane.b32.xlu0 %v16348_v12, %s9035_s21  ;;  %2555 = vrot.lane.b32.xlu1 %v16349_v61, %s9035_s21  ;;  %v16364_v12 = vld [vmem:[#allocation92_spill] sm:$0xff]  ;;  %v16365_v61 = vld [vmem:[#allocation93_spill] sm:$0xff] }
 0x381   :  { %v2301_v13 = vpop.permute.xlu0 %2300  ;;  %v2303_v39 = vpop.permute.xlu1 %2302 }
 0x382   :  { %2461 = vst.msk [vmem:[#allocation4 + $0x100] sm:$0xff] %vm2428_vm10, %v2301_v13  ;;  %2462 = vst.msk [vmem:[#allocation4 + $0x108] sm:$0xff] %vm2428_vm10, %v2303_v39 }
 0x383   :  { %2557 = vrot.lane.b32.xlu0 %v16350_v47, %s9035_s21  ;;  %2559 = vrot.lane.b32.xlu1 %v16351_v11, %s9035_s21  ;;  %v16366_v47 = vld [vmem:[#allocation95_spill] sm:$0xff]  ;;  %v16367_v11 = vld [vmem:[#allocation96_spill] sm:$0xff] }
 0x385   :  { %v2305_v4 = vpop.permute.xlu0 %2304  ;;  %v2307_v58 = vpop.permute.xlu1 %2306 }
 0x386   :  { %2463 = vst.msk [vmem:[#allocation4 + $0x110] sm:$0xff] %vm2428_vm10, %v2305_v4  ;;  %2464 = vst.msk [vmem:[#allocation4 + $0x118] sm:$0xff] %vm2428_vm10, %v2307_v58  ;;  %v16369_v4 = vld [vmem:[#allocation99_spill] sm:$0xff] }
 0x387   :  { %2561 = vrot.lane.b32.xlu0 %v16352_v37, %s9035_s21  ;;  %2563 = vrot.lane.b32.xlu1 %v16353_v42, %s9035_s21  ;;  %v16370_v42 = vld [vmem:[#allocation101_spill] sm:$0xff] }
 0x389   :  { %v2309_v45 = vpop.permute.xlu0 %2308  ;;  %v2311_v50 = vpop.permute.xlu1 %2310 }
 0x38a   :  { %2465 = vst.msk [vmem:[#allocation4 + $0x120] sm:$0xff] %vm2428_vm10, %v2309_v45  ;;  %2466 = vst.msk [vmem:[#allocation4 + $0x128] sm:$0xff] %vm2428_vm10, %v2311_v50  ;;  %v16372_v50 = vld [vmem:[#allocation104_spill] sm:$0xff] }
 0x38b   :  { %2565 = vrot.lane.b32.xlu0 %v2497_v0, %s9035_s21  ;;  %2567 = vrot.lane.b32.xlu1 %v2499_v43, %s9035_s21  ;;  %v16371_v0 = vld [vmem:[#allocation102_spill] sm:$0xff] }
 0x38d   :  { %v2313_v51 = vpop.permute.xlu0 %2312  ;;  %v2315_v23 = vpop.permute.xlu1 %2314 }
 0x38e   :  { %2467 = vst.msk [vmem:[#allocation4 + $0x130] sm:$0xff] %vm2428_vm10, %v2313_v51  ;;  %2468 = vst.msk [vmem:[#allocation4 + $0x138] sm:$0xff] %vm2428_vm10, %v2315_v23  ;;  %v16373_v51 = vld [vmem:[#allocation105_spill] sm:$0xff] }
 0x38f   :  { %2569 = vrot.lane.b32.xlu0 %v16354_v15, %s9035_s21  ;;  %2571 = vrot.lane.b32.xlu1 %v16355_v18, %s9035_s21  ;;  %v16374_v18 = vld [vmem:[#allocation107_spill] sm:$0xff] }
 0x391   :  { %v2317_v16 = vpop.permute.xlu0 %2316  ;;  %v2319_v41 = vpop.permute.xlu1 %2318 }
 0x392   :  { %2469 = vst.msk [vmem:[#allocation4 + $0x140] sm:$0xff] %vm2428_vm10, %v2317_v16  ;;  %2470 = vst.msk [vmem:[#allocation4 + $0x148] sm:$0xff] %vm2428_vm10, %v2319_v41  ;;  %v16375_v16 = vld [vmem:[#allocation108_spill] sm:$0xff] }
 0x393   :  { %2573 = vrot.lane.b32.xlu0 %v16356_v56, %s9035_s21  ;;  %2575 = vrot.lane.b32.xlu1 %v16357_v40, %s9035_s21  ;;  %v16376_v40 = vld [vmem:[#allocation109_spill] sm:$0xff] }
 0x395   :  { %v2321_v27 = vpop.permute.xlu0 %2320  ;;  %v2323_v17 = vpop.permute.xlu1 %2322 }
 0x396   :  { %2471 = vst.msk [vmem:[#allocation4 + $0x150] sm:$0xff] %vm2428_vm10, %v2321_v27  ;;  %2472 = vst.msk [vmem:[#allocation4 + $0x158] sm:$0xff] %vm2428_vm10, %v2323_v17  ;;  %v16377_v27 = vld [vmem:[#allocation110_spill] sm:$0xff] }
 0x397   :  { %2577 = vrot.lane.b32.xlu0 %v16358_v54, %s9035_s21  ;;  %2579 = vrot.lane.b32.xlu1 %v16359_v24, %s9035_s21  ;;  %v16378_v24 = vld [vmem:[#allocation111_spill] sm:$0xff] }
 0x399   :  { %v2325_v14 = vpop.permute.xlu0 %2324  ;;  %v2327_v32 = vpop.permute.xlu1 %2326 }
 0x39a   :  { %2473 = vst.msk [vmem:[#allocation4 + $0x160] sm:$0xff] %vm2428_vm10, %v2325_v14  ;;  %2474 = vst.msk [vmem:[#allocation4 + $0x168] sm:$0xff] %vm2428_vm10, %v2327_v32  ;;  %v16379_v14 = vld [vmem:[#allocation112_spill] sm:$0xff]  ;;  %v3157_v32 = vld [vmem:[%s15361_s1] sm:$0xff] }
 0x39b   :  { %2581 = vrot.lane.b32.xlu0 %v16360_v33, %s9035_s21  ;;  %2583 = vrot.lane.b32.xlu1 %v16361_v46, %s9035_s21  ;;  %v3158_v33 = vld [vmem:[%s15361_s1 + $0x8] sm:$0xff] }
 0x39d   :  { %v2329_v25 = vpop.permute.xlu0 %2328  ;;  %v2331_v21 = vpop.permute.xlu1 %2330 }
 0x39e   :  { %2475 = vst.msk [vmem:[#allocation4 + $0x170] sm:$0xff] %vm2428_vm10, %v2329_v25  ;;  %2476 = vst.msk [vmem:[#allocation4 + $0x178] sm:$0xff] %vm2428_vm10, %v2331_v21  ;;  %v438_v21 = vld [vmem:[#allocation2 + $0x358] sm:$0x3] }
 0x39f   :  { %2585 = vrot.lane.b32.xlu0 %v16362_v31, %s9035_s21  ;;  %2587 = vrot.lane.b32.xlu1 %v16363_v19, %s9035_s21  ;;  %v8692_v31 = vpack.c.bf16 %v3158_v33, %v3157_v32  ;;  %v2500_v19 = vrot.slane %v11517_v55, 1 }
 0x3a1   :  { %v2333_v20 = vpop.permute.xlu0 %2332  ;;  %v2335_v10 = vpop.permute.xlu1 %2334  ;;  %8693 = vmatprep.subr.bf16.mxu0 %v8692_v31 }
 0x3a2   :  { %2477 = vst.msk [vmem:[#allocation4 + $0x180] sm:$0xff] %vm2428_vm10, %v2333_v20  ;;  %2478 = vst.msk [vmem:[#allocation4 + $0x188] sm:$0xff] %vm2428_vm10, %v2335_v10  ;;  %v2501_v20 = vrot.slane %v11519_v30, 1  ;;  %v2503_v10 = vrot.slane %v438_v21, 1  ;;  %8695 = vmatpush3.bf16.msra.mxu0 %v8692_v31 }
 0x3a3   :  { %2589 = vrot.lane.b32.xlu0 %v16364_v12, %s9035_s21  ;;  %2591 = vrot.lane.b32.xlu1 %v16365_v61, %s9035_s21  ;;  %v3159_v12 = vld [vmem:[%s15361_s1 + $0x10] sm:$0xff]  ;;  %v3160_v61 = vld [vmem:[%s15361_s1 + $0x18] sm:$0xff] }
 0x3a4   :  { %v2502_v55 = vsel %vm599_vm3, %v2500_v19, %v2501_v20  ;;  %v2504_v30 = vsel %vm599_vm3, %v2501_v20, %v2503_v10  ;;  %v16395_v19 = vld [vmem:[#allocation44_spill] sm:$0xff] }
 0x3a5   :  { %v2337_v13 = vpop.permute.xlu0 %2336  ;;  %v2339_v39 = vpop.permute.xlu1 %2338  ;;  %v16396_v20 = vld [vmem:[#allocation124_spill] sm:$0xff] }
 0x3a6   :  { %2479 = vst.msk [vmem:[#allocation4 + $0x190] sm:$0xff] %vm2428_vm10, %v2337_v13  ;;  %2480 = vst.msk [vmem:[#allocation4 + $0x198] sm:$0xff] %vm2428_vm10, %v2339_v39 }
 0x3a7   :  { %2593 = vrot.lane.b32.xlu0 %v16366_v47, %s9035_s21  ;;  %2595 = vrot.lane.b32.xlu1 %v16367_v11, %s9035_s21 }
 0x3a9   :  { %v2341_v1 = vpop.permute.xlu0 %2340  ;;  %v2343_v6 = vpop.permute.xlu1 %2342 }
 0x3aa   :  { %2481 = vst.msk [vmem:[#allocation4 + $0x1a0] sm:$0xff] %vm2428_vm10, %v2341_v1  ;;  %2482 = vst.msk [vmem:[#allocation4 + $0x1a8] sm:$0xff] %vm2428_vm10, %v2343_v6  ;;  %v3161_v1 = vld [vmem:[%s15361_s1 + $0x20] sm:$0xf] }
 0x3ab   :  { %2597 = vrot.lane.b32.xlu0 %v16368_v36, %s9035_s21  ;;  %2599 = vrot.lane.b32.xlu1 %v16369_v4, %s9035_s21  ;;  %v16381_v36 = vld [vmem:[#allocation117_spill] sm:$0xff]  ;;  %v16382_v4 = vld [vmem:[#allocation118_spill] sm:$0xff] }
 0x3ad   :  { %v2345_v58 = vpop.permute.xlu0 %2344  ;;  %v2347_v37 = vpop.permute.xlu1 %2346 }
 0x3ae   :  { %2483 = vst.msk [vmem:[#allocation4 + $0x1b0] sm:$0xff] %vm2428_vm10, %v2345_v58  ;;  %2484 = vst.msk [vmem:[#allocation4 + $0x1b8] sm:$0xff] %vm2428_vm10, %v2347_v37 }
 0x3af   :  { %2601 = vrot.lane.b32.xlu0 %v16370_v42, %s9035_s21  ;;  %2603 = vrot.lane.b32.xlu1 %v16371_v0, %s9035_s21  ;;  %v16383_v42 = vld [vmem:[#allocation119_spill] sm:$0xff]  ;;  %v16384_v0 = vld [vmem:[#allocation120_spill] sm:$0xff] }
 0x3b1   :  { %v2349_v43 = vpop.permute.xlu0 %2348  ;;  %v2351_v45 = vpop.permute.xlu1 %2350 }
 0x3b2   :  { %2485 = vst.msk [vmem:[#allocation4 + $0x1c0] sm:$0xff] %vm2428_vm10, %v2349_v43  ;;  %2486 = vst.msk [vmem:[#allocation4 + $0x1c8] sm:$0xff] %vm2428_vm10, %v2351_v45 }
 0x3b3   :  { %2605 = vrot.lane.b32.xlu0 %v16372_v50, %s9035_s21  ;;  %2607 = vrot.lane.b32.xlu1 %v16373_v51, %s9035_s21  ;;  %v16385_v50 = vld [vmem:[#allocation121_spill] sm:$0xff]  ;;  %v16386_v51 = vld [vmem:[#allocation122_spill] sm:$0xff] }
 0x3b5   :  { %v2353_v23 = vpop.permute.xlu0 %2352  ;;  %v2355_v15 = vpop.permute.xlu1 %2354 }
 0x3b6   :  { %2487 = vst.msk [vmem:[#allocation4 + $0x1d0] sm:$0xff] %vm2428_vm10, %v2353_v23  ;;  %2488 = vst.msk [vmem:[#allocation4 + $0x1d8] sm:$0xff] %vm2428_vm10, %v2355_v15 }
 0x3b7   :  { %2609 = vrot.lane.b32.xlu0 %v16374_v18, %s9035_s21  ;;  %2611 = vrot.lane.b32.xlu1 %v16375_v16, %s9035_s21  ;;  %v16387_v18 = vld [vmem:[#allocation24_spill] sm:$0xff] }
 0x3b8   :  { %v16388_v16 = vld [vmem:[#allocation8_spill] sm:$0xff] }
 0x3b9   :  { %v2357_v41 = vpop.permute.xlu0 %2356  ;;  %v2359_v56 = vpop.permute.xlu1 %2358 }
 0x3ba   :  { %2489 = vst.msk [vmem:[#allocation4 + $0x1e0] sm:$0xff] %vm2428_vm10, %v2357_v41  ;;  %2490 = vst.msk [vmem:[#allocation4 + $0x1e8] sm:$0xff] %vm2428_vm10, %v2359_v56 }
 0x3bb   :  { %2613 = vrot.lane.b32.xlu0 %v16376_v40, %s9035_s21  ;;  %2615 = vrot.lane.b32.xlu1 %v16377_v27, %s9035_s21  ;;  %v16389_v40 = vld [vmem:[#allocation9_spill] sm:$0xff]  ;;  %v16390_v27 = vld [vmem:[#allocation26_spill] sm:$0xff] }
 0x3bd   :  { %v2361_v17 = vpop.permute.xlu0 %2360  ;;  %v2363_v54 = vpop.permute.xlu1 %2362 }
 0x3be   :  { %2491 = vst.msk [vmem:[#allocation4 + $0x1f0] sm:$0xff] %vm2428_vm10, %v2361_v17  ;;  %2492 = vst.msk [vmem:[#allocation4 + $0x1f8] sm:$0xff] %vm2428_vm10, %v2363_v54  ;;  %vm6244_vm10 = vcmask 523712  }
 0x3bf   :  { %2617 = vrot.lane.b32.xlu0 %v16378_v24, %s9035_s21  ;;  %2619 = vrot.lane.b32.xlu1 %v16379_v14, %s9035_s21  ;;  %v16391_v24 = vld [vmem:[#allocation10_spill] sm:$0xff]  ;;  %v16392_v14 = vld [vmem:[#allocation33_spill] sm:$0xff] }
 0x3c1   :  { %v2506_v46 = vpop.permute.xlu0 %2505  ;;  %v2508_v25 = vpop.permute.xlu1 %2507 }
 0x3c2   :  { %2698 = vst.msk [vmem:[#allocation4] sm:$0xff] %vm2697_vm11, %v2506_v46  ;;  %2699 = vst.msk [vmem:[#allocation4 + $0x8] sm:$0xff] %vm2697_vm11, %v2508_v25  ;;  %v16393_v46 = vld [vmem:[#allocation41_spill] sm:$0xff]  ;;  %v16394_v25 = vld [vmem:[#allocation123_spill] sm:$0xff] }
 0x3c3   :  { %2621 = vrot.lane.b32.xlu0 %v16252_v3, %s9035_s21  ;;  %2623 = vrot.lane.b32.xlu1 %v16253_v8, %s9035_s21  ;;  %v8696_v3 = vpack.c.bf16 %v3160_v61, %v3159_v12  ;;  %v16380_v8 = vld [vmem:[#allocation25_spill] sm:$0xff] }
 0x3c4   :  { %v16397_v61 = vld [vmem:[#allocation45_spill] sm:$0xff] }
 0x3c5   :  { %v2510_v13 = vpop.permute.xlu0 %2509  ;;  %v2512_v39 = vpop.permute.xlu1 %2511  ;;  %8697 = vmatprep.subr.bf16.mxu0 %v8696_v3 }
 0x3c6   :  { %2700 = vst.msk [vmem:[#allocation4 + $0x10] sm:$0xff] %vm2697_vm11, %v2510_v13  ;;  %2701 = vst.msk [vmem:[#allocation4 + $0x18] sm:$0xff] %vm2697_vm11, %v2512_v39  ;;  %8699 = vmatpush3.bf16.msra.mxu0 %v8696_v3  ;;  %v16398_v13 = vld [vmem:[#allocation125_spill] sm:$0xff] }
 0x3c7   :  { %2625 = vrot.lane.b32.xlu0 %v11110_v48, %s9035_s21  ;;  %2627 = vrot.lane.b32.xlu1 %v16380_v8, %s9035_s21  ;;  %v16399_v8 = vld [vmem:[#allocation50_spill] sm:$0xff] }
 0x3c8   :  { %8374 = vmatprep.subr.msk.mxu0 %vm3362_vm12, %v3161_v1 }
 0x3c9   :  { %v2514_v47 = vpop.permute.xlu0 %2513  ;;  %v2516_v11 = vpop.permute.xlu1 %2515 }
 0x3ca   :  { %2702 = vst.msk [vmem:[#allocation4 + $0x20] sm:$0xff] %vm2697_vm11, %v2514_v47  ;;  %2703 = vst.msk [vmem:[#allocation4 + $0x28] sm:$0xff] %vm2697_vm11, %v2516_v11  ;;  %8375 = vmatpush3.msk.msra.mxu0 %vm3362_vm12, %v3161_v1  ;;  %v16401_v11 = vld [vmem:[#allocation127_spill] sm:$0xff] }
 0x3cb   :  { %2629 = vrot.lane.b32.xlu0 %v2502_v55, %s9035_s21  ;;  %2631 = vrot.lane.b32.xlu1 %v2504_v30, %s9035_s21  ;;  %v16400_v55 = vld [vmem:[#allocation126_spill] sm:$0xff] }
 0x3cd   :  { %v2518_v48 = vpop.permute.xlu0 %2517  ;;  %v2520_v6 = vpop.permute.xlu1 %2519 }
 0x3ce   :  { %2704 = vst.msk [vmem:[#allocation4 + $0x30] sm:$0xff] %vm2697_vm11, %v2518_v48  ;;  %2705 = vst.msk [vmem:[#allocation4 + $0x38] sm:$0xff] %vm2697_vm11, %v2520_v6  ;;  %v16402_v6 = vld [vmem:[#allocation60_spill] sm:$0xff] }
 0x3cf   :  { %2772 = vrot.lane.b32.xlu0 %v16381_v36, %s9036_s24  ;;  %2774 = vrot.lane.b32.xlu1 %v16382_v4, %s9036_s24  ;;  %v16403_v36 = vld [vmem:[#allocation128_spill] sm:$0xff] }
 0x3d1   :  { %v2522_v58 = vpop.permute.xlu0 %2521  ;;  %v2524_v37 = vpop.permute.xlu1 %2523 }
 0x3d2   :  { %2706 = vst.msk [vmem:[#allocation4 + $0x40] sm:$0xff] %vm2697_vm11, %v2522_v58  ;;  %2707 = vst.msk [vmem:[#allocation4 + $0x48] sm:$0xff] %vm2697_vm11, %v2524_v37 }
 0x3d3   :  { %2776 = vrot.lane.b32.xlu0 %v16383_v42, %s9036_s24  ;;  %2778 = vrot.lane.b32.xlu1 %v16384_v0, %s9036_s24  ;;  %v2762_v42 = vrot.slane %v11419_v52, 2  ;;  %v2763_v0 = vrot.slane %v11421_v28, 2 }
 0x3d5   :  { %v2526_v43 = vpop.permute.xlu0 %2525  ;;  %v2528_v45 = vpop.permute.xlu1 %2527 }
 0x3d6   :  { %2708 = vst.msk [vmem:[#allocation4 + $0x50] sm:$0xff] %vm2697_vm11, %v2526_v43  ;;  %2709 = vst.msk [vmem:[#allocation4 + $0x58] sm:$0xff] %vm2697_vm11, %v2528_v45 }
 0x3d7   :  { %2780 = vrot.lane.b32.xlu0 %v16385_v50, %s9036_s24  ;;  %2782 = vrot.lane.b32.xlu1 %v16386_v51, %s9036_s24 }
 0x3d9   :  { %v2530_v23 = vpop.permute.xlu0 %2529  ;;  %v2532_v15 = vpop.permute.xlu1 %2531 }
 0x3da   :  { %2710 = vst.msk [vmem:[#allocation4 + $0x60] sm:$0xff] %vm2697_vm11, %v2530_v23  ;;  %2711 = vst.msk [vmem:[#allocation4 + $0x68] sm:$0xff] %vm2697_vm11, %v2532_v15  ;;  %v16406_v23 = vld [vmem:[#allocation130_spill] sm:$0xff]  ;;  %v16407_v15 = vld [vmem:[#allocation131_spill] sm:$0xff] }
 0x3db   :  { %2784 = vrot.lane.b32.xlu0 %v16387_v18, %s9036_s24  ;;  %2786 = vrot.lane.b32.xlu1 %v16388_v16, %s9036_s24 }
 0x3dd   :  { %v2534_v41 = vpop.permute.xlu0 %2533  ;;  %v2536_v56 = vpop.permute.xlu1 %2535 }
 0x3de   :  { %2712 = vst.msk [vmem:[#allocation4 + $0x70] sm:$0xff] %vm2697_vm11, %v2534_v41  ;;  %2713 = vst.msk [vmem:[#allocation4 + $0x78] sm:$0xff] %vm2697_vm11, %v2536_v56  ;;  %v16408_v41 = vld [vmem:[#allocation132_spill] sm:$0xff]  ;;  %v16409_v56 = vld [vmem:[#allocation133_spill] sm:$0xff] }
 0x3df   :  { %2788 = vrot.lane.b32.xlu0 %v16389_v40, %s9036_s24  ;;  %2790 = vrot.lane.b32.xlu1 %v16390_v27, %s9036_s24 }
 0x3e1   :  { %v2538_v17 = vpop.permute.xlu0 %2537  ;;  %v2540_v54 = vpop.permute.xlu1 %2539 }
 0x3e2   :  { %2714 = vst.msk [vmem:[#allocation4 + $0x80] sm:$0xff] %vm2697_vm11, %v2538_v17  ;;  %2715 = vst.msk [vmem:[#allocation4 + $0x88] sm:$0xff] %vm2697_vm11, %v2540_v54  ;;  %v16410_v17 = vld [vmem:[#allocation82_spill] sm:$0xff] }
 0x3e3   :  { %2792 = vrot.lane.b32.xlu0 %v16391_v24, %s9036_s24  ;;  %2794 = vrot.lane.b32.xlu1 %v16392_v14, %s9036_s24  ;;  %v16411_v54 = vld [vmem:[#allocation134_spill] sm:$0xff] }
 0x3e5   :  { %v2542_v32 = vpop.permute.xlu0 %2541  ;;  %v2544_v33 = vpop.permute.xlu1 %2543 }
 0x3e6   :  { %2716 = vst.msk [vmem:[#allocation4 + $0x90] sm:$0xff] %vm2697_vm11, %v2542_v32  ;;  %2717 = vst.msk [vmem:[#allocation4 + $0x98] sm:$0xff] %vm2697_vm11, %v2544_v33  ;;  %v16412_v32 = vld [vmem:[#allocation85_spill] sm:$0xff]  ;;  %v16413_v33 = vld [vmem:[#allocation135_spill] sm:$0xff] }
 0x3e7   :  { %2796 = vrot.lane.b32.xlu0 %v16393_v46, %s9036_s24  ;;  %2798 = vrot.lane.b32.xlu1 %v16394_v25, %s9036_s24 }
 0x3e9   :  { %v2546_v21 = vpop.permute.xlu0 %2545  ;;  %v2548_v31 = vpop.permute.xlu1 %2547 }
 0x3ea   :  { %2718 = vst.msk [vmem:[#allocation4 + $0xa0] sm:$0xff] %vm2697_vm11, %v2546_v21  ;;  %2719 = vst.msk [vmem:[#allocation4 + $0xa8] sm:$0xff] %vm2697_vm11, %v2548_v31  ;;  %v16414_v21 = vld [vmem:[#allocation88_spill] sm:$0xff] }
 0x3eb   :  { %2800 = vrot.lane.b32.xlu0 %v16395_v19, %s9036_s24  ;;  %2802 = vrot.lane.b32.xlu1 %v16396_v20, %s9036_s24  ;;  %v16415_v31 = vld [vmem:[#allocation136_spill] sm:$0xff] }
 0x3ed   :  { %v2550_v10 = vpop.permute.xlu0 %2549  ;;  %v2552_v12 = vpop.permute.xlu1 %2551 }
 0x3ee   :  { %2720 = vst.msk [vmem:[#allocation4 + $0xb0] sm:$0xff] %vm2697_vm11, %v2550_v10  ;;  %2721 = vst.msk [vmem:[#allocation4 + $0xb8] sm:$0xff] %vm2697_vm11, %v2552_v12  ;;  %v16416_v10 = vld [vmem:[#allocation91_spill] sm:$0xff]  ;;  %v16417_v12 = vld [vmem:[#allocation137_spill] sm:$0xff] }
 0x3ef   :  { %2804 = vrot.lane.b32.xlu0 %v16397_v61, %s9036_s24  ;;  %2806 = vrot.lane.b32.xlu1 %v16398_v13, %s9036_s24 }
 0x3f1   :  { %v2554_v39 = vpop.permute.xlu0 %2553  ;;  %v2556_v3 = vpop.permute.xlu1 %2555 }
 0x3f2   :  { %2722 = vst.msk [vmem:[#allocation4 + $0xc0] sm:$0xff] %vm2697_vm11, %v2554_v39  ;;  %2723 = vst.msk [vmem:[#allocation4 + $0xc8] sm:$0xff] %vm2697_vm11, %v2556_v3  ;;  %v16418_v39 = vld [vmem:[#allocation138_spill] sm:$0xff] }
 0x3f3   :  { %2808 = vrot.lane.b32.xlu0 %v16399_v8, %s9036_s24  ;;  %2810 = vrot.lane.b32.xlu1 %v16400_v55, %s9036_s24  ;;  %v16419_v55 = vld [vmem:[#allocation139_spill] sm:$0xff] }
 0x3f5   :  { %v2558_v30 = vpop.permute.xlu0 %2557  ;;  %v2560_v47 = vpop.permute.xlu1 %2559 }
 0x3f6   :  { %2724 = vst.msk [vmem:[#allocation4 + $0xd0] sm:$0xff] %vm2697_vm11, %v2558_v30  ;;  %2725 = vst.msk [vmem:[#allocation4 + $0xd8] sm:$0xff] %vm2697_vm11, %v2560_v47 }
 0x3f7   :  { %2812 = vrot.lane.b32.xlu0 %v16277_v5, %s9036_s24  ;;  %2814 = vrot.lane.b32.xlu1 %v16401_v11, %s9036_s24 }
 0x3f9   :  { %v2562_v1 = vpop.permute.xlu0 %2561  ;;  %v2564_v48 = vpop.permute.xlu1 %2563 }
 0x3fa   :  { %2726 = vst.msk [vmem:[#allocation4 + $0xe0] sm:$0xff] %vm2697_vm11, %v2562_v1  ;;  %2727 = vst.msk [vmem:[#allocation4 + $0xe8] sm:$0xff] %vm2697_vm11, %v2564_v48 }
 0x3fb   :  { %2816 = vrot.lane.b32.xlu0 %v16402_v6, %s9036_s24  ;;  %2818 = vrot.lane.b32.xlu1 %v16403_v36, %s9036_s24  ;;  %v16423_v36 = vld [vmem:[#allocation140_spill] sm:$0xff] }
 0x3fd   :  { %v2566_v4 = vpop.permute.xlu0 %2565  ;;  %v2568_v58 = vpop.permute.xlu1 %2567 }
 0x3fe   :  { %2728 = vst.msk [vmem:[#allocation4 + $0xf0] sm:$0xff] %vm2697_vm11, %v2566_v4  ;;  %2729 = vst.msk [vmem:[#allocation4 + $0xf8] sm:$0xff] %vm2697_vm11, %v2568_v58 }
 0x3ff   :  { %2820 = vrot.lane.b32.xlu0 %v10442_v26, %s9036_s24  ;;  %2822 = vrot.lane.b32.xlu1 %v10445_v29, %s9036_s24  ;;  %v2765_v26 = vrot.slane %v11605_v9, 2 }
 0x401   :  { %v2570_v5 = vpop.permute.xlu0 %2569  ;;  %v2572_v37 = vpop.permute.xlu1 %2571 }
 0x402   :  { %2730 = vst.msk [vmem:[#allocation4 + $0x100] sm:$0xff] %vm2697_vm11, %v2570_v5  ;;  %2731 = vst.msk [vmem:[#allocation4 + $0x108] sm:$0xff] %vm2697_vm11, %v2572_v37 }
 0x403   :  { %2824 = vrot.lane.b32.xlu0 %v10457_v44, %s9036_s24  ;;  %2826 = vrot.lane.b32.xlu1 %v10460_v38, %s9036_s24  ;;  %v2764_v44 = vsel %vm1017_vm4, %v2762_v42, %v2763_v0  ;;  %v2766_v38 = vsel %vm1017_vm4, %v2763_v0, %v2765_v26 }
 0x405   :  { %v2574_v43 = vpop.permute.xlu0 %2573  ;;  %v2576_v29 = vpop.permute.xlu1 %2575 }
 0x406   :  { %2732 = vst.msk [vmem:[#allocation4 + $0x110] sm:$0xff] %vm2697_vm11, %v2574_v43  ;;  %2733 = vst.msk [vmem:[#allocation4 + $0x118] sm:$0xff] %vm2697_vm11, %v2576_v29 }
 0x407   :  { %2828 = vrot.lane.b32.xlu0 %v11215_v22, %s9036_s24  ;;  %2830 = vrot.lane.b32.xlu1 %v11218_v49, %s9036_s24  ;;  %v16404_v22 = vld [vmem:[#allocation71_spill] sm:$0xff]  ;;  %v16405_v49 = vld [vmem:[#allocation129_spill] sm:$0xff] }
 0x409   :  { %v2578_v52 = vpop.permute.xlu0 %2577  ;;  %v2580_v28 = vpop.permute.xlu1 %2579 }
 0x40a   :  { %2734 = vst.msk [vmem:[#allocation4 + $0x120] sm:$0xff] %vm2697_vm11, %v2578_v52  ;;  %2735 = vst.msk [vmem:[#allocation4 + $0x128] sm:$0xff] %vm2697_vm11, %v2580_v28 }
 0x40b   :  { %2832 = vrot.lane.b32.xlu0 %v2764_v44, %s9036_s24  ;;  %2834 = vrot.lane.b32.xlu1 %v2766_v38, %s9036_s24 }
 0x40d   :  { %v2582_v9 = vpop.permute.xlu0 %2581  ;;  %v2584_v45 = vpop.permute.xlu1 %2583 }
 0x40e   :  { %2736 = vst.msk [vmem:[#allocation4 + $0x130] sm:$0xff] %vm2697_vm11, %v2582_v9  ;;  %2737 = vst.msk [vmem:[#allocation4 + $0x138] sm:$0xff] %vm2697_vm11, %v2584_v45 }
 0x40f   :  { %2836 = vrot.lane.b32.xlu0 %v16404_v22, %s9036_s24  ;;  %2838 = vrot.lane.b32.xlu1 %v16405_v49, %s9036_s24 }
 0x411   :  { %v2586_v50 = vpop.permute.xlu0 %2585  ;;  %v2588_v51 = vpop.permute.xlu1 %2587 }
 0x412   :  { %2738 = vst.msk [vmem:[#allocation4 + $0x140] sm:$0xff] %vm2697_vm11, %v2586_v50  ;;  %2739 = vst.msk [vmem:[#allocation4 + $0x148] sm:$0xff] %vm2697_vm11, %v2588_v51 }
 0x413   :  { %2840 = vrot.lane.b32.xlu0 %v16406_v23, %s9036_s24  ;;  %2842 = vrot.lane.b32.xlu1 %v16407_v15, %s9036_s24 }
 0x415   :  { %v2590_v18 = vpop.permute.xlu0 %2589  ;;  %v2592_v16 = vpop.permute.xlu1 %2591 }
 0x416   :  { %2740 = vst.msk [vmem:[#allocation4 + $0x150] sm:$0xff] %vm2697_vm11, %v2590_v18  ;;  %2741 = vst.msk [vmem:[#allocation4 + $0x158] sm:$0xff] %vm2697_vm11, %v2592_v16 }
 0x417   :  { %2844 = vrot.lane.b32.xlu0 %v16408_v41, %s9036_s24  ;;  %2846 = vrot.lane.b32.xlu1 %v16409_v56, %s9036_s24 }
 0x419   :  { %v2594_v40 = vpop.permute.xlu0 %2593  ;;  %v2596_v27 = vpop.permute.xlu1 %2595 }
 0x41a   :  { %2742 = vst.msk [vmem:[#allocation4 + $0x160] sm:$0xff] %vm2697_vm11, %v2594_v40  ;;  %2743 = vst.msk [vmem:[#allocation4 + $0x168] sm:$0xff] %vm2697_vm11, %v2596_v27 }
 0x41b   :  { %2848 = vrot.lane.b32.xlu0 %v16410_v17, %s9036_s24  ;;  %2850 = vrot.lane.b32.xlu1 %v16411_v54, %s9036_s24 }
 0x41d   :  { %v2598_v24 = vpop.permute.xlu0 %2597  ;;  %v2600_v14 = vpop.permute.xlu1 %2599 }
 0x41e   :  { %2744 = vst.msk [vmem:[#allocation4 + $0x170] sm:$0xff] %vm2697_vm11, %v2598_v24  ;;  %2745 = vst.msk [vmem:[#allocation4 + $0x178] sm:$0xff] %vm2697_vm11, %v2600_v14 }
 0x41f   :  { %2852 = vrot.lane.b32.xlu0 %v16412_v32, %s9036_s24  ;;  %2854 = vrot.lane.b32.xlu1 %v16413_v33, %s9036_s24 }
 0x421   :  { %v2602_v46 = vpop.permute.xlu0 %2601  ;;  %v2604_v25 = vpop.permute.xlu1 %2603 }
 0x422   :  { %2746 = vst.msk [vmem:[#allocation4 + $0x180] sm:$0xff] %vm2697_vm11, %v2602_v46  ;;  %2747 = vst.msk [vmem:[#allocation4 + $0x188] sm:$0xff] %vm2697_vm11, %v2604_v25 }
 0x423   :  { %2856 = vrot.lane.b32.xlu0 %v16414_v21, %s9036_s24  ;;  %2858 = vrot.lane.b32.xlu1 %v16415_v31, %s9036_s24 }
 0x425   :  { %v2606_v19 = vpop.permute.xlu0 %2605  ;;  %v2608_v20 = vpop.permute.xlu1 %2607 }
 0x426   :  { %2748 = vst.msk [vmem:[#allocation4 + $0x190] sm:$0xff] %vm2697_vm11, %v2606_v19  ;;  %2749 = vst.msk [vmem:[#allocation4 + $0x198] sm:$0xff] %vm2697_vm11, %v2608_v20 }
 0x427   :  { %2860 = vrot.lane.b32.xlu0 %v16416_v10, %s9036_s24  ;;  %2862 = vrot.lane.b32.xlu1 %v16417_v12, %s9036_s24 }
 0x429   :  { %v2610_v61 = vpop.permute.xlu0 %2609  ;;  %v2612_v13 = vpop.permute.xlu1 %2611 }
 0x42a   :  { %2750 = vst.msk [vmem:[#allocation4 + $0x1a0] sm:$0xff] %vm2697_vm11, %v2610_v61  ;;  %2751 = vst.msk [vmem:[#allocation4 + $0x1a8] sm:$0xff] %vm2697_vm11, %v2612_v13 }
 0x42b   :  { %2864 = vrot.lane.b32.xlu0 %v16297_v62, %s9036_s24  ;;  %2866 = vrot.lane.b32.xlu1 %v16418_v39, %s9036_s24  ;;  %v16420_v62 = vld [vmem:[#allocation100_spill] sm:$0xff] }
 0x42d   :  { %v2614_v3 = vpop.permute.xlu0 %2613  ;;  %v2616_v8 = vpop.permute.xlu1 %2615 }
 0x42e   :  { %2752 = vst.msk [vmem:[#allocation4 + $0x1b0] sm:$0xff] %vm2697_vm11, %v2614_v3  ;;  %2753 = vst.msk [vmem:[#allocation4 + $0x1b8] sm:$0xff] %vm2697_vm11, %v2616_v8 }
 0x42f   :  { %2868 = vrot.lane.b32.xlu0 %v16299_v35, %s9036_s24  ;;  %2870 = vrot.lane.b32.xlu1 %v16419_v55, %s9036_s24  ;;  %v16421_v35 = vld [vmem:[#allocation103_spill] sm:$0xff] }
 0x431   :  { %v2618_v30 = vpop.permute.xlu0 %2617  ;;  %v2620_v47 = vpop.permute.xlu1 %2619 }
 0x432   :  { %2754 = vst.msk [vmem:[#allocation4 + $0x1c0] sm:$0xff] %vm2697_vm11, %v2618_v30  ;;  %2755 = vst.msk [vmem:[#allocation4 + $0x1c8] sm:$0xff] %vm2697_vm11, %v2620_v47 }
 0x433   :  { %2872 = vrot.lane.b32.xlu0 %v10630_v53, %s9036_s24  ;;  %2874 = vrot.lane.b32.xlu1 %v16420_v62, %s9036_s24  ;;  %v16422_v53 = vld [vmem:[#allocation106_spill] sm:$0xff] }
 0x435   :  { %v2622_v11 = vpop.permute.xlu0 %2621  ;;  %v2624_v1 = vpop.permute.xlu1 %2623 }
 0x436   :  { %2756 = vst.msk [vmem:[#allocation4 + $0x1d0] sm:$0xff] %vm2697_vm11, %v2622_v11  ;;  %2757 = vst.msk [vmem:[#allocation4 + $0x1d8] sm:$0xff] %vm2697_vm11, %v2624_v1 }
 0x437   :  { %2876 = vrot.lane.b32.xlu0 %v10643_v60, %s9036_s24  ;;  %2878 = vrot.lane.b32.xlu1 %v16421_v35, %s9036_s24 }
 0x439   :  { %v2626_v48 = vpop.permute.xlu0 %2625  ;;  %v2628_v6 = vpop.permute.xlu1 %2627 }
 0x43a   :  { %2758 = vst.msk [vmem:[#allocation4 + $0x1e0] sm:$0xff] %vm2697_vm11, %v2626_v48  ;;  %2759 = vst.msk [vmem:[#allocation4 + $0x1e8] sm:$0xff] %vm2697_vm11, %v2628_v6 }
 0x43b   :  { %2880 = vrot.lane.b32.xlu0 %v16422_v53, %s9036_s24  ;;  %2882 = vrot.lane.b32.xlu1 %v16423_v36, %s9036_s24 }
 0x43d   :  { %v2630_v4 = vpop.permute.xlu0 %2629  ;;  %v2632_v58 = vpop.permute.xlu1 %2631 }
 0x43e   :  { %2760 = vst.msk [vmem:[#allocation4 + $0x1f0] sm:$0xff] %vm2697_vm11, %v2630_v4  ;;  %2761 = vst.msk [vmem:[#allocation4 + $0x1f8] sm:$0xff] %vm2697_vm11, %v2632_v58  ;;  %vm6511_vm11 = vcmask 589312  }
 0x43f   :  { %2884 = vrot.lane.b32.xlu0 %v10676_v63, %s9036_s24  ;;  %2886 = vrot.lane.b32.xlu1 %v10683_v2, %s9036_s24  ;;  %v16424_v63 = vmov 0.0  }
 0x440   :  { %115 = vst.msk [vmem:[#allocation3] sm:$0xff] %vm114_vm14, %v16424_v63  ;;  %116 = vst.msk [vmem:[#allocation3 + $0x8] sm:$0xff] %vm114_vm14, %v16424_v63 }
 0x441   :  { %v2773_v60 = vpop.permute.xlu0 %2772  ;;  %v2775_v5 = vpop.permute.xlu1 %2774  ;;  %119 = vst.msk [vmem:[#allocation3 + $0x1b0] sm:$0xff] %vm114_vm14, %v16424_v63  ;;  %120 = vst.msk [vmem:[#allocation3 + $0x1b8] sm:$0xff] %vm114_vm14, %v16424_v63 }
 0x442   :  { %2965 = vst.msk [vmem:[#allocation4] sm:$0xff] %vm2964_vm13, %v2773_v60  ;;  %2966 = vst.msk [vmem:[#allocation4 + $0x8] sm:$0xff] %vm2964_vm13, %v2775_v5 }
 0x443   :  { %2888 = vrot.lane.b32.xlu0 %v10696_v57, %s9036_s24  ;;  %2890 = vrot.lane.b32.xlu1 %v10699_v59, %s9036_s24  ;;  %123 = vst.msk [vmem:[#allocation3 + $0x198] sm:$0xff] %vm114_vm14, %v16424_v63  ;;  %124 = vst.msk [vmem:[#allocation3 + $0x1a0] sm:$0xff] %vm114_vm14, %v16424_v63 }
 0x444   :  { %126 = vst.msk [vmem:[#allocation3 + $0x348] sm:$0xff] %vm114_vm14, %v16424_v63  ;;  %127 = vst.msk [vmem:[#allocation3 + $0x350] sm:$0xff] %vm114_vm14, %v16424_v63 }
 0x445   :  { %v2777_v37 = vpop.permute.xlu0 %2776  ;;  %v2779_v42 = vpop.permute.xlu1 %2778  ;;  %118 = vst.msk [vmem:[#allocation3 + $0x10] sm:$0x3] %vm117_vm0, %v16424_v63  ;;  %121 = vst.msk [vmem:[#allocation3 + $0x1c0] sm:$0x3] %vm117_vm0, %v16424_v63 }
 0x446   :  { %2967 = vst.msk [vmem:[#allocation4 + $0x10] sm:$0xff] %vm2964_vm13, %v2777_v37  ;;  %2968 = vst.msk [vmem:[#allocation4 + $0x18] sm:$0xff] %vm2964_vm13, %v2779_v42 }
 0x447   :  { %2892 = vrot.lane.b32.xlu0 %v11320_v34, %s9036_s24  ;;  %2894 = vrot.lane.b32.xlu1 %v11323_v7, %s9036_s24  ;;  %125 = vst.msk [vmem:[#allocation3 + $0x1a8] sm:$0x3] %vm117_vm0, %v16424_v63  ;;  %128 = vst.msk [vmem:[#allocation3 + $0x358] sm:$0x3] %vm117_vm0, %v16424_v63 }
 0x448   :  { %130 = vst.msk [vmem:[#allocation3] sm:$0x1] %vm129_vm1, %v16424_v63  ;;  %131 = vst.msk [vmem:[#allocation3 + $0x18] sm:$0x1] %vm129_vm1, %v16424_v63 }
 0x449   :  { %v2781_v2 = vpop.permute.xlu0 %2780  ;;  %v2783_v57 = vpop.permute.xlu1 %2782  ;;  %v3029_v59 = vld [vmem:[#allocation4] sm:$0xff]  ;;  %v3030_v0 = vld [vmem:[#allocation4 + $0x8] sm:$0xff]  ;;  %132 = vst.msk [vmem:[#allocation3 + $0x30] sm:$0x1] %vm129_vm1, %v16424_v63  ;;  %133 = vst.msk [vmem:[#allocation3 + $0x48] sm:$0x1] %vm129_vm1, %v16424_v63 }
 0x44a   :  { %2969 = vst.msk [vmem:[#allocation4 + $0x20] sm:$0xff] %vm2964_vm13, %v2781_v2  ;;  %2970 = vst.msk [vmem:[#allocation4 + $0x28] sm:$0xff] %vm2964_vm13, %v2783_v57  ;;  %v3093_v26 = vmax.f32 %v3029_v59, 0.0  ;;  %v3094_v43 = vmax.f32 %v3030_v0, 0.0 }
 0x44b   :  { %134 = vst.msk [vmem:[#allocation3 + $0x60] sm:$0x1] %vm129_vm1, %v16424_v63  ;;  %135 = vst.msk [vmem:[#allocation3 + $0x78] sm:$0x1] %vm129_vm1, %v16424_v63 }
 0x44c   :  { %8376 = vmatprep.mubr.msk.f32.mxu0 %vm3169_vm15, %v3093_v26  ;;  %136 = vst.msk [vmem:[#allocation3 + $0x90] sm:$0x1] %vm129_vm1, %v16424_v63  ;;  %137 = vst.msk [vmem:[#allocation3 + $0xa8] sm:$0x1] %vm129_vm1, %v16424_v63 }
 0x44d   :  { %v2785_v29 = vpop.permute.xlu0 %2784  ;;  %8377 = vmatmul.mubr.msk.f32.vlgmr.msra.gmra.mrb[0].mxu0 %vm3169_vm15, %v3094_v43  ;;  %v2787_v34 = vpop.permute.xlu1 %2786  ;;  %v3031_v44 = vld [vmem:[#allocation4 + $0x10] sm:$0xff]  ;;  %v3032_v38 = vld [vmem:[#allocation4 + $0x18] sm:$0xff]  ;;  %138 = vst.msk [vmem:[#allocation3 + $0xc0] sm:$0x1] %vm129_vm1, %v16424_v63  ;;  %139 = vst.msk [vmem:[#allocation3 + $0xd8] sm:$0x1] %vm129_vm1, %v16424_v63 }
 0x44e   :  { %2971 = vst.msk [vmem:[#allocation4 + $0x30] sm:$0xff] %vm2964_vm13, %v2785_v29  ;;  %2972 = vst.msk [vmem:[#allocation4 + $0x38] sm:$0xff] %vm2964_vm13, %v2787_v34  ;;  %v3095_v7 = vmax.f32 %v3031_v44, 0.0  ;;  %v3096_v52 = vmax.f32 %v3032_v38, 0.0 }
 0x44f   :  { %140 = vst.msk [vmem:[#allocation3 + $0xf0] sm:$0x1] %vm129_vm1, %v16424_v63  ;;  %141 = vst.msk [vmem:[#allocation3 + $0x108] sm:$0x1] %vm129_vm1, %v16424_v63 }
 0x450   :  { %8379 = vmatprep.mubr.msk.f32.mxu0 %vm3169_vm15, %v3095_v7  ;;  %142 = vst.msk [vmem:[#allocation3 + $0x120] sm:$0x1] %vm129_vm1, %v16424_v63  ;;  %143 = vst.msk [vmem:[#allocation3 + $0x138] sm:$0x1] %vm129_vm1, %v16424_v63 }
 0x451   :  { %v2789_v28 = vpop.permute.xlu0 %2788  ;;  %8380 = vmatmul.mubr.msk.f32.gmra.mrb[2].mxu0 %vm3169_vm15, %v3096_v52  ;;  %v2791_v9 = vpop.permute.xlu1 %2790  ;;  %v3033_v45 = vld [vmem:[#allocation4 + $0x20] sm:$0xff]  ;;  %v3034_v22 = vld [vmem:[#allocation4 + $0x28] sm:$0xff]  ;;  %144 = vst.msk [vmem:[#allocation3 + $0x150] sm:$0x1] %vm129_vm1, %v16424_v63  ;;  %145 = vst.msk [vmem:[#allocation3 + $0x168] sm:$0x1] %vm129_vm1, %v16424_v63 }
 0x452   :  { %2973 = vst.msk [vmem:[#allocation4 + $0x40] sm:$0xff] %vm2964_vm13, %v2789_v28  ;;  %2974 = vst.msk [vmem:[#allocation4 + $0x48] sm:$0xff] %vm2964_vm13, %v2791_v9  ;;  %v3097_v49 = vmax.f32 %v3033_v45, 0.0  ;;  %v3098_v50 = vmax.f32 %v3034_v22, 0.0 }
 0x453   :  { %146 = vst.msk [vmem:[#allocation3 + $0x180] sm:$0x1] %vm129_vm1, %v16424_v63  ;;  %147 = vst.msk [vmem:[#allocation3 + $0x198] sm:$0x1] %vm129_vm1, %v16424_v63 }
 0x454   :  { %8382 = vmatprep.mubr.msk.f32.mxu0 %vm3169_vm15, %v3097_v49  ;;  %148 = vst.msk [vmem:[#allocation3 + $0x1b0] sm:$0x1] %vm129_vm1, %v16424_v63  ;;  %149 = vst.msk [vmem:[#allocation3 + $0x1c8] sm:$0x1] %vm129_vm1, %v16424_v63 }
 0x455   :  { %v2793_v51 = vpop.permute.xlu0 %2792  ;;  %8383 = vmatmul.mubr.msk.f32.gmra.mrb[4].mxu0 %vm3169_vm15, %v3098_v50  ;;  %v2795_v23 = vpop.permute.xlu1 %2794  ;;  %v3035_v15 = vld [vmem:[#allocation4 + $0x30] sm:$0xff]  ;;  %v3036_v18 = vld [vmem:[#allocation4 + $0x38] sm:$0xff]  ;;  %150 = vst.msk [vmem:[#allocation3 + $0x1e0] sm:$0x1] %vm129_vm1, %v16424_v63  ;;  %151 = vst.msk [vmem:[#allocation3 + $0x1f8] sm:$0x1] %vm129_vm1, %v16424_v63 }
 0x456   :  { %2975 = vst.msk [vmem:[#allocation4 + $0x50] sm:$0xff] %vm2964_vm13, %v2793_v51  ;;  %2976 = vst.msk [vmem:[#allocation4 + $0x58] sm:$0xff] %vm2964_vm13, %v2795_v23  ;;  %v3099_v16 = vmax.f32 %v3035_v15, 0.0  ;;  %v3100_v41 = vmax.f32 %v3036_v18, 0.0 }
 0x457   :  { %152 = vst.msk [vmem:[#allocation3 + $0x210] sm:$0x1] %vm129_vm1, %v16424_v63  ;;  %153 = vst.msk [vmem:[#allocation3 + $0x228] sm:$0x1] %vm129_vm1, %v16424_v63 }
 0x458   :  { %8385 = vmatprep.mubr.msk.f32.mxu0 %vm3169_vm15, %v3099_v16  ;;  %154 = vst.msk [vmem:[#allocation3 + $0x240] sm:$0x1] %vm129_vm1, %v16424_v63  ;;  %155 = vst.msk [vmem:[#allocation3 + $0x258] sm:$0x1] %vm129_vm1, %v16424_v63 }
 0x459   :  { %v2797_v56 = vpop.permute.xlu0 %2796  ;;  %8386 = vmatmul.mubr.msk.f32.gmra.mrb[6].mxu0 %vm3169_vm15, %v3100_v41  ;;  %v2799_v40 = vpop.permute.xlu1 %2798  ;;  %v3037_v27 = vld [vmem:[#allocation4 + $0x40] sm:$0xff]  ;;  %v3038_v17 = vld [vmem:[#allocation4 + $0x48] sm:$0xff]  ;;  %156 = vst.msk [vmem:[#allocation3 + $0x270] sm:$0x1] %vm129_vm1, %v16424_v63  ;;  %157 = vst.msk [vmem:[#allocation3 + $0x288] sm:$0x1] %vm129_vm1, %v16424_v63 }
 0x45a   :  { %2977 = vst.msk [vmem:[#allocation4 + $0x60] sm:$0xff] %vm2964_vm13, %v2797_v56  ;;  %2978 = vst.msk [vmem:[#allocation4 + $0x68] sm:$0xff] %vm2964_vm13, %v2799_v40  ;;  %v3101_v54 = vmax.f32 %v3037_v27, 0.0  ;;  %v3102_v24 = vmax.f32 %v3038_v17, 0.0 }
 0x45b   :  { %158 = vst.msk [vmem:[#allocation3 + $0x2a0] sm:$0x1] %vm129_vm1, %v16424_v63  ;;  %159 = vst.msk [vmem:[#allocation3 + $0x2b8] sm:$0x1] %vm129_vm1, %v16424_v63 }
 0x45c   :  { %8388 = vmatprep.mubr.msk.f32.mxu0 %vm3169_vm15, %v3101_v54  ;;  %160 = vst.msk [vmem:[#allocation3 + $0x2d0] sm:$0x1] %vm129_vm1, %v16424_v63  ;;  %161 = vst.msk [vmem:[#allocation3 + $0x2e8] sm:$0x1] %vm129_vm1, %v16424_v63 }
 0x45d   :  { %v2801_v14 = vpop.permute.xlu0 %2800  ;;  %8389 = vmatmul.mubr.msk.f32.gmra.mrb[8].mxu0 %vm3169_vm15, %v3102_v24  ;;  %v2803_v32 = vpop.permute.xlu1 %2802  ;;  %v3039_v33 = vld [vmem:[#allocation4 + $0x50] sm:$0xff]  ;;  %v3040_v46 = vld [vmem:[#allocation4 + $0x58] sm:$0xff]  ;;  %162 = vst.msk [vmem:[#allocation3 + $0x300] sm:$0x1] %vm129_vm1, %v16424_v63  ;;  %163 = vst.msk [vmem:[#allocation3 + $0x318] sm:$0x1] %vm129_vm1, %v16424_v63 }
 0x45e   :  { %2979 = vst.msk [vmem:[#allocation4 + $0x70] sm:$0xff] %vm2964_vm13, %v2801_v14  ;;  %2980 = vst.msk [vmem:[#allocation4 + $0x78] sm:$0xff] %vm2964_vm13, %v2803_v32  ;;  %v3103_v25 = vmax.f32 %v3039_v33, 0.0  ;;  %v3104_v21 = vmax.f32 %v3040_v46, 0.0 }
 0x45f   :  { %164 = vst.msk [vmem:[#allocation3 + $0x330] sm:$0x1] %vm129_vm1, %v16424_v63  ;;  %165 = vst.msk [vmem:[#allocation3 + $0x348] sm:$0x1] %vm129_vm1, %v16424_v63 }
 0x460   :  { %8391 = vmatprep.mubr.msk.f32.mxu0 %vm3169_vm15, %v3103_v25  ;;  %167 = vst.msk [vmem:[#allocation3 + $0x29] sm:$0x1] %vm129_vm1, %v16424_v63  ;;  %168 = vst.msk [vmem:[#allocation3 + $0x41] sm:$0x1] %vm129_vm1, %v16424_v63 }
 0x461   :  { %v2805_v31 = vpop.permute.xlu0 %2804  ;;  %8392 = vmatmul.mubr.msk.f32.gmra.mrb[10].mxu0 %vm3169_vm15, %v3104_v21  ;;  %v2807_v19 = vpop.permute.xlu1 %2806  ;;  %v3041_v20 = vld [vmem:[#allocation4 + $0x60] sm:$0xff]  ;;  %v3042_v10 = vld [vmem:[#allocation4 + $0x68] sm:$0xff]  ;;  %169 = vst.msk [vmem:[#allocation3 + $0x59] sm:$0x1] %vm129_vm1, %v16424_v63  ;;  %170 = vst.msk [vmem:[#allocation3 + $0x71] sm:$0x1] %vm129_vm1, %v16424_v63 }
 0x462   :  { %2981 = vst.msk [vmem:[#allocation4 + $0x80] sm:$0xff] %vm2964_vm13, %v2805_v31  ;;  %2982 = vst.msk [vmem:[#allocation4 + $0x88] sm:$0xff] %vm2964_vm13, %v2807_v19  ;;  %v3105_v12 = vmax.f32 %v3041_v20, 0.0  ;;  %v3106_v61 = vmax.f32 %v3042_v10, 0.0 }
 0x463   :  { %171 = vst.msk [vmem:[#allocation3 + $0x89] sm:$0x1] %vm129_vm1, %v16424_v63  ;;  %172 = vst.msk [vmem:[#allocation3 + $0xa1] sm:$0x1] %vm129_vm1, %v16424_v63 }
 0x464   :  { %8394 = vmatprep.mubr.msk.f32.mxu0 %vm3169_vm15, %v3105_v12  ;;  %173 = vst.msk [vmem:[#allocation3 + $0xb9] sm:$0x1] %vm129_vm1, %v16424_v63  ;;  %174 = vst.msk [vmem:[#allocation3 + $0xd1] sm:$0x1] %vm129_vm1, %v16424_v63 }
 0x465   :  { %v2809_v13 = vpop.permute.xlu0 %2808  ;;  %8395 = vmatmul.mubr.msk.f32.gmra.mrb[12].mxu0 %vm3169_vm15, %v3106_v61  ;;  %v2811_v39 = vpop.permute.xlu1 %2810  ;;  %v3043_v3 = vld [vmem:[#allocation4 + $0x70] sm:$0xff]  ;;  %v3044_v8 = vld [vmem:[#allocation4 + $0x78] sm:$0xff]  ;;  %175 = vst.msk [vmem:[#allocation3 + $0xe9] sm:$0x1] %vm129_vm1, %v16424_v63  ;;  %176 = vst.msk [vmem:[#allocation3 + $0x101] sm:$0x1] %vm129_vm1, %v16424_v63 }
 0x466   :  { %2983 = vst.msk [vmem:[#allocation4 + $0x90] sm:$0xff] %vm2964_vm13, %v2809_v13  ;;  %2984 = vst.msk [vmem:[#allocation4 + $0x98] sm:$0xff] %vm2964_vm13, %v2811_v39  ;;  %v3107_v55 = vmax.f32 %v3043_v3, 0.0  ;;  %v3108_v30 = vmax.f32 %v3044_v8, 0.0 }
 0x467   :  { %177 = vst.msk [vmem:[#allocation3 + $0x119] sm:$0x1] %vm129_vm1, %v16424_v63  ;;  %178 = vst.msk [vmem:[#allocation3 + $0x131] sm:$0x1] %vm129_vm1, %v16424_v63 }
 0x468   :  { %8397 = vmatprep.mubr.msk.f32.mxu0 %vm3169_vm15, %v3107_v55  ;;  %179 = vst.msk [vmem:[#allocation3 + $0x149] sm:$0x1] %vm129_vm1, %v16424_v63  ;;  %180 = vst.msk [vmem:[#allocation3 + $0x161] sm:$0x1] %vm129_vm1, %v16424_v63 }
 0x469   :  { %v2813_v47 = vpop.permute.xlu0 %2812  ;;  %8398 = vmatmul.mubr.msk.f32.gmra.mrb[14].mxu0 %vm3169_vm15, %v3108_v30  ;;  %v2815_v62 = vpop.permute.xlu1 %2814  ;;  %v3045_v11 = vld [vmem:[#allocation4 + $0x80] sm:$0xff]  ;;  %v3046_v1 = vld [vmem:[#allocation4 + $0x88] sm:$0xff]  ;;  %181 = vst.msk [vmem:[#allocation3 + $0x179] sm:$0x1] %vm129_vm1, %v16424_v63  ;;  %182 = vst.msk [vmem:[#allocation3 + $0x191] sm:$0x1] %vm129_vm1, %v16424_v63 }
 0x46a   :  { %2985 = vst.msk [vmem:[#allocation4 + $0xa0] sm:$0xff] %vm2964_vm13, %v2813_v47  ;;  %2986 = vst.msk [vmem:[#allocation4 + $0xa8] sm:$0xff] %vm2964_vm13, %v2815_v62  ;;  %v3109_v35 = vmax.f32 %v3045_v11, 0.0  ;;  %v3110_v48 = vmax.f32 %v3046_v1, 0.0 }
 0x46b   :  { %185 = vst.msk [vmem:[#allocation3 + $0x1d9] sm:$0x1] %vm129_vm1, %v16424_v63  ;;  %186 = vst.msk [vmem:[#allocation3 + $0x1f1] sm:$0x1] %vm129_vm1, %v16424_v63 }
 0x46c   :  { %8400 = vmatprep.mubr.msk.f32.mxu0 %vm3169_vm15, %v3109_v35  ;;  %187 = vst.msk [vmem:[#allocation3 + $0x209] sm:$0x1] %vm129_vm1, %v16424_v63  ;;  %188 = vst.msk [vmem:[#allocation3 + $0x221] sm:$0x1] %vm129_vm1, %v16424_v63 }
 0x46d   :  { %v2817_v6 = vpop.permute.xlu0 %2816  ;;  %8401 = vmatmul.mubr.msk.f32.gmra.mrb[16].mxu0 %vm3169_vm15, %v3110_v48  ;;  %v2819_v53 = vpop.permute.xlu1 %2818  ;;  %v3047_v36 = vld [vmem:[#allocation4 + $0x90] sm:$0xff]  ;;  %v3048_v4 = vld [vmem:[#allocation4 + $0x98] sm:$0xff]  ;;  %189 = vst.msk [vmem:[#allocation3 + $0x239] sm:$0x1] %vm129_vm1, %v16424_v63  ;;  %190 = vst.msk [vmem:[#allocation3 + $0x251] sm:$0x1] %vm129_vm1, %v16424_v63 }
 0x46e   :  { %2987 = vst.msk [vmem:[#allocation4 + $0xb0] sm:$0xff] %vm2964_vm13, %v2817_v6  ;;  %2988 = vst.msk [vmem:[#allocation4 + $0xb8] sm:$0xff] %vm2964_vm13, %v2819_v53  ;;  %v3111_v58 = vmax.f32 %v3047_v36, 0.0  ;;  %v3112_v60 = vmax.f32 %v3048_v4, 0.0 }
 0x46f   :  { %191 = vst.msk [vmem:[#allocation3 + $0x269] sm:$0x1] %vm129_vm1, %v16424_v63  ;;  %192 = vst.msk [vmem:[#allocation3 + $0x281] sm:$0x1] %vm129_vm1, %v16424_v63 }
 0x470   :  { %8403 = vmatprep.mubr.msk.f32.mxu0 %vm3169_vm15, %v3111_v58  ;;  %193 = vst.msk [vmem:[#allocation3 + $0x299] sm:$0x1] %vm129_vm1, %v16424_v63  ;;  %194 = vst.msk [vmem:[#allocation3 + $0x2b1] sm:$0x1] %vm129_vm1, %v16424_v63 }
 0x471   :  { %v2821_v5 = vpop.permute.xlu0 %2820  ;;  %8404 = vmatmul.mubr.msk.f32.gmra.mrb[18].mxu0 %vm3169_vm15, %v3112_v60  ;;  %v2823_v37 = vpop.permute.xlu1 %2822  ;;  %v3049_v42 = vld [vmem:[#allocation4 + $0xa0] sm:$0xff]  ;;  %v3050_v2 = vld [vmem:[#allocation4 + $0xa8] sm:$0xff]  ;;  %195 = vst.msk [vmem:[#allocation3 + $0x2c9] sm:$0x1] %vm129_vm1, %v16424_v63  ;;  %196 = vst.msk [vmem:[#allocation3 + $0x2e1] sm:$0x1] %vm129_vm1, %v16424_v63 }
 0x472   :  { %2989 = vst.msk [vmem:[#allocation4 + $0xc0] sm:$0xff] %vm2964_vm13, %v2821_v5  ;;  %2990 = vst.msk [vmem:[#allocation4 + $0xc8] sm:$0xff] %vm2964_vm13, %v2823_v37  ;;  %v3113_v57 = vmax.f32 %v3049_v42, 0.0  ;;  %v3114_v59 = vmax.f32 %v3050_v2, 0.0 }
 0x473   :  { %197 = vst.msk [vmem:[#allocation3 + $0x2f9] sm:$0x1] %vm129_vm1, %v16424_v63  ;;  %198 = vst.msk [vmem:[#allocation3 + $0x311] sm:$0x1] %vm129_vm1, %v16424_v63 }
 0x474   :  { %8406 = vmatprep.mubr.msk.f32.mxu0 %vm3169_vm15, %v3113_v57  ;;  %199 = vst.msk [vmem:[#allocation3 + $0x329] sm:$0x1] %vm129_vm1, %v16424_v63  ;;  %200 = vst.msk [vmem:[#allocation3 + $0x341] sm:$0x1] %vm129_vm1, %v16424_v63 }
 0x475   :  { %v2825_v0 = vpop.permute.xlu0 %2824  ;;  %8407 = vmatmul.mubr.msk.f32.gmra.mrb[20].mxu0 %vm3169_vm15, %v3114_v59  ;;  %v2827_v26 = vpop.permute.xlu1 %2826  ;;  %v3051_v43 = vld [vmem:[#allocation4 + $0xb0] sm:$0xff]  ;;  %v3052_v29 = vld [vmem:[#allocation4 + $0xb8] sm:$0xff]  ;;  %166 = vst.msk [vmem:[#allocation3 + $0x11] sm:$0x1] %vm129_vm1, %v16424_v63  ;;  %183 = vst.msk [vmem:[#allocation3 + $0x1a9] sm:$0x1] %vm129_vm1, %v16424_v63 }
 0x476   :  { %2991 = vst.msk [vmem:[#allocation4 + $0xd0] sm:$0xff] %vm2964_vm13, %v2825_v0  ;;  %2992 = vst.msk [vmem:[#allocation4 + $0xd8] sm:$0xff] %vm2964_vm13, %v2827_v26  ;;  %v3115_v34 = vmax.f32 %v3051_v43, 0.0  ;;  %v3116_v44 = vmax.f32 %v3052_v29, 0.0 }
 0x477   :  { %184 = vst.msk [vmem:[#allocation3 + $0x1c1] sm:$0x1] %vm129_vm1, %v16424_v63  ;;  %201 = vst.msk [vmem:[#allocation3 + $0x359] sm:$0x1] %vm129_vm1, %v16424_v63 }
 0x478   :  { %8409 = vmatprep.mubr.msk.f32.mxu0 %vm3169_vm15, %v3115_v34 }
 0x479   :  { %v2829_v38 = vpop.permute.xlu0 %2828  ;;  %8410 = vmatmul.mubr.msk.f32.gmra.mrb[22].mxu0 %vm3169_vm15, %v3116_v44  ;;  %v2831_v7 = vpop.permute.xlu1 %2830  ;;  %v3053_v52 = vld [vmem:[#allocation4 + $0xc0] sm:$0xff]  ;;  %v3054_v28 = vld [vmem:[#allocation4 + $0xc8] sm:$0xff] }
 0x47a   :  { %2993 = vst.msk [vmem:[#allocation4 + $0xe0] sm:$0xff] %vm2964_vm13, %v2829_v38  ;;  %2994 = vst.msk [vmem:[#allocation4 + $0xe8] sm:$0xff] %vm2964_vm13, %v2831_v7  ;;  %v3117_v9 = vmax.f32 %v3053_v52, 0.0  ;;  %v3118_v45 = vmax.f32 %v3054_v28, 0.0  ;;  %v8943_v28 = vld [vmem:[#allocation2 + $0x348] sm:$0xff] }
 0x47c   :  { %8412 = vmatprep.mubr.msk.f32.mxu0 %vm3169_vm15, %v3117_v9  ;;  %v2767_v9 = vrot.slane %v8943_v28, 2  ;;  %v12257_v28 = vld [vmem:[%s15362_s2] ss:$0 sm:$0xff] }
 0x47d   :  { %v2833_v22 = vpop.permute.xlu0 %2832  ;;  %8413 = vmatmul.mubr.msk.f32.gmra.mrb[24].mxu0 %vm3169_vm15, %v3118_v45  ;;  %v2835_v49 = vpop.permute.xlu1 %2834  ;;  %v3055_v50 = vld [vmem:[#allocation4 + $0xd0] sm:$0xff]  ;;  %v3056_v51 = vld [vmem:[#allocation4 + $0xd8] sm:$0xff] }
 0x47e   :  { %2995 = vst.msk [vmem:[#allocation4 + $0xf0] sm:$0xff] %vm2964_vm13, %v2833_v22  ;;  %2996 = vst.msk [vmem:[#allocation4 + $0xf8] sm:$0xff] %vm2964_vm13, %v2835_v49  ;;  %v3119_v23 = vmax.f32 %v3055_v50, 0.0  ;;  %v3120_v15 = vmax.f32 %v3056_v51, 0.0  ;;  %v8944_v45 = vld [vmem:[#allocation2 + $0x350] sm:$0xff] }
 0x47f   :  { %v2768_v22 = vrot.slane %v8944_v45, 2 }
 0x480   :  { %8415 = vmatprep.mubr.msk.f32.mxu0 %vm3169_vm15, %v3119_v23 }
 0x481   :  { %v2837_v18 = vpop.permute.xlu0 %2836  ;;  %8416 = vmatmul.mubr.msk.f32.gmra.mrb[26].mxu0 %vm3169_vm15, %v3120_v15  ;;  %v2839_v16 = vpop.permute.xlu1 %2838  ;;  %v3057_v41 = vld [vmem:[#allocation4 + $0xe0] sm:$0xff]  ;;  %v3058_v56 = vld [vmem:[#allocation4 + $0xe8] sm:$0xff] }
 0x482   :  { %2997 = vst.msk [vmem:[#allocation4 + $0x100] sm:$0xff] %vm2964_vm13, %v2837_v18  ;;  %2998 = vst.msk [vmem:[#allocation4 + $0x108] sm:$0xff] %vm2964_vm13, %v2839_v16  ;;  %v3121_v40 = vmax.f32 %v3057_v41, 0.0  ;;  %v3122_v27 = vmax.f32 %v3058_v56, 0.0  ;;  %v8945_v18 = vld [vmem:[#allocation2 + $0x358] sm:$0x3]  ;;  %v2769_v41 = vsel %vm1017_vm4, %v2767_v9, %v2768_v22 }
 0x483   :  { %v2770_v16 = vrot.slane %v8945_v18, 2  ;;  %2896 = vrot.lane.b32.xlu0 %v2769_v41, %s9036_s24 }
 0x484   :  { %8418 = vmatprep.mubr.msk.f32.mxu0 %vm3169_vm15, %v3121_v40 }
 0x485   :  { %v2841_v17 = vpop.permute.xlu0 %2840  ;;  %8419 = vmatmul.mubr.msk.f32.gmra.mrb[28].mxu0 %vm3169_vm15, %v3122_v27  ;;  %v2843_v54 = vpop.permute.xlu1 %2842  ;;  %v3059_v24 = vld [vmem:[#allocation4 + $0xf0] sm:$0xff]  ;;  %v3060_v14 = vld [vmem:[#allocation4 + $0xf8] sm:$0xff]  ;;  %v2771_v56 = vsel %vm1017_vm4, %v2768_v22, %v2770_v16 }
 0x486   :  { %2999 = vst.msk [vmem:[#allocation4 + $0x110] sm:$0xff] %vm2964_vm13, %v2841_v17  ;;  %3000 = vst.msk [vmem:[#allocation4 + $0x118] sm:$0xff] %vm2964_vm13, %v2843_v54  ;;  %v3123_v32 = vmax.f32 %v3059_v24, 0.0  ;;  %v3124_v33 = vmax.f32 %v3060_v14, 0.0  ;;  %2898 = vrot.lane.b32.xlu1 %v2771_v56, %s9036_s24  ;;  %v12206_v24 = vld [vmem:[#allocation3] sm:$0xff] }
 0x487   :  { %3988 = vst.msk [vmem:[#allocation5] sm:$0xff] %vm114_vm14, %v12206_v24 }
 0x488   :  { %8421 = vmatprep.mubr.msk.f32.mxu0 %vm3169_vm15, %v3123_v32 }
 0x489   :  { %v2845_v46 = vpop.permute.xlu0 %2844  ;;  %8422 = vmatmul.mubr.msk.f32.gmra.mrb[30].mxu0 %vm3169_vm15, %v3124_v33  ;;  %v2847_v25 = vpop.permute.xlu1 %2846  ;;  %v3061_v21 = vld [vmem:[#allocation4 + $0x100] sm:$0xff]  ;;  %v3062_v31 = vld [vmem:[#allocation4 + $0x108] sm:$0xff] }
 0x48a   :  { %3001 = vst.msk [vmem:[#allocation4 + $0x120] sm:$0xff] %vm2964_vm13, %v2845_v46  ;;  %3002 = vst.msk [vmem:[#allocation4 + $0x128] sm:$0xff] %vm2964_vm13, %v2847_v25  ;;  %v3125_v19 = vmax.f32 %v3061_v21, 0.0  ;;  %v3126_v20 = vmax.f32 %v3062_v31, 0.0  ;;  %v12210_v33 = vld [vmem:[#allocation3 + $0x8] sm:$0xff]  ;;  %v4148_v46 = vrot.slane %v12206_v24, 1 }
 0x48b   :  { %v3882_v25 = vld [vmem:[#allocation3 + $0x10] sm:$0x3]  ;;  %v4149_v21 = vrot.slane %v12210_v33, 1  ;;  %3989 = vst.msk [vmem:[#allocation5 + $0x8] sm:$0xff] %vm114_vm14, %v12210_v33 }
 0x48c   :  { %8424 = vmatprep.mubr.msk.f32.mxu0 %vm3169_vm15, %v3125_v19  ;;  %v4151_v31 = vrot.slane %v3882_v25, 1 }
 0x48d   :  { %v2849_v10 = vpop.permute.xlu0 %2848  ;;  %8425 = vmatmul.mubr.msk.f32.gmra.mrb[32].mxu0 %vm3169_vm15, %v3126_v20  ;;  %v2851_v12 = vpop.permute.xlu1 %2850  ;;  %v3063_v61 = vld [vmem:[#allocation4 + $0x110] sm:$0xff]  ;;  %v3064_v13 = vld [vmem:[#allocation4 + $0x118] sm:$0xff] }
 0x48e   :  { %3003 = vst.msk [vmem:[#allocation4 + $0x130] sm:$0xff] %vm2964_vm13, %v2849_v10  ;;  %3004 = vst.msk [vmem:[#allocation4 + $0x138] sm:$0xff] %vm2964_vm13, %v2851_v12  ;;  %v3127_v39 = vmax.f32 %v3063_v61, 0.0  ;;  %v3128_v3 = vmax.f32 %v3064_v13, 0.0  ;;  %v4150_v61 = vsel %vm599_vm3, %v4148_v46, %v4149_v21  ;;  %v4152_v13 = vsel %vm599_vm3, %v4149_v21, %v4151_v31 }
 0x48f   :  { %4308 = vrot.lane.b32.xlu0 %v4150_v61, %s9030_s10  ;;  %4310 = vrot.lane.b32.xlu1 %v4152_v13, %s9030_s10 }
 0x490   :  { %8427 = vmatprep.mubr.msk.f32.mxu0 %vm3169_vm15, %v3127_v39 }
 0x491   :  { %v2853_v8 = vpop.permute.xlu0 %2852  ;;  %8428 = vmatmul.mubr.msk.f32.gmra.mrb[34].mxu0 %vm3169_vm15, %v3128_v3  ;;  %v2855_v55 = vpop.permute.xlu1 %2854  ;;  %v3065_v30 = vld [vmem:[#allocation4 + $0x120] sm:$0xff]  ;;  %v3066_v47 = vld [vmem:[#allocation4 + $0x128] sm:$0xff] }
 0x492   :  { %3005 = vst.msk [vmem:[#allocation4 + $0x140] sm:$0xff] %vm2964_vm13, %v2853_v8  ;;  %3006 = vst.msk [vmem:[#allocation4 + $0x148] sm:$0xff] %vm2964_vm13, %v2855_v55  ;;  %v3129_v62 = vmax.f32 %v3065_v30, 0.0  ;;  %v3130_v11 = vmax.f32 %v3066_v47, 0.0 }
 0x494   :  { %8430 = vmatprep.mubr.msk.f32.mxu0 %vm3169_vm15, %v3129_v62 }
 0x495   :  { %v2857_v1 = vpop.permute.xlu0 %2856  ;;  %8431 = vmatmul.mubr.msk.f32.gmra.mrb[36].mxu0 %vm3169_vm15, %v3130_v11  ;;  %v2859_v35 = vpop.permute.xlu1 %2858  ;;  %v3067_v48 = vld [vmem:[#allocation4 + $0x130] sm:$0xff]  ;;  %v3068_v6 = vld [vmem:[#allocation4 + $0x138] sm:$0xff] }
 0x496   :  { %3007 = vst.msk [vmem:[#allocation4 + $0x150] sm:$0xff] %vm2964_vm13, %v2857_v1  ;;  %3008 = vst.msk [vmem:[#allocation4 + $0x158] sm:$0xff] %vm2964_vm13, %v2859_v35  ;;  %v3131_v53 = vmax.f32 %v3067_v48, 0.0  ;;  %v3132_v36 = vmax.f32 %v3068_v6, 0.0 }
 0x498   :  { %8433 = vmatprep.mubr.msk.f32.mxu0 %vm3169_vm15, %v3131_v53 }
 0x499   :  { %v2861_v4 = vpop.permute.xlu0 %2860  ;;  %8434 = vmatmul.mubr.msk.f32.gmra.mrb[38].mxu0 %vm3169_vm15, %v3132_v36  ;;  %v2863_v58 = vpop.permute.xlu1 %2862  ;;  %v3069_v60 = vld [vmem:[#allocation4 + $0x140] sm:$0xff]  ;;  %v3070_v5 = vld [vmem:[#allocation4 + $0x148] sm:$0xff] }
 0x49a   :  { %3009 = vst.msk [vmem:[#allocation4 + $0x160] sm:$0xff] %vm2964_vm13, %v2861_v4  ;;  %3010 = vst.msk [vmem:[#allocation4 + $0x168] sm:$0xff] %vm2964_vm13, %v2863_v58  ;;  %v3133_v37 = vmax.f32 %v3069_v60, 0.0  ;;  %v3134_v42 = vmax.f32 %v3070_v5, 0.0 }
 0x49c   :  { %8436 = vmatprep.mubr.msk.f32.mxu0 %vm3169_vm15, %v3133_v37 }
 0x49d   :  { %v2865_v2 = vpop.permute.xlu0 %2864  ;;  %8437 = vmatmul.mubr.msk.f32.gmra.mrb[40].mxu0 %vm3169_vm15, %v3134_v42  ;;  %v2867_v57 = vpop.permute.xlu1 %2866  ;;  %v3071_v59 = vld [vmem:[#allocation4 + $0x150] sm:$0xff]  ;;  %v3072_v0 = vld [vmem:[#allocation4 + $0x158] sm:$0xff] }
 0x49e   :  { %3011 = vst.msk [vmem:[#allocation4 + $0x170] sm:$0xff] %vm2964_vm13, %v2865_v2  ;;  %3012 = vst.msk [vmem:[#allocation4 + $0x178] sm:$0xff] %vm2964_vm13, %v2867_v57  ;;  %v3135_v26 = vmax.f32 %v3071_v59, 0.0  ;;  %v3136_v43 = vmax.f32 %v3072_v0, 0.0 }
 0x4a0   :  { %8439 = vmatprep.mubr.msk.f32.mxu0 %vm3169_vm15, %v3135_v26 }
 0x4a1   :  { %v2869_v29 = vpop.permute.xlu0 %2868  ;;  %8440 = vmatmul.mubr.msk.f32.gmra.mrb[42].mxu0 %vm3169_vm15, %v3136_v43  ;;  %v2871_v34 = vpop.permute.xlu1 %2870  ;;  %v12036_v44 = vld [vmem:[#allocation4 + $0x160] sm:$0xff]  ;;  %v12038_v38 = vld [vmem:[#allocation4 + $0x168] sm:$0xff] }
 0x4a2   :  { %3013 = vst.msk [vmem:[#allocation4 + $0x180] sm:$0xff] %vm2964_vm13, %v2869_v29  ;;  %3014 = vst.msk [vmem:[#allocation4 + $0x188] sm:$0xff] %vm2964_vm13, %v2871_v34  ;;  %v3137_v7 = vmax.f32 %v12036_v44, 0.0  ;;  %v3138_v52 = vmax.f32 %v12038_v38, 0.0  ;;  %v12244_v44 = vld [vmem:[#allocation3 + $0x1b8] sm:$0xff]  ;;  %v12246_v38 = vld [vmem:[#allocation3 + $0x1b0] sm:$0xff] }
 0x4a3   :  { %4021 = vst.msk [vmem:[#allocation5 + $0x108] sm:$0xff] %vm114_vm14, %v12244_v44  ;;  %4020 = vst.msk [vmem:[#allocation5 + $0x100] sm:$0xff] %vm114_vm14, %v12246_v38 }
 0x4a4   :  { %8442 = vmatprep.mubr.msk.f32.mxu0 %vm3169_vm15, %v3137_v7 }
 0x4a5   :  { %v2873_v49 = vpop.permute.xlu0 %2872  ;;  %8443 = vmatmul.mubr.msk.f32.gmra.mrb[44].mxu0 %vm3169_vm15, %v3138_v52  ;;  %v2875_v50 = vpop.permute.xlu1 %2874  ;;  %v3075_v51 = vld [vmem:[#allocation4 + $0x170] sm:$0xff]  ;;  %v3076_v23 = vld [vmem:[#allocation4 + $0x178] sm:$0xff] }
 0x4a6   :  { %3015 = vst.msk [vmem:[#allocation4 + $0x190] sm:$0xff] %vm2964_vm13, %v2873_v49  ;;  %3016 = vst.msk [vmem:[#allocation4 + $0x198] sm:$0xff] %vm2964_vm13, %v2875_v50  ;;  %v3139_v63 = vmax.f32 %v3075_v51, 0.0  ;;  %v3140_v15 = vmax.f32 %v3076_v23, 0.0 }
 0x4a8   :  { %8445 = vmatprep.mubr.msk.f32.mxu0 %vm3169_vm15, %v3139_v63 }
 0x4a9   :  { %v2877_v40 = vpop.permute.xlu0 %2876  ;;  %8446 = vmatmul.mubr.msk.f32.gmra.mrb[46].mxu0 %vm3169_vm15, %v3140_v15  ;;  %v2879_v27 = vpop.permute.xlu1 %2878  ;;  %v3077_v17 = vld [vmem:[#allocation4 + $0x180] sm:$0xff]  ;;  %v3078_v54 = vld [vmem:[#allocation4 + $0x188] sm:$0xff] }
 0x4aa   :  { %3017 = vst.msk [vmem:[#allocation4 + $0x1a0] sm:$0xff] %vm2964_vm13, %v2877_v40  ;;  %3018 = vst.msk [vmem:[#allocation4 + $0x1a8] sm:$0xff] %vm2964_vm13, %v2879_v27  ;;  %v3141_v14 = vmax.f32 %v3077_v17, 0.0  ;;  %v3142_v32 = vmax.f32 %v3078_v54, 0.0 }
 0x4ac   :  { %8448 = vmatprep.mubr.msk.f32.mxu0 %vm3169_vm15, %v3141_v14 }
 0x4ad   :  { %v2881_v19 = vpop.permute.xlu0 %2880  ;;  %8449 = vmatmul.mubr.msk.f32.gmra.mrb[48].mxu0 %vm3169_vm15, %v3142_v32  ;;  %v2883_v20 = vpop.permute.xlu1 %2882  ;;  %v3079_v10 = vld [vmem:[#allocation4 + $0x190] sm:$0xff]  ;;  %v3080_v12 = vld [vmem:[#allocation4 + $0x198] sm:$0xff] }
 0x4ae   :  { %3019 = vst.msk [vmem:[#allocation4 + $0x1b0] sm:$0xff] %vm2964_vm13, %v2881_v19  ;;  %3020 = vst.msk [vmem:[#allocation4 + $0x1b8] sm:$0xff] %vm2964_vm13, %v2883_v20  ;;  %v3143_v39 = vmax.f32 %v3079_v10, 0.0  ;;  %v3144_v3 = vmax.f32 %v3080_v12, 0.0 }
 0x4b0   :  { %8451 = vmatprep.mubr.msk.f32.mxu0 %vm3169_vm15, %v3143_v39 }
 0x4b1   :  { %v2885_v8 = vpop.permute.xlu0 %2884  ;;  %8452 = vmatmul.mubr.msk.f32.gmra.mrb[50].mxu0 %vm3169_vm15, %v3144_v3  ;;  %v2887_v55 = vpop.permute.xlu1 %2886  ;;  %v3081_v30 = vld [vmem:[#allocation4 + $0x1a0] sm:$0xff]  ;;  %v3082_v47 = vld [vmem:[#allocation4 + $0x1a8] sm:$0xff] }
 0x4b2   :  { %3021 = vst.msk [vmem:[#allocation4 + $0x1c0] sm:$0xff] %vm2964_vm13, %v2885_v8  ;;  %3022 = vst.msk [vmem:[#allocation4 + $0x1c8] sm:$0xff] %vm2964_vm13, %v2887_v55  ;;  %v3145_v62 = vmax.f32 %v3081_v30, 0.0  ;;  %v3146_v11 = vmax.f32 %v3082_v47, 0.0 }
 0x4b4   :  { %8454 = vmatprep.mubr.msk.f32.mxu0 %vm3169_vm15, %v3145_v62 }
 0x4b5   :  { %v2889_v1 = vpop.permute.xlu0 %2888  ;;  %8455 = vmatmul.mubr.msk.f32.gmra.mrb[52].mxu0 %vm3169_vm15, %v3146_v11  ;;  %v2891_v35 = vpop.permute.xlu1 %2890  ;;  %v3083_v48 = vld [vmem:[#allocation4 + $0x1b0] sm:$0xff]  ;;  %v3084_v6 = vld [vmem:[#allocation4 + $0x1b8] sm:$0xff] }
 0x4b6   :  { %3023 = vst.msk [vmem:[#allocation4 + $0x1d0] sm:$0xff] %vm2964_vm13, %v2889_v1  ;;  %3024 = vst.msk [vmem:[#allocation4 + $0x1d8] sm:$0xff] %vm2964_vm13, %v2891_v35  ;;  %v3147_v53 = vmax.f32 %v3083_v48, 0.0  ;;  %v3148_v36 = vmax.f32 %v3084_v6, 0.0 }
 0x4b8   :  { %8457 = vmatprep.mubr.msk.f32.mxu0 %vm3169_vm15, %v3147_v53 }
 0x4b9   :  { %v2893_v4 = vpop.permute.xlu0 %2892  ;;  %8458 = vmatmul.mubr.msk.f32.gmra.mrb[54].mxu0 %vm3169_vm15, %v3148_v36  ;;  %v2895_v58 = vpop.permute.xlu1 %2894  ;;  %v3085_v60 = vld [vmem:[#allocation4 + $0x1c0] sm:$0xff]  ;;  %v3086_v5 = vld [vmem:[#allocation4 + $0x1c8] sm:$0xff] }
 0x4ba   :  { %3025 = vst.msk [vmem:[#allocation4 + $0x1e0] sm:$0xff] %vm2964_vm13, %v2893_v4  ;;  %3026 = vst.msk [vmem:[#allocation4 + $0x1e8] sm:$0xff] %vm2964_vm13, %v2895_v58  ;;  %v3149_v37 = vmax.f32 %v3085_v60, 0.0  ;;  %v3150_v42 = vmax.f32 %v3086_v5, 0.0 }
 0x4bc   :  { %8460 = vmatprep.mubr.msk.f32.mxu0 %vm3169_vm15, %v3149_v37 }
 0x4bd   :  { %8461 = vmatmul.mubr.msk.f32.gmra.mrb[56].mxu0 %vm3169_vm15, %v3150_v42  ;;  %v3087_v2 = vld [vmem:[#allocation4 + $0x1d0] sm:$0xff]  ;;  %v3088_v57 = vld [vmem:[#allocation4 + $0x1d8] sm:$0xff] }
 0x4be   :  { %v3151_v59 = vmax.f32 %v3087_v2, 0.0  ;;  %v3152_v0 = vmax.f32 %v3088_v57, 0.0 }
 0x4c0   :  { %8463 = vmatprep.mubr.msk.f32.mxu0 %vm3169_vm15, %v3151_v59 }
 0x4c1   :  { %8464 = vmatmul.mubr.msk.f32.gmra.mrb[58].mxu0 %vm3169_vm15, %v3152_v0  ;;  %v3089_v26 = vld [vmem:[#allocation4 + $0x1e0] sm:$0xff]  ;;  %v3090_v43 = vld [vmem:[#allocation4 + $0x1e8] sm:$0xff] }
 0x4c2   :  { %v3153_v29 = vmax.f32 %v3089_v26, 0.0  ;;  %v3154_v34 = vmax.f32 %v3090_v43, 0.0 }
 0x4c4   :  { %8466 = vmatprep.mubr.msk.f32.mxu0 %vm3169_vm15, %v3153_v29 }
 0x4c5   :  { %8467 = vmatmul.mubr.msk.f32.gmra.mrb[60].mxu0 %vm3169_vm15, %v3154_v34 }
 0x4f5   :  { %v2897_v7 = vpop.permute.xlu0 %2896 }
 0x4f6   :  { %3027 = vst.msk [vmem:[#allocation4 + $0x1f0] sm:$0xff] %vm2964_vm13, %v2897_v7 }
 0x4f8   :  { %v2899_v52 = vpop.permute.xlu1 %2898 }
 0x4f9   :  { %3028 = vst.msk [vmem:[#allocation4 + $0x1f8] sm:$0xff] %vm2964_vm13, %v2899_v52  ;;  %vm6656_vm13 = vcmask 588800  }
 0x4fd   :  { %v3091_v23 = vld [vmem:[#allocation4 + $0x1f0] sm:$0xff] }
 0x4fe   :  { %v3155_v15 = vmax.f32 %v3091_v23, 0.0 }
 0x500   :  { %v3092_v18 = vld [vmem:[#allocation4 + $0x1f8] sm:$0xff]  ;;  %8469 = vmatprep.mubr.msk.f32.mxu0 %vm3169_vm15, %v3155_v15 }
 0x501   :  { %v4309_v45 = vpop.permute.xlu0 %4308  ;;  %v4311_v50 = vpop.permute.xlu1 %4310  ;;  %v3156_v56 = vmax.f32 %v3092_v18, 0.0 }
 0x502   :  { %4501 = vst.msk [vmem:[#allocation5] sm:$0xff] %vm4500_vm2, %v4309_v45  ;;  %4502 = vst.msk [vmem:[#allocation5 + $0x8] sm:$0xff] %vm4500_vm2, %v4311_v50 }
 0x503   :  { %8470 = vmatmul.mubr.msk.f32.gmra.mrb[62].mxu0 %vm3169_vm15, %v3156_v56 }
 0x520   :  { %v8378_v9 = vpop.f32.mrb[0].mxu0 }
 0x521   :  { %v3438_v22 = vadd.f32 %v8378_v9, %v12257_v28  ;;  %v3432_v49 = vpop.f32.mrb[1].mxu0 }
 0x522   :  { %v3433_v51 = vadd.f32 %v12257_v28, %v3432_v49 }
 0x523   :  { %v3752_v63 = vmax.f32 %v3438_v22, 0.0 }
 0x524   :  { %v3751_v16 = vmax.f32 %v3433_v51, 0.0  ;;  %v8381_v41 = vpop.f32.mrb[2].mxu0 }
 0x525   :  { %3817 = vst.msk [vmem:[#allocation3 + $0x21] sm:$0xff] %vm114_vm14, %v3752_v63  ;;  %v3448_v40 = vadd.f32 %v8381_v41, %v12257_v28  ;;  %v3442_v27 = vpop.f32.mrb[3].mxu0 }
 0x526   :  { %3816 = vst.msk [vmem:[#allocation3 + $0x19] sm:$0xff] %vm114_vm14, %v3751_v16  ;;  %v3443_v17 = vadd.f32 %v12257_v28, %v3442_v27 }
 0x527   :  { %v3754_v54 = vmax.f32 %v3448_v40, 0.0 }
 0x528   :  { %v3753_v14 = vmax.f32 %v3443_v17, 0.0  ;;  %v8384_v32 = vpop.f32.mrb[4].mxu0 }
 0x529   :  { %3819 = vst.msk [vmem:[#allocation3 + $0x39] sm:$0xff] %vm114_vm14, %v3754_v54  ;;  %v3458_v46 = vadd.f32 %v8384_v32, %v12257_v28  ;;  %v3452_v25 = vpop.f32.mrb[5].mxu0 }
 0x52a   :  { %3818 = vst.msk [vmem:[#allocation3 + $0x31] sm:$0xff] %vm114_vm14, %v3753_v14  ;;  %v3453_v21 = vadd.f32 %v12257_v28, %v3452_v25 }
 0x52b   :  { %v3756_v31 = vmax.f32 %v3458_v46, 0.0 }
 0x52c   :  { %v3755_v19 = vmax.f32 %v3453_v21, 0.0  ;;  %v8387_v20 = vpop.f32.mrb[6].mxu0  ;;  %v3885_v10 = vld [vmem:[#allocation3 + $0x28] sm:$0x3] }
 0x52d   :  { %3821 = vst.msk [vmem:[#allocation3 + $0x51] sm:$0xff] %vm114_vm14, %v3756_v31  ;;  %v3468_v12 = vadd.f32 %v8387_v20, %v12257_v28  ;;  %v3462_v61 = vpop.f32.mrb[7].mxu0  ;;  %v12275_v13 = vld [vmem:[#allocation3 + $0x20] sm:$0xff]  ;;  %v4156_v39 = vrot.slane %v3885_v10, 1  ;;  %v12277_v3 = vld [vmem:[#allocation3 + $0x18] sm:$0xff] }
 0x52e   :  { %3820 = vst.msk [vmem:[#allocation3 + $0x49] sm:$0xff] %vm114_vm14, %v3755_v19  ;;  %v3463_v8 = vadd.f32 %v12257_v28, %v3462_v61  ;;  %v4154_v55 = vrot.slane %v12275_v13, 1  ;;  %3991 = vst.msk [vmem:[#allocation5 + $0x18] sm:$0xff] %vm114_vm14, %v12275_v13  ;;  %v4153_v30 = vrot.slane %v12277_v3, 1 }
 0x52f   :  { %3990 = vst.msk [vmem:[#allocation5 + $0x10] sm:$0xff] %vm114_vm14, %v12277_v3  ;;  %v3758_v47 = vmax.f32 %v3468_v12, 0.0 }
 0x530   :  { %v3757_v62 = vmax.f32 %v3463_v8, 0.0  ;;  %v8390_v11 = vpop.f32.mrb[8].mxu0  ;;  %v12288_v1 = vsel %vm599_vm3, %v4154_v55, %v4156_v39  ;;  %v12291_v35 = vsel %vm599_vm3, %v4153_v30, %v4154_v55  ;;  %v3888_v48 = vld [vmem:[#allocation3 + $0x40] sm:$0x3] }
 0x531   :  { %16425 = vst [vmem:[#allocation36_spill] sm:$0xff] %v12288_v1  ;;  %16426 = vst [vmem:[#allocation37_spill] sm:$0xff] %v12291_v35  ;;  %v3478_v6 = vadd.f32 %v8390_v11, %v12257_v28  ;;  %4314 = vrot.lane.b32.xlu1 %v12288_v1, %s9030_s10  ;;  %4312 = vrot.lane.b32.xlu0 %v12291_v35, %s9030_s10  ;;  %v3472_v53 = vpop.f32.mrb[9].mxu0  ;;  %v12299_v36 = vld [vmem:[#allocation3 + $0x38] sm:$0xff]  ;;  %v4161_v4 = vrot.slane %v3888_v48, 1  ;;  %v12301_v58 = vld [vmem:[#allocation3 + $0x30] sm:$0xff] }
 0x532   :  { %3823 = vst.msk [vmem:[#allocation3 + $0x69] sm:$0xff] %vm114_vm14, %v3758_v47  ;;  %16427 = vst [vmem:[#allocation6_spill] sm:$0xff] %v12299_v36  ;;  %v3473_v60 = vadd.f32 %v12257_v28, %v3472_v53  ;;  %v4159_v5 = vrot.slane %v12299_v36, 1  ;;  %v4158_v37 = vrot.slane %v12301_v58, 1 }
 0x533   :  { %16428 = vst [vmem:[#allocation7_spill] sm:$0xff] %v12301_v58  ;;  %3822 = vst.msk [vmem:[#allocation3 + $0x61] sm:$0xff] %vm114_vm14, %v3757_v62  ;;  %v3760_v42 = vmax.f32 %v3478_v6, 0.0 }
 0x534   :  { %3993 = vst.msk [vmem:[#allocation5 + $0x28] sm:$0xff] %vm114_vm14, %v12299_v36  ;;  %3992 = vst.msk [vmem:[#allocation5 + $0x20] sm:$0xff] %vm114_vm14, %v12301_v58  ;;  %v3759_v2 = vmax.f32 %v3473_v60, 0.0  ;;  %v8393_v57 = vpop.f32.mrb[10].mxu0  ;;  %v12312_v59 = vsel %vm599_vm3, %v4159_v5, %v4161_v4  ;;  %v12315_v0 = vsel %vm599_vm3, %v4158_v37, %v4159_v5  ;;  %v3891_v26 = vld [vmem:[#allocation3 + $0x58] sm:$0x3] }
 0x535   :  { %16429 = vst [vmem:[#allocation76_spill] sm:$0xff] %v12312_v59  ;;  %16430 = vst [vmem:[#allocation77_spill] sm:$0xff] %v12315_v0  ;;  %v3488_v43 = vadd.f32 %v8393_v57, %v12257_v28  ;;  %v3482_v29 = vpop.f32.mrb[11].mxu0  ;;  %4318 = vrot.lane.b32.xlu1 %v12312_v59, %s9030_s10  ;;  %4316 = vrot.lane.b32.xlu0 %v12315_v0, %s9030_s10  ;;  %v12323_v34 = vld [vmem:[#allocation3 + $0x50] sm:$0xff]  ;;  %v4166_v7 = vrot.slane %v3891_v26, 1  ;;  %v12325_v52 = vld [vmem:[#allocation3 + $0x48] sm:$0xff] }
 0x536   :  { %3825 = vst.msk [vmem:[#allocation3 + $0x81] sm:$0xff] %vm114_vm14, %v3760_v42  ;;  %16431 = vst [vmem:[#allocation113_spill] sm:$0xff] %v12323_v34  ;;  %v3483_v9 = vadd.f32 %v12257_v28, %v3482_v29  ;;  %v4164_v45 = vrot.slane %v12323_v34, 1  ;;  %v4163_v22 = vrot.slane %v12325_v52, 1 }
 0x537   :  { %16432 = vst [vmem:[#allocation114_spill] sm:$0xff] %v12325_v52  ;;  %3824 = vst.msk [vmem:[#allocation3 + $0x79] sm:$0xff] %vm114_vm14, %v3759_v2  ;;  %v3762_v49 = vmax.f32 %v3488_v43, 0.0 }
 0x538   :  { %3995 = vst.msk [vmem:[#allocation5 + $0x38] sm:$0xff] %vm114_vm14, %v12323_v34  ;;  %3994 = vst.msk [vmem:[#allocation5 + $0x30] sm:$0xff] %vm114_vm14, %v12325_v52  ;;  %v3761_v50 = vmax.f32 %v3483_v9, 0.0  ;;  %v8396_v51 = vpop.f32.mrb[12].mxu0  ;;  %v12336_v23 = vsel %vm599_vm3, %v4164_v45, %v4166_v7  ;;  %v12339_v63 = vsel %vm599_vm3, %v4163_v22, %v4164_v45 }
 0x539   :  { %16433 = vst [vmem:[#allocation115_spill] sm:$0xff] %v12336_v23  ;;  %16434 = vst [vmem:[#allocation116_spill] sm:$0xff] %v12339_v63  ;;  %v3894_v15 = vld [vmem:[#allocation3 + $0x70] sm:$0x3]  ;;  %v3498_v18 = vadd.f32 %v8396_v51, %v12257_v28  ;;  %v3492_v16 = vpop.f32.mrb[13].mxu0  ;;  %4322 = vrot.lane.b32.xlu1 %v12336_v23, %s9030_s10  ;;  %4320 = vrot.lane.b32.xlu0 %v12339_v63, %s9030_s10 }
 0x53a   :  { %3827 = vst.msk [vmem:[#allocation3 + $0x99] sm:$0xff] %vm114_vm14, %v3762_v49  ;;  %v12347_v41 = vld [vmem:[#allocation3 + $0x68] sm:$0xff]  ;;  %v4171_v56 = vrot.slane %v3894_v15, 1  ;;  %v12349_v40 = vld [vmem:[#allocation3 + $0x60] sm:$0xff]  ;;  %3826 = vst.msk [vmem:[#allocation3 + $0x91] sm:$0xff] %vm114_vm14, %v3761_v50  ;;  %v3493_v27 = vadd.f32 %v12257_v28, %v3492_v16 }
 0x53b   :  { %16435 = vst [vmem:[#allocation53_spill] sm:$0xff] %v12347_v41  ;;  %16436 = vst [vmem:[#allocation68_spill] sm:$0xff] %v12349_v40  ;;  %v4169_v17 = vrot.slane %v12347_v41, 1  ;;  %v4168_v54 = vrot.slane %v12349_v40, 1  ;;  %v3764_v14 = vmax.f32 %v3498_v18, 0.0 }
 0x53c   :  { %3997 = vst.msk [vmem:[#allocation5 + $0x48] sm:$0xff] %vm114_vm14, %v12347_v41  ;;  %3996 = vst.msk [vmem:[#allocation5 + $0x40] sm:$0xff] %vm114_vm14, %v12349_v40  ;;  %v3763_v32 = vmax.f32 %v3493_v27, 0.0  ;;  %v8399_v46 = vpop.f32.mrb[14].mxu0 }
 0x53d   :  { %v12360_v25 = vsel %vm599_vm3, %v4169_v17, %v4171_v56  ;;  %v12363_v21 = vsel %vm599_vm3, %v4168_v54, %v4169_v17  ;;  %v3897_v31 = vld [vmem:[#allocation3 + $0x88] sm:$0x3]  ;;  %3829 = vst.msk [vmem:[#allocation3 + $0xb1] sm:$0xff] %vm114_vm14, %v3764_v14  ;;  %v3508_v19 = vadd.f32 %v8399_v46, %v12257_v28  ;;  %v3502_v20 = vpop.f32.mrb[15].mxu0 }
 0x53e   :  { %16437 = vst [vmem:[#allocation38_spill] sm:$0xff] %v12360_v25  ;;  %16438 = vst [vmem:[#allocation94_spill] sm:$0xff] %v12363_v21  ;;  %4326 = vrot.lane.b32.xlu1 %v12360_v25, %s9030_s10  ;;  %4324 = vrot.lane.b32.xlu0 %v12363_v21, %s9030_s10  ;;  %v12371_v10 = vld [vmem:[#allocation3 + $0x80] sm:$0xff]  ;;  %v4176_v12 = vrot.slane %v3897_v31, 1  ;;  %v12373_v61 = vld [vmem:[#allocation3 + $0x78] sm:$0xff]  ;;  %v3503_v39 = vadd.f32 %v12257_v28, %v3502_v20 }
 0x53f   :  { %16439 = vst [vmem:[#allocation97_spill] sm:$0xff] %v12371_v10  ;;  %16440 = vst [vmem:[#allocation15_spill] sm:$0xff] %v12373_v61  ;;  %v4174_v8 = vrot.slane %v12371_v10, 1  ;;  %v4173_v55 = vrot.slane %v12373_v61, 1  ;;  %v3766_v30 = vmax.f32 %v3508_v19, 0.0 }
 0x540   :  { %3828 = vst.msk [vmem:[#allocation3 + $0xa9] sm:$0xff] %vm114_vm14, %v3763_v32  ;;  %3999 = vst.msk [vmem:[#allocation5 + $0x58] sm:$0xff] %vm114_vm14, %v12371_v10  ;;  %v3765_v47 = vmax.f32 %v3503_v39, 0.0  ;;  %v8402_v62 = vpop.f32.mrb[16].mxu0 }
 0x541   :  { %3998 = vst.msk [vmem:[#allocation5 + $0x50] sm:$0xff] %vm114_vm14, %v12373_v61  ;;  %v12384_v11 = vsel %vm599_vm3, %v4174_v8, %v4176_v12  ;;  %v12387_v48 = vsel %vm599_vm3, %v4173_v55, %v4174_v8  ;;  %v3900_v6 = vld [vmem:[#allocation3 + $0xa0] sm:$0x3]  ;;  %3831 = vst.msk [vmem:[#allocation3 + $0xc9] sm:$0xff] %vm114_vm14, %v3766_v30  ;;  %v3518_v53 = vadd.f32 %v8402_v62, %v12257_v28  ;;  %v3512_v4 = vpop.f32.mrb[17].mxu0  ;;  %v12395_v60 = vld [vmem:[#allocation3 + $0x98] sm:$0xff] }
 0x542   :  { %16441 = vst [vmem:[#allocation16_spill] sm:$0xff] %v12384_v11  ;;  %16442 = vst [vmem:[#allocation17_spill] sm:$0xff] %v12387_v48  ;;  %4330 = vrot.lane.b32.xlu1 %v12384_v11, %s9030_s10  ;;  %4328 = vrot.lane.b32.xlu0 %v12387_v48, %s9030_s10  ;;  %v4181_v5 = vrot.slane %v3900_v6, 1  ;;  %v12397_v37 = vld [vmem:[#allocation3 + $0x90] sm:$0xff]  ;;  %v3513_v42 = vadd.f32 %v12257_v28, %v3512_v4  ;;  %v4179_v2 = vrot.slane %v12395_v60, 1 }
 0x543   :  { %16443 = vst [vmem:[#allocation18_spill] sm:$0xff] %v12395_v60  ;;  %16444 = vst [vmem:[#allocation19_spill] sm:$0xff] %v12397_v37  ;;  %v4178_v57 = vrot.slane %v12397_v37, 1  ;;  %v3768_v26 = vmax.f32 %v3518_v53, 0.0 }
 0x544   :  { %3830 = vst.msk [vmem:[#allocation3 + $0xc1] sm:$0xff] %vm114_vm14, %v3765_v47  ;;  %4001 = vst.msk [vmem:[#allocation5 + $0x68] sm:$0xff] %vm114_vm14, %v12395_v60  ;;  %v3767_v43 = vmax.f32 %v3513_v42, 0.0  ;;  %v8405_v29 = vpop.f32.mrb[18].mxu0  ;;  %v12408_v7 = vsel %vm599_vm3, %v4179_v2, %v4181_v5  ;;  %v3903_v45 = vld [vmem:[#allocation3 + $0xb8] sm:$0x3] }
 0x545   :  { %4000 = vst.msk [vmem:[#allocation5 + $0x60] sm:$0xff] %vm114_vm14, %v12397_v37  ;;  %16445 = vst [vmem:[#allocation20_spill] sm:$0xff] %v12408_v7  ;;  %v12411_v9 = vsel %vm599_vm3, %v4178_v57, %v4179_v2  ;;  %v3528_v22 = vadd.f32 %v8405_v29, %v12257_v28  ;;  %v3522_v49 = vpop.f32.mrb[19].mxu0  ;;  %v4186_v51 = vrot.slane %v3903_v45, 1 }
 0x546   :  { %16446 = vst [vmem:[#allocation21_spill] sm:$0xff] %v12411_v9  ;;  %3833 = vst.msk [vmem:[#allocation3 + $0xe1] sm:$0xff] %vm114_vm14, %v3768_v26  ;;  %4334 = vrot.lane.b32.xlu1 %v12408_v7, %s9030_s10  ;;  %4332 = vrot.lane.b32.xlu0 %v12411_v9, %s9030_s10  ;;  %v3523_v18 = vadd.f32 %v12257_v28, %v3522_v49 }
 0x547   :  { %v12419_v50 = vld [vmem:[#allocation3 + $0xb0] sm:$0xff]  ;;  %v12421_v15 = vld [vmem:[#allocation3 + $0xa8] sm:$0xff]  ;;  %3832 = vst.msk [vmem:[#allocation3 + $0xd9] sm:$0xff] %vm114_vm14, %v3767_v43  ;;  %v3770_v27 = vmax.f32 %v3528_v22, 0.0 }
 0x548   :  { %16447 = vst [vmem:[#allocation29_spill] sm:$0xff] %v12419_v50  ;;  %16448 = vst [vmem:[#allocation32_spill] sm:$0xff] %v12421_v15  ;;  %v4184_v16 = vrot.slane %v12419_v50, 1  ;;  %v4183_v56 = vrot.slane %v12421_v15, 1  ;;  %v3769_v17 = vmax.f32 %v3523_v18, 0.0  ;;  %v8408_v54 = vpop.f32.mrb[20].mxu0 }
 0x549   :  { %4003 = vst.msk [vmem:[#allocation5 + $0x78] sm:$0xff] %vm114_vm14, %v12419_v50  ;;  %4002 = vst.msk [vmem:[#allocation5 + $0x70] sm:$0xff] %vm114_vm14, %v12421_v15  ;;  %v3906_v46 = vld [vmem:[#allocation3 + $0xd0] sm:$0x3]  ;;  %v3538_v31 = vadd.f32 %v8408_v54, %v12257_v28  ;;  %v3532_v19 = vpop.f32.mrb[21].mxu0 }
 0x54a   :  { %v12432_v14 = vsel %vm599_vm3, %v4184_v16, %v4186_v51  ;;  %v12435_v32 = vsel %vm599_vm3, %v4183_v56, %v4184_v16  ;;  %3835 = vst.msk [vmem:[#allocation3 + $0xf9] sm:$0xff] %vm114_vm14, %v3770_v27  ;;  %v4191_v12 = vrot.slane %v3906_v46, 1  ;;  %3834 = vst.msk [vmem:[#allocation3 + $0xf1] sm:$0xff] %vm114_vm14, %v3769_v17  ;;  %v3533_v8 = vadd.f32 %v12257_v28, %v3532_v19 }
 0x54b   :  { %16449 = vst [vmem:[#allocation34_spill] sm:$0xff] %v12432_v14  ;;  %16450 = vst [vmem:[#allocation35_spill] sm:$0xff] %v12435_v32  ;;  %4338 = vrot.lane.b32.xlu1 %v12432_v14, %s9030_s10  ;;  %4336 = vrot.lane.b32.xlu0 %v12435_v32, %s9030_s10  ;;  %v12443_v20 = vld [vmem:[#allocation3 + $0xc8] sm:$0xff]  ;;  %v12445_v39 = vld [vmem:[#allocation3 + $0xc0] sm:$0xff]  ;;  %v3772_v47 = vmax.f32 %v3538_v31, 0.0 }
 0x54c   :  { %16451 = vst [vmem:[#allocation54_spill] sm:$0xff] %v12443_v20  ;;  %16452 = vst [vmem:[#allocation55_spill] sm:$0xff] %v12445_v39  ;;  %v4189_v55 = vrot.slane %v12443_v20, 1  ;;  %v4188_v30 = vrot.slane %v12445_v39, 1  ;;  %v3771_v62 = vmax.f32 %v3533_v8, 0.0  ;;  %v8411_v6 = vpop.f32.mrb[22].mxu0 }
 0x54d   :  { %4005 = vst.msk [vmem:[#allocation5 + $0x88] sm:$0xff] %vm114_vm14, %v12443_v20  ;;  %4004 = vst.msk [vmem:[#allocation5 + $0x80] sm:$0xff] %vm114_vm14, %v12445_v39  ;;  %v3909_v5 = vld [vmem:[#allocation3 + $0xe8] sm:$0x3]  ;;  %v3548_v42 = vadd.f32 %v8411_v6, %v12257_v28  ;;  %v3542_v2 = vpop.f32.mrb[23].mxu0 }
 0x54e   :  { %v12456_v53 = vsel %vm599_vm3, %v4189_v55, %v4191_v12  ;;  %v12459_v4 = vsel %vm599_vm3, %v4188_v30, %v4189_v55  ;;  %3837 = vst.msk [vmem:[#allocation3 + $0x111] sm:$0xff] %vm114_vm14, %v3772_v47  ;;  %v12467_v57 = vld [vmem:[#allocation3 + $0xe0] sm:$0xff]  ;;  %v4196_v26 = vrot.slane %v3909_v5, 1  ;;  %v12469_v43 = vld [vmem:[#allocation3 + $0xd8] sm:$0xff]  ;;  %3836 = vst.msk [vmem:[#allocation3 + $0x109] sm:$0xff] %vm114_vm14, %v3771_v62  ;;  %v3543_v29 = vadd.f32 %v12257_v28, %v3542_v2 }
 0x54f   :  { %16453 = vst [vmem:[#allocation56_spill] sm:$0xff] %v12456_v53  ;;  %16454 = vst [vmem:[#allocation59_spill] sm:$0xff] %v12459_v4  ;;  %4342 = vrot.lane.b32.xlu1 %v12456_v53, %s9030_s10  ;;  %4340 = vrot.lane.b32.xlu0 %v12459_v4, %s9030_s10  ;;  %v4194_v45 = vrot.slane %v12467_v57, 1  ;;  %v4193_v22 = vrot.slane %v12469_v43, 1  ;;  %v3774_v49 = vmax.f32 %v3548_v42, 0.0 }
 0x550   :  { %16455 = vst [vmem:[#allocation61_spill] sm:$0xff] %v12467_v57  ;;  %16456 = vst [vmem:[#allocation62_spill] sm:$0xff] %v12469_v43  ;;  %v3773_v51 = vmax.f32 %v3543_v29, 0.0  ;;  %v8414_v18 = vpop.f32.mrb[24].mxu0 }
 0x551   :  { %4007 = vst.msk [vmem:[#allocation5 + $0x98] sm:$0xff] %vm114_vm14, %v12467_v57  ;;  %4006 = vst.msk [vmem:[#allocation5 + $0x90] sm:$0xff] %vm114_vm14, %v12469_v43  ;;  %v12480_v16 = vsel %vm599_vm3, %v4194_v45, %v4196_v26  ;;  %v12483_v56 = vsel %vm599_vm3, %v4193_v22, %v4194_v45  ;;  %v3912_v27 = vld [vmem:[#allocation3 + $0x100] sm:$0x3]  ;;  %v3558_v17 = vadd.f32 %v8414_v18, %v12257_v28  ;;  %v3552_v54 = vpop.f32.mrb[25].mxu0  ;;  %v12491_v46 = vld [vmem:[#allocation3 + $0xf8] sm:$0xff] }
 0x552   :  { %16457 = vst [vmem:[#allocation63_spill] sm:$0xff] %v12480_v16  ;;  %16458 = vst [vmem:[#allocation64_spill] sm:$0xff] %v12483_v56  ;;  %v4201_v31 = vrot.slane %v3912_v27, 1  ;;  %v12493_v19 = vld [vmem:[#allocation3 + $0xf0] sm:$0xff]  ;;  %v3553_v12 = vadd.f32 %v12257_v28, %v3552_v54  ;;  %v4199_v8 = vrot.slane %v12491_v46, 1 }
 0x553   :  { %3839 = vst.msk [vmem:[#allocation3 + $0x129] sm:$0xff] %vm114_vm14, %v3774_v49  ;;  %4346 = vrot.lane.b32.xlu1 %v12480_v16, %s9030_s10  ;;  %4344 = vrot.lane.b32.xlu0 %v12483_v56, %s9030_s10  ;;  %16459 = vst [vmem:[#allocation65_spill] sm:$0xff] %v12491_v46  ;;  %v4198_v55 = vrot.slane %v12493_v19, 1  ;;  %v3776_v30 = vmax.f32 %v3558_v17, 0.0 }
 0x554   :  { %16460 = vst [vmem:[#allocation13_spill] sm:$0xff] %v12493_v19  ;;  %3838 = vst.msk [vmem:[#allocation3 + $0x121] sm:$0xff] %vm114_vm14, %v3773_v51  ;;  %v3775_v47 = vmax.f32 %v3553_v12, 0.0  ;;  %v8417_v62 = vpop.f32.mrb[26].mxu0  ;;  %v12504_v6 = vsel %vm599_vm3, %v4199_v8, %v4201_v31 }
 0x555   :  { %4009 = vst.msk [vmem:[#allocation5 + $0xa8] sm:$0xff] %vm114_vm14, %v12491_v46  ;;  %4008 = vst.msk [vmem:[#allocation5 + $0xa0] sm:$0xff] %vm114_vm14, %v12493_v19  ;;  %v12507_v5 = vsel %vm599_vm3, %v4198_v55, %v4199_v8  ;;  %v3915_v42 = vld [vmem:[#allocation3 + $0x118] sm:$0x3]  ;;  %v3568_v2 = vadd.f32 %v8417_v62, %v12257_v28  ;;  %v3562_v26 = vpop.f32.mrb[27].mxu0  ;;  %v12515_v29 = vld [vmem:[#allocation3 + $0x110] sm:$0xff] }
 0x556   :  { %16461 = vst [vmem:[#allocation14_spill] sm:$0xff] %v12504_v6  ;;  %16462 = vst [vmem:[#allocation22_spill] sm:$0xff] %v12507_v5  ;;  %v4206_v45 = vrot.slane %v3915_v42, 1  ;;  %v12517_v22 = vld [vmem:[#allocation3 + $0x108] sm:$0xff]  ;;  %v3563_v49 = vadd.f32 %v12257_v28, %v3562_v26  ;;  %v4204_v51 = vrot.slane %v12515_v29, 1 }
 0x557   :  { %3841 = vst.msk [vmem:[#allocation3 + $0x141] sm:$0xff] %vm114_vm14, %v3776_v30  ;;  %4350 = vrot.lane.b32.xlu1 %v12504_v6, %s9030_s10  ;;  %4348 = vrot.lane.b32.xlu0 %v12507_v5, %s9030_s10  ;;  %16463 = vst [vmem:[#allocation23_spill] sm:$0xff] %v12515_v29  ;;  %v4203_v18 = vrot.slane %v12517_v22, 1  ;;  %v3778_v27 = vmax.f32 %v3568_v2, 0.0 }
 0x558   :  { %16464 = vst [vmem:[#allocation27_spill] sm:$0xff] %v12517_v22  ;;  %3840 = vst.msk [vmem:[#allocation3 + $0x139] sm:$0xff] %vm114_vm14, %v3775_v47  ;;  %v3777_v17 = vmax.f32 %v3563_v49, 0.0  ;;  %v8420_v54 = vpop.f32.mrb[28].mxu0  ;;  %v12528_v31 = vsel %vm599_vm3, %v4204_v51, %v4206_v45 }
 0x559   :  { %4011 = vst.msk [vmem:[#allocation5 + $0xb8] sm:$0xff] %vm114_vm14, %v12515_v29  ;;  %4010 = vst.msk [vmem:[#allocation5 + $0xb0] sm:$0xff] %vm114_vm14, %v12517_v22  ;;  %v12531_v12 = vsel %vm599_vm3, %v4203_v18, %v4204_v51  ;;  %v3578_v55 = vadd.f32 %v8420_v54, %v12257_v28  ;;  %v3572_v30 = vpop.f32.mrb[29].mxu0 }
 0x55a   :  { %16465 = vst [vmem:[#allocation28_spill] sm:$0xff] %v12528_v31  ;;  %16466 = vst [vmem:[#allocation30_spill] sm:$0xff] %v12531_v12  ;;  %v12533_v8 = vld [vmem:[#allocation3 + $0x130] sm:$0x3]  ;;  %v3573_v2 = vadd.f32 %v12257_v28, %v3572_v30 }
 0x55b   :  { %3843 = vst.msk [vmem:[#allocation3 + $0x159] sm:$0xff] %vm114_vm14, %v3778_v27  ;;  %4354 = vrot.lane.b32.xlu1 %v12528_v31, %s9030_s10  ;;  %4352 = vrot.lane.b32.xlu0 %v12531_v12, %s9030_s10  ;;  %v12541_v47 = vld [vmem:[#allocation3 + $0x128] sm:$0xff]  ;;  %v4211_v62 = vrot.slane %v12533_v8, 1  ;;  %v12544_v42 = vld [vmem:[#allocation3 + $0x120] sm:$0xff]  ;;  %3842 = vst.msk [vmem:[#allocation3 + $0x151] sm:$0xff] %vm114_vm14, %v3777_v17  ;;  %v3780_v49 = vmax.f32 %v3578_v55, 0.0 }
 0x55c   :  { %16467 = vst [vmem:[#allocation31_spill] sm:$0xff] %v12541_v47  ;;  %16468 = vst [vmem:[#allocation39_spill] sm:$0xff] %v12544_v42  ;;  %v4209_v26 = vrot.slane %v12541_v47, 1  ;;  %v4208_v45 = vrot.slane %v12544_v42, 1  ;;  %v3779_v51 = vmax.f32 %v3573_v2, 0.0  ;;  %v8423_v18 = vpop.f32.mrb[30].mxu0 }
 0x55d   :  { %4013 = vst.msk [vmem:[#allocation5 + $0xc8] sm:$0xff] %vm114_vm14, %v12541_v47  ;;  %4012 = vst.msk [vmem:[#allocation5 + $0xc0] sm:$0xff] %vm114_vm14, %v12544_v42  ;;  %v3588_v30 = vadd.f32 %v8423_v18, %v12257_v28  ;;  %v3582_v12 = vpop.f32.mrb[31].mxu0 }
 0x55e   :  { %v12555_v27 = vsel %vm599_vm3, %v4209_v26, %v4211_v62  ;;  %v12558_v17 = vsel %vm599_vm3, %v4208_v45, %v4209_v26  ;;  %v12560_v54 = vld [vmem:[#allocation3 + $0x148] sm:$0x3]  ;;  %3845 = vst.msk [vmem:[#allocation3 + $0x171] sm:$0xff] %vm114_vm14, %v3780_v49  ;;  %3844 = vst.msk [vmem:[#allocation3 + $0x169] sm:$0xff] %vm114_vm14, %v3779_v51  ;;  %v3583_v26 = vadd.f32 %v12257_v28, %v3582_v12 }
 0x55f   :  { %16469 = vst [vmem:[#allocation40_spill] sm:$0xff] %v12555_v27  ;;  %16470 = vst [vmem:[#allocation42_spill] sm:$0xff] %v12558_v17  ;;  %4358 = vrot.lane.b32.xlu1 %v12555_v27, %s9030_s10  ;;  %4356 = vrot.lane.b32.xlu0 %v12558_v17, %s9030_s10  ;;  %v12568_v55 = vld [vmem:[#allocation3 + $0x140] sm:$0xff]  ;;  %v4216_v62 = vrot.slane %v12560_v54, 1  ;;  %v12571_v2 = vld [vmem:[#allocation3 + $0x138] sm:$0xff]  ;;  %v3782_v18 = vmax.f32 %v3588_v30, 0.0 }
 0x560   :  { %16471 = vst [vmem:[#allocation43_spill] sm:$0xff] %v12568_v55  ;;  %16472 = vst [vmem:[#allocation46_spill] sm:$0xff] %v12571_v2  ;;  %v4214_v45 = vrot.slane %v12568_v55, 1  ;;  %v4213_v49 = vrot.slane %v12571_v2, 1  ;;  %v3781_v17 = vmax.f32 %v3583_v26, 0.0  ;;  %v8426_v27 = vpop.f32.mrb[32].mxu0 }
 0x561   :  { %4015 = vst.msk [vmem:[#allocation5 + $0xd8] sm:$0xff] %vm114_vm14, %v12568_v55  ;;  %4014 = vst.msk [vmem:[#allocation5 + $0xd0] sm:$0xff] %vm114_vm14, %v12571_v2  ;;  %v3598_v5 = vadd.f32 %v8426_v27, %v12257_v28  ;;  %v3592_v6 = vpop.f32.mrb[33].mxu0 }
 0x562   :  { %v12582_v31 = vsel %vm599_vm3, %v4214_v45, %v4216_v62  ;;  %v12585_v51 = vsel %vm599_vm3, %v4213_v49, %v4214_v45  ;;  %v12587_v12 = vld [vmem:[#allocation3 + $0x160] sm:$0x3]  ;;  %3847 = vst.msk [vmem:[#allocation3 + $0x189] sm:$0xff] %vm114_vm14, %v3782_v18  ;;  %v12595_v30 = vld [vmem:[#allocation3 + $0x158] sm:$0xff]  ;;  %v12598_v26 = vld [vmem:[#allocation3 + $0x150] sm:$0xff]  ;;  %v3593_v45 = vadd.f32 %v12257_v28, %v3592_v6 }
 0x563   :  { %16473 = vst [vmem:[#allocation47_spill] sm:$0xff] %v12582_v31  ;;  %16474 = vst [vmem:[#allocation48_spill] sm:$0xff] %v12585_v51  ;;  %4362 = vrot.lane.b32.xlu1 %v12582_v31, %s9030_s10  ;;  %4360 = vrot.lane.b32.xlu0 %v12585_v51, %s9030_s10  ;;  %v4221_v62 = vrot.slane %v12587_v12, 1  ;;  %v4219_v49 = vrot.slane %v12595_v30, 1  ;;  %v4218_v27 = vrot.slane %v12598_v26, 1  ;;  %v3784_v51 = vmax.f32 %v3598_v5, 0.0 }
 0x564   :  { %16475 = vst [vmem:[#allocation49_spill] sm:$0xff] %v12595_v30  ;;  %16476 = vst [vmem:[#allocation51_spill] sm:$0xff] %v12598_v26  ;;  %v12608_v18 = vld [vmem:[#allocation3 + $0x1c0] sm:$0x3]  ;;  %v3783_v31 = vmax.f32 %v3593_v45, 0.0  ;;  %v8429_v56 = vpop.f32.mrb[34].mxu0 }
 0x565   :  { %3846 = vst.msk [vmem:[#allocation3 + $0x181] sm:$0xff] %vm114_vm14, %v3781_v17  ;;  %4017 = vst.msk [vmem:[#allocation5 + $0xe8] sm:$0xff] %vm114_vm14, %v12595_v30  ;;  %v12611_v16 = vsel %vm599_vm3, %v4219_v49, %v4221_v62  ;;  %v12614_v6 = vsel %vm599_vm3, %v4218_v27, %v4219_v49  ;;  %v12616_v17 = vld [vmem:[#allocation3 + $0x178] sm:$0x3]  ;;  %v3608_v4 = vadd.f32 %v8429_v56, %v12257_v28  ;;  %v3602_v53 = vpop.f32.mrb[35].mxu0  ;;  %v12624_v5 = vld [vmem:[#allocation3 + $0x170] sm:$0xff] }
 0x566   :  { %4016 = vst.msk [vmem:[#allocation5 + $0xe0] sm:$0xff] %vm114_vm14, %v12598_v26  ;;  %16477 = vst [vmem:[#allocation52_spill] sm:$0xff] %v12611_v16  ;;  %v4226_v62 = vrot.slane %v12616_v17, 1  ;;  %v12627_v45 = vld [vmem:[#allocation3 + $0x168] sm:$0xff]  ;;  %v4229_v49 = vrot.slane %v12244_v44, 1  ;;  %v4231_v27 = vrot.slane %v12608_v18, 1  ;;  %v3603_v56 = vadd.f32 %v12257_v28, %v3602_v53 }
 0x567   :  { %16478 = vst [vmem:[#allocation57_spill] sm:$0xff] %v12614_v6  ;;  %3849 = vst.msk [vmem:[#allocation3 + $0x1d1] sm:$0xff] %vm114_vm14, %v3784_v51  ;;  %4366 = vrot.lane.b32.xlu1 %v12611_v16, %s9030_s10  ;;  %4364 = vrot.lane.b32.xlu0 %v12614_v6, %s9030_s10  ;;  %v4224_v51 = vrot.slane %v12624_v5, 1  ;;  %v4223_v6 = vrot.slane %v12627_v45, 1  ;;  %v4228_v16 = vrot.slane %v12246_v38, 1  ;;  %v3786_v32 = vmax.f32 %v3608_v4, 0.0 }
 0x568   :  { %16479 = vst [vmem:[#allocation58_spill] sm:$0xff] %v12624_v5  ;;  %16480 = vst [vmem:[#allocation66_spill] sm:$0xff] %v12627_v45  ;;  %v3785_v14 = vmax.f32 %v3603_v56, 0.0  ;;  %v8432_v9 = vpop.f32.mrb[36].mxu0 }
 0x569   :  { %3848 = vst.msk [vmem:[#allocation3 + $0x1c9] sm:$0xff] %vm114_vm14, %v3783_v31  ;;  %4019 = vst.msk [vmem:[#allocation5 + $0xf8] sm:$0xff] %vm114_vm14, %v12624_v5  ;;  %v12641_v7 = vsel %vm599_vm3, %v4224_v51, %v4226_v62  ;;  %v12644_v53 = vsel %vm599_vm3, %v4223_v6, %v4224_v51  ;;  %v3618_v31 = vadd.f32 %v8432_v9, %v12257_v28  ;;  %v3612_v48 = vpop.f32.mrb[37].mxu0 }
 0x56a   :  { %4018 = vst.msk [vmem:[#allocation5 + $0xf0] sm:$0xff] %vm114_vm14, %v12627_v45  ;;  %16481 = vst [vmem:[#allocation67_spill] sm:$0xff] %v12641_v7  ;;  %v3613_v4 = vadd.f32 %v12257_v28, %v3612_v48  ;;  %v4232_v62 = vsel %vm599_vm3, %v4229_v49, %v4231_v27  ;;  %v4230_v6 = vsel %vm599_vm3, %v4228_v16, %v4229_v49 }
 0x56b   :  { %16482 = vst [vmem:[#allocation69_spill] sm:$0xff] %v12644_v53  ;;  %3851 = vst.msk [vmem:[#allocation3 + $0x1e9] sm:$0xff] %vm114_vm14, %v3786_v32  ;;  %4370 = vrot.lane.b32.xlu1 %v12641_v7, %s9030_s10  ;;  %4368 = vrot.lane.b32.xlu0 %v12644_v53, %s9030_s10  ;;  %v3788_v56 = vmax.f32 %v3618_v31, 0.0 }
 0x56c   :  { %3850 = vst.msk [vmem:[#allocation3 + $0x1e1] sm:$0xff] %vm114_vm14, %v3785_v14  ;;  %v3787_v51 = vmax.f32 %v3613_v4, 0.0  ;;  %v8435_v32 = vpop.f32.mrb[38].mxu0 }
 0x56d   :  { %3853 = vst.msk [vmem:[#allocation3 + $0x201] sm:$0xff] %vm114_vm14, %v3788_v56  ;;  %v3628_v9 = vadd.f32 %v8435_v32, %v12257_v28  ;;  %v3622_v7 = vpop.f32.mrb[39].mxu0 }
 0x56e   :  { %v12656_v11 = vld [vmem:[#allocation3 + $0x1d8] sm:$0x3]  ;;  %3852 = vst.msk [vmem:[#allocation3 + $0x1f9] sm:$0xff] %vm114_vm14, %v3787_v51  ;;  %v3623_v16 = vadd.f32 %v12257_v28, %v3622_v7 }
 0x56f   :  { %4374 = vrot.lane.b32.xlu1 %v4232_v62, %s9030_s10  ;;  %4372 = vrot.lane.b32.xlu0 %v4230_v6, %s9030_s10  ;;  %v4236_v48 = vrot.slane %v12656_v11, 1  ;;  %v3790_v4 = vmax.f32 %v3628_v9, 0.0 }
 0x570   :  { %v12662_v14 = vld [vmem:[#allocation3 + $0x1d0] sm:$0xff]  ;;  %v12665_v27 = vld [vmem:[#allocation3 + $0x1c8] sm:$0xff]  ;;  %v3789_v62 = vmax.f32 %v3623_v16, 0.0  ;;  %v8438_v6 = vpop.f32.mrb[40].mxu0 }
 0x571   :  { %v4234_v49 = vrot.slane %v12662_v14, 1  ;;  %4023 = vst.msk [vmem:[#allocation5 + $0x118] sm:$0xff] %vm114_vm14, %v12662_v14  ;;  %v4233_v31 = vrot.slane %v12665_v27, 1  ;;  %4022 = vst.msk [vmem:[#allocation5 + $0x110] sm:$0xff] %vm114_vm14, %v12665_v27  ;;  %v3638_v32 = vadd.f32 %v8438_v6, %v12257_v28  ;;  %v3632_v53 = vpop.f32.mrb[41].mxu0 }
 0x572   :  { %v12681_v7 = vld [vmem:[#allocation3 + $0x1f0] sm:$0x3]  ;;  %3855 = vst.msk [vmem:[#allocation3 + $0x219] sm:$0xff] %vm114_vm14, %v3790_v4  ;;  %3854 = vst.msk [vmem:[#allocation3 + $0x211] sm:$0xff] %vm114_vm14, %v3789_v62 }
 0x573   :  { %v12676_v56 = vsel %vm599_vm3, %v4234_v49, %v4236_v48  ;;  %v12679_v51 = vsel %vm599_vm3, %v4233_v31, %v4234_v49  ;;  %v12689_v9 = vld [vmem:[#allocation3 + $0x1e8] sm:$0xff]  ;;  %v4241_v48 = vrot.slane %v12681_v7, 1  ;;  %v12692_v16 = vld [vmem:[#allocation3 + $0x1e0] sm:$0xff]  ;;  %v3633_v49 = vadd.f32 %v12257_v28, %v3632_v53 }
 0x574   :  { %16483 = vst [vmem:[#allocation70_spill] sm:$0xff] %v12676_v56  ;;  %16484 = vst [vmem:[#allocation72_spill] sm:$0xff] %v12679_v51  ;;  %4378 = vrot.lane.b32.xlu1 %v12676_v56, %s9030_s10  ;;  %4376 = vrot.lane.b32.xlu0 %v12679_v51, %s9030_s10  ;;  %v4239_v31 = vrot.slane %v12689_v9, 1  ;;  %v4238_v4 = vrot.slane %v12692_v16, 1  ;;  %v3792_v6 = vmax.f32 %v3638_v32, 0.0  ;;  %v8441_v56 = vpop.f32.mrb[42].mxu0 }
 0x575   :  { %16485 = vst [vmem:[#allocation73_spill] sm:$0xff] %v12689_v9  ;;  %16486 = vst [vmem:[#allocation74_spill] sm:$0xff] %v12692_v16  ;;  %v3791_v51 = vmax.f32 %v3633_v49, 0.0  ;;  %v12708_v53 = vld [vmem:[#allocation3 + $0x208] sm:$0x3]  ;;  %v3648_v25 = vadd.f32 %v8441_v56, %v12257_v28  ;;  %v3642_v63 = vpop.f32.mrb[43].mxu0 }
 0x576   :  { %4025 = vst.msk [vmem:[#allocation5 + $0x128] sm:$0xff] %vm114_vm14, %v12689_v9  ;;  %4024 = vst.msk [vmem:[#allocation5 + $0x120] sm:$0xff] %vm114_vm14, %v12692_v16  ;;  %v12703_v21 = vsel %vm599_vm3, %v4239_v31, %v4241_v48  ;;  %v12706_v62 = vsel %vm599_vm3, %v4238_v4, %v4239_v31  ;;  %v12716_v32 = vld [vmem:[#allocation3 + $0x200] sm:$0xff]  ;;  %v4246_v48 = vrot.slane %v12708_v53, 1  ;;  %v12719_v49 = vld [vmem:[#allocation3 + $0x1f8] sm:$0xff]  ;;  %v3643_v31 = vadd.f32 %v12257_v28, %v3642_v63 }
 0x577   :  { %16487 = vst [vmem:[#allocation75_spill] sm:$0xff] %v12703_v21  ;;  %16488 = vst [vmem:[#allocation11_spill] sm:$0xff] %v12706_v62  ;;  %v4244_v4 = vrot.slane %v12716_v32, 1  ;;  %v4243_v56 = vrot.slane %v12719_v49, 1 }
 0x578   :  { %3857 = vst.msk [vmem:[#allocation3 + $0x231] sm:$0xff] %vm114_vm14, %v3792_v6  ;;  %4382 = vrot.lane.b32.xlu1 %v12703_v21, %s9030_s10  ;;  %4380 = vrot.lane.b32.xlu0 %v12706_v62, %s9030_s10  ;;  %3856 = vst.msk [vmem:[#allocation3 + $0x229] sm:$0xff] %vm114_vm14, %v3791_v51  ;;  %v3794_v6 = vmax.f32 %v3648_v25, 0.0  ;;  %v3793_v62 = vmax.f32 %v3643_v31, 0.0  ;;  %v8444_v21 = vpop.f32.mrb[44].mxu0 }
 0x579   :  { %4027 = vst.msk [vmem:[#allocation5 + $0x138] sm:$0xff] %vm114_vm14, %v12716_v32  ;;  %4026 = vst.msk [vmem:[#allocation5 + $0x130] sm:$0xff] %vm114_vm14, %v12719_v49  ;;  %v12730_v23 = vsel %vm599_vm3, %v4244_v4, %v4246_v48  ;;  %v12733_v51 = vsel %vm599_vm3, %v4243_v56, %v4244_v4  ;;  %v12735_v63 = vld [vmem:[#allocation3 + $0x220] sm:$0x3]  ;;  %v3658_v0 = vadd.f32 %v8444_v21, %v12257_v28  ;;  %v3652_v59 = vpop.f32.mrb[45].mxu0  ;;  %v12743_v25 = vld [vmem:[#allocation3 + $0x218] sm:$0xff] }
 0x57a   :  { %16489 = vst [vmem:[#allocation12_spill] sm:$0xff] %v12730_v23  ;;  %16490 = vst [vmem:[#allocation78_spill] sm:$0xff] %v12733_v51  ;;  %v4251_v48 = vrot.slane %v12735_v63, 1  ;;  %v12746_v31 = vld [vmem:[#allocation3 + $0x210] sm:$0xff]  ;;  %v3653_v4 = vadd.f32 %v12257_v28, %v3652_v59  ;;  %v4249_v56 = vrot.slane %v12743_v25, 1 }
 0x57b   :  { %16491 = vst [vmem:[#allocation79_spill] sm:$0xff] %v12735_v63  ;;  %3859 = vst.msk [vmem:[#allocation3 + $0x249] sm:$0xff] %vm114_vm14, %v3794_v6  ;;  %v4248_v21 = vrot.slane %v12746_v31, 1  ;;  %v3796_v6 = vmax.f32 %v3658_v0, 0.0 }
 0x57c   :  { %4386 = vrot.lane.b32.xlu1 %v12730_v23, %s9030_s10  ;;  %4384 = vrot.lane.b32.xlu0 %v12733_v51, %s9030_s10  ;;  %16492 = vst [vmem:[#allocation80_spill] sm:$0xff] %v12746_v31  ;;  %3858 = vst.msk [vmem:[#allocation3 + $0x241] sm:$0xff] %vm114_vm14, %v3793_v62  ;;  %v3795_v51 = vmax.f32 %v3653_v4, 0.0  ;;  %v8447_v23 = vpop.f32.mrb[46].mxu0  ;;  %v12757_v35 = vsel %vm599_vm3, %v4249_v56, %v4251_v48 }
 0x57d   :  { %4029 = vst.msk [vmem:[#allocation5 + $0x148] sm:$0xff] %vm114_vm14, %v12743_v25  ;;  %4028 = vst.msk [vmem:[#allocation5 + $0x140] sm:$0xff] %vm114_vm14, %v12746_v31  ;;  %v12760_v62 = vsel %vm599_vm3, %v4248_v21, %v4249_v56  ;;  %v3668_v1 = vadd.f32 %v8447_v23, %v12257_v28  ;;  %v3662_v63 = vpop.f32.mrb[47].mxu0 }
 0x57e   :  { %16493 = vst [vmem:[#allocation81_spill] sm:$0xff] %v12757_v35  ;;  %16494 = vst [vmem:[#allocation83_spill] sm:$0xff] %v12760_v62  ;;  %v3663_v56 = vadd.f32 %v12257_v28, %v3662_v63 }
 0x57f   :  { %v12762_v59 = vld [vmem:[#allocation3 + $0x238] sm:$0x3]  ;;  %3861 = vst.msk [vmem:[#allocation3 + $0x261] sm:$0xff] %vm114_vm14, %v3796_v6  ;;  %v12770_v0 = vld [vmem:[#allocation3 + $0x230] sm:$0xff]  ;;  %v12773_v4 = vld [vmem:[#allocation3 + $0x228] sm:$0xff]  ;;  %v3798_v6 = vmax.f32 %v3668_v1, 0.0 }
 0x580   :  { %16495 = vst [vmem:[#allocation84_spill] sm:$0xff] %v12762_v59  ;;  %4390 = vrot.lane.b32.xlu1 %v12757_v35, %s9030_s10  ;;  %4388 = vrot.lane.b32.xlu0 %v12760_v62, %s9030_s10  ;;  %16496 = vst [vmem:[#allocation86_spill] sm:$0xff] %v12770_v0  ;;  %v4256_v48 = vrot.slane %v12762_v59, 1  ;;  %v4254_v21 = vrot.slane %v12770_v0, 1  ;;  %v4253_v23 = vrot.slane %v12773_v4, 1  ;;  %v3797_v62 = vmax.f32 %v3663_v56, 0.0 }
 0x581   :  { %16497 = vst [vmem:[#allocation87_spill] sm:$0xff] %v12773_v4  ;;  %3860 = vst.msk [vmem:[#allocation3 + $0x259] sm:$0xff] %vm114_vm14, %v3795_v51  ;;  %v8450_v35 = vpop.f32.mrb[48].mxu0 }
 0x582   :  { %4031 = vst.msk [vmem:[#allocation5 + $0x158] sm:$0xff] %vm114_vm14, %v12770_v0  ;;  %4030 = vst.msk [vmem:[#allocation5 + $0x150] sm:$0xff] %vm114_vm14, %v12773_v4  ;;  %v12784_v59 = vsel %vm599_vm3, %v4254_v21, %v4256_v48  ;;  %v12787_v51 = vsel %vm599_vm3, %v4253_v23, %v4254_v21  ;;  %v12789_v63 = vld [vmem:[#allocation3 + $0x250] sm:$0x3]  ;;  %v3678_v0 = vadd.f32 %v8450_v35, %v12257_v28  ;;  %v3672_v31 = vpop.f32.mrb[49].mxu0 }
 0x583   :  { %16498 = vst [vmem:[#allocation89_spill] sm:$0xff] %v12784_v59  ;;  %16499 = vst [vmem:[#allocation90_spill] sm:$0xff] %v12787_v51  ;;  %v12797_v1 = vld [vmem:[#allocation3 + $0x248] sm:$0xff]  ;;  %v4261_v48 = vrot.slane %v12789_v63, 1  ;;  %v12800_v56 = vld [vmem:[#allocation3 + $0x240] sm:$0xff]  ;;  %v3673_v21 = vadd.f32 %v12257_v28, %v3672_v31 }
 0x584   :  { %16500 = vst [vmem:[#allocation92_spill] sm:$0xff] %v12789_v63  ;;  %3863 = vst.msk [vmem:[#allocation3 + $0x279] sm:$0xff] %vm114_vm14, %v3798_v6  ;;  %4394 = vrot.lane.b32.xlu1 %v12784_v59, %s9030_s10  ;;  %4392 = vrot.lane.b32.xlu0 %v12787_v51, %s9030_s10  ;;  %v4259_v23 = vrot.slane %v12797_v1, 1  ;;  %v4258_v35 = vrot.slane %v12800_v56, 1  ;;  %v3800_v6 = vmax.f32 %v3678_v0, 0.0  ;;  %v8453_v59 = vpop.f32.mrb[50].mxu0 }
 0x585   :  { %16501 = vst [vmem:[#allocation93_spill] sm:$0xff] %v12797_v1  ;;  %16502 = vst [vmem:[#allocation95_spill] sm:$0xff] %v12800_v56  ;;  %v3799_v51 = vmax.f32 %v3673_v21, 0.0  ;;  %v3682_v4 = vpop.f32.mrb[51].mxu0 }
 0x586   :  { %3862 = vst.msk [vmem:[#allocation3 + $0x271] sm:$0xff] %vm114_vm14, %v3797_v62  ;;  %4033 = vst.msk [vmem:[#allocation5 + $0x168] sm:$0xff] %vm114_vm14, %v12797_v1  ;;  %v12811_v63 = vsel %vm599_vm3, %v4259_v23, %v4261_v48  ;;  %v12814_v62 = vsel %vm599_vm3, %v4258_v35, %v4259_v23  ;;  %v12816_v31 = vld [vmem:[#allocation3 + $0x268] sm:$0x3]  ;;  %v3688_v1 = vadd.f32 %v8453_v59, %v12257_v28 }
 0x587   :  { %4032 = vst.msk [vmem:[#allocation5 + $0x160] sm:$0xff] %vm114_vm14, %v12800_v56  ;;  %16503 = vst [vmem:[#allocation96_spill] sm:$0xff] %v12811_v63  ;;  %v4266_v48 = vrot.slane %v12816_v31, 1  ;;  %v3683_v23 = vadd.f32 %v12257_v28, %v3682_v4 }
 0x588   :  { %16504 = vst [vmem:[#allocation98_spill] sm:$0xff] %v12814_v62  ;;  %16505 = vst [vmem:[#allocation99_spill] sm:$0xff] %v12816_v31  ;;  %4398 = vrot.lane.b32.xlu1 %v12811_v63, %s9030_s10  ;;  %4396 = vrot.lane.b32.xlu0 %v12814_v62, %s9030_s10  ;;  %v12824_v0 = vld [vmem:[#allocation3 + $0x260] sm:$0xff]  ;;  %v12827_v21 = vld [vmem:[#allocation3 + $0x258] sm:$0xff]  ;;  %v8456_v63 = vpop.f32.mrb[52].mxu0 }
 0x589   :  { %3865 = vst.msk [vmem:[#allocation3 + $0x291] sm:$0xff] %vm114_vm14, %v3800_v6  ;;  %16506 = vst [vmem:[#allocation101_spill] sm:$0xff] %v12824_v0  ;;  %v4264_v35 = vrot.slane %v12824_v0, 1  ;;  %v4263_v59 = vrot.slane %v12827_v21, 1  ;;  %v3802_v6 = vmax.f32 %v3688_v1, 0.0  ;;  %v3801_v62 = vmax.f32 %v3683_v23, 0.0 }
 0x58a   :  { %16507 = vst [vmem:[#allocation102_spill] sm:$0xff] %v12827_v21  ;;  %3864 = vst.msk [vmem:[#allocation3 + $0x289] sm:$0xff] %vm114_vm14, %v3799_v51  ;;  %v3692_v56 = vpop.f32.mrb[53].mxu0 }
 0x58b   :  { %4035 = vst.msk [vmem:[#allocation5 + $0x178] sm:$0xff] %vm114_vm14, %v12824_v0  ;;  %4034 = vst.msk [vmem:[#allocation5 + $0x170] sm:$0xff] %vm114_vm14, %v12827_v21  ;;  %v12838_v31 = vsel %vm599_vm3, %v4264_v35, %v4266_v48  ;;  %v12841_v51 = vsel %vm599_vm3, %v4263_v59, %v4264_v35  ;;  %v12843_v4 = vld [vmem:[#allocation3 + $0x280] sm:$0x3]  ;;  %v3698_v0 = vadd.f32 %v8456_v63, %v12257_v28 }
 0x58c   :  { %16508 = vst [vmem:[#allocation104_spill] sm:$0xff] %v12838_v31  ;;  %16509 = vst [vmem:[#allocation105_spill] sm:$0xff] %v12841_v51  ;;  %4402 = vrot.lane.b32.xlu1 %v12838_v31, %s9030_s10  ;;  %4400 = vrot.lane.b32.xlu0 %v12841_v51, %s9030_s10  ;;  %v4271_v48 = vrot.slane %v12843_v4, 1  ;;  %v3693_v35 = vadd.f32 %v12257_v28, %v3692_v56  ;;  %v8459_v31 = vpop.f32.mrb[54].mxu0 }
 0x58d   :  { %16510 = vst [vmem:[#allocation107_spill] sm:$0xff] %v12843_v4  ;;  %3867 = vst.msk [vmem:[#allocation3 + $0x2a9] sm:$0xff] %vm114_vm14, %v3802_v6  ;;  %v12851_v1 = vld [vmem:[#allocation3 + $0x278] sm:$0xff]  ;;  %v12854_v23 = vld [vmem:[#allocation3 + $0x270] sm:$0xff]  ;;  %v3804_v6 = vmax.f32 %v3698_v0, 0.0  ;;  %v3702_v21 = vpop.f32.mrb[55].mxu0 }
 0x58e   :  { %16511 = vst [vmem:[#allocation108_spill] sm:$0xff] %v12851_v1  ;;  %16512 = vst [vmem:[#allocation109_spill] sm:$0xff] %v12854_v23  ;;  %v4269_v59 = vrot.slane %v12851_v1, 1  ;;  %v4268_v63 = vrot.slane %v12854_v23, 1  ;;  %v3803_v51 = vmax.f32 %v3693_v35, 0.0 }
 0x58f   :  { %3866 = vst.msk [vmem:[#allocation3 + $0x2a1] sm:$0xff] %vm114_vm14, %v3801_v62  ;;  %4037 = vst.msk [vmem:[#allocation5 + $0x188] sm:$0xff] %vm114_vm14, %v12851_v1  ;;  %v3708_v1 = vadd.f32 %v8459_v31, %v12257_v28 }
 0x590   :  { %4036 = vst.msk [vmem:[#allocation5 + $0x180] sm:$0xff] %vm114_vm14, %v12854_v23  ;;  %v12865_v4 = vsel %vm599_vm3, %v4269_v59, %v4271_v48  ;;  %v12868_v62 = vsel %vm599_vm3, %v4268_v63, %v4269_v59  ;;  %v12870_v56 = vld [vmem:[#allocation3 + $0x298] sm:$0x3]  ;;  %3869 = vst.msk [vmem:[#allocation3 + $0x2c1] sm:$0xff] %vm114_vm14, %v3804_v6  ;;  %v12887_v59 = vld [vmem:[%s15362_s2] ss:$0 sm:$0xff] }
 0x591   :  { %16513 = vst [vmem:[#allocation110_spill] sm:$0xff] %v12865_v4  ;;  %16514 = vst [vmem:[#allocation111_spill] sm:$0xff] %v12868_v62  ;;  %4406 = vrot.lane.b32.xlu1 %v12865_v4, %s9030_s10  ;;  %4404 = vrot.lane.b32.xlu0 %v12868_v62, %s9030_s10  ;;  %v12878_v0 = vld [vmem:[#allocation3 + $0x290] sm:$0xff]  ;;  %v4276_v48 = vrot.slane %v12870_v56, 1  ;;  %v12881_v35 = vld [vmem:[#allocation3 + $0x288] sm:$0xff]  ;;  %v3703_v28 = vadd.f32 %v12887_v59, %v3702_v21  ;;  %v3806_v6 = vmax.f32 %v3708_v1, 0.0 }
 0x592   :  { %16515 = vst [vmem:[#allocation112_spill] sm:$0xff] %v12870_v56  ;;  %16516 = vst [vmem:[#allocation25_spill] sm:$0xff] %v12878_v0  ;;  %v4274_v31 = vrot.slane %v12878_v0, 1  ;;  %v4273_v63 = vrot.slane %v12881_v35, 1  ;;  %s9037_s2 = smov 40  }
 0x593   :  { %16517 = vst [vmem:[#allocation117_spill] sm:$0xff] %v12881_v35  ;;  %3868 = vst.msk [vmem:[#allocation3 + $0x2b9] sm:$0xff] %vm114_vm14, %v3803_v51  ;;  %v3805_v62 = vmax.f32 %v3703_v28, 0.0  ;;  %v8462_v51 = vpop.f32.mrb[56].mxu0 }
 0x594   :  { %4039 = vst.msk [vmem:[#allocation5 + $0x198] sm:$0xff] %vm114_vm14, %v12878_v0  ;;  %4038 = vst.msk [vmem:[#allocation5 + $0x190] sm:$0xff] %vm114_vm14, %v12881_v35  ;;  %v12897_v4 = vsel %vm599_vm3, %v4274_v31, %v4276_v48  ;;  %v12900_v56 = vsel %vm599_vm3, %v4273_v63, %v4274_v31  ;;  %v12902_v21 = vld [vmem:[#allocation3 + $0x2b0] sm:$0x3]  ;;  %v3718_v0 = vadd.f32 %v12887_v59, %v8462_v51  ;;  %v3712_v23 = vpop.f32.mrb[57].mxu0 }
 0x595   :  { %16518 = vst [vmem:[#allocation118_spill] sm:$0xff] %v12897_v4  ;;  %16519 = vst [vmem:[#allocation119_spill] sm:$0xff] %v12900_v56  ;;  %4410 = vrot.lane.b32.xlu1 %v12897_v4, %s9030_s10  ;;  %4408 = vrot.lane.b32.xlu0 %v12900_v56, %s9030_s10  ;;  %v4281_v48 = vrot.slane %v12902_v21, 1  ;;  %v3713_v31 = vadd.f32 %v12887_v59, %v3712_v23  ;;  %v8465_v4 = vpop.f32.mrb[58].mxu0 }
 0x596   :  { %16520 = vst [vmem:[#allocation120_spill] sm:$0xff] %v12902_v21  ;;  %3871 = vst.msk [vmem:[#allocation3 + $0x2d9] sm:$0xff] %vm114_vm14, %v3806_v6  ;;  %v12910_v1 = vld [vmem:[#allocation3 + $0x2a8] sm:$0xff]  ;;  %v12913_v28 = vld [vmem:[#allocation3 + $0x2a0] sm:$0xff]  ;;  %v3808_v51 = vmax.f32 %v3718_v0, 0.0  ;;  %v3722_v35 = vpop.f32.mrb[59].mxu0 }
 0x597   :  { %16521 = vst [vmem:[#allocation121_spill] sm:$0xff] %v12910_v1  ;;  %16522 = vst [vmem:[#allocation122_spill] sm:$0xff] %v12913_v28  ;;  %v4279_v63 = vrot.slane %v12910_v1, 1  ;;  %v4278_v6 = vrot.slane %v12913_v28, 1  ;;  %v3807_v56 = vmax.f32 %v3713_v31, 0.0 }
 0x598   :  { %3870 = vst.msk [vmem:[#allocation3 + $0x2d1] sm:$0xff] %vm114_vm14, %v3805_v62  ;;  %4041 = vst.msk [vmem:[#allocation5 + $0x1a8] sm:$0xff] %vm114_vm14, %v12910_v1  ;;  %v12929_v23 = vld [vmem:[#allocation3 + $0x2c8] sm:$0x3]  ;;  %v3728_v1 = vadd.f32 %v12887_v59, %v8465_v4 }
 0x599   :  { %4040 = vst.msk [vmem:[#allocation5 + $0x1a0] sm:$0xff] %vm114_vm14, %v12913_v28  ;;  %v12924_v21 = vsel %vm599_vm3, %v4279_v63, %v4281_v48  ;;  %v12927_v62 = vsel %vm599_vm3, %v4278_v6, %v4279_v63  ;;  %16525 = vst [vmem:[#allocation9_spill] sm:$0xff] %v12929_v23  ;;  %v4286_v48 = vrot.slane %v12929_v23, 1  ;;  %v3723_v63 = vadd.f32 %v12887_v59, %v3722_v35 }
 0x59a   :  { %16523 = vst [vmem:[#allocation24_spill] sm:$0xff] %v12924_v21  ;;  %16524 = vst [vmem:[#allocation8_spill] sm:$0xff] %v12927_v62  ;;  %4414 = vrot.lane.b32.xlu1 %v12924_v21, %s9030_s10  ;;  %4412 = vrot.lane.b32.xlu0 %v12927_v62, %s9030_s10  ;;  %v12937_v0 = vld [vmem:[#allocation3 + $0x2c0] sm:$0xff]  ;;  %v12940_v31 = vld [vmem:[#allocation3 + $0x2b8] sm:$0xff]  ;;  %v8468_v21 = vpop.f32.mrb[60].mxu0 }
 0x59b   :  { %3873 = vst.msk [vmem:[#allocation3 + $0x2f1] sm:$0xff] %vm114_vm14, %v3808_v51  ;;  %16526 = vst [vmem:[#allocation26_spill] sm:$0xff] %v12937_v0  ;;  %v4284_v6 = vrot.slane %v12937_v0, 1  ;;  %v4283_v4 = vrot.slane %v12940_v31, 1  ;;  %v3810_v51 = vmax.f32 %v3728_v1, 0.0  ;;  %v3809_v62 = vmax.f32 %v3723_v63, 0.0 }
 0x59c   :  { %3872 = vst.msk [vmem:[#allocation3 + $0x2e9] sm:$0xff] %vm114_vm14, %v3807_v56  ;;  %4043 = vst.msk [vmem:[#allocation5 + $0x1b8] sm:$0xff] %vm114_vm14, %v12937_v0  ;;  %v3738_v0 = vadd.f32 %v12887_v59, %v8468_v21  ;;  %v3732_v28 = vpop.f32.mrb[61].mxu0 }
 0x59d   :  { %4042 = vst.msk [vmem:[#allocation5 + $0x1b0] sm:$0xff] %vm114_vm14, %v12940_v31  ;;  %v12951_v23 = vsel %vm599_vm3, %v4284_v6, %v4286_v48  ;;  %v12954_v56 = vsel %vm599_vm3, %v4283_v4, %v4284_v6  ;;  %v12956_v35 = vld [vmem:[#allocation3 + $0x2e0] sm:$0x3]  ;;  %3875 = vst.msk [vmem:[#allocation3 + $0x309] sm:$0xff] %vm114_vm14, %v3810_v51  ;;  %v3733_v6 = vadd.f32 %v12887_v59, %v3732_v28 }
 0x59e   :  { %16527 = vst [vmem:[#allocation10_spill] sm:$0xff] %v12951_v23  ;;  %16528 = vst [vmem:[#allocation33_spill] sm:$0xff] %v12954_v56  ;;  %4418 = vrot.lane.b32.xlu1 %v12951_v23, %s9030_s10  ;;  %4416 = vrot.lane.b32.xlu0 %v12954_v56, %s9030_s10  ;;  %v4291_v48 = vrot.slane %v12956_v35, 1  ;;  %v3812_v51 = vmax.f32 %v3738_v0, 0.0 }
 0x59f   :  { %16529 = vst [vmem:[#allocation41_spill] sm:$0xff] %v12956_v35  ;;  %v12964_v1 = vld [vmem:[#allocation3 + $0x2d8] sm:$0xff]  ;;  %v12967_v63 = vld [vmem:[#allocation3 + $0x2d0] sm:$0xff]  ;;  %3874 = vst.msk [vmem:[#allocation3 + $0x301] sm:$0xff] %vm114_vm14, %v3809_v62  ;;  %v3811_v56 = vmax.f32 %v3733_v6, 0.0 }
 0x5a0   :  { %16530 = vst [vmem:[#allocation123_spill] sm:$0xff] %v12964_v1  ;;  %16531 = vst [vmem:[#allocation44_spill] sm:$0xff] %v12967_v63  ;;  %v4289_v4 = vrot.slane %v12964_v1, 1  ;;  %v4288_v21 = vrot.slane %v12967_v63, 1 }
 0x5a1   :  { %4045 = vst.msk [vmem:[#allocation5 + $0x1c8] sm:$0xff] %vm114_vm14, %v12964_v1  ;;  %4044 = vst.msk [vmem:[#allocation5 + $0x1c0] sm:$0xff] %vm114_vm14, %v12967_v63 }
 0x5a2   :  { %v12978_v23 = vsel %vm599_vm3, %v4289_v4, %v4291_v48  ;;  %v12981_v35 = vsel %vm599_vm3, %v4288_v21, %v4289_v4  ;;  %v12983_v62 = vld [vmem:[#allocation3 + $0x2f8] sm:$0x3]  ;;  %3877 = vst.msk [vmem:[#allocation3 + $0x321] sm:$0xff] %vm114_vm14, %v3812_v51  ;;  %3876 = vst.msk [vmem:[#allocation3 + $0x319] sm:$0xff] %vm114_vm14, %v3811_v56 }
 0x5a3   :  { %16532 = vst [vmem:[#allocation124_spill] sm:$0xff] %v12978_v23  ;;  %16533 = vst [vmem:[#allocation45_spill] sm:$0xff] %v12981_v35  ;;  %4422 = vrot.lane.b32.xlu1 %v12978_v23, %s9030_s10  ;;  %4420 = vrot.lane.b32.xlu0 %v12981_v35, %s9030_s10  ;;  %v12990_v28 = vld [vmem:[#allocation3 + $0x2f0] sm:$0xff]  ;;  %v4296_v0 = vrot.slane %v12983_v62, 1  ;;  %v12993_v6 = vld [vmem:[#allocation3 + $0x2e8] sm:$0xff] }
 0x5a4   :  { %16534 = vst [vmem:[#allocation125_spill] sm:$0xff] %v12983_v62  ;;  %16535 = vst [vmem:[#allocation50_spill] sm:$0xff] %v12990_v28  ;;  %v4294_v48 = vrot.slane %v12990_v28, 1  ;;  %v4293_v4 = vrot.slane %v12993_v6, 1  ;;  %v13008_v35 = vld [vmem:[#allocation3 + $0x310] sm:$0x3] }
 0x5a5   :  { %16536 = vst [vmem:[#allocation126_spill] sm:$0xff] %v12993_v6  ;;  %4047 = vst.msk [vmem:[#allocation5 + $0x1d8] sm:$0xff] %vm114_vm14, %v12990_v28  ;;  %v4301_v23 = vrot.slane %v13008_v35, 1 }
 0x5a6   :  { %4046 = vst.msk [vmem:[#allocation5 + $0x1d0] sm:$0xff] %vm114_vm14, %v12993_v6  ;;  %v13003_v21 = vsel %vm599_vm3, %v4294_v48, %v4296_v0  ;;  %v13006_v51 = vsel %vm599_vm3, %v4293_v4, %v4294_v48  ;;  %16539 = vst [vmem:[#allocation128_spill] sm:$0xff] %v13008_v35  ;;  %v13014_v56 = vld [vmem:[#allocation3 + $0x308] sm:$0xff]  ;;  %v13017_v62 = vld [vmem:[#allocation3 + $0x300] sm:$0xff]  ;;  %v4313_v4 = vpop.permute.xlu0 %4312 }
 0x5a7   :  { %16537 = vst [vmem:[#allocation127_spill] sm:$0xff] %v13003_v21  ;;  %16538 = vst [vmem:[#allocation60_spill] sm:$0xff] %v13006_v51  ;;  %4426 = vrot.lane.b32.xlu1 %v13003_v21, %s9030_s10  ;;  %4424 = vrot.lane.b32.xlu0 %v13006_v51, %s9030_s10  ;;  %v4299_v0 = vrot.slane %v13014_v56, 1  ;;  %v4298_v48 = vrot.slane %v13017_v62, 1  ;;  %v4315_v21 = vpop.permute.xlu1 %4314 }
 0x5a8   :  { %16540 = vst [vmem:[#allocation71_spill] sm:$0xff] %v13014_v56  ;;  %16541 = vst [vmem:[#allocation129_spill] sm:$0xff] %v13017_v62 }
 0x5a9   :  { %4049 = vst.msk [vmem:[#allocation5 + $0x1e8] sm:$0xff] %vm114_vm14, %v13014_v56  ;;  %4048 = vst.msk [vmem:[#allocation5 + $0x1e0] sm:$0xff] %vm114_vm14, %v13017_v62  ;;  %v13028_v51 = vsel %vm599_vm3, %v4299_v0, %v4301_v23  ;;  %v13031_v35 = vsel %vm599_vm3, %v4298_v48, %v4299_v0  ;;  %v13033_v6 = vld [vmem:[#allocation3 + $0x328] sm:$0x3]  ;;  %v13039_v62 = vld [vmem:[#allocation3 + $0x320] sm:$0xff]  ;;  %v4566_v23 = vrot.slane %v12210_v33, 2 }
 0x5aa   :  { %4503 = vst.msk [vmem:[#allocation5 + $0x10] sm:$0xff] %vm4500_vm2, %v4313_v4  ;;  %4504 = vst.msk [vmem:[#allocation5 + $0x18] sm:$0xff] %vm4500_vm2, %v4315_v21  ;;  %v4306_v4 = vrot.slane %v13033_v6, 1  ;;  %v13042_v56 = vld [vmem:[#allocation3 + $0x318] sm:$0xff]  ;;  %v4304_v21 = vrot.slane %v13039_v62, 1 }
 0x5ab   :  { %16542 = vst [vmem:[#allocation130_spill] sm:$0xff] %v13028_v51  ;;  %16543 = vst [vmem:[#allocation131_spill] sm:$0xff] %v13031_v35  ;;  %4430 = vrot.lane.b32.xlu1 %v13028_v51, %s9030_s10  ;;  %4428 = vrot.lane.b32.xlu0 %v13031_v35, %s9030_s10  ;;  %v4303_v0 = vrot.slane %v13042_v56, 1  ;;  %v8947_v48 = vld [vmem:[#allocation3 + $0x10] sm:$0x3]  ;;  %v4565_v51 = vrot.slane %v12206_v24, 2  ;;  %v4319_v28 = vpop.permute.xlu1 %4318 }
 0x5ac   :  { %16544 = vst [vmem:[#allocation132_spill] sm:$0xff] %v13033_v6  ;;  %16545 = vst [vmem:[#allocation133_spill] sm:$0xff] %v13039_v62  ;;  %v4568_v35 = vrot.slane %v8947_v48, 2  ;;  %v4317_v6 = vpop.permute.xlu0 %4316  ;;  %v13055_v33 = vsel %vm599_vm3, %v4304_v21, %v4306_v4  ;;  %v8948_v4 = vld [vmem:[#allocation3 + $0x28] sm:$0x3] }
 0x5ad   :  { %16546 = vst [vmem:[#allocation82_spill] sm:$0xff] %v13042_v56  ;;  %4051 = vst.msk [vmem:[#allocation5 + $0x1f8] sm:$0xff] %vm114_vm14, %v13039_v62  ;;  %v13058_v62 = vsel %vm599_vm3, %v4303_v0, %v4304_v21  ;;  %v4567_v48 = vsel %vm1017_vm4, %v4565_v51, %v4566_v23  ;;  %v4573_v21 = vrot.slane %v8948_v4, 2  ;;  %v4570_v0 = vrot.slane %v12277_v3, 2 }
 0x5ae   :  { %4050 = vst.msk [vmem:[#allocation5 + $0x1f0] sm:$0xff] %vm114_vm14, %v13042_v56  ;;  %16547 = vst [vmem:[#allocation134_spill] sm:$0xff] %v13055_v33  ;;  %v4569_v24 = vsel %vm1017_vm4, %v4566_v23, %v4568_v35  ;;  %v4576_v51 = vrot.slane %v12299_v36, 2  ;;  %v8949_v23 = vld [vmem:[#allocation3 + $0x40] sm:$0x3] }
 0x5af   :  { %4506 = vst.msk [vmem:[#allocation5 + $0x28] sm:$0xff] %vm4500_vm2, %v4319_v28  ;;  %4505 = vst.msk [vmem:[#allocation5 + $0x20] sm:$0xff] %vm4500_vm2, %v4317_v6  ;;  %4434 = vrot.lane.b32.xlu1 %v13055_v33, %s9030_s10  ;;  %4432 = vrot.lane.b32.xlu0 %v13058_v62, %s9030_s10  ;;  %v4323_v56 = vpop.permute.xlu1 %4322  ;;  %v4571_v6 = vrot.slane %v12275_v13, 2  ;;  %v4578_v33 = vrot.slane %v8949_v23, 2  ;;  %v4580_v23 = vrot.slane %v12325_v52, 2 }
 0x5b0   :  { %16548 = vst [vmem:[#allocation85_spill] sm:$0xff] %v13058_v62  ;;  %v4321_v28 = vpop.permute.xlu0 %4320  ;;  %4508 = vst.msk [vmem:[#allocation5 + $0x38] sm:$0xff] %vm4500_vm2, %v4323_v56 }
 0x5b1   :  { %4507 = vst.msk [vmem:[#allocation5 + $0x30] sm:$0xff] %vm4500_vm2, %v4321_v28  ;;  %v13076_v56 = vsel %vm1017_vm4, %v4571_v6, %v4573_v21  ;;  %v13079_v28 = vsel %vm1017_vm4, %v4570_v0, %v4571_v6  ;;  %v4581_v21 = vrot.slane %v12323_v34, 2  ;;  %v8950_v0 = vld [vmem:[#allocation3 + $0x58] sm:$0x3] }
 0x5b2   :  { %16549 = vst [vmem:[#allocation135_spill] sm:$0xff] %v13076_v56  ;;  %16550 = vst [vmem:[#allocation88_spill] sm:$0xff] %v13079_v28 }
 0x5b3   :  { %4727 = vrot.lane.b32.xlu1 %v4569_v24, %s9032_s18  ;;  %4725 = vrot.lane.b32.xlu0 %v4567_v48, %s9032_s18  ;;  %v4327_v62 = vpop.permute.xlu1 %4326  ;;  %v4575_v24 = vrot.slane %v12301_v58, 2 }
 0x5b4   :  { %v4325_v35 = vpop.permute.xlu0 %4324  ;;  %4510 = vst.msk [vmem:[#allocation5 + $0x48] sm:$0xff] %vm4500_vm2, %v4327_v62  ;;  %v13087_v62 = vsel %vm1017_vm4, %v4576_v51, %v4578_v33 }
 0x5b5   :  { %4509 = vst.msk [vmem:[#allocation5 + $0x40] sm:$0xff] %vm4500_vm2, %v4325_v35  ;;  %16551 = vst [vmem:[#allocation136_spill] sm:$0xff] %v13087_v62  ;;  %v13092_v6 = vsel %vm1017_vm4, %v4575_v24, %v4576_v51  ;;  %v4583_v35 = vrot.slane %v8950_v0, 2  ;;  %v13107_v24 = vsel %vm1017_vm4, %v4580_v23, %v4581_v21  ;;  %v4585_v0 = vrot.slane %v12349_v40, 2 }
 0x5b6   :  { %16552 = vst [vmem:[#allocation91_spill] sm:$0xff] %v13092_v6  ;;  %16554 = vst [vmem:[#allocation138_spill] sm:$0xff] %v13107_v24 }
 0x5b7   :  { %4731 = vrot.lane.b32.xlu1 %v13076_v56, %s9032_s18  ;;  %4729 = vrot.lane.b32.xlu0 %v13079_v28, %s9032_s18  ;;  %v4331_v48 = vpop.permute.xlu1 %4330  ;;  %v13104_v51 = vsel %vm1017_vm4, %v4581_v21, %v4583_v35  ;;  %v4591_v21 = vrot.slane %v12371_v10, 2  ;;  %v8952_v35 = vld [vmem:[#allocation3 + $0x88] sm:$0x3] }
 0x5b8   :  { %v4329_v4 = vpop.permute.xlu0 %4328  ;;  %4512 = vst.msk [vmem:[#allocation5 + $0x58] sm:$0xff] %vm4500_vm2, %v4331_v48  ;;  %v4586_v48 = vrot.slane %v12347_v41, 2  ;;  %16553 = vst [vmem:[#allocation137_spill] sm:$0xff] %v13104_v51  ;;  %v4593_v23 = vrot.slane %v8952_v35, 2  ;;  %v4595_v35 = vrot.slane %v12397_v37, 2 }
 0x5b9   :  { %4511 = vst.msk [vmem:[#allocation5 + $0x50] sm:$0xff] %vm4500_vm2, %v4329_v4  ;;  %v8951_v4 = vld [vmem:[#allocation3 + $0x70] sm:$0x3] }
 0x5ba   :  { %v4588_v56 = vrot.slane %v8951_v4, 2 }
 0x5bb   :  { %4735 = vrot.lane.b32.xlu1 %v13087_v62, %s9032_s18  ;;  %4733 = vrot.lane.b32.xlu0 %v13092_v6, %s9032_s18  ;;  %v4335_v33 = vpop.permute.xlu1 %4334 }
 0x5bc   :  { %v4333_v28 = vpop.permute.xlu0 %4332  ;;  %4514 = vst.msk [vmem:[#allocation5 + $0x68] sm:$0xff] %vm4500_vm2, %v4335_v33  ;;  %v13115_v33 = vsel %vm1017_vm4, %v4586_v48, %v4588_v56 }
 0x5bd   :  { %4513 = vst.msk [vmem:[#allocation5 + $0x60] sm:$0xff] %vm4500_vm2, %v4333_v28  ;;  %16555 = vst [vmem:[#allocation139_spill] sm:$0xff] %v13115_v33  ;;  %v13120_v28 = vsel %vm1017_vm4, %v4585_v0, %v4586_v48  ;;  %v13132_v48 = vsel %vm1017_vm4, %v4591_v21, %v4593_v23 }
 0x5be   :  { %16556 = vst [vmem:[#allocation100_spill] sm:$0xff] %v13120_v28  ;;  %16557 = vst [vmem:[#allocation103_spill] sm:$0xff] %v13132_v48 }
 0x5bf   :  { %4739 = vrot.lane.b32.xlu1 %v13104_v51, %s9032_s18  ;;  %4737 = vrot.lane.b32.xlu0 %v13107_v24, %s9032_s18  ;;  %v4339_v6 = vpop.permute.xlu1 %4338  ;;  %v4590_v51 = vrot.slane %v12373_v61, 2 }
 0x5c0   :  { %v4337_v4 = vpop.permute.xlu0 %4336  ;;  %4516 = vst.msk [vmem:[#allocation5 + $0x78] sm:$0xff] %vm4500_vm2, %v4339_v6  ;;  %v4596_v6 = vrot.slane %v12395_v60, 2 }
 0x5c1   :  { %4515 = vst.msk [vmem:[#allocation5 + $0x70] sm:$0xff] %vm4500_vm2, %v4337_v4  ;;  %v8953_v4 = vld [vmem:[#allocation3 + $0xa0] sm:$0x3]  ;;  %v13135_v0 = vsel %vm1017_vm4, %v4590_v51, %v4591_v21  ;;  %v8954_v21 = vld [vmem:[#allocation3 + $0xb8] sm:$0x3] }
 0x5c2   :  { %v4598_v62 = vrot.slane %v8953_v4, 2  ;;  %16558 = vst [vmem:[#allocation106_spill] sm:$0xff] %v13135_v0  ;;  %v13148_v51 = vsel %vm1017_vm4, %v4595_v35, %v4596_v6  ;;  %v4603_v23 = vrot.slane %v8954_v21, 2  ;;  %v4605_v21 = vrot.slane %v12445_v39, 2 }
 0x5c3   :  { %4743 = vrot.lane.b32.xlu1 %v13115_v33, %s9032_s18  ;;  %4741 = vrot.lane.b32.xlu0 %v13120_v28, %s9032_s18  ;;  %v4343_v56 = vpop.permute.xlu1 %4342  ;;  %16560 = vst [vmem:[#allocation141_spill] sm:$0xff] %v13148_v51 }
 0x5c4   :  { %v4341_v24 = vpop.permute.xlu0 %4340  ;;  %4518 = vst.msk [vmem:[#allocation5 + $0x88] sm:$0xff] %vm4500_vm2, %v4343_v56  ;;  %v13143_v56 = vsel %vm1017_vm4, %v4596_v6, %v4598_v62 }
 0x5c5   :  { %4517 = vst.msk [vmem:[#allocation5 + $0x80] sm:$0xff] %vm4500_vm2, %v4341_v24  ;;  %16559 = vst [vmem:[#allocation140_spill] sm:$0xff] %v13143_v56  ;;  %v4601_v24 = vrot.slane %v12419_v50, 2 }
 0x5c7   :  { %4747 = vrot.lane.b32.xlu1 %v13132_v48, %s9032_s18  ;;  %4745 = vrot.lane.b32.xlu0 %v13135_v0, %s9032_s18  ;;  %v4347_v28 = vpop.permute.xlu1 %4346  ;;  %v4600_v48 = vrot.slane %v12421_v15, 2  ;;  %v13160_v6 = vsel %vm1017_vm4, %v4601_v24, %v4603_v23 }
 0x5c8   :  { %v4345_v4 = vpop.permute.xlu0 %4344  ;;  %4520 = vst.msk [vmem:[#allocation5 + $0x98] sm:$0xff] %vm4500_vm2, %v4347_v28  ;;  %v4606_v28 = vrot.slane %v12443_v20, 2  ;;  %16561 = vst [vmem:[#allocation142_spill] sm:$0xff] %v13160_v6 }
 0x5c9   :  { %4519 = vst.msk [vmem:[#allocation5 + $0x90] sm:$0xff] %vm4500_vm2, %v4345_v4  ;;  %v8955_v4 = vld [vmem:[#allocation3 + $0xd0] sm:$0x3]  ;;  %v13163_v35 = vsel %vm1017_vm4, %v4600_v48, %v4601_v24  ;;  %v8956_v24 = vld [vmem:[#allocation3 + $0xe8] sm:$0x3] }
 0x5ca   :  { %v4608_v33 = vrot.slane %v8955_v4, 2  ;;  %16562 = vst [vmem:[#allocation143_spill] sm:$0xff] %v13163_v35  ;;  %v13176_v48 = vsel %vm1017_vm4, %v4605_v21, %v4606_v28  ;;  %v4613_v23 = vrot.slane %v8956_v24, 2  ;;  %v4615_v24 = vrot.slane %v12493_v19, 2 }
 0x5cb   :  { %4751 = vrot.lane.b32.xlu1 %v13143_v56, %s9032_s18  ;;  %4749 = vrot.lane.b32.xlu0 %v13148_v51, %s9032_s18  ;;  %v4351_v62 = vpop.permute.xlu1 %4350  ;;  %16564 = vst [vmem:[#allocation145_spill] sm:$0xff] %v13176_v48 }
 0x5cc   :  { %v4349_v0 = vpop.permute.xlu0 %4348  ;;  %4522 = vst.msk [vmem:[#allocation5 + $0xa8] sm:$0xff] %vm4500_vm2, %v4351_v62  ;;  %v13171_v62 = vsel %vm1017_vm4, %v4606_v28, %v4608_v33 }
 0x5cd   :  { %4521 = vst.msk [vmem:[#allocation5 + $0xa0] sm:$0xff] %vm4500_vm2, %v4349_v0  ;;  %16563 = vst [vmem:[#allocation144_spill] sm:$0xff] %v13171_v62  ;;  %v4611_v0 = vrot.slane %v12467_v57, 2 }
 0x5cf   :  { %4755 = vrot.lane.b32.xlu1 %v13160_v6, %s9032_s18  ;;  %4753 = vrot.lane.b32.xlu0 %v13163_v35, %s9032_s18  ;;  %v4355_v51 = vpop.permute.xlu1 %4354  ;;  %v4610_v6 = vrot.slane %v12469_v43, 2  ;;  %v13188_v28 = vsel %vm1017_vm4, %v4611_v0, %v4613_v23 }
 0x5d0   :  { %v4353_v4 = vpop.permute.xlu0 %4352  ;;  %4524 = vst.msk [vmem:[#allocation5 + $0xb8] sm:$0xff] %vm4500_vm2, %v4355_v51  ;;  %v4616_v51 = vrot.slane %v12491_v46, 2  ;;  %16565 = vst [vmem:[#allocation146_spill] sm:$0xff] %v13188_v28 }
 0x5d1   :  { %4523 = vst.msk [vmem:[#allocation5 + $0xb0] sm:$0xff] %vm4500_vm2, %v4353_v4  ;;  %v8957_v4 = vld [vmem:[#allocation3 + $0x100] sm:$0x3]  ;;  %v13191_v21 = vsel %vm1017_vm4, %v4610_v6, %v4611_v0  ;;  %v8958_v0 = vld [vmem:[#allocation3 + $0x118] sm:$0x3] }
 0x5d2   :  { %v4618_v56 = vrot.slane %v8957_v4, 2  ;;  %16566 = vst [vmem:[#allocation147_spill] sm:$0xff] %v13191_v21  ;;  %v13204_v6 = vsel %vm1017_vm4, %v4615_v24, %v4616_v51  ;;  %v4623_v23 = vrot.slane %v8958_v0, 2  ;;  %v4625_v0 = vrot.slane %v12544_v42, 2 }
 0x5d3   :  { %4759 = vrot.lane.b32.xlu1 %v13171_v62, %s9032_s18  ;;  %4757 = vrot.lane.b32.xlu0 %v13176_v48, %s9032_s18  ;;  %v4359_v33 = vpop.permute.xlu1 %4358  ;;  %16568 = vst [vmem:[#allocation149_spill] sm:$0xff] %v13204_v6 }
 0x5d4   :  { %v4357_v35 = vpop.permute.xlu0 %4356  ;;  %4526 = vst.msk [vmem:[#allocation5 + $0xc8] sm:$0xff] %vm4500_vm2, %v4359_v33  ;;  %v13199_v33 = vsel %vm1017_vm4, %v4616_v51, %v4618_v56 }
 0x5d5   :  { %4525 = vst.msk [vmem:[#allocation5 + $0xc0] sm:$0xff] %vm4500_vm2, %v4357_v35  ;;  %16567 = vst [vmem:[#allocation148_spill] sm:$0xff] %v13199_v33  ;;  %v4621_v35 = vrot.slane %v12515_v29, 2 }
 0x5d7   :  { %4763 = vrot.lane.b32.xlu1 %v13188_v28, %s9032_s18  ;;  %4761 = vrot.lane.b32.xlu0 %v13191_v21, %s9032_s18  ;;  %v4363_v48 = vpop.permute.xlu1 %4362  ;;  %v4620_v28 = vrot.slane %v12517_v22, 2  ;;  %v13217_v51 = vsel %vm1017_vm4, %v4621_v35, %v4623_v23  ;;  %v4630_v23 = vrot.slane %v12571_v2, 2 }
 0x5d8   :  { %v4361_v4 = vpop.permute.xlu0 %4360  ;;  %4528 = vst.msk [vmem:[#allocation5 + $0xd8] sm:$0xff] %vm4500_vm2, %v4363_v48  ;;  %v4626_v48 = vrot.slane %v12541_v47, 2  ;;  %16569 = vst [vmem:[#allocation150_spill] sm:$0xff] %v13217_v51 }
 0x5d9   :  { %4527 = vst.msk [vmem:[#allocation5 + $0xd0] sm:$0xff] %vm4500_vm2, %v4361_v4  ;;  %v4628_v4 = vrot.slane %v12533_v8, 2  ;;  %v13220_v24 = vsel %vm1017_vm4, %v4620_v28, %v4621_v35  ;;  %v4633_v35 = vrot.slane %v12560_v54, 2 }
 0x5da   :  { %16570 = vst [vmem:[#allocation151_spill] sm:$0xff] %v13220_v24  ;;  %v13233_v28 = vsel %vm1017_vm4, %v4625_v0, %v4626_v48  ;;  %v4635_v0 = vrot.slane %v12598_v26, 2 }
 0x5db   :  { %4767 = vrot.lane.b32.xlu1 %v13199_v33, %s9032_s18  ;;  %4765 = vrot.lane.b32.xlu0 %v13204_v6, %s9032_s18  ;;  %v4367_v56 = vpop.permute.xlu1 %4366  ;;  %16572 = vst [vmem:[#allocation153_spill] sm:$0xff] %v13233_v28 }
 0x5dc   :  { %v4365_v21 = vpop.permute.xlu0 %4364  ;;  %4530 = vst.msk [vmem:[#allocation5 + $0xe8] sm:$0xff] %vm4500_vm2, %v4367_v56  ;;  %v13228_v56 = vsel %vm1017_vm4, %v4626_v48, %v4628_v4 }
 0x5dd   :  { %4529 = vst.msk [vmem:[#allocation5 + $0xe0] sm:$0xff] %vm4500_vm2, %v4365_v21  ;;  %16571 = vst [vmem:[#allocation152_spill] sm:$0xff] %v13228_v56  ;;  %v4631_v21 = vrot.slane %v12568_v55, 2 }
 0x5df   :  { %4771 = vrot.lane.b32.xlu1 %v13217_v51, %s9032_s18  ;;  %4769 = vrot.lane.b32.xlu0 %v13220_v24, %s9032_s18  ;;  %v4371_v6 = vpop.permute.xlu1 %4370  ;;  %v13247_v54 = vsel %vm1017_vm4, %v4631_v21, %v4633_v35  ;;  %v13250_v48 = vsel %vm1017_vm4, %v4630_v23, %v4631_v21  ;;  %v4641_v21 = vrot.slane %v12624_v5, 2  ;;  %v4643_v35 = vrot.slane %v12616_v17, 2 }
 0x5e0   :  { %v4369_v8 = vpop.permute.xlu0 %4368  ;;  %4532 = vst.msk [vmem:[#allocation5 + $0xf8] sm:$0xff] %vm4500_vm2, %v4371_v6  ;;  %v4636_v6 = vrot.slane %v12595_v30, 2  ;;  %16573 = vst [vmem:[#allocation154_spill] sm:$0xff] %v13247_v54  ;;  %v4640_v23 = vrot.slane %v12627_v45, 2 }
 0x5e1   :  { %4531 = vst.msk [vmem:[#allocation5 + $0xf0] sm:$0xff] %vm4500_vm2, %v4369_v8  ;;  %v4638_v8 = vrot.slane %v12587_v12, 2  ;;  %16574 = vst [vmem:[#allocation155_spill] sm:$0xff] %v13250_v48  ;;  %v13278_v17 = vsel %vm1017_vm4, %v4641_v21, %v4643_v35  ;;  %v4651_v35 = vrot.slane %v12662_v14, 2 }
 0x5e2   :  { %16577 = vst [vmem:[#allocation158_spill] sm:$0xff] %v13278_v17 }
 0x5e3   :  { %4775 = vrot.lane.b32.xlu1 %v13228_v56, %s9032_s18  ;;  %4773 = vrot.lane.b32.xlu0 %v13233_v28, %s9032_s18  ;;  %v4375_v4 = vpop.permute.xlu1 %4374 }
 0x5e4   :  { %v4373_v24 = vpop.permute.xlu0 %4372  ;;  %4534 = vst.msk [vmem:[#allocation5 + $0x108] sm:$0xff] %vm4500_vm2, %v4375_v4  ;;  %v13258_v4 = vsel %vm1017_vm4, %v4636_v6, %v4638_v8  ;;  %v4646_v8 = vrot.slane %v12244_v44, 2 }
 0x5e5   :  { %4533 = vst.msk [vmem:[#allocation5 + $0x100] sm:$0xff] %vm4500_vm2, %v4373_v24  ;;  %16575 = vst [vmem:[#allocation156_spill] sm:$0xff] %v13258_v4  ;;  %v13263_v24 = vsel %vm1017_vm4, %v4635_v0, %v4636_v6 }
 0x5e6   :  { %16576 = vst [vmem:[#allocation157_spill] sm:$0xff] %v13263_v24 }
 0x5e7   :  { %4779 = vrot.lane.b32.xlu1 %v13247_v54, %s9032_s18  ;;  %4777 = vrot.lane.b32.xlu0 %v13250_v48, %s9032_s18  ;;  %v4379_v56 = vpop.permute.xlu1 %4378  ;;  %v16590_v48 = vld [vmem:[#allocation84_spill] sm:$0xff] }
 0x5e8   :  { %v4377_v12 = vpop.permute.xlu0 %4376  ;;  %4536 = vst.msk [vmem:[#allocation5 + $0x118] sm:$0xff] %vm4500_vm2, %v4379_v56  ;;  %v4648_v56 = vrot.slane %v12608_v18, 2  ;;  %v4673_v28 = vrot.slane %v16590_v48, 2 }
 0x5e9   :  { %4535 = vst.msk [vmem:[#allocation5 + $0x110] sm:$0xff] %vm4500_vm2, %v4377_v12  ;;  %v4645_v12 = vrot.slane %v12246_v38, 2 }
 0x5ea   :  { %v4649_v44 = vsel %vm1017_vm4, %v4646_v8, %v4648_v56 }
 0x5eb   :  { %4783 = vrot.lane.b32.xlu1 %v13258_v4, %s9032_s18  ;;  %4781 = vrot.lane.b32.xlu0 %v13263_v24, %s9032_s18  ;;  %v4383_v6 = vpop.permute.xlu1 %4382  ;;  %v13281_v4 = vsel %vm1017_vm4, %v4640_v23, %v4641_v21  ;;  %v4647_v38 = vsel %vm1017_vm4, %v4645_v12, %v4646_v8  ;;  %v4653_v21 = vrot.slane %v12656_v11, 2  ;;  %v4650_v23 = vrot.slane %v12665_v27, 2 }
 0x5ec   :  { %v4381_v0 = vpop.permute.xlu0 %4380  ;;  %4538 = vst.msk [vmem:[#allocation5 + $0x128] sm:$0xff] %vm4500_vm2, %v4383_v6  ;;  %16578 = vst [vmem:[#allocation159_spill] sm:$0xff] %v13281_v4  ;;  %v4656_v8 = vrot.slane %v12689_v9, 2  ;;  %v4658_v12 = vrot.slane %v12681_v7, 2 }
 0x5ed   :  { %4537 = vst.msk [vmem:[#allocation5 + $0x120] sm:$0xff] %vm4500_vm2, %v4381_v0  ;;  %v13304_v11 = vsel %vm1017_vm4, %v4650_v23, %v4651_v35  ;;  %v4663_v23 = vrot.slane %v12708_v53, 2 }
 0x5ee   :  { %16580 = vst [vmem:[#allocation161_spill] sm:$0xff] %v13304_v11 }
 0x5ef   :  { %4787 = vrot.lane.b32.xlu1 %v13278_v17, %s9032_s18  ;;  %4785 = vrot.lane.b32.xlu0 %v13281_v4, %s9032_s18  ;;  %v4387_v18 = vpop.permute.xlu1 %4386  ;;  %v8471_v17 = vpop.f32.mrb[62].mxu0 }
 0x5f0   :  { %v4385_v6 = vpop.permute.xlu0 %4384  ;;  %4540 = vst.msk [vmem:[#allocation5 + $0x138] sm:$0xff] %vm4500_vm2, %v4387_v18  ;;  %v13301_v18 = vsel %vm1017_vm4, %v4651_v35, %v4653_v21  ;;  %v4661_v21 = vrot.slane %v12716_v32, 2  ;;  %v3742_v4 = vpop.f32.mrb[63].mxu0 }
 0x5f1   :  { %4539 = vst.msk [vmem:[#allocation5 + $0x130] sm:$0xff] %vm4500_vm2, %v4385_v6  ;;  %16579 = vst [vmem:[#allocation160_spill] sm:$0xff] %v13301_v18  ;;  %v13312_v6 = vsel %vm1017_vm4, %v4656_v8, %v4658_v12 }
 0x5f2   :  { %16581 = vst [vmem:[#allocation162_spill] sm:$0xff] %v13312_v6  ;;  %v13332_v53 = vsel %vm1017_vm4, %v4661_v21, %v4663_v23 }
 0x5f3   :  { %4791 = vrot.lane.b32.xlu1 %v4649_v44, %s9032_s18  ;;  %4789 = vrot.lane.b32.xlu0 %v4647_v38, %s9032_s18  ;;  %v4391_v0 = vpop.permute.xlu1 %4390  ;;  %v4655_v44 = vrot.slane %v12692_v16, 2 }
 0x5f4   :  { %v4389_v56 = vpop.permute.xlu0 %4388  ;;  %4542 = vst.msk [vmem:[#allocation5 + $0x148] sm:$0xff] %vm4500_vm2, %v4391_v0  ;;  %v4660_v0 = vrot.slane %v12719_v49, 2 }
 0x5f5   :  { %4541 = vst.msk [vmem:[#allocation5 + $0x140] sm:$0xff] %vm4500_vm2, %v4389_v56  ;;  %v13317_v35 = vsel %vm1017_vm4, %v4655_v44, %v4656_v8  ;;  %v16584_v8 = vld [vmem:[#allocation80_spill] sm:$0xff] }
 0x5f6   :  { %16582 = vst [vmem:[#allocation163_spill] sm:$0xff] %v13317_v35  ;;  %v4665_v44 = vrot.slane %v16584_v8, 2 }
 0x5f7   :  { %4795 = vrot.lane.b32.xlu1 %v13301_v18, %s9032_s18  ;;  %4793 = vrot.lane.b32.xlu0 %v13304_v11, %s9032_s18  ;;  %v4395_v38 = vpop.permute.xlu1 %4394  ;;  %v13335_v11 = vsel %vm1017_vm4, %v4660_v0, %v4661_v21  ;;  %v3743_v21 = vadd.f32 %v12887_v59, %v3742_v4  ;;  %v16589_v0 = vld [vmem:[#allocation86_spill] sm:$0xff] }
 0x5f8   :  { %v4393_v7 = vpop.permute.xlu0 %4392  ;;  %4544 = vst.msk [vmem:[#allocation5 + $0x158] sm:$0xff] %vm4500_vm2, %v4395_v38  ;;  %v4666_v38 = vrot.slane %v12743_v25, 2  ;;  %16586 = vst [vmem:[#allocation80_spill] sm:$0xff] %v13335_v11  ;;  %v4671_v54 = vrot.slane %v16589_v0, 2 }
 0x5f9   :  { %4543 = vst.msk [vmem:[#allocation5 + $0x150] sm:$0xff] %vm4500_vm2, %v4393_v7  ;;  %v16583_v7 = vld [vmem:[#allocation79_spill] sm:$0xff] }
 0x5fa   :  { %v4668_v18 = vrot.slane %v16583_v7, 2  ;;  %16585 = vst [vmem:[#allocation79_spill] sm:$0xff] %v13332_v53  ;;  %v3748_v7 = vadd.f32 %v12887_v59, %v8471_v17  ;;  %v13346_v23 = vsel %vm1017_vm4, %v4665_v44, %v4666_v38  ;;  %v16591_v17 = vld [vmem:[#allocation87_spill] sm:$0xff]  ;;  %v16593_v44 = vld [vmem:[#allocation92_spill] sm:$0xff]  ;;  %v13365_v48 = vsel %vm1017_vm4, %v4671_v54, %v4673_v28 }
 0x5fb   :  { %4799 = vrot.lane.b32.xlu1 %v13312_v6, %s9032_s18  ;;  %4797 = vrot.lane.b32.xlu0 %v13317_v35, %s9032_s18  ;;  %v4399_v56 = vpop.permute.xlu1 %4398  ;;  %16588 = vst [vmem:[#allocation165_spill] sm:$0xff] %v13346_v23  ;;  %16594 = vst [vmem:[#allocation86_spill] sm:$0xff] %v13365_v48 }
 0x5fc   :  { %v4397_v12 = vpop.permute.xlu0 %4396  ;;  %4546 = vst.msk [vmem:[#allocation5 + $0x168] sm:$0xff] %vm4500_vm2, %v4399_v56 }
 0x5fd   :  { %4545 = vst.msk [vmem:[#allocation5 + $0x160] sm:$0xff] %vm4500_vm2, %v4397_v12  ;;  %v13343_v12 = vsel %vm1017_vm4, %v4666_v38, %v4668_v18  ;;  %v3813_v18 = vmax.f32 %v3743_v21, 0.0  ;;  %v16596_v21 = vld [vmem:[#allocation95_spill] sm:$0xff] }
 0x5fe   :  { %16587 = vst [vmem:[#allocation164_spill] sm:$0xff] %v13343_v12 }
 0x5ff   :  { %4803 = vrot.lane.b32.xlu1 %v13332_v53, %s9032_s18  ;;  %4801 = vrot.lane.b32.xlu0 %v13335_v11, %s9032_s18  ;;  %v4403_v24 = vpop.permute.xlu1 %4402  ;;  %v4670_v53 = vrot.slane %v16591_v17, 2  ;;  %v3814_v11 = vmax.f32 %v3748_v7, 0.0  ;;  %3878 = vst.msk [vmem:[#allocation3 + $0x331] sm:$0xff] %vm114_vm14, %v3813_v18 }
 0x600   :  { %v4401_v56 = vpop.permute.xlu0 %4400  ;;  %4548 = vst.msk [vmem:[#allocation5 + $0x178] sm:$0xff] %vm4500_vm2, %v4403_v24  ;;  %v16592_v24 = vld [vmem:[#allocation93_spill] sm:$0xff] }
 0x601   :  { %4547 = vst.msk [vmem:[#allocation5 + $0x170] sm:$0xff] %vm4500_vm2, %v4401_v56  ;;  %v4676_v38 = vrot.slane %v16592_v24, 2  ;;  %v4678_v56 = vrot.slane %v16593_v44, 2  ;;  %v13368_v7 = vsel %vm1017_vm4, %v4670_v53, %v4671_v54  ;;  %v16599_v54 = vld [vmem:[#allocation101_spill] sm:$0xff] }
 0x602   :  { %3879 = vst.msk [vmem:[#allocation3 + $0x339] sm:$0xff] %vm114_vm14, %v3814_v11  ;;  %16595 = vst [vmem:[#allocation84_spill] sm:$0xff] %v13368_v7  ;;  %v4675_v11 = vrot.slane %v16596_v21, 2  ;;  %v4681_v53 = vrot.slane %v16599_v54, 2 }
 0x603   :  { %4807 = vrot.lane.b32.xlu1 %v13343_v12, %s9032_s18  ;;  %4805 = vrot.lane.b32.xlu0 %v13346_v23, %s9032_s18  ;;  %v4407_v59 = vpop.permute.xlu1 %4406 }
 0x604   :  { %v4405_v4 = vpop.permute.xlu0 %4404  ;;  %4550 = vst.msk [vmem:[#allocation5 + $0x188] sm:$0xff] %vm4500_vm2, %v4407_v59  ;;  %v13376_v59 = vsel %vm1017_vm4, %v4676_v38, %v4678_v56  ;;  %v13381_v28 = vsel %vm1017_vm4, %v4675_v11, %v4676_v38 }
 0x605   :  { %4549 = vst.msk [vmem:[#allocation5 + $0x180] sm:$0xff] %vm4500_vm2, %v4405_v4  ;;  %16597 = vst [vmem:[#allocation87_spill] sm:$0xff] %v13376_v59  ;;  %v16600_v4 = vld [vmem:[#allocation99_spill] sm:$0xff] }
 0x606   :  { %16598 = vst [vmem:[#allocation93_spill] sm:$0xff] %v13381_v28  ;;  %v4683_v12 = vrot.slane %v16600_v4, 2  ;;  %v16606_v4 = vld [vmem:[#allocation109_spill] sm:$0xff] }
 0x607   :  { %4811 = vrot.lane.b32.xlu1 %v13365_v48, %s9032_s18  ;;  %4809 = vrot.lane.b32.xlu0 %v13368_v7, %s9032_s18  ;;  %v4411_v44 = vpop.permute.xlu1 %4410  ;;  %v16601_v48 = vld [vmem:[#allocation102_spill] sm:$0xff] }
 0x608   :  { %v4409_v18 = vpop.permute.xlu0 %4408  ;;  %4552 = vst.msk [vmem:[#allocation5 + $0x198] sm:$0xff] %vm4500_vm2, %v4411_v44  ;;  %v4680_v23 = vrot.slane %v16601_v48, 2  ;;  %v16602_v44 = vld [vmem:[#allocation108_spill] sm:$0xff]  ;;  %v13395_v38 = vsel %vm1017_vm4, %v4681_v53, %v4683_v12 }
 0x609   :  { %4551 = vst.msk [vmem:[#allocation5 + $0x190] sm:$0xff] %vm4500_vm2, %v4409_v18  ;;  %v4686_v35 = vrot.slane %v16602_v44, 2  ;;  %v16603_v18 = vld [vmem:[#allocation107_spill] sm:$0xff]  ;;  %16604 = vst [vmem:[#allocation92_spill] sm:$0xff] %v13395_v38 }
 0x60a   :  { %v4688_v6 = vrot.slane %v16603_v18, 2  ;;  %v13398_v11 = vsel %vm1017_vm4, %v4680_v23, %v4681_v53  ;;  %v16609_v23 = vld [vmem:[#allocation25_spill] sm:$0xff]  ;;  %v16610_v53 = vld [vmem:[#allocation112_spill] sm:$0xff] }
 0x60b   :  { %4815 = vrot.lane.b32.xlu1 %v13376_v59, %s9032_s18  ;;  %4813 = vrot.lane.b32.xlu0 %v13381_v28, %s9032_s18  ;;  %16605 = vst [vmem:[#allocation95_spill] sm:$0xff] %v13398_v11  ;;  %v4685_v59 = vrot.slane %v16606_v4, 2  ;;  %v4693_v51 = vrot.slane %v16610_v53, 2  ;;  %v16616_v53 = vld [vmem:[#allocation122_spill] sm:$0xff] }
 0x60c   :  { %v4415_v56 = vpop.permute.xlu1 %4414  ;;  %v4413_v7 = vpop.permute.xlu0 %4412 }
 0x60d   :  { %4554 = vst.msk [vmem:[#allocation5 + $0x1a8] sm:$0xff] %vm4500_vm2, %v4415_v56  ;;  %4553 = vst.msk [vmem:[#allocation5 + $0x1a0] sm:$0xff] %vm4500_vm2, %v4413_v7  ;;  %v13406_v56 = vsel %vm1017_vm4, %v4686_v35, %v4688_v6  ;;  %v13411_v12 = vsel %vm1017_vm4, %v4685_v59, %v4686_v35  ;;  %v4691_v7 = vrot.slane %v16609_v23, 2 }
 0x60e   :  { %16607 = vst [vmem:[#allocation101_spill] sm:$0xff] %v13406_v56  ;;  %16608 = vst [vmem:[#allocation99_spill] sm:$0xff] %v13411_v12 }
 0x60f   :  { %4819 = vrot.lane.b32.xlu1 %v13395_v38, %s9032_s18  ;;  %4817 = vrot.lane.b32.xlu0 %v13398_v11, %s9032_s18  ;;  %v16611_v38 = vld [vmem:[#allocation117_spill] sm:$0xff]  ;;  %v13425_v35 = vsel %vm1017_vm4, %v4691_v7, %v4693_v51  ;;  %v16619_v51 = vld [vmem:[#allocation26_spill] sm:$0xff] }
 0x610   :  { %v4419_v28 = vpop.permute.xlu1 %4418  ;;  %v4417_v18 = vpop.permute.xlu0 %4416  ;;  %v4690_v33 = vrot.slane %v16611_v38, 2  ;;  %16614 = vst [vmem:[#allocation102_spill] sm:$0xff] %v13425_v35 }
 0x611   :  { %4556 = vst.msk [vmem:[#allocation5 + $0x1b8] sm:$0xff] %vm4500_vm2, %v4419_v28  ;;  %4555 = vst.msk [vmem:[#allocation5 + $0x1b0] sm:$0xff] %vm4500_vm2, %v4417_v18  ;;  %v16612_v28 = vld [vmem:[#allocation121_spill] sm:$0xff]  ;;  %v16613_v18 = vld [vmem:[#allocation120_spill] sm:$0xff] }
 0x612   :  { %v4696_v62 = vrot.slane %v16612_v28, 2  ;;  %v4698_v4 = vrot.slane %v16613_v18, 2  ;;  %v13428_v59 = vsel %vm1017_vm4, %v4690_v33, %v4691_v7  ;;  %v16620_v7 = vld [vmem:[#allocation9_spill] sm:$0xff] }
 0x613   :  { %4823 = vrot.lane.b32.xlu1 %v13406_v56, %s9032_s18  ;;  %4821 = vrot.lane.b32.xlu0 %v13411_v12, %s9032_s18  ;;  %16615 = vst [vmem:[#allocation108_spill] sm:$0xff] %v13428_v59  ;;  %v4695_v56 = vrot.slane %v16616_v53, 2  ;;  %v4703_v53 = vrot.slane %v16620_v7, 2  ;;  %v4705_v7 = vrot.slane %v12967_v63, 2 }
 0x615   :  { %v4423_v6 = vpop.permute.xlu1 %4422  ;;  %v4421_v11 = vpop.permute.xlu0 %4420  ;;  %v13441_v33 = vsel %vm1017_vm4, %v4695_v56, %v4696_v62 }
 0x616   :  { %4558 = vst.msk [vmem:[#allocation5 + $0x1c8] sm:$0xff] %vm4500_vm2, %v4423_v6  ;;  %4557 = vst.msk [vmem:[#allocation5 + $0x1c0] sm:$0xff] %vm4500_vm2, %v4421_v11  ;;  %v13436_v6 = vsel %vm1017_vm4, %v4696_v62, %v4698_v4  ;;  %v4701_v11 = vrot.slane %v16619_v51, 2 }
 0x617   :  { %4827 = vrot.lane.b32.xlu1 %v13425_v35, %s9032_s18  ;;  %4825 = vrot.lane.b32.xlu0 %v13428_v59, %s9032_s18  ;;  %16617 = vst [vmem:[#allocation107_spill] sm:$0xff] %v13436_v6  ;;  %16618 = vst [vmem:[#allocation25_spill] sm:$0xff] %v13441_v33  ;;  %v4700_v35 = vrot.slane %v12940_v31, 2 }
 0x618   :  { %v13455_v62 = vsel %vm1017_vm4, %v4701_v11, %v4703_v53 }
 0x619   :  { %v4427_v12 = vpop.permute.xlu1 %4426  ;;  %v4425_v18 = vpop.permute.xlu0 %4424  ;;  %16622 = vst [vmem:[#allocation112_spill] sm:$0xff] %v13455_v62  ;;  %v13458_v56 = vsel %vm1017_vm4, %v4700_v35, %v4701_v11  ;;  %v16627_v11 = vld [vmem:[#allocation125_spill] sm:$0xff] }
 0x61a   :  { %4560 = vst.msk [vmem:[#allocation5 + $0x1d8] sm:$0xff] %vm4500_vm2, %v4427_v12  ;;  %4559 = vst.msk [vmem:[#allocation5 + $0x1d0] sm:$0xff] %vm4500_vm2, %v4425_v18  ;;  %v4706_v12 = vrot.slane %v12964_v1, 2  ;;  %v16621_v18 = vld [vmem:[#allocation41_spill] sm:$0xff]  ;;  %v16630_v1 = vld [vmem:[#allocation128_spill] sm:$0xff] }
 0x61b   :  { %4831 = vrot.lane.b32.xlu1 %v13436_v6, %s9032_s18  ;;  %4829 = vrot.lane.b32.xlu0 %v13441_v33, %s9032_s18  ;;  %v4708_v28 = vrot.slane %v16621_v18, 2  ;;  %16623 = vst [vmem:[#allocation117_spill] sm:$0xff] %v13458_v56  ;;  %v4713_v33 = vrot.slane %v16627_v11, 2 }
 0x61c   :  { %v13471_v35 = vsel %vm1017_vm4, %v4705_v7, %v4706_v12 }
 0x61d   :  { %v4431_v4 = vpop.permute.xlu1 %4430  ;;  %v4429_v59 = vpop.permute.xlu0 %4428  ;;  %16625 = vst [vmem:[#allocation26_spill] sm:$0xff] %v13471_v35 }
 0x61e   :  { %4562 = vst.msk [vmem:[#allocation5 + $0x1e8] sm:$0xff] %vm4500_vm2, %v4431_v4  ;;  %4561 = vst.msk [vmem:[#allocation5 + $0x1e0] sm:$0xff] %vm4500_vm2, %v4429_v59  ;;  %v13466_v4 = vsel %vm1017_vm4, %v4706_v12, %v4708_v28  ;;  %v16626_v59 = vld [vmem:[#allocation50_spill] sm:$0xff]  ;;  %v4718_v12 = vrot.slane %v16630_v1, 2 }
 0x61f   :  { %4835 = vrot.lane.b32.xlu1 %v13455_v62, %s9032_s18  ;;  %4833 = vrot.lane.b32.xlu0 %v13458_v56, %s9032_s18  ;;  %16624 = vst [vmem:[#allocation120_spill] sm:$0xff] %v13466_v4  ;;  %v4711_v53 = vrot.slane %v16626_v59, 2  ;;  %v16628_v62 = vld [vmem:[#allocation126_spill] sm:$0xff]  ;;  %v16629_v56 = vld [vmem:[#allocation71_spill] sm:$0xff] }
 0x620   :  { %v4710_v63 = vrot.slane %v16628_v62, 2 }
 0x621   :  { %v4435_v6 = vpop.permute.xlu1 %4434  ;;  %v4433_v18 = vpop.permute.xlu0 %4432  ;;  %v13485_v7 = vsel %vm1017_vm4, %v4711_v53, %v4713_v33  ;;  %v16634_v33 = vld [vmem:[#allocation133_spill] sm:$0xff] }
 0x622   :  { %4564 = vst.msk [vmem:[#allocation5 + $0x1f8] sm:$0xff] %vm4500_vm2, %v4435_v6  ;;  %4563 = vst.msk [vmem:[#allocation5 + $0x1f0] sm:$0xff] %vm4500_vm2, %v4433_v18  ;;  %v4716_v18 = vrot.slane %v16629_v56, 2  ;;  %v13488_v11 = vsel %vm1017_vm4, %v4710_v63, %v4711_v53  ;;  %v4721_v53 = vrot.slane %v16634_v33, 2 }
 0x623   :  { %4839 = vrot.lane.b32.xlu1 %v13466_v4, %s9032_s18  ;;  %4837 = vrot.lane.b32.xlu0 %v13471_v35, %s9032_s18  ;;  %16631 = vst [vmem:[#allocation9_spill] sm:$0xff] %v13485_v7  ;;  %16632 = vst [vmem:[#allocation41_spill] sm:$0xff] %v13488_v11  ;;  %v16633_v4 = vld [vmem:[#allocation129_spill] sm:$0xff] }
 0x624   :  { %v4715_v62 = vrot.slane %v16633_v4, 2 }
 0x625   :  { %v4728_v28 = vpop.permute.xlu1 %4727  ;;  %v4726_v6 = vpop.permute.xlu0 %4725 }
 0x626   :  { %4919 = vst.msk [vmem:[#allocation5 + $0x8] sm:$0xff] %vm4917_vm5, %v4728_v28  ;;  %4918 = vst.msk [vmem:[#allocation5] sm:$0xff] %vm4917_vm5, %v4726_v6  ;;  %v13496_v28 = vsel %vm1017_vm4, %v4716_v18, %v4718_v12  ;;  %v13501_v63 = vsel %vm1017_vm4, %v4715_v62, %v4716_v18  ;;  %v16635_v6 = vld [vmem:[#allocation132_spill] sm:$0xff] }
 0x627   :  { %4843 = vrot.lane.b32.xlu1 %v13485_v7, %s9032_s18  ;;  %4841 = vrot.lane.b32.xlu0 %v13488_v11, %s9032_s18  ;;  %v4723_v4 = vrot.slane %v16635_v6, 2  ;;  %v16636_v7 = vld [vmem:[#allocation82_spill] sm:$0xff] }
 0x628   :  { %v4720_v56 = vrot.slane %v16636_v7, 2 }
 0x629   :  { %v4732_v35 = vpop.permute.xlu1 %4731  ;;  %v4730_v1 = vpop.permute.xlu0 %4729  ;;  %v13513_v62 = vsel %vm1017_vm4, %v4721_v53, %v4723_v4 }
 0x62a   :  { %4921 = vst.msk [vmem:[#allocation5 + $0x18] sm:$0xff] %vm4917_vm5, %v4732_v35  ;;  %4920 = vst.msk [vmem:[#allocation5 + $0x10] sm:$0xff] %vm4917_vm5, %v4730_v1  ;;  %v13516_v35 = vsel %vm1017_vm4, %v4720_v56, %v4721_v53 }
 0x62b   :  { %4847 = vrot.lane.b32.xlu1 %v13496_v28, %s9032_s18  ;;  %4845 = vrot.lane.b32.xlu0 %v13501_v63, %s9032_s18  ;;  %16637 = vst [vmem:[#allocation50_spill] sm:$0xff] %v13513_v62  ;;  %16638 = vst [vmem:[#allocation125_spill] sm:$0xff] %v13516_v35 }
 0x62d   :  { %v4736_v12 = vpop.permute.xlu1 %4735  ;;  %v4734_v11 = vpop.permute.xlu0 %4733 }
 0x62e   :  { %4923 = vst.msk [vmem:[#allocation5 + $0x28] sm:$0xff] %vm4917_vm5, %v4736_v12  ;;  %4922 = vst.msk [vmem:[#allocation5 + $0x20] sm:$0xff] %vm4917_vm5, %v4734_v11 }
 0x62f   :  { %4851 = vrot.lane.b32.xlu1 %v13513_v62, %s9032_s18  ;;  %4849 = vrot.lane.b32.xlu0 %v13516_v35, %s9032_s18 }
 0x631   :  { %v4740_v18 = vpop.permute.xlu1 %4739  ;;  %v4738_v1 = vpop.permute.xlu0 %4737 }
 0x632   :  { %4925 = vst.msk [vmem:[#allocation5 + $0x38] sm:$0xff] %vm4917_vm5, %v4740_v18  ;;  %4924 = vst.msk [vmem:[#allocation5 + $0x30] sm:$0xff] %vm4917_vm5, %v4738_v1 }
 0x633   :  { %4988 = vrot.lane.b32.xlu1 %v12275_v13, %s9034_s20  ;;  %4986 = vrot.lane.b32.xlu0 %v12277_v3, %s9034_s20 }
 0x635   :  { %v4744_v56 = vpop.permute.xlu1 %4743  ;;  %v4742_v4 = vpop.permute.xlu0 %4741 }
 0x636   :  { %4927 = vst.msk [vmem:[#allocation5 + $0x48] sm:$0xff] %vm4917_vm5, %v4744_v56  ;;  %4926 = vst.msk [vmem:[#allocation5 + $0x40] sm:$0xff] %vm4917_vm5, %v4742_v4 }
 0x637   :  { %4992 = vrot.lane.b32.xlu1 %v12299_v36, %s9034_s20  ;;  %4990 = vrot.lane.b32.xlu0 %v12301_v58, %s9034_s20  ;;  %v16709_v36 = vld [vmem:[#allocation85_spill] sm:$0xff] }
 0x639   :  { %v4748_v11 = vpop.permute.xlu1 %4747  ;;  %v4746_v53 = vpop.permute.xlu0 %4745 }
 0x63a   :  { %4929 = vst.msk [vmem:[#allocation5 + $0x58] sm:$0xff] %vm4917_vm5, %v4748_v11  ;;  %4928 = vst.msk [vmem:[#allocation5 + $0x50] sm:$0xff] %vm4917_vm5, %v4746_v53 }
 0x63b   :  { %4996 = vrot.lane.b32.xlu1 %v12323_v34, %s9034_s20  ;;  %4994 = vrot.lane.b32.xlu0 %v12325_v52, %s9034_s20  ;;  %v16705_v52 = vld [vmem:[#allocation130_spill] sm:$0xff] }
 0x63d   :  { %v4752_v13 = vpop.permute.xlu1 %4751  ;;  %v4750_v3 = vpop.permute.xlu0 %4749 }
 0x63e   :  { %4931 = vst.msk [vmem:[#allocation5 + $0x68] sm:$0xff] %vm4917_vm5, %v4752_v13  ;;  %4930 = vst.msk [vmem:[#allocation5 + $0x60] sm:$0xff] %vm4917_vm5, %v4750_v3 }
 0x63f   :  { %5000 = vrot.lane.b32.xlu1 %v12347_v41, %s9034_s20  ;;  %4998 = vrot.lane.b32.xlu0 %v12349_v40, %s9034_s20  ;;  %v16701_v40 = vld [vmem:[#allocation124_spill] sm:$0xff]  ;;  %v16702_v41 = vld [vmem:[#allocation45_spill] sm:$0xff] }
 0x641   :  { %v4756_v6 = vpop.permute.xlu1 %4755  ;;  %v4754_v12 = vpop.permute.xlu0 %4753 }
 0x642   :  { %4933 = vst.msk [vmem:[#allocation5 + $0x78] sm:$0xff] %vm4917_vm5, %v4756_v6  ;;  %4932 = vst.msk [vmem:[#allocation5 + $0x70] sm:$0xff] %vm4917_vm5, %v4754_v12 }
 0x643   :  { %5004 = vrot.lane.b32.xlu1 %v12371_v10, %s9034_s20  ;;  %5002 = vrot.lane.b32.xlu0 %v12373_v61, %s9034_s20  ;;  %v16697_v61 = vld [vmem:[#allocation24_spill] sm:$0xff] }
 0x644   :  { %v16698_v10 = vld [vmem:[#allocation8_spill] sm:$0xff] }
 0x645   :  { %v4760_v18 = vpop.permute.xlu1 %4759  ;;  %v4758_v1 = vpop.permute.xlu0 %4757 }
 0x646   :  { %4935 = vst.msk [vmem:[#allocation5 + $0x88] sm:$0xff] %vm4917_vm5, %v4760_v18  ;;  %4934 = vst.msk [vmem:[#allocation5 + $0x80] sm:$0xff] %vm4917_vm5, %v4758_v1 }
 0x647   :  { %5008 = vrot.lane.b32.xlu1 %v12395_v60, %s9034_s20  ;;  %5006 = vrot.lane.b32.xlu0 %v12397_v37, %s9034_s20  ;;  %v16693_v37 = vld [vmem:[#allocation110_spill] sm:$0xff]  ;;  %v16694_v60 = vld [vmem:[#allocation111_spill] sm:$0xff] }
 0x649   :  { %v4764_v56 = vpop.permute.xlu1 %4763  ;;  %v4762_v4 = vpop.permute.xlu0 %4761 }
 0x64a   :  { %4937 = vst.msk [vmem:[#allocation5 + $0x98] sm:$0xff] %vm4917_vm5, %v4764_v56  ;;  %4936 = vst.msk [vmem:[#allocation5 + $0x90] sm:$0xff] %vm4917_vm5, %v4762_v4 }
 0x64b   :  { %5012 = vrot.lane.b32.xlu1 %v12419_v50, %s9034_s20  ;;  %5010 = vrot.lane.b32.xlu0 %v12421_v15, %s9034_s20 }
 0x64d   :  { %v4768_v11 = vpop.permute.xlu1 %4767  ;;  %v4766_v53 = vpop.permute.xlu0 %4765 }
 0x64e   :  { %4939 = vst.msk [vmem:[#allocation5 + $0xa8] sm:$0xff] %vm4917_vm5, %v4768_v11  ;;  %4938 = vst.msk [vmem:[#allocation5 + $0xa0] sm:$0xff] %vm4917_vm5, %v4766_v53 }
 0x64f   :  { %5016 = vrot.lane.b32.xlu1 %v12443_v20, %s9034_s20  ;;  %5014 = vrot.lane.b32.xlu0 %v12445_v39, %s9034_s20  ;;  %v16661_v39 = vld [vmem:[#allocation56_spill] sm:$0xff]  ;;  %v16662_v20 = vld [vmem:[#allocation59_spill] sm:$0xff] }
 0x651   :  { %v4772_v13 = vpop.permute.xlu1 %4771  ;;  %v4770_v3 = vpop.permute.xlu0 %4769 }
 0x652   :  { %4941 = vst.msk [vmem:[#allocation5 + $0xb8] sm:$0xff] %vm4917_vm5, %v4772_v13  ;;  %4940 = vst.msk [vmem:[#allocation5 + $0xb0] sm:$0xff] %vm4917_vm5, %v4770_v3 }
 0x653   :  { %5020 = vrot.lane.b32.xlu1 %v12467_v57, %s9034_s20  ;;  %5018 = vrot.lane.b32.xlu0 %v12469_v43, %s9034_s20  ;;  %v16659_v43 = vld [vmem:[#allocation34_spill] sm:$0xff]  ;;  %v16660_v57 = vld [vmem:[#allocation35_spill] sm:$0xff] }
 0x655   :  { %v4776_v6 = vpop.permute.xlu1 %4775  ;;  %v4774_v12 = vpop.permute.xlu0 %4773 }
 0x656   :  { %4943 = vst.msk [vmem:[#allocation5 + $0xc8] sm:$0xff] %vm4917_vm5, %v4776_v6  ;;  %4942 = vst.msk [vmem:[#allocation5 + $0xc0] sm:$0xff] %vm4917_vm5, %v4774_v12 }
 0x657   :  { %5024 = vrot.lane.b32.xlu1 %v12491_v46, %s9034_s20  ;;  %5022 = vrot.lane.b32.xlu0 %v12493_v19, %s9034_s20  ;;  %v16657_v19 = vld [vmem:[#allocation20_spill] sm:$0xff]  ;;  %v16658_v46 = vld [vmem:[#allocation21_spill] sm:$0xff] }
 0x659   :  { %v4780_v18 = vpop.permute.xlu1 %4779  ;;  %v4778_v1 = vpop.permute.xlu0 %4777 }
 0x65a   :  { %4945 = vst.msk [vmem:[#allocation5 + $0xd8] sm:$0xff] %vm4917_vm5, %v4780_v18  ;;  %4944 = vst.msk [vmem:[#allocation5 + $0xd0] sm:$0xff] %vm4917_vm5, %v4778_v1 }
 0x65b   :  { %5028 = vrot.lane.b32.xlu1 %v12515_v29, %s9034_s20  ;;  %5026 = vrot.lane.b32.xlu0 %v12517_v22, %s9034_s20  ;;  %v16655_v22 = vld [vmem:[#allocation16_spill] sm:$0xff]  ;;  %v16656_v29 = vld [vmem:[#allocation17_spill] sm:$0xff] }
 0x65d   :  { %v4784_v56 = vpop.permute.xlu1 %4783  ;;  %v4782_v4 = vpop.permute.xlu0 %4781 }
 0x65e   :  { %4947 = vst.msk [vmem:[#allocation5 + $0xe8] sm:$0xff] %vm4917_vm5, %v4784_v56  ;;  %4946 = vst.msk [vmem:[#allocation5 + $0xe0] sm:$0xff] %vm4917_vm5, %v4782_v4  ;;  %v13614_v56 = vld [vmem:[#allocation3 + $0x188] sm:$0xff]  ;;  %v13616_v4 = vld [vmem:[#allocation3 + $0x180] sm:$0xff] }
 0x65f   :  { %5032 = vrot.lane.b32.xlu1 %v12541_v47, %s9034_s20  ;;  %5030 = vrot.lane.b32.xlu0 %v12544_v42, %s9034_s20  ;;  %v16653_v42 = vld [vmem:[#allocation38_spill] sm:$0xff]  ;;  %v5245_v50 = vrot.slane %v13616_v4, 1 }
 0x660   :  { %v16654_v47 = vld [vmem:[#allocation94_spill] sm:$0xff] }
 0x661   :  { %v4788_v11 = vpop.permute.xlu1 %4787  ;;  %v4786_v53 = vpop.permute.xlu0 %4785 }
 0x662   :  { %4949 = vst.msk [vmem:[#allocation5 + $0xf8] sm:$0xff] %vm4917_vm5, %v4788_v11  ;;  %4948 = vst.msk [vmem:[#allocation5 + $0xf0] sm:$0xff] %vm4917_vm5, %v4786_v53 }
 0x663   :  { %5036 = vrot.lane.b32.xlu1 %v12568_v55, %s9034_s20  ;;  %5034 = vrot.lane.b32.xlu0 %v12571_v2, %s9034_s20  ;;  %v16649_v2 = vld [vmem:[#allocation76_spill] sm:$0xff]  ;;  %v16650_v55 = vld [vmem:[#allocation77_spill] sm:$0xff] }
 0x665   :  { %v4792_v13 = vpop.permute.xlu1 %4791  ;;  %v4790_v3 = vpop.permute.xlu0 %4789 }
 0x666   :  { %4951 = vst.msk [vmem:[#allocation5 + $0x108] sm:$0xff] %vm4917_vm5, %v4792_v13  ;;  %4950 = vst.msk [vmem:[#allocation5 + $0x100] sm:$0xff] %vm4917_vm5, %v4790_v3 }
 0x667   :  { %5040 = vrot.lane.b32.xlu1 %v12595_v30, %s9034_s20  ;;  %5038 = vrot.lane.b32.xlu0 %v12598_v26, %s9034_s20 }
 0x669   :  { %v4796_v6 = vpop.permute.xlu1 %4795  ;;  %v4794_v12 = vpop.permute.xlu0 %4793 }
 0x66a   :  { %4953 = vst.msk [vmem:[#allocation5 + $0x118] sm:$0xff] %vm4917_vm5, %v4796_v6  ;;  %4952 = vst.msk [vmem:[#allocation5 + $0x110] sm:$0xff] %vm4917_vm5, %v4794_v12 }
 0x66b   :  { %5044 = vrot.lane.b32.xlu1 %v12624_v5, %s9034_s20  ;;  %5042 = vrot.lane.b32.xlu0 %v12627_v45, %s9034_s20  ;;  %v13714_v45 = vld [vmem:[#allocation3 + $0x338] sm:$0xff]  ;;  %v13716_v5 = vld [vmem:[#allocation3 + $0x330] sm:$0xff] }
 0x66c   :  { %v5250_v58 = vrot.slane %v13716_v5, 1 }
 0x66d   :  { %v4800_v18 = vpop.permute.xlu1 %4799  ;;  %v4798_v1 = vpop.permute.xlu0 %4797 }
 0x66e   :  { %4955 = vst.msk [vmem:[#allocation5 + $0x128] sm:$0xff] %vm4917_vm5, %v4800_v18  ;;  %4954 = vst.msk [vmem:[#allocation5 + $0x120] sm:$0xff] %vm4917_vm5, %v4798_v1 }
 0x66f   :  { %5048 = vrot.lane.b32.xlu1 %v13614_v56, %s9034_s20  ;;  %5046 = vrot.lane.b32.xlu0 %v13616_v4, %s9034_s20 }
 0x671   :  { %v4804_v11 = vpop.permute.xlu1 %4803  ;;  %v4802_v53 = vpop.permute.xlu0 %4801 }
 0x672   :  { %4957 = vst.msk [vmem:[#allocation5 + $0x138] sm:$0xff] %vm4917_vm5, %v4804_v11  ;;  %4956 = vst.msk [vmem:[#allocation5 + $0x130] sm:$0xff] %vm4917_vm5, %v4802_v53 }
 0x673   :  { %5052 = vrot.lane.b32.xlu1 %v12662_v14, %s9034_s20  ;;  %5050 = vrot.lane.b32.xlu0 %v12665_v27, %s9034_s20 }
 0x675   :  { %v4808_v13 = vpop.permute.xlu1 %4807  ;;  %v4806_v3 = vpop.permute.xlu0 %4805 }
 0x676   :  { %4959 = vst.msk [vmem:[#allocation5 + $0x148] sm:$0xff] %vm4917_vm5, %v4808_v13  ;;  %4958 = vst.msk [vmem:[#allocation5 + $0x140] sm:$0xff] %vm4917_vm5, %v4806_v3 }
 0x677   :  { %5056 = vrot.lane.b32.xlu1 %v12689_v9, %s9034_s20  ;;  %5054 = vrot.lane.b32.xlu0 %v12692_v16, %s9034_s20  ;;  %v16645_v16 = vld [vmem:[#allocation71_spill] sm:$0xff] }
 0x679   :  { %v4812_v6 = vpop.permute.xlu1 %4811  ;;  %v4810_v12 = vpop.permute.xlu0 %4809 }
 0x67a   :  { %4961 = vst.msk [vmem:[#allocation5 + $0x158] sm:$0xff] %vm4917_vm5, %v4812_v6  ;;  %4960 = vst.msk [vmem:[#allocation5 + $0x150] sm:$0xff] %vm4917_vm5, %v4810_v12 }
 0x67b   :  { %5060 = vrot.lane.b32.xlu1 %v12716_v32, %s9034_s20  ;;  %5058 = vrot.lane.b32.xlu0 %v12719_v49, %s9034_s20 }
 0x67d   :  { %v4816_v14 = vpop.permute.xlu1 %4815  ;;  %v4814_v27 = vpop.permute.xlu0 %4813 }
 0x67e   :  { %4963 = vst.msk [vmem:[#allocation5 + $0x168] sm:$0xff] %vm4917_vm5, %v4816_v14  ;;  %4962 = vst.msk [vmem:[#allocation5 + $0x160] sm:$0xff] %vm4917_vm5, %v4814_v27  ;;  %v16639_v14 = vld [vmem:[#allocation109_spill] sm:$0xff] }
 0x67f   :  { %5064 = vrot.lane.b32.xlu1 %v12743_v25, %s9034_s20  ;;  %5062 = vrot.lane.b32.xlu0 %v16584_v8, %s9034_s20 }
 0x681   :  { %v4820_v18 = vpop.permute.xlu1 %4819  ;;  %v4818_v1 = vpop.permute.xlu0 %4817 }
 0x682   :  { %4965 = vst.msk [vmem:[#allocation5 + $0x178] sm:$0xff] %vm4917_vm5, %v4820_v18  ;;  %4964 = vst.msk [vmem:[#allocation5 + $0x170] sm:$0xff] %vm4917_vm5, %v4818_v1 }
 0x683   :  { %5068 = vrot.lane.b32.xlu1 %v16589_v0, %s9034_s20  ;;  %5066 = vrot.lane.b32.xlu0 %v16591_v17, %s9034_s20 }
 0x685   :  { %v4824_v11 = vpop.permute.xlu1 %4823  ;;  %v4822_v53 = vpop.permute.xlu0 %4821 }
 0x686   :  { %4967 = vst.msk [vmem:[#allocation5 + $0x188] sm:$0xff] %vm4917_vm5, %v4824_v11  ;;  %4966 = vst.msk [vmem:[#allocation5 + $0x180] sm:$0xff] %vm4917_vm5, %v4822_v53  ;;  %v16640_v53 = vld [vmem:[#allocation121_spill] sm:$0xff] }
 0x687   :  { %5072 = vrot.lane.b32.xlu1 %v16592_v24, %s9034_s20  ;;  %5070 = vrot.lane.b32.xlu0 %v16596_v21, %s9034_s20 }
 0x689   :  { %v4828_v13 = vpop.permute.xlu1 %4827  ;;  %v4826_v3 = vpop.permute.xlu0 %4825 }
 0x68a   :  { %4969 = vst.msk [vmem:[#allocation5 + $0x198] sm:$0xff] %vm4917_vm5, %v4828_v13  ;;  %4968 = vst.msk [vmem:[#allocation5 + $0x190] sm:$0xff] %vm4917_vm5, %v4826_v3  ;;  %v16641_v13 = vld [vmem:[#allocation122_spill] sm:$0xff] }
 0x68b   :  { %5076 = vrot.lane.b32.xlu1 %v16599_v54, %s9034_s20  ;;  %5074 = vrot.lane.b32.xlu0 %v16601_v48, %s9034_s20 }
 0x68d   :  { %v4832_v6 = vpop.permute.xlu1 %4831  ;;  %v4830_v12 = vpop.permute.xlu0 %4829 }
 0x68e   :  { %4971 = vst.msk [vmem:[#allocation5 + $0x1a8] sm:$0xff] %vm4917_vm5, %v4832_v6  ;;  %4970 = vst.msk [vmem:[#allocation5 + $0x1a0] sm:$0xff] %vm4917_vm5, %v4830_v12 }
 0x68f   :  { %5080 = vrot.lane.b32.xlu1 %v16602_v44, %s9034_s20  ;;  %5078 = vrot.lane.b32.xlu0 %v16639_v14, %s9034_s20 }
 0x691   :  { %v4836_v27 = vpop.permute.xlu1 %4835  ;;  %v4834_v18 = vpop.permute.xlu0 %4833 }
 0x692   :  { %4973 = vst.msk [vmem:[#allocation5 + $0x1b8] sm:$0xff] %vm4917_vm5, %v4836_v27  ;;  %4972 = vst.msk [vmem:[#allocation5 + $0x1b0] sm:$0xff] %vm4917_vm5, %v4834_v18  ;;  %v16642_v18 = vld [vmem:[#allocation123_spill] sm:$0xff] }
 0x693   :  { %5084 = vrot.lane.b32.xlu1 %v16609_v23, %s9034_s20  ;;  %5082 = vrot.lane.b32.xlu0 %v16611_v38, %s9034_s20 }
 0x695   :  { %v4840_v1 = vpop.permute.xlu1 %4839  ;;  %v4838_v11 = vpop.permute.xlu0 %4837 }
 0x696   :  { %4975 = vst.msk [vmem:[#allocation5 + $0x1c8] sm:$0xff] %vm4917_vm5, %v4840_v1  ;;  %4974 = vst.msk [vmem:[#allocation5 + $0x1c0] sm:$0xff] %vm4917_vm5, %v4838_v11  ;;  %v16643_v1 = vld [vmem:[#allocation44_spill] sm:$0xff] }
 0x697   :  { %5088 = vrot.lane.b32.xlu1 %v16640_v53, %s9034_s20  ;;  %5086 = vrot.lane.b32.xlu0 %v16641_v13, %s9034_s20 }
 0x699   :  { %v4844_v3 = vpop.permute.xlu1 %4843  ;;  %v4842_v6 = vpop.permute.xlu0 %4841 }
 0x69a   :  { %4977 = vst.msk [vmem:[#allocation5 + $0x1d8] sm:$0xff] %vm4917_vm5, %v4844_v3  ;;  %4976 = vst.msk [vmem:[#allocation5 + $0x1d0] sm:$0xff] %vm4917_vm5, %v4842_v6  ;;  %v16644_v6 = vld [vmem:[#allocation126_spill] sm:$0xff] }
 0x69b   :  { %5092 = vrot.lane.b32.xlu1 %v16619_v51, %s9034_s20  ;;  %5090 = vrot.lane.b32.xlu0 %v12940_v31, %s9034_s20 }
 0x69d   :  { %v4848_v12 = vpop.permute.xlu1 %4847  ;;  %v4846_v27 = vpop.permute.xlu0 %4845 }
 0x69e   :  { %4979 = vst.msk [vmem:[#allocation5 + $0x1e8] sm:$0xff] %vm4917_vm5, %v4848_v12  ;;  %4978 = vst.msk [vmem:[#allocation5 + $0x1e0] sm:$0xff] %vm4917_vm5, %v4846_v27 }
 0x69f   :  { %5096 = vrot.lane.b32.xlu1 %v16642_v18, %s9034_s20  ;;  %5094 = vrot.lane.b32.xlu0 %v16643_v1, %s9034_s20 }
 0x6a1   :  { %v4852_v11 = vpop.permute.xlu1 %4851  ;;  %v4850_v3 = vpop.permute.xlu0 %4849 }
 0x6a2   :  { %4981 = vst.msk [vmem:[#allocation5 + $0x1f8] sm:$0xff] %vm4917_vm5, %v4852_v11  ;;  %4980 = vst.msk [vmem:[#allocation5 + $0x1f0] sm:$0xff] %vm4917_vm5, %v4850_v3  ;;  %v16646_v11 = vld [vmem:[#allocation129_spill] sm:$0xff] }
 0x6a3   :  { %5100 = vrot.lane.b32.xlu1 %v16626_v59, %s9034_s20  ;;  %5098 = vrot.lane.b32.xlu0 %v16644_v6, %s9034_s20 }
 0x6a5   :  { %v4989_v12 = vpop.permute.xlu1 %4988  ;;  %v4987_v27 = vpop.permute.xlu0 %4986 }
 0x6a6   :  { %5180 = vst.msk [vmem:[#allocation5 + $0x8] sm:$0xff] %vm5178_vm6, %v4989_v12  ;;  %5179 = vst.msk [vmem:[#allocation5] sm:$0xff] %vm5178_vm6, %v4987_v27 }
 0x6a7   :  { %5104 = vrot.lane.b32.xlu1 %v16645_v16, %s9034_s20  ;;  %5102 = vrot.lane.b32.xlu0 %v16646_v11, %s9034_s20 }
 0x6a9   :  { %v4993_v3 = vpop.permute.xlu1 %4992  ;;  %v4991_v9 = vpop.permute.xlu0 %4990 }
 0x6aa   :  { %5182 = vst.msk [vmem:[#allocation5 + $0x18] sm:$0xff] %vm5178_vm6, %v4993_v3  ;;  %5181 = vst.msk [vmem:[#allocation5 + $0x10] sm:$0xff] %vm5178_vm6, %v4991_v9 }
 0x6ab   :  { %5108 = vrot.lane.b32.xlu1 %v16634_v33, %s9034_s20  ;;  %5106 = vrot.lane.b32.xlu0 %v16636_v7, %s9034_s20 }
 0x6ad   :  { %v4997_v12 = vpop.permute.xlu1 %4996  ;;  %v4995_v27 = vpop.permute.xlu0 %4994 }
 0x6ae   :  { %5184 = vst.msk [vmem:[#allocation5 + $0x28] sm:$0xff] %vm5178_vm6, %v4997_v12  ;;  %5183 = vst.msk [vmem:[#allocation5 + $0x20] sm:$0xff] %vm5178_vm6, %v4995_v27  ;;  %v16647_v12 = vld [vmem:[#allocation36_spill] sm:$0xff]  ;;  %v16648_v27 = vld [vmem:[#allocation37_spill] sm:$0xff] }
 0x6af   :  { %5112 = vrot.lane.b32.xlu1 %v13714_v45, %s9034_s20  ;;  %5110 = vrot.lane.b32.xlu0 %v13716_v5, %s9034_s20 }
 0x6b1   :  { %v5001_v9 = vpop.permute.xlu1 %5000  ;;  %v4999_v3 = vpop.permute.xlu0 %4998 }
 0x6b2   :  { %5186 = vst.msk [vmem:[#allocation5 + $0x38] sm:$0xff] %vm5178_vm6, %v5001_v9  ;;  %5185 = vst.msk [vmem:[#allocation5 + $0x30] sm:$0xff] %vm5178_vm6, %v4999_v3 }
 0x6b3   :  { %5257 = vrot.lane.b32.xlu1 %v16647_v12, %s9036_s24  ;;  %5255 = vrot.lane.b32.xlu0 %v16648_v27, %s9036_s24  ;;  %v16651_v12 = vld [vmem:[#allocation115_spill] sm:$0xff]  ;;  %v16652_v27 = vld [vmem:[#allocation116_spill] sm:$0xff] }
 0x6b5   :  { %v5005_v26 = vpop.permute.xlu1 %5004  ;;  %v5003_v30 = vpop.permute.xlu0 %5002 }
 0x6b6   :  { %5188 = vst.msk [vmem:[#allocation5 + $0x48] sm:$0xff] %vm5178_vm6, %v5005_v26  ;;  %5187 = vst.msk [vmem:[#allocation5 + $0x40] sm:$0xff] %vm5178_vm6, %v5003_v30 }
 0x6b7   :  { %5261 = vrot.lane.b32.xlu1 %v16649_v2, %s9036_s24  ;;  %5259 = vrot.lane.b32.xlu0 %v16650_v55, %s9036_s24  ;;  %v5251_v2 = vrot.slane %v13714_v45, 1 }
 0x6b9   :  { %v5009_v9 = vpop.permute.xlu1 %5008  ;;  %v5007_v3 = vpop.permute.xlu0 %5006 }
 0x6ba   :  { %5190 = vst.msk [vmem:[#allocation5 + $0x58] sm:$0xff] %vm5178_vm6, %v5009_v9  ;;  %5189 = vst.msk [vmem:[#allocation5 + $0x50] sm:$0xff] %vm5178_vm6, %v5007_v3 }
 0x6bb   :  { %5265 = vrot.lane.b32.xlu1 %v16651_v12, %s9036_s24  ;;  %5263 = vrot.lane.b32.xlu0 %v16652_v27, %s9036_s24  ;;  %v16703_v27 = vld [vmem:[#allocation127_spill] sm:$0xff]  ;;  %v16704_v12 = vld [vmem:[#allocation60_spill] sm:$0xff] }
 0x6bd   :  { %v5013_v26 = vpop.permute.xlu1 %5012  ;;  %v5011_v30 = vpop.permute.xlu0 %5010 }
 0x6be   :  { %5192 = vst.msk [vmem:[#allocation5 + $0x68] sm:$0xff] %vm5178_vm6, %v5013_v26  ;;  %5191 = vst.msk [vmem:[#allocation5 + $0x60] sm:$0xff] %vm5178_vm6, %v5011_v30 }
 0x6bf   :  { %5269 = vrot.lane.b32.xlu1 %v16653_v42, %s9036_s24  ;;  %5267 = vrot.lane.b32.xlu0 %v16654_v47, %s9036_s24  ;;  %v16699_v47 = vld [vmem:[#allocation10_spill] sm:$0xff]  ;;  %v16700_v42 = vld [vmem:[#allocation33_spill] sm:$0xff] }
 0x6c1   :  { %v5017_v9 = vpop.permute.xlu1 %5016  ;;  %v5015_v3 = vpop.permute.xlu0 %5014 }
 0x6c2   :  { %5194 = vst.msk [vmem:[#allocation5 + $0x78] sm:$0xff] %vm5178_vm6, %v5017_v9  ;;  %5193 = vst.msk [vmem:[#allocation5 + $0x70] sm:$0xff] %vm5178_vm6, %v5015_v3 }
 0x6c3   :  { %5273 = vrot.lane.b32.xlu1 %v16655_v22, %s9036_s24  ;;  %5271 = vrot.lane.b32.xlu0 %v16656_v29, %s9036_s24  ;;  %v16695_v29 = vld [vmem:[#allocation118_spill] sm:$0xff]  ;;  %v16696_v22 = vld [vmem:[#allocation119_spill] sm:$0xff] }
 0x6c5   :  { %v5021_v26 = vpop.permute.xlu1 %5020  ;;  %v5019_v30 = vpop.permute.xlu0 %5018 }
 0x6c6   :  { %5196 = vst.msk [vmem:[#allocation5 + $0x88] sm:$0xff] %vm5178_vm6, %v5021_v26  ;;  %5195 = vst.msk [vmem:[#allocation5 + $0x80] sm:$0xff] %vm5178_vm6, %v5019_v30 }
 0x6c7   :  { %5277 = vrot.lane.b32.xlu1 %v16657_v19, %s9036_s24  ;;  %5275 = vrot.lane.b32.xlu0 %v16658_v46, %s9036_s24  ;;  %v16691_v46 = vld [vmem:[#allocation104_spill] sm:$0xff]  ;;  %v16692_v19 = vld [vmem:[#allocation105_spill] sm:$0xff] }
 0x6c9   :  { %v5025_v9 = vpop.permute.xlu1 %5024  ;;  %v5023_v3 = vpop.permute.xlu0 %5022 }
 0x6ca   :  { %5198 = vst.msk [vmem:[#allocation5 + $0x98] sm:$0xff] %vm5178_vm6, %v5025_v9  ;;  %5197 = vst.msk [vmem:[#allocation5 + $0x90] sm:$0xff] %vm5178_vm6, %v5023_v3 }
 0x6cb   :  { %5281 = vrot.lane.b32.xlu1 %v16659_v43, %s9036_s24  ;;  %5279 = vrot.lane.b32.xlu0 %v16660_v57, %s9036_s24  ;;  %v16663_v57 = vld [vmem:[#allocation63_spill] sm:$0xff]  ;;  %v16664_v43 = vld [vmem:[#allocation64_spill] sm:$0xff] }
 0x6cd   :  { %v5029_v26 = vpop.permute.xlu1 %5028  ;;  %v5027_v30 = vpop.permute.xlu0 %5026 }
 0x6ce   :  { %5200 = vst.msk [vmem:[#allocation5 + $0xa8] sm:$0xff] %vm5178_vm6, %v5029_v26  ;;  %5199 = vst.msk [vmem:[#allocation5 + $0xa0] sm:$0xff] %vm5178_vm6, %v5027_v30 }
 0x6cf   :  { %5285 = vrot.lane.b32.xlu1 %v16661_v39, %s9036_s24  ;;  %5283 = vrot.lane.b32.xlu0 %v16662_v20, %s9036_s24  ;;  %v16665_v20 = vld [vmem:[#allocation14_spill] sm:$0xff] }
 0x6d0   :  { %v16666_v39 = vld [vmem:[#allocation22_spill] sm:$0xff] }
 0x6d1   :  { %v5033_v9 = vpop.permute.xlu1 %5032  ;;  %v5031_v3 = vpop.permute.xlu0 %5030 }
 0x6d2   :  { %5202 = vst.msk [vmem:[#allocation5 + $0xb8] sm:$0xff] %vm5178_vm6, %v5033_v9  ;;  %5201 = vst.msk [vmem:[#allocation5 + $0xb0] sm:$0xff] %vm5178_vm6, %v5031_v3 }
 0x6d3   :  { %5289 = vrot.lane.b32.xlu1 %v16663_v57, %s9036_s24  ;;  %5287 = vrot.lane.b32.xlu0 %v16664_v43, %s9036_s24  ;;  %v16667_v43 = vld [vmem:[#allocation28_spill] sm:$0xff]  ;;  %v16668_v57 = vld [vmem:[#allocation30_spill] sm:$0xff] }
 0x6d5   :  { %v5037_v26 = vpop.permute.xlu1 %5036  ;;  %v5035_v30 = vpop.permute.xlu0 %5034 }
 0x6d6   :  { %5204 = vst.msk [vmem:[#allocation5 + $0xc8] sm:$0xff] %vm5178_vm6, %v5037_v26  ;;  %5203 = vst.msk [vmem:[#allocation5 + $0xc0] sm:$0xff] %vm5178_vm6, %v5035_v30 }
 0x6d7   :  { %5293 = vrot.lane.b32.xlu1 %v16665_v20, %s9036_s24  ;;  %5291 = vrot.lane.b32.xlu0 %v16666_v39, %s9036_s24  ;;  %v16669_v39 = vld [vmem:[#allocation40_spill] sm:$0xff]  ;;  %v16670_v20 = vld [vmem:[#allocation42_spill] sm:$0xff] }
 0x6d9   :  { %v5041_v9 = vpop.permute.xlu1 %5040  ;;  %v5039_v3 = vpop.permute.xlu0 %5038 }
 0x6da   :  { %5206 = vst.msk [vmem:[#allocation5 + $0xd8] sm:$0xff] %vm5178_vm6, %v5041_v9  ;;  %5205 = vst.msk [vmem:[#allocation5 + $0xd0] sm:$0xff] %vm5178_vm6, %v5039_v3 }
 0x6db   :  { %5297 = vrot.lane.b32.xlu1 %v16667_v43, %s9036_s24  ;;  %5295 = vrot.lane.b32.xlu0 %v16668_v57, %s9036_s24  ;;  %v16671_v57 = vld [vmem:[#allocation47_spill] sm:$0xff]  ;;  %v16672_v43 = vld [vmem:[#allocation48_spill] sm:$0xff] }
 0x6dd   :  { %v5045_v26 = vpop.permute.xlu1 %5044  ;;  %v5043_v30 = vpop.permute.xlu0 %5042 }
 0x6de   :  { %5208 = vst.msk [vmem:[#allocation5 + $0xe8] sm:$0xff] %vm5178_vm6, %v5045_v26  ;;  %5207 = vst.msk [vmem:[#allocation5 + $0xe0] sm:$0xff] %vm5178_vm6, %v5043_v30 }
 0x6df   :  { %5301 = vrot.lane.b32.xlu1 %v16669_v39, %s9036_s24  ;;  %5299 = vrot.lane.b32.xlu0 %v16670_v20, %s9036_s24  ;;  %v16673_v20 = vld [vmem:[#allocation52_spill] sm:$0xff]  ;;  %v16674_v39 = vld [vmem:[#allocation57_spill] sm:$0xff] }
 0x6e1   :  { %v5049_v9 = vpop.permute.xlu1 %5048  ;;  %v5047_v3 = vpop.permute.xlu0 %5046 }
 0x6e2   :  { %5210 = vst.msk [vmem:[#allocation5 + $0xf8] sm:$0xff] %vm5178_vm6, %v5049_v9  ;;  %5209 = vst.msk [vmem:[#allocation5 + $0xf0] sm:$0xff] %vm5178_vm6, %v5047_v3  ;;  %v3930_v9 = vld [vmem:[#allocation3 + $0x190] sm:$0x3] }
 0x6e3   :  { %5305 = vrot.lane.b32.xlu1 %v16671_v57, %s9036_s24  ;;  %5303 = vrot.lane.b32.xlu0 %v16672_v43, %s9036_s24  ;;  %v5246_v57 = vrot.slane %v13614_v56, 1 }
 0x6e5   :  { %v5053_v26 = vpop.permute.xlu1 %5052  ;;  %v5051_v30 = vpop.permute.xlu0 %5050  ;;  %v13820_v4 = vsel %vm599_vm3, %v5245_v50, %v5246_v57 }
 0x6e6   :  { %5212 = vst.msk [vmem:[#allocation5 + $0x108] sm:$0xff] %vm5178_vm6, %v5053_v26  ;;  %5211 = vst.msk [vmem:[#allocation5 + $0x100] sm:$0xff] %vm5178_vm6, %v5051_v30  ;;  %v5248_v26 = vrot.slane %v3930_v9, 1  ;;  %v16675_v30 = vld [vmem:[#allocation67_spill] sm:$0xff] }
 0x6e7   :  { %5309 = vrot.lane.b32.xlu1 %v16673_v20, %s9036_s24  ;;  %5307 = vrot.lane.b32.xlu0 %v16674_v39, %s9036_s24  ;;  %v16676_v20 = vld [vmem:[#allocation69_spill] sm:$0xff]  ;;  %16678 = vst [vmem:[#allocation133_spill] sm:$0xff] %v13820_v4 }
 0x6e8   :  { %v13817_v56 = vsel %vm599_vm3, %v5246_v57, %v5248_v26  ;;  %v16682_v26 = vld [vmem:[#allocation11_spill] sm:$0xff] }
 0x6e9   :  { %v5057_v3 = vpop.permute.xlu1 %5056  ;;  %v5055_v15 = vpop.permute.xlu0 %5054  ;;  %16677 = vst [vmem:[#allocation128_spill] sm:$0xff] %v13817_v56 }
 0x6ea   :  { %5214 = vst.msk [vmem:[#allocation5 + $0x118] sm:$0xff] %vm5178_vm6, %v5057_v3  ;;  %5213 = vst.msk [vmem:[#allocation5 + $0x110] sm:$0xff] %vm5178_vm6, %v5055_v15  ;;  %v16681_v3 = vld [vmem:[#allocation75_spill] sm:$0xff] }
 0x6eb   :  { %5313 = vrot.lane.b32.xlu1 %v16675_v30, %s9036_s24  ;;  %5311 = vrot.lane.b32.xlu0 %v16676_v20, %s9036_s24  ;;  %v16689_v20 = vld [vmem:[#allocation96_spill] sm:$0xff]  ;;  %v16690_v30 = vld [vmem:[#allocation98_spill] sm:$0xff] }
 0x6ed   :  { %v5061_v43 = vpop.permute.xlu1 %5060  ;;  %v5059_v39 = vpop.permute.xlu0 %5058 }
 0x6ee   :  { %5216 = vst.msk [vmem:[#allocation5 + $0x128] sm:$0xff] %vm5178_vm6, %v5061_v43  ;;  %5215 = vst.msk [vmem:[#allocation5 + $0x120] sm:$0xff] %vm5178_vm6, %v5059_v39  ;;  %v16679_v39 = vld [vmem:[#allocation70_spill] sm:$0xff]  ;;  %v16680_v43 = vld [vmem:[#allocation72_spill] sm:$0xff] }
 0x6ef   :  { %5317 = vrot.lane.b32.xlu1 %v13817_v56, %s9036_s24  ;;  %5315 = vrot.lane.b32.xlu0 %v13820_v4, %s9036_s24  ;;  %v16687_v4 = vld [vmem:[#allocation89_spill] sm:$0xff]  ;;  %v16688_v56 = vld [vmem:[#allocation90_spill] sm:$0xff] }
 0x6f1   :  { %v5065_v15 = vpop.permute.xlu1 %5064  ;;  %v5063_v9 = vpop.permute.xlu0 %5062 }
 0x6f2   :  { %5218 = vst.msk [vmem:[#allocation5 + $0x138] sm:$0xff] %vm5178_vm6, %v5065_v15  ;;  %5217 = vst.msk [vmem:[#allocation5 + $0x130] sm:$0xff] %vm5178_vm6, %v5063_v9 }
 0x6f3   :  { %5321 = vrot.lane.b32.xlu1 %v16679_v39, %s9036_s24  ;;  %5319 = vrot.lane.b32.xlu0 %v16680_v43, %s9036_s24  ;;  %v16683_v39 = vld [vmem:[#allocation12_spill] sm:$0xff]  ;;  %v16684_v43 = vld [vmem:[#allocation78_spill] sm:$0xff] }
 0x6f5   :  { %v5069_v50 = vpop.permute.xlu1 %5068  ;;  %v5067_v57 = vpop.permute.xlu0 %5066 }
 0x6f6   :  { %5220 = vst.msk [vmem:[#allocation5 + $0x148] sm:$0xff] %vm5178_vm6, %v5069_v50  ;;  %5219 = vst.msk [vmem:[#allocation5 + $0x140] sm:$0xff] %vm5178_vm6, %v5067_v57 }
 0x6f7   :  { %5325 = vrot.lane.b32.xlu1 %v16681_v3, %s9036_s24  ;;  %5323 = vrot.lane.b32.xlu0 %v16682_v26, %s9036_s24  ;;  %v16685_v26 = vld [vmem:[#allocation81_spill] sm:$0xff]  ;;  %v16686_v3 = vld [vmem:[#allocation83_spill] sm:$0xff] }
 0x6f9   :  { %v5073_v15 = vpop.permute.xlu1 %5072  ;;  %v5071_v9 = vpop.permute.xlu0 %5070 }
 0x6fa   :  { %5222 = vst.msk [vmem:[#allocation5 + $0x158] sm:$0xff] %vm5178_vm6, %v5073_v15  ;;  %5221 = vst.msk [vmem:[#allocation5 + $0x150] sm:$0xff] %vm5178_vm6, %v5071_v9 }
 0x6fb   :  { %5329 = vrot.lane.b32.xlu1 %v16683_v39, %s9036_s24  ;;  %5327 = vrot.lane.b32.xlu0 %v16684_v43, %s9036_s24 }
 0x6fd   :  { %v5077_v50 = vpop.permute.xlu1 %5076  ;;  %v5075_v57 = vpop.permute.xlu0 %5074 }
 0x6fe   :  { %5224 = vst.msk [vmem:[#allocation5 + $0x168] sm:$0xff] %vm5178_vm6, %v5077_v50  ;;  %5223 = vst.msk [vmem:[#allocation5 + $0x160] sm:$0xff] %vm5178_vm6, %v5075_v57 }
 0x6ff   :  { %5333 = vrot.lane.b32.xlu1 %v16685_v26, %s9036_s24  ;;  %5331 = vrot.lane.b32.xlu0 %v16686_v3, %s9036_s24 }
 0x701   :  { %v5081_v15 = vpop.permute.xlu1 %5080  ;;  %v5079_v9 = vpop.permute.xlu0 %5078 }
 0x702   :  { %5226 = vst.msk [vmem:[#allocation5 + $0x178] sm:$0xff] %vm5178_vm6, %v5081_v15  ;;  %5225 = vst.msk [vmem:[#allocation5 + $0x170] sm:$0xff] %vm5178_vm6, %v5079_v9 }
 0x703   :  { %5337 = vrot.lane.b32.xlu1 %v16687_v4, %s9036_s24  ;;  %5335 = vrot.lane.b32.xlu0 %v16688_v56, %s9036_s24 }
 0x705   :  { %v5085_v50 = vpop.permute.xlu1 %5084  ;;  %v5083_v57 = vpop.permute.xlu0 %5082 }
 0x706   :  { %5228 = vst.msk [vmem:[#allocation5 + $0x188] sm:$0xff] %vm5178_vm6, %v5085_v50  ;;  %5227 = vst.msk [vmem:[#allocation5 + $0x180] sm:$0xff] %vm5178_vm6, %v5083_v57 }
 0x707   :  { %5341 = vrot.lane.b32.xlu1 %v16689_v20, %s9036_s24  ;;  %5339 = vrot.lane.b32.xlu0 %v16690_v30, %s9036_s24 }
 0x709   :  { %v5089_v15 = vpop.permute.xlu1 %5088  ;;  %v5087_v9 = vpop.permute.xlu0 %5086 }
 0x70a   :  { %5230 = vst.msk [vmem:[#allocation5 + $0x198] sm:$0xff] %vm5178_vm6, %v5089_v15  ;;  %5229 = vst.msk [vmem:[#allocation5 + $0x190] sm:$0xff] %vm5178_vm6, %v5087_v9 }
 0x70b   :  { %5345 = vrot.lane.b32.xlu1 %v16691_v46, %s9036_s24  ;;  %5343 = vrot.lane.b32.xlu0 %v16692_v19, %s9036_s24 }
 0x70d   :  { %v5093_v50 = vpop.permute.xlu1 %5092  ;;  %v5091_v57 = vpop.permute.xlu0 %5090 }
 0x70e   :  { %5232 = vst.msk [vmem:[#allocation5 + $0x1a8] sm:$0xff] %vm5178_vm6, %v5093_v50  ;;  %5231 = vst.msk [vmem:[#allocation5 + $0x1a0] sm:$0xff] %vm5178_vm6, %v5091_v57 }
 0x70f   :  { %5349 = vrot.lane.b32.xlu1 %v16693_v37, %s9036_s24  ;;  %5347 = vrot.lane.b32.xlu0 %v16694_v60, %s9036_s24 }
 0x711   :  { %v5097_v15 = vpop.permute.xlu1 %5096  ;;  %v5095_v9 = vpop.permute.xlu0 %5094 }
 0x712   :  { %5234 = vst.msk [vmem:[#allocation5 + $0x1b8] sm:$0xff] %vm5178_vm6, %v5097_v15  ;;  %5233 = vst.msk [vmem:[#allocation5 + $0x1b0] sm:$0xff] %vm5178_vm6, %v5095_v9 }
 0x713   :  { %5353 = vrot.lane.b32.xlu1 %v16695_v29, %s9036_s24  ;;  %5351 = vrot.lane.b32.xlu0 %v16696_v22, %s9036_s24 }
 0x715   :  { %v5101_v50 = vpop.permute.xlu1 %5100  ;;  %v5099_v57 = vpop.permute.xlu0 %5098 }
 0x716   :  { %5236 = vst.msk [vmem:[#allocation5 + $0x1c8] sm:$0xff] %vm5178_vm6, %v5101_v50  ;;  %5235 = vst.msk [vmem:[#allocation5 + $0x1c0] sm:$0xff] %vm5178_vm6, %v5099_v57 }
 0x717   :  { %5357 = vrot.lane.b32.xlu1 %v16697_v61, %s9036_s24  ;;  %5355 = vrot.lane.b32.xlu0 %v16698_v10, %s9036_s24 }
 0x719   :  { %v5105_v15 = vpop.permute.xlu1 %5104  ;;  %v5103_v9 = vpop.permute.xlu0 %5102 }
 0x71a   :  { %5238 = vst.msk [vmem:[#allocation5 + $0x1d8] sm:$0xff] %vm5178_vm6, %v5105_v15  ;;  %5237 = vst.msk [vmem:[#allocation5 + $0x1d0] sm:$0xff] %vm5178_vm6, %v5103_v9 }
 0x71b   :  { %5361 = vrot.lane.b32.xlu1 %v16699_v47, %s9036_s24  ;;  %5359 = vrot.lane.b32.xlu0 %v16700_v42, %s9036_s24 }
 0x71d   :  { %v5109_v50 = vpop.permute.xlu1 %5108  ;;  %v5107_v57 = vpop.permute.xlu0 %5106 }
 0x71e   :  { %5240 = vst.msk [vmem:[#allocation5 + $0x1e8] sm:$0xff] %vm5178_vm6, %v5109_v50  ;;  %5239 = vst.msk [vmem:[#allocation5 + $0x1e0] sm:$0xff] %vm5178_vm6, %v5107_v57 }
 0x71f   :  { %5365 = vrot.lane.b32.xlu1 %v16701_v40, %s9036_s24  ;;  %5363 = vrot.lane.b32.xlu0 %v16702_v41, %s9036_s24 }
 0x721   :  { %v5113_v15 = vpop.permute.xlu1 %5112  ;;  %v5111_v9 = vpop.permute.xlu0 %5110 }
 0x722   :  { %5242 = vst.msk [vmem:[#allocation5 + $0x1f8] sm:$0xff] %vm5178_vm6, %v5113_v15  ;;  %5241 = vst.msk [vmem:[#allocation5 + $0x1f0] sm:$0xff] %vm5178_vm6, %v5111_v9  ;;  %v16706_v15 = vld [vmem:[#allocation131_spill] sm:$0xff]  ;;  %v13910_v9 = vld [vmem:[#allocation3 + $0x340] sm:$0x3] }
 0x723   :  { %5369 = vrot.lane.b32.xlu1 %v16703_v27, %s9036_s24  ;;  %5367 = vrot.lane.b32.xlu0 %v16704_v12, %s9036_s24  ;;  %16707 = vst [vmem:[#allocation132_spill] sm:$0xff] %v13910_v9 }
 0x725   :  { %v5258_v50 = vpop.permute.xlu1 %5257  ;;  %v5256_v57 = vpop.permute.xlu0 %5255 }
 0x726   :  { %5449 = vst.msk [vmem:[#allocation5 + $0x8] sm:$0xff] %vm5447_vm7, %v5258_v50  ;;  %5448 = vst.msk [vmem:[#allocation5] sm:$0xff] %vm5447_vm7, %v5256_v57  ;;  %v5253_v50 = vrot.slane %v13910_v9, 1  ;;  %v16708_v57 = vld [vmem:[#allocation134_spill] sm:$0xff] }
 0x727   :  { %5373 = vrot.lane.b32.xlu1 %v16705_v52, %s9036_s24  ;;  %5371 = vrot.lane.b32.xlu0 %v16706_v15, %s9036_s24 }
 0x728   :  { %v13924_v5 = vsel %vm599_vm3, %v5251_v2, %v5253_v50  ;;  %v16713_v50 = vld [vmem:[#allocation136_spill] sm:$0xff] }
 0x729   :  { %v5262_v34 = vpop.permute.xlu1 %5261  ;;  %v5260_v55 = vpop.permute.xlu0 %5259 }
 0x72a   :  { %5451 = vst.msk [vmem:[#allocation5 + $0x18] sm:$0xff] %vm5447_vm7, %v5262_v34  ;;  %5450 = vst.msk [vmem:[#allocation5 + $0x10] sm:$0xff] %vm5447_vm7, %v5260_v55  ;;  %v13927_v34 = vsel %vm599_vm3, %v5250_v58, %v5251_v2 }
 0x72b   :  { %5377 = vrot.lane.b32.xlu1 %v16708_v57, %s9036_s24  ;;  %5375 = vrot.lane.b32.xlu0 %v16709_v36, %s9036_s24  ;;  %16710 = vst [vmem:[#allocation82_spill] sm:$0xff] %v13927_v34 }
 0x72d   :  { %v5266_v62 = vpop.permute.xlu1 %5265  ;;  %v5264_v35 = vpop.permute.xlu0 %5263 }
 0x72e   :  { %5453 = vst.msk [vmem:[#allocation5 + $0x28] sm:$0xff] %vm5447_vm7, %v5266_v62  ;;  %5452 = vst.msk [vmem:[#allocation5 + $0x20] sm:$0xff] %vm5447_vm7, %v5264_v35  ;;  %v16711_v62 = vld [vmem:[#allocation135_spill] sm:$0xff]  ;;  %v16712_v35 = vld [vmem:[#allocation88_spill] sm:$0xff] }
 0x72f   :  { %5381 = vrot.lane.b32.xlu1 %v13924_v5, %s9036_s24  ;;  %5379 = vrot.lane.b32.xlu0 %v13927_v34, %s9036_s24  ;;  %s9040_s24 = smov 64  }
 0x731   :  { %v5270_v55 = vpop.permute.xlu1 %5269  ;;  %v5268_v45 = vpop.permute.xlu0 %5267 }
 0x732   :  { %5455 = vst.msk [vmem:[#allocation5 + $0x38] sm:$0xff] %vm5447_vm7, %v5270_v55  ;;  %5454 = vst.msk [vmem:[#allocation5 + $0x30] sm:$0xff] %vm5447_vm7, %v5268_v45  ;;  %v16714_v55 = vld [vmem:[#allocation91_spill] sm:$0xff] }
 0x733   :  { %5524 = vrot.lane.b32.xlu1 %v16711_v62, %s9037_s2  ;;  %5522 = vrot.lane.b32.xlu0 %v16712_v35, %s9037_s2  ;;  %v16715_v62 = vld [vmem:[#allocation137_spill] sm:$0xff]  ;;  %v16716_v35 = vld [vmem:[#allocation138_spill] sm:$0xff] }
 0x735   :  { %v5274_v58 = vpop.permute.xlu1 %5273  ;;  %v5272_v2 = vpop.permute.xlu0 %5271 }
 0x736   :  { %5457 = vst.msk [vmem:[#allocation5 + $0x48] sm:$0xff] %vm5447_vm7, %v5274_v58  ;;  %5456 = vst.msk [vmem:[#allocation5 + $0x40] sm:$0xff] %vm5447_vm7, %v5272_v2 }
 0x737   :  { %5528 = vrot.lane.b32.xlu1 %v16713_v50, %s9037_s2  ;;  %5526 = vrot.lane.b32.xlu0 %v16714_v55, %s9037_s2  ;;  %v16717_v55 = vld [vmem:[#allocation139_spill] sm:$0xff]  ;;  %v16718_v50 = vld [vmem:[#allocation100_spill] sm:$0xff] }
 0x739   :  { %v5278_v45 = vpop.permute.xlu1 %5277  ;;  %v5276_v9 = vpop.permute.xlu0 %5275 }
 0x73a   :  { %5459 = vst.msk [vmem:[#allocation5 + $0x58] sm:$0xff] %vm5447_vm7, %v5278_v45  ;;  %5458 = vst.msk [vmem:[#allocation5 + $0x50] sm:$0xff] %vm5447_vm7, %v5276_v9 }
 0x73b   :  { %5532 = vrot.lane.b32.xlu1 %v16715_v62, %s9037_s2  ;;  %5530 = vrot.lane.b32.xlu0 %v16716_v35, %s9037_s2  ;;  %v16719_v35 = vld [vmem:[#allocation103_spill] sm:$0xff]  ;;  %v16720_v62 = vld [vmem:[#allocation106_spill] sm:$0xff] }
 0x73d   :  { %v5282_v58 = vpop.permute.xlu1 %5281  ;;  %v5280_v2 = vpop.permute.xlu0 %5279 }
 0x73e   :  { %5461 = vst.msk [vmem:[#allocation5 + $0x68] sm:$0xff] %vm5447_vm7, %v5282_v58  ;;  %5460 = vst.msk [vmem:[#allocation5 + $0x60] sm:$0xff] %vm5447_vm7, %v5280_v2 }
 0x73f   :  { %5536 = vrot.lane.b32.xlu1 %v16717_v55, %s9037_s2  ;;  %5534 = vrot.lane.b32.xlu0 %v16718_v50, %s9037_s2  ;;  %v16721_v50 = vld [vmem:[#allocation140_spill] sm:$0xff]  ;;  %v16722_v55 = vld [vmem:[#allocation141_spill] sm:$0xff] }
 0x741   :  { %v5286_v45 = vpop.permute.xlu1 %5285  ;;  %v5284_v9 = vpop.permute.xlu0 %5283 }
 0x742   :  { %5463 = vst.msk [vmem:[#allocation5 + $0x78] sm:$0xff] %vm5447_vm7, %v5286_v45  ;;  %5462 = vst.msk [vmem:[#allocation5 + $0x70] sm:$0xff] %vm5447_vm7, %v5284_v9 }
 0x743   :  { %5540 = vrot.lane.b32.xlu1 %v16719_v35, %s9037_s2  ;;  %5538 = vrot.lane.b32.xlu0 %v16720_v62, %s9037_s2  ;;  %v16723_v62 = vld [vmem:[#allocation142_spill] sm:$0xff]  ;;  %v16724_v35 = vld [vmem:[#allocation143_spill] sm:$0xff] }
 0x745   :  { %v5290_v58 = vpop.permute.xlu1 %5289  ;;  %v5288_v2 = vpop.permute.xlu0 %5287 }
 0x746   :  { %5465 = vst.msk [vmem:[#allocation5 + $0x88] sm:$0xff] %vm5447_vm7, %v5290_v58  ;;  %5464 = vst.msk [vmem:[#allocation5 + $0x80] sm:$0xff] %vm5447_vm7, %v5288_v2 }
 0x747   :  { %5544 = vrot.lane.b32.xlu1 %v16721_v50, %s9037_s2  ;;  %5542 = vrot.lane.b32.xlu0 %v16722_v55, %s9037_s2  ;;  %v16725_v55 = vld [vmem:[#allocation144_spill] sm:$0xff]  ;;  %v16726_v50 = vld [vmem:[#allocation145_spill] sm:$0xff] }
 0x749   :  { %v5294_v45 = vpop.permute.xlu1 %5293  ;;  %v5292_v9 = vpop.permute.xlu0 %5291 }
 0x74a   :  { %5467 = vst.msk [vmem:[#allocation5 + $0x98] sm:$0xff] %vm5447_vm7, %v5294_v45  ;;  %5466 = vst.msk [vmem:[#allocation5 + $0x90] sm:$0xff] %vm5447_vm7, %v5292_v9 }
 0x74b   :  { %5548 = vrot.lane.b32.xlu1 %v16723_v62, %s9037_s2  ;;  %5546 = vrot.lane.b32.xlu0 %v16724_v35, %s9037_s2  ;;  %v16727_v35 = vld [vmem:[#allocation146_spill] sm:$0xff]  ;;  %v16728_v62 = vld [vmem:[#allocation147_spill] sm:$0xff] }
 0x74d   :  { %v5298_v58 = vpop.permute.xlu1 %5297  ;;  %v5296_v2 = vpop.permute.xlu0 %5295 }
 0x74e   :  { %5469 = vst.msk [vmem:[#allocation5 + $0xa8] sm:$0xff] %vm5447_vm7, %v5298_v58  ;;  %5468 = vst.msk [vmem:[#allocation5 + $0xa0] sm:$0xff] %vm5447_vm7, %v5296_v2 }
 0x74f   :  { %5552 = vrot.lane.b32.xlu1 %v16725_v55, %s9037_s2  ;;  %5550 = vrot.lane.b32.xlu0 %v16726_v50, %s9037_s2  ;;  %v16729_v50 = vld [vmem:[#allocation148_spill] sm:$0xff]  ;;  %v16730_v55 = vld [vmem:[#allocation149_spill] sm:$0xff] }
 0x751   :  { %v5302_v45 = vpop.permute.xlu1 %5301  ;;  %v5300_v9 = vpop.permute.xlu0 %5299 }
 0x752   :  { %5471 = vst.msk [vmem:[#allocation5 + $0xb8] sm:$0xff] %vm5447_vm7, %v5302_v45  ;;  %5470 = vst.msk [vmem:[#allocation5 + $0xb0] sm:$0xff] %vm5447_vm7, %v5300_v9  ;;  %v6640_v45 = vld [vmem:[%s15363_s3] sm:$0xff]  ;;  %v6641_v9 = vld [vmem:[%s15363_s3 + $0x8] sm:$0xff] }
 0x753   :  { %5556 = vrot.lane.b32.xlu1 %v16727_v35, %s9037_s2  ;;  %5554 = vrot.lane.b32.xlu0 %v16728_v62, %s9037_s2  ;;  %v8700_v62 = vpack.c.bf16 %v6641_v9, %v6640_v45  ;;  %v6643_v45 = vld [vmem:[%s15363_s3 + $0x18] sm:$0xff] }
 0x755   :  { %v5306_v58 = vpop.permute.xlu1 %5305  ;;  %v5304_v2 = vpop.permute.xlu0 %5303  ;;  %8724 = vmatprep.subr.bf16.mxu1 %v8700_v62  ;;  %8701 = vmatprep.subr.bf16.mxu0 %v8700_v62 }
 0x756   :  { %5473 = vst.msk [vmem:[#allocation5 + $0xc8] sm:$0xff] %vm5447_vm7, %v5306_v58  ;;  %5472 = vst.msk [vmem:[#allocation5 + $0xc0] sm:$0xff] %vm5447_vm7, %v5304_v2  ;;  %v16731_v58 = vld [vmem:[#allocation150_spill] sm:$0xff]  ;;  %v16732_v2 = vld [vmem:[#allocation151_spill] sm:$0xff]  ;;  %8729 = vmatpush3.bf16.msra.mxu1 %v8700_v62  ;;  %8703 = vmatpush3.bf16.msra.mxu0 %v8700_v62 }
 0x757   :  { %5560 = vrot.lane.b32.xlu1 %v16729_v50, %s9037_s2  ;;  %5558 = vrot.lane.b32.xlu0 %v16730_v55, %s9037_s2  ;;  %v6642_v55 = vld [vmem:[%s15363_s3 + $0x10] sm:$0xff]  ;;  %v6644_v50 = vld [vmem:[%s15363_s3 + $0x20] sm:$0xff] }
 0x759   :  { %v5310_v35 = vpop.permute.xlu1 %5309  ;;  %v5308_v34 = vpop.permute.xlu0 %5307 }
 0x75a   :  { %5475 = vst.msk [vmem:[#allocation5 + $0xd8] sm:$0xff] %vm5447_vm7, %v5310_v35  ;;  %5474 = vst.msk [vmem:[#allocation5 + $0xd0] sm:$0xff] %vm5447_vm7, %v5308_v34  ;;  %v8704_v35 = vpack.c.bf16 %v6643_v45, %v6642_v55  ;;  %v6645_v55 = vld [vmem:[%s15363_s3 + $0x28] sm:$0xff] }
 0x75b   :  { %5564 = vrot.lane.b32.xlu1 %v16731_v58, %s9037_s2  ;;  %5562 = vrot.lane.b32.xlu0 %v16732_v2, %s9037_s2  ;;  %v16733_v2 = vld [vmem:[#allocation162_spill] sm:$0xff]  ;;  %v16734_v58 = vld [vmem:[#allocation163_spill] sm:$0xff]  ;;  %v8708_v62 = vpack.c.bf16 %v6645_v55, %v6644_v50  ;;  %v6646_v50 = vld [vmem:[%s15363_s3 + $0x30] sm:$0xff] }
 0x75c   :  { %8725 = vmatprep.subr.bf16.mxu1 %v8704_v35  ;;  %8705 = vmatprep.subr.bf16.mxu0 %v8704_v35 }
 0x75d   :  { %v5314_v34 = vpop.permute.xlu1 %5313  ;;  %v5312_v9 = vpop.permute.xlu0 %5311  ;;  %8730 = vmatpush3.bf16.msra.mxu1 %v8704_v35  ;;  %8707 = vmatpush3.bf16.msra.mxu0 %v8704_v35  ;;  %v6647_v35 = vld [vmem:[%s15363_s3 + $0x38] sm:$0xff] }
 0x75e   :  { %5477 = vst.msk [vmem:[#allocation5 + $0xe8] sm:$0xff] %vm5447_vm7, %v5314_v34  ;;  %5476 = vst.msk [vmem:[#allocation5 + $0xe0] sm:$0xff] %vm5447_vm7, %v5312_v9  ;;  %8726 = vmatprep.subr.bf16.mxu1 %v8708_v62  ;;  %8709 = vmatprep.subr.bf16.mxu0 %v8708_v62  ;;  %v8712_v9 = vpack.c.bf16 %v6647_v35, %v6646_v50  ;;  %v16736_v50 = vld [vmem:[#allocation79_spill] sm:$0xff] }
 0x75f   :  { %5592 = vrot.lane.b32.xlu1 %v16733_v2, %s9037_s2  ;;  %5590 = vrot.lane.b32.xlu0 %v16734_v58, %s9037_s2 }
 0x761   :  { %v5318_v45 = vpop.permute.xlu1 %5317  ;;  %v5316_v34 = vpop.permute.xlu0 %5315  ;;  %8731 = vmatpush3.bf16.msra.mxu1 %v8708_v62  ;;  %8711 = vmatpush3.bf16.msra.mxu0 %v8708_v62 }
 0x762   :  { %5479 = vst.msk [vmem:[#allocation5 + $0xf8] sm:$0xff] %vm5447_vm7, %v5318_v45  ;;  %5478 = vst.msk [vmem:[#allocation5 + $0xf0] sm:$0xff] %vm5447_vm7, %v5316_v34  ;;  %8727 = vmatprep.subr.bf16.mxu1 %v8712_v9  ;;  %8713 = vmatprep.subr.bf16.mxu0 %v8712_v9  ;;  %v16735_v34 = vld [vmem:[#allocation80_spill] sm:$0xff] }
 0x763   :  { %5853 = vrot.lane.b32.xlu1 %v12716_v32, %s9038_s25  ;;  %5851 = vrot.lane.b32.xlu0 %v12719_v49, %s9038_s25  ;;  %v6648_v32 = vld [vmem:[%s15363_s3 + $0x40] sm:$0xff] }
 0x765   :  { %v5322_v55 = vpop.permute.xlu1 %5321  ;;  %v5320_v45 = vpop.permute.xlu0 %5319  ;;  %8732 = vmatpush3.bf16.msra.mxu1 %v8712_v9  ;;  %8715 = vmatpush3.bf16.msra.mxu0 %v8712_v9 }
 0x766   :  { %5481 = vst.msk [vmem:[#allocation5 + $0x108] sm:$0xff] %vm5447_vm7, %v5322_v55  ;;  %5480 = vst.msk [vmem:[#allocation5 + $0x100] sm:$0xff] %vm5447_vm7, %v5320_v45  ;;  %8728 = vmatprep.subr.mxu1 %v6648_v32  ;;  %8488 = vmatprep.subr.mxu0 %v6648_v32 }
 0x767   :  { %6122 = vrot.lane.b32.xlu1 %v16683_v39, %s9039_s30  ;;  %6120 = vrot.lane.b32.xlu0 %v16684_v43, %s9039_s30 }
 0x769   :  { %v5326_v49 = vpop.permute.xlu1 %5325  ;;  %v5324_v62 = vpop.permute.xlu0 %5323  ;;  %8733 = vmatpush3.msra.mxu1 %v6648_v32  ;;  %8489 = vmatpush3.msra.mxu0 %v6648_v32 }
 0x76a   :  { %5483 = vst.msk [vmem:[#allocation5 + $0x118] sm:$0xff] %vm5447_vm7, %v5326_v49  ;;  %5482 = vst.msk [vmem:[#allocation5 + $0x110] sm:$0xff] %vm5447_vm7, %v5324_v62 }
 0x76b   :  { %5594 = vrot.lane.b32.xlu1 %v16735_v34, %s9037_s2  ;;  %6387 = vrot.lane.b32.xlu0 %v16735_v34, %s9040_s24 }
 0x76d   :  { %v5330_v39 = vpop.permute.xlu1 %5329  ;;  %v5328_v43 = vpop.permute.xlu0 %5327 }
 0x76e   :  { %5485 = vst.msk [vmem:[#allocation5 + $0x128] sm:$0xff] %vm5447_vm7, %v5330_v39  ;;  %5484 = vst.msk [vmem:[#allocation5 + $0x120] sm:$0xff] %vm5447_vm7, %v5328_v43 }
 0x76f   :  { %5596 = vrot.lane.b32.xlu1 %v16736_v50, %s9037_s2  ;;  %6389 = vrot.lane.b32.xlu0 %v16736_v50, %s9040_s24 }
 0x771   :  { %v5334_v35 = vpop.permute.xlu1 %5333  ;;  %v5332_v9 = vpop.permute.xlu0 %5331 }
 0x772   :  { %5487 = vst.msk [vmem:[#allocation5 + $0x138] sm:$0xff] %vm5447_vm7, %v5334_v35  ;;  %5486 = vst.msk [vmem:[#allocation5 + $0x130] sm:$0xff] %vm5447_vm7, %v5332_v9 }
 0x773   :  { %5857 = vrot.lane.b32.xlu1 %v12743_v25, %s9038_s25  ;;  %5855 = vrot.lane.b32.xlu0 %v16584_v8, %s9038_s25  ;;  %v16737_v25 = vld [vmem:[#allocation165_spill] sm:$0xff] }
 0x775   :  { %v5338_v55 = vpop.permute.xlu1 %5337  ;;  %v5336_v45 = vpop.permute.xlu0 %5335 }
 0x776   :  { %5489 = vst.msk [vmem:[#allocation5 + $0x148] sm:$0xff] %vm5447_vm7, %v5338_v55  ;;  %5488 = vst.msk [vmem:[#allocation5 + $0x140] sm:$0xff] %vm5447_vm7, %v5336_v45 }
 0x777   :  { %6126 = vrot.lane.b32.xlu1 %v16685_v26, %s9039_s30  ;;  %6124 = vrot.lane.b32.xlu0 %v16686_v3, %s9039_s30  ;;  %v16738_v3 = vld [vmem:[#allocation164_spill] sm:$0xff] }
 0x779   :  { %v5342_v32 = vpop.permute.xlu1 %5341  ;;  %v5340_v49 = vpop.permute.xlu0 %5339 }
 0x77a   :  { %5491 = vst.msk [vmem:[#allocation5 + $0x158] sm:$0xff] %vm5447_vm7, %v5342_v32  ;;  %5490 = vst.msk [vmem:[#allocation5 + $0x150] sm:$0xff] %vm5447_vm7, %v5340_v49 }
 0x77b   :  { %5598 = vrot.lane.b32.xlu1 %v16737_v25, %s9037_s2  ;;  %6391 = vrot.lane.b32.xlu0 %v16737_v25, %s9040_s24 }
 0x77d   :  { %v5346_v8 = vpop.permute.xlu1 %5345  ;;  %v5344_v62 = vpop.permute.xlu0 %5343 }
 0x77e   :  { %5493 = vst.msk [vmem:[#allocation5 + $0x168] sm:$0xff] %vm5447_vm7, %v5346_v8  ;;  %5492 = vst.msk [vmem:[#allocation5 + $0x160] sm:$0xff] %vm5447_vm7, %v5344_v62 }
 0x77f   :  { %5600 = vrot.lane.b32.xlu1 %v16738_v3, %s9037_s2  ;;  %6393 = vrot.lane.b32.xlu0 %v16738_v3, %s9040_s24 }
 0x781   :  { %v5350_v26 = vpop.permute.xlu1 %5349  ;;  %v5348_v34 = vpop.permute.xlu0 %5347 }
 0x782   :  { %5495 = vst.msk [vmem:[#allocation5 + $0x178] sm:$0xff] %vm5447_vm7, %v5350_v26  ;;  %5494 = vst.msk [vmem:[#allocation5 + $0x170] sm:$0xff] %vm5447_vm7, %v5348_v34 }
 0x783   :  { %5861 = vrot.lane.b32.xlu1 %v16589_v0, %s9038_s25  ;;  %5859 = vrot.lane.b32.xlu0 %v16591_v17, %s9038_s25  ;;  %v16739_v0 = vld [vmem:[#allocation84_spill] sm:$0xff] }
 0x785   :  { %v5354_v39 = vpop.permute.xlu1 %5353  ;;  %v5352_v43 = vpop.permute.xlu0 %5351 }
 0x786   :  { %5497 = vst.msk [vmem:[#allocation5 + $0x188] sm:$0xff] %vm5447_vm7, %v5354_v39  ;;  %5496 = vst.msk [vmem:[#allocation5 + $0x180] sm:$0xff] %vm5447_vm7, %v5352_v43 }
 0x787   :  { %6130 = vrot.lane.b32.xlu1 %v16687_v4, %s9039_s30  ;;  %6128 = vrot.lane.b32.xlu0 %v16688_v56, %s9039_s30  ;;  %v16740_v56 = vld [vmem:[#allocation86_spill] sm:$0xff] }
 0x789   :  { %v5358_v50 = vpop.permute.xlu1 %5357  ;;  %v5356_v35 = vpop.permute.xlu0 %5355 }
 0x78a   :  { %5499 = vst.msk [vmem:[#allocation5 + $0x198] sm:$0xff] %vm5447_vm7, %v5358_v50  ;;  %5498 = vst.msk [vmem:[#allocation5 + $0x190] sm:$0xff] %vm5447_vm7, %v5356_v35 }
 0x78b   :  { %5602 = vrot.lane.b32.xlu1 %v16739_v0, %s9037_s2  ;;  %6395 = vrot.lane.b32.xlu0 %v16739_v0, %s9040_s24 }
 0x78d   :  { %v5362_v17 = vpop.permute.xlu1 %5361  ;;  %v5360_v9 = vpop.permute.xlu0 %5359 }
 0x78e   :  { %5501 = vst.msk [vmem:[#allocation5 + $0x1a8] sm:$0xff] %vm5447_vm7, %v5362_v17  ;;  %5500 = vst.msk [vmem:[#allocation5 + $0x1a0] sm:$0xff] %vm5447_vm7, %v5360_v9 }
 0x78f   :  { %5604 = vrot.lane.b32.xlu1 %v16740_v56, %s9037_s2  ;;  %6397 = vrot.lane.b32.xlu0 %v16740_v56, %s9040_s24 }
 0x791   :  { %v5366_v4 = vpop.permute.xlu1 %5365  ;;  %v5364_v55 = vpop.permute.xlu0 %5363 }
 0x792   :  { %5503 = vst.msk [vmem:[#allocation5 + $0x1b8] sm:$0xff] %vm5447_vm7, %v5366_v4  ;;  %5502 = vst.msk [vmem:[#allocation5 + $0x1b0] sm:$0xff] %vm5447_vm7, %v5364_v55 }
 0x793   :  { %5865 = vrot.lane.b32.xlu1 %v16592_v24, %s9038_s25  ;;  %5863 = vrot.lane.b32.xlu0 %v16596_v21, %s9038_s25  ;;  %v16741_v24 = vld [vmem:[#allocation93_spill] sm:$0xff] }
 0x795   :  { %v5370_v45 = vpop.permute.xlu1 %5369  ;;  %v5368_v32 = vpop.permute.xlu0 %5367 }
 0x796   :  { %5505 = vst.msk [vmem:[#allocation5 + $0x1c8] sm:$0xff] %vm5447_vm7, %v5370_v45  ;;  %5504 = vst.msk [vmem:[#allocation5 + $0x1c0] sm:$0xff] %vm5447_vm7, %v5368_v32 }
 0x797   :  { %6134 = vrot.lane.b32.xlu1 %v16689_v20, %s9039_s30  ;;  %6132 = vrot.lane.b32.xlu0 %v16690_v30, %s9039_s30  ;;  %v16742_v20 = vld [vmem:[#allocation87_spill] sm:$0xff] }
 0x799   :  { %v5374_v49 = vpop.permute.xlu1 %5373  ;;  %v5372_v25 = vpop.permute.xlu0 %5371 }
 0x79a   :  { %5507 = vst.msk [vmem:[#allocation5 + $0x1d8] sm:$0xff] %vm5447_vm7, %v5374_v49  ;;  %5506 = vst.msk [vmem:[#allocation5 + $0x1d0] sm:$0xff] %vm5447_vm7, %v5372_v25 }
 0x79b   :  { %5606 = vrot.lane.b32.xlu1 %v16741_v24, %s9037_s2  ;;  %6399 = vrot.lane.b32.xlu0 %v16741_v24, %s9040_s24 }
 0x79d   :  { %v5378_v21 = vpop.permute.xlu1 %5377  ;;  %v5376_v8 = vpop.permute.xlu0 %5375 }
 0x79e   :  { %5509 = vst.msk [vmem:[#allocation5 + $0x1e8] sm:$0xff] %vm5447_vm7, %v5378_v21  ;;  %5508 = vst.msk [vmem:[#allocation5 + $0x1e0] sm:$0xff] %vm5447_vm7, %v5376_v8 }
 0x79f   :  { %5608 = vrot.lane.b32.xlu1 %v16742_v20, %s9037_s2  ;;  %6401 = vrot.lane.b32.xlu0 %v16742_v20, %s9040_s24 }
 0x7a1   :  { %v5382_v30 = vpop.permute.xlu1 %5381  ;;  %v5380_v62 = vpop.permute.xlu0 %5379 }
 0x7a2   :  { %5511 = vst.msk [vmem:[#allocation5 + $0x1f8] sm:$0xff] %vm5447_vm7, %v5382_v30  ;;  %5510 = vst.msk [vmem:[#allocation5 + $0x1f0] sm:$0xff] %vm5447_vm7, %v5380_v62 }
 0x7a3   :  { %5869 = vrot.lane.b32.xlu1 %v16599_v54, %s9038_s25  ;;  %5867 = vrot.lane.b32.xlu0 %v16601_v48, %s9038_s25  ;;  %v16743_v48 = vld [vmem:[#allocation95_spill] sm:$0xff] }
 0x7a5   :  { %v5525_v3 = vpop.permute.xlu1 %5524  ;;  %v5523_v26 = vpop.permute.xlu0 %5522 }
 0x7a6   :  { %5716 = vst.msk [vmem:[#allocation5 + $0x8] sm:$0xff] %vm5714_vm8, %v5525_v3  ;;  %5715 = vst.msk [vmem:[#allocation5] sm:$0xff] %vm5714_vm8, %v5523_v26 }
 0x7a7   :  { %6138 = vrot.lane.b32.xlu1 %v16691_v46, %s9039_s30  ;;  %6136 = vrot.lane.b32.xlu0 %v16692_v19, %s9039_s30  ;;  %v16744_v46 = vld [vmem:[#allocation92_spill] sm:$0xff] }
 0x7a9   :  { %v5529_v34 = vpop.permute.xlu1 %5528  ;;  %v5527_v39 = vpop.permute.xlu0 %5526 }
 0x7aa   :  { %5718 = vst.msk [vmem:[#allocation5 + $0x18] sm:$0xff] %vm5714_vm8, %v5529_v34  ;;  %5717 = vst.msk [vmem:[#allocation5 + $0x10] sm:$0xff] %vm5714_vm8, %v5527_v39 }
 0x7ab   :  { %5610 = vrot.lane.b32.xlu1 %v16743_v48, %s9037_s2  ;;  %6403 = vrot.lane.b32.xlu0 %v16743_v48, %s9040_s24 }
 0x7ad   :  { %v5533_v54 = vpop.permute.xlu1 %5532  ;;  %v5531_v43 = vpop.permute.xlu0 %5530 }
 0x7ae   :  { %5720 = vst.msk [vmem:[#allocation5 + $0x28] sm:$0xff] %vm5714_vm8, %v5533_v54  ;;  %5719 = vst.msk [vmem:[#allocation5 + $0x20] sm:$0xff] %vm5714_vm8, %v5531_v43 }
 0x7af   :  { %5612 = vrot.lane.b32.xlu1 %v16744_v46, %s9037_s2  ;;  %6405 = vrot.lane.b32.xlu0 %v16744_v46, %s9040_s24 }
 0x7b1   :  { %v5537_v19 = vpop.permute.xlu1 %5536  ;;  %v5535_v50 = vpop.permute.xlu0 %5534 }
 0x7b2   :  { %5722 = vst.msk [vmem:[#allocation5 + $0x38] sm:$0xff] %vm5714_vm8, %v5537_v19  ;;  %5721 = vst.msk [vmem:[#allocation5 + $0x30] sm:$0xff] %vm5714_vm8, %v5535_v50 }
 0x7b3   :  { %5873 = vrot.lane.b32.xlu1 %v16602_v44, %s9038_s25  ;;  %5871 = vrot.lane.b32.xlu0 %v16639_v14, %s9038_s25  ;;  %v16745_v44 = vld [vmem:[#allocation99_spill] sm:$0xff] }
 0x7b5   :  { %v5541_v35 = vpop.permute.xlu1 %5540  ;;  %v5539_v0 = vpop.permute.xlu0 %5538 }
 0x7b6   :  { %5724 = vst.msk [vmem:[#allocation5 + $0x48] sm:$0xff] %vm5714_vm8, %v5541_v35  ;;  %5723 = vst.msk [vmem:[#allocation5 + $0x40] sm:$0xff] %vm5714_vm8, %v5539_v0 }
 0x7b7   :  { %6142 = vrot.lane.b32.xlu1 %v16693_v37, %s9039_s30  ;;  %6140 = vrot.lane.b32.xlu0 %v16694_v60, %s9039_s30  ;;  %v16746_v60 = vld [vmem:[#allocation101_spill] sm:$0xff] }
 0x7b9   :  { %v5545_v17 = vpop.permute.xlu1 %5544  ;;  %v5543_v9 = vpop.permute.xlu0 %5542 }
 0x7ba   :  { %5726 = vst.msk [vmem:[#allocation5 + $0x58] sm:$0xff] %vm5714_vm8, %v5545_v17  ;;  %5725 = vst.msk [vmem:[#allocation5 + $0x50] sm:$0xff] %vm5714_vm8, %v5543_v9 }
 0x7bb   :  { %5614 = vrot.lane.b32.xlu1 %v16745_v44, %s9037_s2  ;;  %6407 = vrot.lane.b32.xlu0 %v16745_v44, %s9040_s24 }
 0x7bd   :  { %v5549_v14 = vpop.permute.xlu1 %5548  ;;  %v5547_v56 = vpop.permute.xlu0 %5546 }
 0x7be   :  { %5728 = vst.msk [vmem:[#allocation5 + $0x68] sm:$0xff] %vm5714_vm8, %v5549_v14  ;;  %5727 = vst.msk [vmem:[#allocation5 + $0x60] sm:$0xff] %vm5714_vm8, %v5547_v56 }
 0x7bf   :  { %5616 = vrot.lane.b32.xlu1 %v16746_v60, %s9037_s2  ;;  %6409 = vrot.lane.b32.xlu0 %v16746_v60, %s9040_s24 }
 0x7c1   :  { %v5553_v37 = vpop.permute.xlu1 %5552  ;;  %v5551_v4 = vpop.permute.xlu0 %5550 }
 0x7c2   :  { %5730 = vst.msk [vmem:[#allocation5 + $0x78] sm:$0xff] %vm5714_vm8, %v5553_v37  ;;  %5729 = vst.msk [vmem:[#allocation5 + $0x70] sm:$0xff] %vm5714_vm8, %v5551_v4 }
 0x7c3   :  { %5877 = vrot.lane.b32.xlu1 %v16609_v23, %s9038_s25  ;;  %5875 = vrot.lane.b32.xlu0 %v16611_v38, %s9038_s25  ;;  %v16747_v38 = vld [vmem:[#allocation108_spill] sm:$0xff] }
 0x7c5   :  { %v5557_v55 = vpop.permute.xlu1 %5556  ;;  %v5555_v45 = vpop.permute.xlu0 %5554 }
 0x7c6   :  { %5732 = vst.msk [vmem:[#allocation5 + $0x88] sm:$0xff] %vm5714_vm8, %v5557_v55  ;;  %5731 = vst.msk [vmem:[#allocation5 + $0x80] sm:$0xff] %vm5714_vm8, %v5555_v45 }
 0x7c7   :  { %6146 = vrot.lane.b32.xlu1 %v16695_v29, %s9039_s30  ;;  %6144 = vrot.lane.b32.xlu0 %v16696_v22, %s9039_s30  ;;  %v16748_v29 = vld [vmem:[#allocation102_spill] sm:$0xff] }
 0x7c9   :  { %v5561_v32 = vpop.permute.xlu1 %5560  ;;  %v5559_v49 = vpop.permute.xlu0 %5558 }
 0x7ca   :  { %5734 = vst.msk [vmem:[#allocation5 + $0x98] sm:$0xff] %vm5714_vm8, %v5561_v32  ;;  %5733 = vst.msk [vmem:[#allocation5 + $0x90] sm:$0xff] %vm5714_vm8, %v5559_v49 }
 0x7cb   :  { %5618 = vrot.lane.b32.xlu1 %v16747_v38, %s9037_s2  ;;  %6411 = vrot.lane.b32.xlu0 %v16747_v38, %s9040_s24 }
 0x7cd   :  { %v5565_v23 = vpop.permute.xlu1 %5564  ;;  %v5563_v25 = vpop.permute.xlu0 %5562 }
 0x7ce   :  { %5736 = vst.msk [vmem:[#allocation5 + $0xa8] sm:$0xff] %vm5714_vm8, %v5565_v23  ;;  %5735 = vst.msk [vmem:[#allocation5 + $0xa0] sm:$0xff] %vm5714_vm8, %v5563_v25 }
 0x7cf   :  { %5620 = vrot.lane.b32.xlu1 %v16748_v29, %s9037_s2  ;;  %6413 = vrot.lane.b32.xlu0 %v16748_v29, %s9040_s24 }
 0x7d1   :  { %v5593_v22 = vpop.permute.xlu1 %5592  ;;  %v5591_v24 = vpop.permute.xlu0 %5590 }
 0x7d2   :  { %5750 = vst.msk [vmem:[#allocation5 + $0x118] sm:$0xff] %vm5714_vm8, %v5593_v22  ;;  %5749 = vst.msk [vmem:[#allocation5 + $0x110] sm:$0xff] %vm5714_vm8, %v5591_v24 }
 0x7d3   :  { %5881 = vrot.lane.b32.xlu1 %v16640_v53, %s9038_s25  ;;  %5879 = vrot.lane.b32.xlu0 %v16641_v13, %s9038_s25  ;;  %v16749_v53 = vld [vmem:[#allocation25_spill] sm:$0xff] }
 0x7d5   :  { %v5854_v21 = vpop.permute.xlu1 %5853  ;;  %v5852_v8 = vpop.permute.xlu0 %5851 }
 0x7d6   :  { %6011 = vst.msk [vmem:[#allocation5 + $0x118] sm:$0xff] %vm5975_vm9, %v5854_v21  ;;  %6010 = vst.msk [vmem:[#allocation5 + $0x110] sm:$0xff] %vm5975_vm9, %v5852_v8 }
 0x7d7   :  { %6150 = vrot.lane.b32.xlu1 %v16697_v61, %s9039_s30  ;;  %6148 = vrot.lane.b32.xlu0 %v16698_v10, %s9039_s30  ;;  %v16750_v10 = vld [vmem:[#allocation107_spill] sm:$0xff] }
 0x7d9   :  { %v6123_v20 = vpop.permute.xlu1 %6122  ;;  %v6121_v30 = vpop.permute.xlu0 %6120 }
 0x7da   :  { %6280 = vst.msk [vmem:[#allocation5 + $0x118] sm:$0xff] %vm6244_vm10, %v6123_v20  ;;  %6279 = vst.msk [vmem:[#allocation5 + $0x110] sm:$0xff] %vm6244_vm10, %v6121_v30 }
 0x7db   :  { %5622 = vrot.lane.b32.xlu1 %v16749_v53, %s9037_s2  ;;  %6415 = vrot.lane.b32.xlu0 %v16749_v53, %s9040_s24 }
 0x7dd   :  { %v5595_v13 = vpop.permute.xlu1 %5594  ;;  %v6388_v62 = vpop.permute.xlu0 %6387 }
 0x7de   :  { %5751 = vst.msk [vmem:[#allocation5 + $0x120] sm:$0xff] %vm5714_vm8, %v5595_v13 }
 0x7df   :  { %6546 = vst.msk [vmem:[#allocation5 + $0x110] sm:$0xff] %vm6511_vm11, %v6388_v62  ;;  %5624 = vrot.lane.b32.xlu1 %v16750_v10, %s9037_s2  ;;  %6417 = vrot.lane.b32.xlu0 %v16750_v10, %s9040_s24  ;;  %v8959_v10 = vld [vmem:[#allocation3 + $0x338] sm:$0xff] }
 0x7e1   :  { %v5597_v61 = vpop.permute.xlu1 %5596  ;;  %v6390_v3 = vpop.permute.xlu0 %6389 }
 0x7e2   :  { %5752 = vst.msk [vmem:[#allocation5 + $0x128] sm:$0xff] %vm5714_vm8, %v5597_v61  ;;  %v8960_v61 = vld [vmem:[#allocation3 + $0x330] sm:$0xff] }
 0x7e3   :  { %6547 = vst.msk [vmem:[#allocation5 + $0x118] sm:$0xff] %vm6511_vm11, %v6390_v3  ;;  %5885 = vrot.lane.b32.xlu1 %v16619_v51, %s9038_s25  ;;  %5883 = vrot.lane.b32.xlu0 %v12940_v31, %s9038_s25  ;;  %v16751_v31 = vld [vmem:[#allocation117_spill] sm:$0xff] }
 0x7e5   :  { %v5858_v26 = vpop.permute.xlu1 %5857  ;;  %v5856_v34 = vpop.permute.xlu0 %5855 }
 0x7e6   :  { %v6610_v39 = vld [vmem:[#allocation5 + $0x110] sm:$0xff]  ;;  %6013 = vst.msk [vmem:[#allocation5 + $0x128] sm:$0xff] %vm5975_vm9, %v5858_v26  ;;  %6012 = vst.msk [vmem:[#allocation5 + $0x120] sm:$0xff] %vm5975_vm9, %v5856_v34 }
 0x7e7   :  { %8541 = vmatprep.mubr.msk.f32.mxu1 %vm6656_vm13, %v6610_v39  ;;  %6154 = vrot.lane.b32.xlu1 %v16699_v47, %s9039_s30  ;;  %v5518_v39 = vrot.slane %v8959_v10, 2 }
 0x7e8   :  { %6152 = vrot.lane.b32.xlu0 %v16700_v42, %s9039_s30  ;;  %v16752_v42 = vld [vmem:[#allocation112_spill] sm:$0xff] }
 0x7e9   :  { %v6127_v51 = vpop.permute.xlu1 %6126  ;;  %v6125_v48 = vpop.permute.xlu0 %6124 }
 0x7ea   :  { %v6611_v54 = vld [vmem:[#allocation5 + $0x118] sm:$0xff]  ;;  %6282 = vst.msk [vmem:[#allocation5 + $0x128] sm:$0xff] %vm6244_vm10, %v6127_v51  ;;  %6281 = vst.msk [vmem:[#allocation5 + $0x120] sm:$0xff] %vm6244_vm10, %v6125_v48  ;;  %v5517_v51 = vrot.slane %v8960_v61, 2  ;;  %v16759_v48 = vld [vmem:[#allocation82_spill] sm:$0xff] }
 0x7eb   :  { %8542 = vmatmul.mubr.msk.f32.vlgmr.msra.gmra.mrb[0].mxu1 %vm6656_vm13, %v6611_v54  ;;  %5626 = vrot.lane.b32.xlu1 %v16751_v31, %s9037_s2 }
 0x7ec   :  { %6419 = vrot.lane.b32.xlu0 %v16751_v31, %s9040_s24 }
 0x7ed   :  { %v5599_v43 = vpop.permute.xlu1 %5598  ;;  %v6392_v47 = vpop.permute.xlu0 %6391 }
 0x7ee   :  { %5753 = vst.msk [vmem:[#allocation5 + $0x130] sm:$0xff] %vm5714_vm8, %v5599_v43 }
 0x7ef   :  { %6548 = vst.msk [vmem:[#allocation5 + $0x120] sm:$0xff] %vm6511_vm11, %v6392_v47  ;;  %5628 = vrot.lane.b32.xlu1 %v16752_v42, %s9037_s2  ;;  %v5519_v47 = vsel %vm1017_vm4, %v5517_v51, %v5518_v39 }
 0x7f0   :  { %6421 = vrot.lane.b32.xlu0 %v16752_v42, %s9040_s24  ;;  %v16760_v42 = vld [vmem:[#allocation132_spill] sm:$0xff] }
 0x7f1   :  { %v5601_v46 = vpop.permute.xlu1 %5600  ;;  %v6394_v19 = vpop.permute.xlu0 %6393 }
 0x7f2   :  { %5754 = vst.msk [vmem:[#allocation5 + $0x138] sm:$0xff] %vm5714_vm8, %v5601_v46  ;;  %v5520_v46 = vrot.slane %v16760_v42, 2  ;;  %v16773_v42 = vld [vmem:[#allocation53_spill] sm:$0xff] }
 0x7f3   :  { %6549 = vst.msk [vmem:[#allocation5 + $0x128] sm:$0xff] %vm6511_vm11, %v6394_v19  ;;  %5889 = vrot.lane.b32.xlu1 %v16642_v18, %s9038_s25 }
 0x7f4   :  { %5887 = vrot.lane.b32.xlu0 %v16643_v1, %s9038_s25  ;;  %v16753_v1 = vld [vmem:[#allocation26_spill] sm:$0xff] }
 0x7f5   :  { %v5862_v50 = vpop.permute.xlu1 %5861  ;;  %v5860_v35 = vpop.permute.xlu0 %5859 }
 0x7f6   :  { %v6612_v0 = vld [vmem:[#allocation5 + $0x120] sm:$0xff]  ;;  %6015 = vst.msk [vmem:[#allocation5 + $0x138] sm:$0xff] %vm5975_vm9, %v5862_v50  ;;  %6014 = vst.msk [vmem:[#allocation5 + $0x130] sm:$0xff] %vm5975_vm9, %v5860_v35  ;;  %v3986_v50 = vld [vmem:[#allocation3 + $0x350] sm:$0xff] }
 0x7f7   :  { %8544 = vmatprep.mubr.msk.f32.mxu1 %vm6656_vm13, %v6612_v0  ;;  %6158 = vrot.lane.b32.xlu1 %v16701_v40, %s9039_s30  ;;  %v3985_v35 = vld [vmem:[#allocation3 + $0x348] sm:$0xff]  ;;  %v3987_v0 = vld [vmem:[#allocation3 + $0x358] sm:$0x3] }
 0x7f8   :  { %6156 = vrot.lane.b32.xlu0 %v16702_v41, %s9039_s30  ;;  %v16754_v41 = vld [vmem:[#allocation120_spill] sm:$0xff] }
 0x7f9   :  { %v6131_v17 = vpop.permute.xlu1 %6130  ;;  %v6129_v18 = vpop.permute.xlu0 %6128 }
 0x7fa   :  { %v6613_v9 = vld [vmem:[#allocation5 + $0x128] sm:$0xff]  ;;  %6284 = vst.msk [vmem:[#allocation5 + $0x138] sm:$0xff] %vm6244_vm10, %v6131_v17  ;;  %6283 = vst.msk [vmem:[#allocation5 + $0x130] sm:$0xff] %vm6244_vm10, %v6129_v18  ;;  %v5521_v17 = vsel %vm1017_vm4, %v5518_v39, %v5520_v46  ;;  %v6048_v18 = vrot.slane %v3986_v50, 1  ;;  %v16774_v46 = vld [vmem:[#allocation68_spill] sm:$0xff] }
 0x7fb   :  { %8545 = vmatmul.mubr.msk.f32.gmra.mrb[2].mxu1 %vm6656_vm13, %v6613_v9  ;;  %5630 = vrot.lane.b32.xlu1 %v16753_v1, %s9037_s2  ;;  %v6047_v9 = vrot.slane %v3985_v35, 1 }
 0x7fc   :  { %6423 = vrot.lane.b32.xlu0 %v16753_v1, %s9040_s24  ;;  %v6050_v1 = vrot.slane %v3987_v0, 1 }
 0x7fd   :  { %v5603_v44 = vpop.permute.xlu1 %5602  ;;  %v6396_v40 = vpop.permute.xlu0 %6395 }
 0x7fe   :  { %5755 = vst.msk [vmem:[#allocation5 + $0x140] sm:$0xff] %vm5714_vm8, %v5603_v44  ;;  %v7234_v44 = vld [vmem:[%s15364_s5] sm:$0xff] }
 0x7ff   :  { %6550 = vst.msk [vmem:[#allocation5 + $0x130] sm:$0xff] %vm6511_vm11, %v6396_v40  ;;  %5632 = vrot.lane.b32.xlu1 %v16754_v41, %s9037_s2  ;;  %v7235_v40 = vld [vmem:[%s15364_s5 + $0x8] sm:$0xff] }
 0x800   :  { %6425 = vrot.lane.b32.xlu0 %v16754_v41, %s9040_s24 }
 0x801   :  { %v5605_v14 = vpop.permute.xlu1 %5604  ;;  %v6398_v56 = vpop.permute.xlu0 %6397 }
 0x802   :  { %5756 = vst.msk [vmem:[#allocation5 + $0x148] sm:$0xff] %vm5714_vm8, %v5605_v14 }
 0x803   :  { %6551 = vst.msk [vmem:[#allocation5 + $0x138] sm:$0xff] %vm6511_vm11, %v6398_v56  ;;  %5893 = vrot.lane.b32.xlu1 %v16626_v59, %s9038_s25  ;;  %v8716_v56 = vpack.c.bf16 %v7235_v40, %v7234_v44 }
 0x804   :  { %5891 = vrot.lane.b32.xlu0 %v16644_v6, %s9038_s25  ;;  %v16755_v6 = vld [vmem:[#allocation41_spill] sm:$0xff] }
 0x805   :  { %v5866_v60 = vpop.permute.xlu1 %5865  ;;  %v5864_v37 = vpop.permute.xlu0 %5863  ;;  %8717 = vmatprep.subr.bf16.mxu1 %v8716_v56 }
 0x806   :  { %v6614_v4 = vld [vmem:[#allocation5 + $0x130] sm:$0xff]  ;;  %6017 = vst.msk [vmem:[#allocation5 + $0x148] sm:$0xff] %vm5975_vm9, %v5866_v60  ;;  %6016 = vst.msk [vmem:[#allocation5 + $0x140] sm:$0xff] %vm5975_vm9, %v5864_v37  ;;  %v6315_v60 = vrot.slane %v3986_v50, 2  ;;  %v6314_v37 = vrot.slane %v3985_v35, 2  ;;  %8719 = vmatpush3.bf16.msra.mxu1 %v8716_v56 }
 0x807   :  { %8547 = vmatprep.mubr.msk.f32.mxu1 %vm6656_vm13, %v6614_v4  ;;  %6162 = vrot.lane.b32.xlu1 %v16703_v27, %s9039_s30  ;;  %v6051_v4 = vsel %vm599_vm3, %v6048_v18, %v6050_v1  ;;  %v16778_v1 = vld [vmem:[#allocation100_spill] sm:$0xff] }
 0x808   :  { %6160 = vrot.lane.b32.xlu0 %v16704_v12, %s9039_s30  ;;  %v16756_v12 = vld [vmem:[#allocation9_spill] sm:$0xff] }
 0x809   :  { %v6135_v55 = vpop.permute.xlu1 %6134  ;;  %v6133_v59 = vpop.permute.xlu0 %6132 }
 0x80a   :  { %v6615_v45 = vld [vmem:[#allocation5 + $0x138] sm:$0xff]  ;;  %6286 = vst.msk [vmem:[#allocation5 + $0x148] sm:$0xff] %vm6244_vm10, %v6135_v55  ;;  %6285 = vst.msk [vmem:[#allocation5 + $0x140] sm:$0xff] %vm6244_vm10, %v6133_v59  ;;  %v6049_v55 = vsel %vm599_vm3, %v6047_v9, %v6048_v18  ;;  %v6317_v59 = vrot.slane %v3987_v0, 2  ;;  %v16776_v0 = vld [vmem:[#allocation94_spill] sm:$0xff] }
 0x80b   :  { %8548 = vmatmul.mubr.msk.f32.gmra.mrb[4].mxu1 %vm6656_vm13, %v6615_v45  ;;  %5634 = vrot.lane.b32.xlu1 %v16755_v6, %s9037_s2  ;;  %v7236_v45 = vld [vmem:[%s15364_s5 + $0x10] sm:$0xff]  ;;  %v16777_v9 = vld [vmem:[#allocation139_spill] sm:$0xff] }
 0x80c   :  { %6427 = vrot.lane.b32.xlu0 %v16755_v6, %s9040_s24  ;;  %v7237_v6 = vld [vmem:[%s15364_s5 + $0x18] sm:$0xff] }
 0x80d   :  { %v5607_v32 = vpop.permute.xlu1 %5606  ;;  %v6400_v27 = vpop.permute.xlu0 %6399 }
 0x80e   :  { %5757 = vst.msk [vmem:[#allocation5 + $0x150] sm:$0xff] %vm5714_vm8, %v5607_v32 }
 0x80f   :  { %6552 = vst.msk [vmem:[#allocation5 + $0x140] sm:$0xff] %vm6511_vm11, %v6400_v27  ;;  %5636 = vrot.lane.b32.xlu1 %v16756_v12, %s9037_s2 }
 0x810   :  { %6429 = vrot.lane.b32.xlu0 %v16756_v12, %s9040_s24 }
 0x811   :  { %v5609_v49 = vpop.permute.xlu1 %5608  ;;  %v6402_v38 = vpop.permute.xlu0 %6401 }
 0x812   :  { %5758 = vst.msk [vmem:[#allocation5 + $0x158] sm:$0xff] %vm5714_vm8, %v5609_v49  ;;  %v8720_v49 = vpack.c.bf16 %v7237_v6, %v7236_v45 }
 0x813   :  { %6553 = vst.msk [vmem:[#allocation5 + $0x148] sm:$0xff] %vm6511_vm11, %v6402_v38  ;;  %5897 = vrot.lane.b32.xlu1 %v16645_v16, %s9038_s25  ;;  %v6318_v38 = vsel %vm1017_vm4, %v6315_v60, %v6317_v59 }
 0x814   :  { %5895 = vrot.lane.b32.xlu0 %v16646_v11, %s9038_s25  ;;  %8721 = vmatprep.subr.bf16.mxu1 %v8720_v49 }
 0x815   :  { %v5870_v23 = vpop.permute.xlu1 %5869  ;;  %v5868_v25 = vpop.permute.xlu0 %5867  ;;  %8723 = vmatpush3.bf16.msra.mxu1 %v8720_v49 }
 0x816   :  { %v6616_v29 = vld [vmem:[#allocation5 + $0x140] sm:$0xff]  ;;  %6019 = vst.msk [vmem:[#allocation5 + $0x158] sm:$0xff] %vm5975_vm9, %v5870_v23  ;;  %6018 = vst.msk [vmem:[#allocation5 + $0x150] sm:$0xff] %vm5975_vm9, %v5868_v25  ;;  %v6316_v23 = vsel %vm1017_vm4, %v6314_v37, %v6315_v60 }
 0x817   :  { %8550 = vmatprep.mubr.msk.f32.mxu1 %vm6656_vm13, %v6616_v29  ;;  %6166 = vrot.lane.b32.xlu1 %v16705_v52, %s9039_s30 }
 0x818   :  { %6164 = vrot.lane.b32.xlu0 %v16706_v15, %s9039_s30 }
 0x819   :  { %v6139_v22 = vpop.permute.xlu1 %6138  ;;  %v6137_v16 = vpop.permute.xlu0 %6136 }
 0x81a   :  { %v6617_v24 = vld [vmem:[#allocation5 + $0x148] sm:$0xff]  ;;  %6288 = vst.msk [vmem:[#allocation5 + $0x158] sm:$0xff] %vm6244_vm10, %v6139_v22  ;;  %6287 = vst.msk [vmem:[#allocation5 + $0x150] sm:$0xff] %vm6244_vm10, %v6137_v16  ;;  %v7238_v16 = vld [vmem:[%s15364_s5 + $0x20] sm:$0xf] }
 0x81b   :  { %8551 = vmatmul.mubr.msk.f32.gmra.mrb[6].mxu1 %vm6656_vm13, %v6617_v24  ;;  %5638 = vrot.lane.b32.xlu1 %v13501_v63, %s9037_s2 }
 0x81c   :  { %6431 = vrot.lane.b32.xlu0 %v13501_v63, %s9040_s24  ;;  %8594 = vmatprep.subr.msk.mxu1 %vm3362_vm12, %v7238_v16 }
 0x81d   :  { %v5611_v11 = vpop.permute.xlu1 %5610  ;;  %v6404_v52 = vpop.permute.xlu0 %6403  ;;  %8595 = vmatpush3.msk.msra.mxu1 %vm3362_vm12, %v7238_v16  ;;  %v16788_v16 = vld [vmem:[#allocation21_spill] sm:$0xff] }
 0x81e   :  { %5759 = vst.msk [vmem:[#allocation5 + $0x160] sm:$0xff] %vm5714_vm8, %v5611_v11 }
 0x81f   :  { %6554 = vst.msk [vmem:[#allocation5 + $0x150] sm:$0xff] %vm6511_vm11, %v6404_v52  ;;  %5640 = vrot.lane.b32.xlu1 %v13496_v28, %s9037_s2  ;;  %v16761_v52 = vld [vmem:[#allocation6_spill] sm:$0xff] }
 0x820   :  { %6433 = vrot.lane.b32.xlu0 %v13496_v28, %s9040_s24 }
 0x821   :  { %v5613_v15 = vpop.permute.xlu1 %5612  ;;  %v6406_v21 = vpop.permute.xlu0 %6405 }
 0x822   :  { %5760 = vst.msk [vmem:[#allocation5 + $0x168] sm:$0xff] %vm5714_vm8, %v5613_v15  ;;  %v16762_v15 = vld [vmem:[#allocation7_spill] sm:$0xff] }
 0x823   :  { %6555 = vst.msk [vmem:[#allocation5 + $0x158] sm:$0xff] %vm6511_vm11, %v6406_v21  ;;  %5901 = vrot.lane.b32.xlu1 %v16634_v33, %s9038_s25 }
 0x824   :  { %5899 = vrot.lane.b32.xlu0 %v16636_v7, %s9038_s25  ;;  %v16757_v7 = vld [vmem:[#allocation125_spill] sm:$0xff] }
 0x825   :  { %v5874_v63 = vpop.permute.xlu1 %5873  ;;  %v5872_v8 = vpop.permute.xlu0 %5871 }
 0x826   :  { %v6618_v20 = vld [vmem:[#allocation5 + $0x150] sm:$0xff]  ;;  %6021 = vst.msk [vmem:[#allocation5 + $0x168] sm:$0xff] %vm5975_vm9, %v5874_v63  ;;  %6020 = vst.msk [vmem:[#allocation5 + $0x160] sm:$0xff] %vm5975_vm9, %v5872_v8 }
 0x827   :  { %8553 = vmatprep.mubr.msk.f32.mxu1 %vm6656_vm13, %v6618_v20  ;;  %6170 = vrot.lane.b32.xlu1 %v16708_v57, %s9039_s30  ;;  %v16763_v8 = vld [vmem:[#allocation76_spill] sm:$0xff]  ;;  %v16764_v20 = vld [vmem:[#allocation77_spill] sm:$0xff] }
 0x828   :  { %6168 = vrot.lane.b32.xlu0 %v16709_v36, %s9039_s30  ;;  %v16758_v36 = vld [vmem:[#allocation50_spill] sm:$0xff] }
 0x829   :  { %v6143_v28 = vpop.permute.xlu1 %6142  ;;  %v6141_v33 = vpop.permute.xlu0 %6140 }
 0x82a   :  { %v6619_v30 = vld [vmem:[#allocation5 + $0x158] sm:$0xff]  ;;  %6290 = vst.msk [vmem:[#allocation5 + $0x168] sm:$0xff] %vm6244_vm10, %v6143_v28  ;;  %6289 = vst.msk [vmem:[#allocation5 + $0x160] sm:$0xff] %vm6244_vm10, %v6141_v33 }
 0x82b   :  { %8554 = vmatmul.mubr.msk.f32.gmra.mrb[8].mxu1 %vm6656_vm13, %v6619_v30  ;;  %5642 = vrot.lane.b32.xlu1 %v16757_v7, %s9037_s2 }
 0x82c   :  { %6435 = vrot.lane.b32.xlu0 %v16757_v7, %s9040_s24  ;;  %v16765_v7 = vld [vmem:[#allocation136_spill] sm:$0xff] }
 0x82d   :  { %v5615_v53 = vpop.permute.xlu1 %5614  ;;  %v6408_v57 = vpop.permute.xlu0 %6407 }
 0x82e   :  { %5761 = vst.msk [vmem:[#allocation5 + $0x170] sm:$0xff] %vm5714_vm8, %v5615_v53  ;;  %v16766_v53 = vld [vmem:[#allocation91_spill] sm:$0xff] }
 0x82f   :  { %6556 = vst.msk [vmem:[#allocation5 + $0x160] sm:$0xff] %vm6511_vm11, %v6408_v57  ;;  %5644 = vrot.lane.b32.xlu1 %v16758_v36, %s9037_s2 }
 0x830   :  { %6437 = vrot.lane.b32.xlu0 %v16758_v36, %s9040_s24 }
 0x831   :  { %v5617_v13 = vpop.permute.xlu1 %5616  ;;  %v6410_v62 = vpop.permute.xlu0 %6409 }
 0x832   :  { %5762 = vst.msk [vmem:[#allocation5 + $0x178] sm:$0xff] %vm5714_vm8, %v5617_v13 }
 0x833   :  { %6557 = vst.msk [vmem:[#allocation5 + $0x168] sm:$0xff] %vm6511_vm11, %v6410_v62  ;;  %5905 = vrot.lane.b32.xlu1 %v8959_v10, %s9038_s25  ;;  %v16767_v62 = vld [vmem:[#allocation113_spill] sm:$0xff]  ;;  %v16768_v10 = vld [vmem:[#allocation114_spill] sm:$0xff] }
 0x834   :  { %5903 = vrot.lane.b32.xlu0 %v8960_v61, %s9038_s25 }
 0x835   :  { %v5878_v3 = vpop.permute.xlu1 %5877  ;;  %v5876_v26 = vpop.permute.xlu0 %5875 }
 0x836   :  { %v6620_v34 = vld [vmem:[#allocation5 + $0x160] sm:$0xff]  ;;  %6023 = vst.msk [vmem:[#allocation5 + $0x178] sm:$0xff] %vm5975_vm9, %v5878_v3  ;;  %6022 = vst.msk [vmem:[#allocation5 + $0x170] sm:$0xff] %vm5975_vm9, %v5876_v26  ;;  %v16769_v26 = vld [vmem:[#allocation115_spill] sm:$0xff] }
 0x837   :  { %8556 = vmatprep.mubr.msk.f32.mxu1 %vm6656_vm13, %v6620_v34  ;;  %6174 = vrot.lane.b32.xlu1 %v13924_v5, %s9039_s30  ;;  %v16770_v34 = vld [vmem:[#allocation116_spill] sm:$0xff] }
 0x838   :  { %6172 = vrot.lane.b32.xlu0 %v16759_v48, %s9039_s30  ;;  %v16771_v48 = vld [vmem:[#allocation137_spill] sm:$0xff] }
 0x839   :  { %v6147_v54 = vpop.permute.xlu1 %6146  ;;  %v6145_v31 = vpop.permute.xlu0 %6144 }
 0x83a   :  { %v6621_v43 = vld [vmem:[#allocation5 + $0x168] sm:$0xff]  ;;  %6292 = vst.msk [vmem:[#allocation5 + $0x178] sm:$0xff] %vm6244_vm10, %v6147_v54  ;;  %6291 = vst.msk [vmem:[#allocation5 + $0x170] sm:$0xff] %vm6244_vm10, %v6145_v31  ;;  %v16772_v54 = vld [vmem:[#allocation138_spill] sm:$0xff] }
 0x83b   :  { %8557 = vmatmul.mubr.msk.f32.gmra.mrb[10].mxu1 %vm6656_vm13, %v6621_v43  ;;  %5646 = vrot.lane.b32.xlu1 %v5519_v47, %s9037_s2 }
 0x83c   :  { %6439 = vrot.lane.b32.xlu0 %v5519_v47, %s9040_s24 }
 0x83d   :  { %v5619_v5 = vpop.permute.xlu1 %5618  ;;  %v6412_v19 = vpop.permute.xlu0 %6411 }
 0x83e   :  { %5763 = vst.msk [vmem:[#allocation5 + $0x180] sm:$0xff] %vm5714_vm8, %v5619_v5 }
 0x83f   :  { %6558 = vst.msk [vmem:[#allocation5 + $0x170] sm:$0xff] %vm6511_vm11, %v6412_v19  ;;  %5648 = vrot.lane.b32.xlu1 %v5521_v17, %s9037_s2 }
 0x840   :  { %6441 = vrot.lane.b32.xlu0 %v5521_v17, %s9040_s24 }
 0x841   :  { %v5621_v41 = vpop.permute.xlu1 %5620  ;;  %v6414_v14 = vpop.permute.xlu0 %6413 }
 0x842   :  { %5764 = vst.msk [vmem:[#allocation5 + $0x188] sm:$0xff] %vm5714_vm8, %v5621_v41  ;;  %v16779_v41 = vld [vmem:[#allocation97_spill] sm:$0xff] }
 0x843   :  { %6559 = vst.msk [vmem:[#allocation5 + $0x178] sm:$0xff] %vm6511_vm11, %v6414_v14  ;;  %5909 = vrot.lane.b32.xlu1 %v3986_v50, %s9038_s25  ;;  %v16780_v14 = vld [vmem:[#allocation15_spill] sm:$0xff] }
 0x844   :  { %5907 = vrot.lane.b32.xlu0 %v3985_v35, %s9038_s25  ;;  %v16775_v35 = vld [vmem:[#allocation38_spill] sm:$0xff] }
 0x845   :  { %v5882_v32 = vpop.permute.xlu1 %5881  ;;  %v5880_v27 = vpop.permute.xlu0 %5879 }
 0x846   :  { %v6622_v12 = vld [vmem:[#allocation5 + $0x170] sm:$0xff]  ;;  %6025 = vst.msk [vmem:[#allocation5 + $0x188] sm:$0xff] %vm5975_vm9, %v5882_v32  ;;  %6024 = vst.msk [vmem:[#allocation5 + $0x180] sm:$0xff] %vm5975_vm9, %v5880_v27  ;;  %v16783_v32 = vld [vmem:[#allocation103_spill] sm:$0xff] }
 0x847   :  { %8559 = vmatprep.mubr.msk.f32.mxu1 %vm6656_vm13, %v6622_v12  ;;  %6178 = vrot.lane.b32.xlu1 %v6051_v4, %s9039_s30  ;;  %v16781_v4 = vld [vmem:[#allocation16_spill] sm:$0xff]  ;;  %v16784_v27 = vld [vmem:[#allocation106_spill] sm:$0xff] }
 0x848   :  { %6176 = vrot.lane.b32.xlu0 %v6049_v55, %s9039_s30  ;;  %v16782_v55 = vld [vmem:[#allocation17_spill] sm:$0xff] }
 0x849   :  { %v6151_v25 = vpop.permute.xlu1 %6150  ;;  %v6149_v29 = vpop.permute.xlu0 %6148 }
 0x84a   :  { %v6623_v22 = vld [vmem:[#allocation5 + $0x178] sm:$0xff]  ;;  %6294 = vst.msk [vmem:[#allocation5 + $0x188] sm:$0xff] %vm6244_vm10, %v6151_v25  ;;  %6293 = vst.msk [vmem:[#allocation5 + $0x180] sm:$0xff] %vm6244_vm10, %v6149_v29 }
 0x84b   :  { %8560 = vmatmul.mubr.msk.f32.gmra.mrb[12].mxu1 %vm6656_vm13, %v6623_v22  ;;  %6445 = vrot.lane.b32.xlu1 %v6318_v38, %s9040_s24  ;;  %v16785_v38 = vld [vmem:[#allocation18_spill] sm:$0xff]  ;;  %v16787_v22 = vld [vmem:[#allocation20_spill] sm:$0xff] }
 0x84c   :  { %6443 = vrot.lane.b32.xlu0 %v6316_v23, %s9040_s24  ;;  %v16786_v23 = vld [vmem:[#allocation19_spill] sm:$0xff] }
 0x84d   :  { %v5623_v24 = vpop.permute.xlu1 %5622  ;;  %v6416_v11 = vpop.permute.xlu0 %6415 }
 0x84e   :  { %5765 = vst.msk [vmem:[#allocation5 + $0x190] sm:$0xff] %vm5714_vm8, %v5623_v24 }
 0x84f   :  { %6560 = vst.msk [vmem:[#allocation5 + $0x180] sm:$0xff] %vm6511_vm11, %v6416_v11  ;;  %5785 = vrot.lane.b32.xlu1 %v16761_v52, %s9038_s25 }
 0x850   :  { %5783 = vrot.lane.b32.xlu0 %v16762_v15, %s9038_s25  ;;  %v16789_v15 = vld [vmem:[#allocation140_spill] sm:$0xff] }
 0x851   :  { %v5625_v21 = vpop.permute.xlu1 %5624  ;;  %v6418_v63 = vpop.permute.xlu0 %6417 }
 0x852   :  { %5766 = vst.msk [vmem:[#allocation5 + $0x198] sm:$0xff] %vm5714_vm8, %v5625_v21  ;;  %v16790_v21 = vld [vmem:[#allocation141_spill] sm:$0xff] }
 0x853   :  { %6561 = vst.msk [vmem:[#allocation5 + $0x188] sm:$0xff] %vm6511_vm11, %v6418_v63  ;;  %6054 = vrot.lane.b32.xlu1 %v16763_v8, %s9039_s30 }
 0x854   :  { %6052 = vrot.lane.b32.xlu0 %v16764_v20, %s9039_s30 }
 0x855   :  { %v5886_v28 = vpop.permute.xlu1 %5885  ;;  %v5884_v33 = vpop.permute.xlu0 %5883 }
 0x856   :  { %v6624_v30 = vld [vmem:[#allocation5 + $0x180] sm:$0xff]  ;;  %6027 = vst.msk [vmem:[#allocation5 + $0x198] sm:$0xff] %vm5975_vm9, %v5886_v28  ;;  %6026 = vst.msk [vmem:[#allocation5 + $0x190] sm:$0xff] %vm5975_vm9, %v5884_v33  ;;  %v16791_v28 = vld [vmem:[#allocation29_spill] sm:$0xff] }
 0x857   :  { %8562 = vmatprep.mubr.msk.f32.mxu1 %vm6656_vm13, %v6624_v30  ;;  %6321 = vrot.lane.b32.xlu1 %v16765_v7, %s9040_s24  ;;  %v16792_v33 = vld [vmem:[#allocation32_spill] sm:$0xff] }
 0x858   :  { %6319 = vrot.lane.b32.xlu0 %v16766_v53, %s9040_s24  ;;  %v16793_v53 = vld [vmem:[#allocation34_spill] sm:$0xff] }
 0x859   :  { %v6155_v57 = vpop.permute.xlu1 %6154 }
 0x85a   :  { %v6153_v36 = vpop.permute.xlu0 %6152  ;;  %v6625_v13 = vld [vmem:[#allocation5 + $0x188] sm:$0xff]  ;;  %6296 = vst.msk [vmem:[#allocation5 + $0x198] sm:$0xff] %vm6244_vm10, %v6155_v57 }
 0x85b   :  { %6295 = vst.msk [vmem:[#allocation5 + $0x190] sm:$0xff] %vm6244_vm10, %v6153_v36  ;;  %8563 = vmatmul.mubr.msk.f32.gmra.mrb[14].mxu1 %vm6656_vm13, %v6625_v13  ;;  %5789 = vrot.lane.b32.xlu1 %v16767_v62, %s9038_s25  ;;  %v16794_v57 = vld [vmem:[#allocation35_spill] sm:$0xff]  ;;  %v16795_v62 = vld [vmem:[#allocation142_spill] sm:$0xff] }
 0x85c   :  { %5787 = vrot.lane.b32.xlu0 %v16768_v10, %s9038_s25  ;;  %v16796_v10 = vld [vmem:[#allocation143_spill] sm:$0xff] }
 0x85d   :  { %v5627_v61 = vpop.permute.xlu1 %5626 }
 0x85e   :  { %v6420_v3 = vpop.permute.xlu0 %6419  ;;  %5767 = vst.msk [vmem:[#allocation5 + $0x1a0] sm:$0xff] %vm5714_vm8, %v5627_v61 }
 0x85f   :  { %6562 = vst.msk [vmem:[#allocation5 + $0x190] sm:$0xff] %vm6511_vm11, %v6420_v3  ;;  %6058 = vrot.lane.b32.xlu1 %v16769_v26, %s9039_s30 }
 0x860   :  { %6056 = vrot.lane.b32.xlu0 %v16770_v34, %s9039_s30  ;;  %v16797_v34 = vld [vmem:[#allocation54_spill] sm:$0xff] }
 0x861   :  { %v5629_v39 = vpop.permute.xlu1 %5628 }
 0x862   :  { %v6422_v51 = vpop.permute.xlu0 %6421  ;;  %5768 = vst.msk [vmem:[#allocation5 + $0x1a8] sm:$0xff] %vm5714_vm8, %v5629_v39  ;;  %v16798_v39 = vld [vmem:[#allocation55_spill] sm:$0xff] }
 0x863   :  { %6563 = vst.msk [vmem:[#allocation5 + $0x198] sm:$0xff] %vm6511_vm11, %v6422_v51  ;;  %6325 = vrot.lane.b32.xlu1 %v16771_v48, %s9040_s24 }
 0x864   :  { %6323 = vrot.lane.b32.xlu0 %v16772_v54, %s9040_s24 }
 0x865   :  { %v5890_v31 = vpop.permute.xlu1 %5889 }
 0x866   :  { %v5888_v43 = vpop.permute.xlu0 %5887  ;;  %v6626_v47 = vld [vmem:[#allocation5 + $0x190] sm:$0xff]  ;;  %6029 = vst.msk [vmem:[#allocation5 + $0x1a8] sm:$0xff] %vm5975_vm9, %v5890_v31 }
 0x867   :  { %6028 = vst.msk [vmem:[#allocation5 + $0x1a0] sm:$0xff] %vm5975_vm9, %v5888_v43  ;;  %8565 = vmatprep.mubr.msk.f32.mxu1 %vm6656_vm13, %v6626_v47  ;;  %5793 = vrot.lane.b32.xlu1 %v16773_v42, %s9038_s25  ;;  %v16799_v31 = vld [vmem:[#allocation56_spill] sm:$0xff]  ;;  %v16800_v43 = vld [vmem:[#allocation59_spill] sm:$0xff] }
 0x868   :  { %5791 = vrot.lane.b32.xlu0 %v16774_v46, %s9038_s25  ;;  %v16801_v46 = vld [vmem:[#allocation144_spill] sm:$0xff] }
 0x869   :  { %v6159_v5 = vpop.permute.xlu1 %6158 }
 0x86a   :  { %v6157_v19 = vpop.permute.xlu0 %6156  ;;  %v6627_v50 = vld [vmem:[#allocation5 + $0x198] sm:$0xff]  ;;  %6298 = vst.msk [vmem:[#allocation5 + $0x1a8] sm:$0xff] %vm6244_vm10, %v6159_v5 }
 0x86b   :  { %6297 = vst.msk [vmem:[#allocation5 + $0x1a0] sm:$0xff] %vm6244_vm10, %v6157_v19  ;;  %8566 = vmatmul.mubr.msk.f32.gmra.mrb[16].mxu1 %vm6656_vm13, %v6627_v50  ;;  %6062 = vrot.lane.b32.xlu1 %v16775_v35, %s9039_s30  ;;  %v16802_v5 = vld [vmem:[#allocation145_spill] sm:$0xff] }
 0x86c   :  { %6060 = vrot.lane.b32.xlu0 %v16776_v0, %s9039_s30  ;;  %v16803_v35 = vld [vmem:[#allocation61_spill] sm:$0xff]  ;;  %v16804_v0 = vld [vmem:[#allocation62_spill] sm:$0xff] }
 0x86d   :  { %v5631_v17 = vpop.permute.xlu1 %5630 }
 0x86e   :  { %v6424_v18 = vpop.permute.xlu0 %6423  ;;  %5769 = vst.msk [vmem:[#allocation5 + $0x1b0] sm:$0xff] %vm5714_vm8, %v5631_v17 }
 0x86f   :  { %6564 = vst.msk [vmem:[#allocation5 + $0x1a0] sm:$0xff] %vm6511_vm11, %v6424_v18  ;;  %6329 = vrot.lane.b32.xlu1 %v16777_v9, %s9040_s24 }
 0x870   :  { %6327 = vrot.lane.b32.xlu0 %v16778_v1, %s9040_s24  ;;  %v16805_v1 = vld [vmem:[#allocation63_spill] sm:$0xff] }
 0x871   :  { %v5633_v44 = vpop.permute.xlu1 %5632 }
 0x872   :  { %v6426_v40 = vpop.permute.xlu0 %6425  ;;  %5770 = vst.msk [vmem:[#allocation5 + $0x1b8] sm:$0xff] %vm5714_vm8, %v5633_v44  ;;  %v16806_v44 = vld [vmem:[#allocation64_spill] sm:$0xff] }
 0x873   :  { %6565 = vst.msk [vmem:[#allocation5 + $0x1a8] sm:$0xff] %vm6511_vm11, %v6426_v40  ;;  %5797 = vrot.lane.b32.xlu1 %v16779_v41, %s9038_s25 }
 0x874   :  { %5795 = vrot.lane.b32.xlu0 %v16780_v14, %s9038_s25 }
 0x875   :  { %v5894_v56 = vpop.permute.xlu1 %5893 }
 0x876   :  { %v5892_v60 = vpop.permute.xlu0 %5891  ;;  %v6628_v37 = vld [vmem:[#allocation5 + $0x1a0] sm:$0xff]  ;;  %6031 = vst.msk [vmem:[#allocation5 + $0x1b8] sm:$0xff] %vm5975_vm9, %v5894_v56 }
 0x877   :  { %6030 = vst.msk [vmem:[#allocation5 + $0x1b0] sm:$0xff] %vm5975_vm9, %v5892_v60  ;;  %8568 = vmatprep.mubr.msk.f32.mxu1 %vm6656_vm13, %v6628_v37  ;;  %6066 = vrot.lane.b32.xlu1 %v16781_v4, %s9039_s30  ;;  %v16807_v56 = vld [vmem:[#allocation146_spill] sm:$0xff]  ;;  %v16808_v60 = vld [vmem:[#allocation147_spill] sm:$0xff] }
 0x878   :  { %6064 = vrot.lane.b32.xlu0 %v16782_v55, %s9039_s30  ;;  %v16809_v55 = vld [vmem:[#allocation65_spill] sm:$0xff] }
 0x879   :  { %v6163_v59 = vpop.permute.xlu1 %6162 }
 0x87a   :  { %v6161_v45 = vpop.permute.xlu0 %6160  ;;  %v6629_v6 = vld [vmem:[#allocation5 + $0x1a8] sm:$0xff]  ;;  %6300 = vst.msk [vmem:[#allocation5 + $0x1b8] sm:$0xff] %vm6244_vm10, %v6163_v59  ;;  %v16810_v59 = vld [vmem:[#allocation13_spill] sm:$0xff] }
 0x87b   :  { %6299 = vst.msk [vmem:[#allocation5 + $0x1b0] sm:$0xff] %vm6244_vm10, %v6161_v45  ;;  %8569 = vmatmul.mubr.msk.f32.gmra.mrb[18].mxu1 %vm6656_vm13, %v6629_v6  ;;  %6333 = vrot.lane.b32.xlu1 %v16783_v32, %s9040_s24  ;;  %v16811_v32 = vld [vmem:[#allocation14_spill] sm:$0xff] }
 0x87c   :  { %6331 = vrot.lane.b32.xlu0 %v16784_v27, %s9040_s24  ;;  %v16812_v27 = vld [vmem:[#allocation22_spill] sm:$0xff] }
 0x87d   :  { %v5635_v12 = vpop.permute.xlu1 %5634 }
 0x87e   :  { %v6428_v49 = vpop.permute.xlu0 %6427  ;;  %5771 = vst.msk [vmem:[#allocation5 + $0x1c0] sm:$0xff] %vm5714_vm8, %v5635_v12 }
 0x87f   :  { %6566 = vst.msk [vmem:[#allocation5 + $0x1b0] sm:$0xff] %vm6511_vm11, %v6428_v49  ;;  %5801 = vrot.lane.b32.xlu1 %v16785_v38, %s9038_s25 }
 0x880   :  { %5799 = vrot.lane.b32.xlu0 %v16786_v23, %s9038_s25  ;;  %v16813_v23 = vld [vmem:[#allocation148_spill] sm:$0xff] }
 0x881   :  { %v5637_v25 = vpop.permute.xlu1 %5636 }
 0x882   :  { %v6430_v29 = vpop.permute.xlu0 %6429  ;;  %5772 = vst.msk [vmem:[#allocation5 + $0x1c8] sm:$0xff] %vm5714_vm8, %v5637_v25  ;;  %v16814_v25 = vld [vmem:[#allocation149_spill] sm:$0xff] }
 0x883   :  { %6567 = vst.msk [vmem:[#allocation5 + $0x1b8] sm:$0xff] %vm6511_vm11, %v6430_v29  ;;  %6070 = vrot.lane.b32.xlu1 %v16787_v22, %s9039_s30 }
 0x884   :  { %6068 = vrot.lane.b32.xlu0 %v16788_v16, %s9039_s30 }
 0x885   :  { %v5898_v24 = vpop.permute.xlu1 %5897 }
 0x886   :  { %v5896_v11 = vpop.permute.xlu0 %5895  ;;  %v6630_v52 = vld [vmem:[#allocation5 + $0x1b0] sm:$0xff]  ;;  %6033 = vst.msk [vmem:[#allocation5 + $0x1c8] sm:$0xff] %vm5975_vm9, %v5898_v24  ;;  %v16815_v24 = vld [vmem:[#allocation23_spill] sm:$0xff] }
 0x887   :  { %6032 = vst.msk [vmem:[#allocation5 + $0x1c0] sm:$0xff] %vm5975_vm9, %v5896_v11  ;;  %8571 = vmatprep.mubr.msk.f32.mxu1 %vm6656_vm13, %v6630_v52  ;;  %6337 = vrot.lane.b32.xlu1 %v16789_v15, %s9040_s24  ;;  %v16816_v11 = vld [vmem:[#allocation27_spill] sm:$0xff] }
 0x888   :  { %6335 = vrot.lane.b32.xlu0 %v16790_v21, %s9040_s24  ;;  %v16817_v21 = vld [vmem:[#allocation28_spill] sm:$0xff] }
 0x889   :  { %v6167_v63 = vpop.permute.xlu1 %6166 }
 0x88a   :  { %v6165_v8 = vpop.permute.xlu0 %6164  ;;  %v6631_v20 = vld [vmem:[#allocation5 + $0x1b8] sm:$0xff]  ;;  %6302 = vst.msk [vmem:[#allocation5 + $0x1c8] sm:$0xff] %vm6244_vm10, %v6167_v63  ;;  %v16818_v63 = vld [vmem:[#allocation30_spill] sm:$0xff] }
 0x88b   :  { %6301 = vst.msk [vmem:[#allocation5 + $0x1c0] sm:$0xff] %vm6244_vm10, %v6165_v8  ;;  %8572 = vmatmul.mubr.msk.f32.gmra.mrb[20].mxu1 %vm6656_vm13, %v6631_v20  ;;  %5805 = vrot.lane.b32.xlu1 %v16791_v28, %s9038_s25  ;;  %v16819_v28 = vld [vmem:[#allocation150_spill] sm:$0xff] }
 0x88c   :  { %5803 = vrot.lane.b32.xlu0 %v16792_v33, %s9038_s25  ;;  %v16820_v33 = vld [vmem:[#allocation151_spill] sm:$0xff] }
 0x88d   :  { %v5639_v30 = vpop.permute.xlu1 %5638 }
 0x88e   :  { %v6432_v7 = vpop.permute.xlu0 %6431  ;;  %5773 = vst.msk [vmem:[#allocation5 + $0x1d0] sm:$0xff] %vm5714_vm8, %v5639_v30 }
 0x88f   :  { %6568 = vst.msk [vmem:[#allocation5 + $0x1c0] sm:$0xff] %vm6511_vm11, %v6432_v7  ;;  %6074 = vrot.lane.b32.xlu1 %v16793_v53, %s9039_s30 }
 0x890   :  { %6072 = vrot.lane.b32.xlu0 %v16794_v57, %s9039_s30 }
 0x891   :  { %v5641_v36 = vpop.permute.xlu1 %5640 }
 0x892   :  { %v6434_v13 = vpop.permute.xlu0 %6433  ;;  %5774 = vst.msk [vmem:[#allocation5 + $0x1d8] sm:$0xff] %vm5714_vm8, %v5641_v36  ;;  %v16821_v36 = vld [vmem:[#allocation31_spill] sm:$0xff] }
 0x893   :  { %6569 = vst.msk [vmem:[#allocation5 + $0x1c8] sm:$0xff] %vm6511_vm11, %v6434_v13  ;;  %6341 = vrot.lane.b32.xlu1 %v16795_v62, %s9040_s24  ;;  %v16822_v13 = vld [vmem:[#allocation39_spill] sm:$0xff]  ;;  %v8961_v62 = vld [vmem:[#allocation4] sm:$0xff] }
 0x894   :  { %6339 = vrot.lane.b32.xlu0 %v16796_v10, %s9040_s24 }
 0x895   :  { %v5902_v61 = vpop.permute.xlu1 %5901 }
 0x896   :  { %v5900_v3 = vpop.permute.xlu0 %5899  ;;  %v6632_v26 = vld [vmem:[#allocation5 + $0x1c0] sm:$0xff]  ;;  %6035 = vst.msk [vmem:[#allocation5 + $0x1d8] sm:$0xff] %vm5975_vm9, %v5902_v61 }
 0x897   :  { %6034 = vst.msk [vmem:[#allocation5 + $0x1d0] sm:$0xff] %vm5975_vm9, %v5900_v3  ;;  %8574 = vmatprep.mubr.msk.f32.mxu1 %vm6656_vm13, %v6632_v26  ;;  %5809 = vrot.lane.b32.xlu1 %v16797_v34, %s9038_s25  ;;  %v16823_v3 = vld [vmem:[#allocation40_spill] sm:$0xff]  ;;  %v16824_v26 = vld [vmem:[#allocation42_spill] sm:$0xff]  ;;  %v8962_v34 = vld [vmem:[#allocation4 + $0x8] sm:$0xff] }
 0x898   :  { %5807 = vrot.lane.b32.xlu0 %v16798_v39, %s9038_s25  ;;  %v8963_v39 = vld [vmem:[#allocation4 + $0x10] sm:$0xff] }
 0x899   :  { %v6171_v51 = vpop.permute.xlu1 %6170 }
 0x89a   :  { %v6169_v48 = vpop.permute.xlu0 %6168  ;;  %v6633_v54 = vld [vmem:[#allocation5 + $0x1c8] sm:$0xff]  ;;  %6304 = vst.msk [vmem:[#allocation5 + $0x1d8] sm:$0xff] %vm6244_vm10, %v6171_v51 }
 0x89b   :  { %6303 = vst.msk [vmem:[#allocation5 + $0x1d0] sm:$0xff] %vm6244_vm10, %v6169_v48  ;;  %8575 = vmatmul.mubr.msk.f32.gmra.mrb[22].mxu1 %vm6656_vm13, %v6633_v54  ;;  %6078 = vrot.lane.b32.xlu1 %v16799_v31, %s9039_s30  ;;  %v16825_v54 = vld [vmem:[#allocation153_spill] sm:$0xff] }
 0x89c   :  { %6076 = vrot.lane.b32.xlu0 %v16800_v43, %s9039_s30  ;;  %v8964_v31 = vld [vmem:[#allocation4 + $0x18] sm:$0xff]  ;;  %v8965_v43 = vld [vmem:[#allocation4 + $0x20] sm:$0xff] }
 0x89d   :  { %v5643_v47 = vpop.permute.xlu1 %5642 }
 0x89e   :  { %v6436_v42 = vpop.permute.xlu0 %6435  ;;  %5775 = vst.msk [vmem:[#allocation5 + $0x1e0] sm:$0xff] %vm5714_vm8, %v5643_v47 }
 0x89f   :  { %6570 = vst.msk [vmem:[#allocation5 + $0x1d0] sm:$0xff] %vm6511_vm11, %v6436_v42  ;;  %6345 = vrot.lane.b32.xlu1 %v16801_v46, %s9040_s24 }
 0x8a0   :  { %6343 = vrot.lane.b32.xlu0 %v16802_v5, %s9040_s24 }
 0x8a1   :  { %v5645_v19 = vpop.permute.xlu1 %5644 }
 0x8a2   :  { %v6438_v50 = vpop.permute.xlu0 %6437  ;;  %5776 = vst.msk [vmem:[#allocation5 + $0x1e8] sm:$0xff] %vm5714_vm8, %v5645_v19  ;;  %v16826_v19 = vld [vmem:[#allocation152_spill] sm:$0xff] }
 0x8a3   :  { %6571 = vst.msk [vmem:[#allocation5 + $0x1d8] sm:$0xff] %vm6511_vm11, %v6438_v50  ;;  %5813 = vrot.lane.b32.xlu1 %v16803_v35, %s9038_s25  ;;  %v8966_v50 = vld [vmem:[#allocation4 + $0x28] sm:$0xff]  ;;  %v8967_v35 = vld [vmem:[#allocation4 + $0x30] sm:$0xff] }
 0x8a4   :  { %5811 = vrot.lane.b32.xlu0 %v16804_v0, %s9038_s25 }
 0x8a5   :  { %v5906_v17 = vpop.permute.xlu1 %5905 }
 0x8a6   :  { %v5904_v18 = vpop.permute.xlu0 %5903  ;;  %v6634_v9 = vld [vmem:[#allocation5 + $0x1d0] sm:$0xff]  ;;  %6037 = vst.msk [vmem:[#allocation5 + $0x1e8] sm:$0xff] %vm5975_vm9, %v5906_v17 }
 0x8a7   :  { %6036 = vst.msk [vmem:[#allocation5 + $0x1e0] sm:$0xff] %vm5975_vm9, %v5904_v18  ;;  %8577 = vmatprep.mubr.msk.f32.mxu1 %vm6656_vm13, %v6634_v9  ;;  %6082 = vrot.lane.b32.xlu1 %v16805_v1, %s9039_s30  ;;  %v16827_v18 = vld [vmem:[#allocation43_spill] sm:$0xff]  ;;  %v16828_v9 = vld [vmem:[#allocation46_spill] sm:$0xff]  ;;  %v8968_v1 = vld [vmem:[#allocation4 + $0x38] sm:$0xff] }
 0x8a8   :  { %6080 = vrot.lane.b32.xlu0 %v16806_v44, %s9039_s30  ;;  %v8969_v44 = vld [vmem:[#allocation4 + $0x40] sm:$0xff] }
 0x8a9   :  { %v6175_v40 = vpop.permute.xlu1 %6174 }
 0x8aa   :  { %v6173_v41 = vpop.permute.xlu0 %6172  ;;  %v6635_v14 = vld [vmem:[#allocation5 + $0x1d8] sm:$0xff]  ;;  %6306 = vst.msk [vmem:[#allocation5 + $0x1e8] sm:$0xff] %vm6244_vm10, %v6175_v40 }
 0x8ab   :  { %6305 = vst.msk [vmem:[#allocation5 + $0x1e0] sm:$0xff] %vm6244_vm10, %v6173_v41  ;;  %8578 = vmatmul.mubr.msk.f32.gmra.mrb[24].mxu1 %vm6656_vm13, %v6635_v14  ;;  %6349 = vrot.lane.b32.xlu1 %v16807_v56, %s9040_s24  ;;  %v16829_v14 = vld [vmem:[#allocation47_spill] sm:$0xff]  ;;  %v16830_v56 = vld [vmem:[#allocation48_spill] sm:$0xff] }
 0x8ac   :  { %6347 = vrot.lane.b32.xlu0 %v16808_v60, %s9040_s24  ;;  %v8970_v60 = vld [vmem:[#allocation4 + $0x48] sm:$0xff] }
 0x8ad   :  { %v5647_v37 = vpop.permute.xlu1 %5646 }
 0x8ae   :  { %v6440_v4 = vpop.permute.xlu0 %6439  ;;  %5777 = vst.msk [vmem:[#allocation5 + $0x1f0] sm:$0xff] %vm5714_vm8, %v5647_v37  ;;  %v8971_v37 = vld [vmem:[#allocation4 + $0x50] sm:$0xff] }
 0x8af   :  { %6572 = vst.msk [vmem:[#allocation5 + $0x1e0] sm:$0xff] %vm6511_vm11, %v6440_v4  ;;  %5817 = vrot.lane.b32.xlu1 %v16809_v55, %s9038_s25 }
 0x8b0   :  { %5815 = vrot.lane.b32.xlu0 %v16810_v59, %s9038_s25 }
 0x8b1   :  { %v5649_v45 = vpop.permute.xlu1 %5648 }
 0x8b2   :  { %v6442_v6 = vpop.permute.xlu0 %6441  ;;  %5778 = vst.msk [vmem:[#allocation5 + $0x1f8] sm:$0xff] %vm5714_vm8, %v5649_v45 }
 0x8b3   :  { %6573 = vst.msk [vmem:[#allocation5 + $0x1e8] sm:$0xff] %vm6511_vm11, %v6442_v6  ;;  %6086 = vrot.lane.b32.xlu1 %v16811_v32, %s9039_s30  ;;  %v16831_v6 = vld [vmem:[#allocation155_spill] sm:$0xff]  ;;  %v8972_v32 = vld [vmem:[#allocation4 + $0x58] sm:$0xff] }
 0x8b4   :  { %6084 = vrot.lane.b32.xlu0 %v16812_v27, %s9039_s30  ;;  %v8973_v27 = vld [vmem:[#allocation4 + $0x60] sm:$0xff] }
 0x8b5   :  { %v5910_v12 = vpop.permute.xlu1 %5909 }
 0x8b6   :  { %v5908_v49 = vpop.permute.xlu0 %5907  ;;  %v6636_v38 = vld [vmem:[#allocation5 + $0x1e0] sm:$0xff]  ;;  %6039 = vst.msk [vmem:[#allocation5 + $0x1f8] sm:$0xff] %vm5975_vm9, %v5910_v12 }
 0x8b7   :  { %6038 = vst.msk [vmem:[#allocation5 + $0x1f0] sm:$0xff] %vm5975_vm9, %v5908_v49  ;;  %8580 = vmatprep.mubr.msk.f32.mxu1 %vm6656_vm13, %v6636_v38  ;;  %6353 = vrot.lane.b32.xlu1 %v16813_v23, %s9040_s24  ;;  %v16832_v38 = vld [vmem:[#allocation154_spill] sm:$0xff]  ;;  %v8974_v23 = vld [vmem:[#allocation4 + $0x68] sm:$0xff] }
 0x8b8   :  { %6351 = vrot.lane.b32.xlu0 %v16814_v25, %s9040_s24  ;;  %v8975_v25 = vld [vmem:[#allocation4 + $0x70] sm:$0xff] }
 0x8b9   :  { %v6179_v29 = vpop.permute.xlu1 %6178 }
 0x8ba   :  { %v6177_v22 = vpop.permute.xlu0 %6176  ;;  %v6637_v16 = vld [vmem:[#allocation5 + $0x1e8] sm:$0xff]  ;;  %6308 = vst.msk [vmem:[#allocation5 + $0x1f8] sm:$0xff] %vm6244_vm10, %v6179_v29 }
 0x8bb   :  { %6307 = vst.msk [vmem:[#allocation5 + $0x1f0] sm:$0xff] %vm6244_vm10, %v6177_v22  ;;  %8581 = vmatmul.mubr.msk.f32.gmra.mrb[26].mxu1 %vm6656_vm13, %v6637_v16  ;;  %5821 = vrot.lane.b32.xlu1 %v16815_v24, %s9038_s25  ;;  %v16833_v16 = vld [vmem:[#allocation49_spill] sm:$0xff]  ;;  %v16834_v24 = vld [vmem:[#allocation51_spill] sm:$0xff] }
 0x8bc   :  { %5819 = vrot.lane.b32.xlu0 %v16816_v11, %s9038_s25  ;;  %v8976_v11 = vld [vmem:[#allocation4 + $0x78] sm:$0xff] }
 0x8bd   :  { %v6446_v52 = vpop.permute.xlu1 %6445 }
 0x8be   :  { %v6444_v15 = vpop.permute.xlu0 %6443  ;;  %6575 = vst.msk [vmem:[#allocation5 + $0x1f8] sm:$0xff] %vm6511_vm11, %v6446_v52  ;;  %v8977_v52 = vld [vmem:[#allocation4 + $0x80] sm:$0xff] }
 0x8bf   :  { %6574 = vst.msk [vmem:[#allocation5 + $0x1f0] sm:$0xff] %vm6511_vm11, %v6444_v15  ;;  %6090 = vrot.lane.b32.xlu1 %v16817_v21, %s9039_s30 }
 0x8c0   :  { %6088 = vrot.lane.b32.xlu0 %v16818_v63, %s9039_s30 }
 0x8c1   :  { %v5786_v8 = vpop.permute.xlu1 %5785 }
 0x8c2   :  { %v5784_v20 = vpop.permute.xlu0 %5783  ;;  %5977 = vst.msk [vmem:[#allocation5 + $0x8] sm:$0xff] %vm5975_vm9, %v5786_v8 }
 0x8c3   :  { %5976 = vst.msk [vmem:[#allocation5] sm:$0xff] %vm5975_vm9, %v5784_v20  ;;  %6357 = vrot.lane.b32.xlu1 %v16819_v28, %s9040_s24  ;;  %v16835_v20 = vld [vmem:[#allocation52_spill] sm:$0xff]  ;;  %v16836_v28 = vld [vmem:[#allocation57_spill] sm:$0xff] }
 0x8c4   :  { %6355 = vrot.lane.b32.xlu0 %v16820_v33, %s9040_s24  ;;  %v8978_v33 = vld [vmem:[#allocation4 + $0x88] sm:$0xff] }
 0x8c5   :  { %v6055_v30 = vpop.permute.xlu1 %6054  ;;  %v6639_v57 = vld [vmem:[#allocation5 + $0x1f8] sm:$0xff] }
 0x8c6   :  { %v6053_v7 = vpop.permute.xlu0 %6052  ;;  %v6638_v53 = vld [vmem:[#allocation5 + $0x1f0] sm:$0xff]  ;;  %6246 = vst.msk [vmem:[#allocation5 + $0x8] sm:$0xff] %vm6244_vm10, %v6055_v30 }
 0x8c7   :  { %6245 = vst.msk [vmem:[#allocation5] sm:$0xff] %vm6244_vm10, %v6053_v7  ;;  %8583 = vmatprep.mubr.msk.f32.mxu1 %vm6656_vm13, %v6638_v53  ;;  %5825 = vrot.lane.b32.xlu1 %v16821_v36, %s9038_s25  ;;  %v8979_v30 = vld [vmem:[#allocation4 + $0x90] sm:$0xff]  ;;  %v8980_v36 = vld [vmem:[#allocation4 + $0x98] sm:$0xff] }
 0x8c8   :  { %5823 = vrot.lane.b32.xlu0 %v16822_v13, %s9038_s25  ;;  %8584 = vmatmul.mubr.msk.f32.gmra.mrb[28].mxu1 %vm6656_vm13, %v6639_v57  ;;  %v16837_v57 = vld [vmem:[#allocation157_spill] sm:$0xff]  ;;  %v8981_v13 = vld [vmem:[#allocation4 + $0xa0] sm:$0xff] }
 0x8c9   :  { %8596 = vmatprep.mubr.msk.f32.mxu1 %vm3169_vm15, %v8961_v62  ;;  %v6322_v10 = vpop.permute.xlu1 %6321 }
 0x8ca   :  { %v6320_v61 = vpop.permute.xlu0 %6319  ;;  %6513 = vst.msk [vmem:[#allocation5 + $0x8] sm:$0xff] %vm6511_vm11, %v6322_v10 }
 0x8cb   :  { %6512 = vst.msk [vmem:[#allocation5] sm:$0xff] %vm6511_vm11, %v6320_v61  ;;  %6094 = vrot.lane.b32.xlu1 %v16823_v3, %s9039_s30  ;;  %v16838_v61 = vld [vmem:[#allocation156_spill] sm:$0xff]  ;;  %v8982_v3 = vld [vmem:[#allocation4 + $0xa8] sm:$0xff] }
 0x8cc   :  { %6092 = vrot.lane.b32.xlu0 %v16824_v26, %s9039_s30  ;;  %8597 = vmatmul.mubr.msk.f32.vlgmr.msra.gmra.mrb[30].mxu1 %vm3169_vm15, %v8962_v34  ;;  %v8983_v26 = vld [vmem:[#allocation4 + $0xb0] sm:$0xff] }
 0x8cd   :  { %8599 = vmatprep.mubr.msk.f32.mxu1 %vm3169_vm15, %v8963_v39  ;;  %v5790_v51 = vpop.permute.xlu1 %5789 }
 0x8ce   :  { %v5788_v48 = vpop.permute.xlu0 %5787  ;;  %5979 = vst.msk [vmem:[#allocation5 + $0x18] sm:$0xff] %vm5975_vm9, %v5790_v51 }
 0x8cf   :  { %5978 = vst.msk [vmem:[#allocation5 + $0x10] sm:$0xff] %vm5975_vm9, %v5788_v48  ;;  %5566 = vrot.lane.b32.xlu1 %v16825_v54, %s9037_s2 }
 0x8d0   :  { %6359 = vrot.lane.b32.xlu0 %v16825_v54, %s9040_s24  ;;  %8600 = vmatmul.mubr.msk.f32.gmra.mrb[32].mxu1 %vm3169_vm15, %v8964_v31  ;;  %v16839_v54 = vld [vmem:[#allocation58_spill] sm:$0xff] }
 0x8d1   :  { %8602 = vmatprep.mubr.msk.f32.mxu1 %vm3169_vm15, %v8965_v43  ;;  %v6059_v47 = vpop.permute.xlu1 %6058  ;;  %v6577_v5 = vld [vmem:[#allocation5 + $0x8] sm:$0xff]  ;;  %v16840_v31 = vld [vmem:[#allocation66_spill] sm:$0xff]  ;;  %v8984_v43 = vld [vmem:[#allocation4 + $0xb8] sm:$0xff] }
 0x8d2   :  { %v6057_v42 = vpop.permute.xlu0 %6056  ;;  %v6576_v46 = vld [vmem:[#allocation5] sm:$0xff]  ;;  %6248 = vst.msk [vmem:[#allocation5 + $0x18] sm:$0xff] %vm6244_vm10, %v6059_v47 }
 0x8d3   :  { %6247 = vst.msk [vmem:[#allocation5 + $0x10] sm:$0xff] %vm6244_vm10, %v6057_v42  ;;  %8490 = vmatprep.mubr.msk.f32.mxu0 %vm6656_vm13, %v6576_v46  ;;  %5568 = vrot.lane.b32.xlu1 %v16826_v19, %s9037_s2  ;;  %v8985_v47 = vld [vmem:[#allocation4 + $0xc0] sm:$0xff] }
 0x8d4   :  { %6361 = vrot.lane.b32.xlu0 %v16826_v19, %s9040_s24  ;;  %8491 = vmatmul.mubr.msk.f32.vlgmr.msra.gmra.mrb[64].mxu0 %vm6656_vm13, %v6577_v5  ;;  %v16841_v5 = vld [vmem:[#allocation67_spill] sm:$0xff]  ;;  %v16842_v19 = vld [vmem:[#allocation69_spill] sm:$0xff] }
 0x8d5   :  { %8603 = vmatmul.mubr.msk.f32.gmra.mrb[34].mxu1 %vm3169_vm15, %v8966_v50  ;;  %v6326_v0 = vpop.permute.xlu1 %6325  ;;  %v8986_v50 = vld [vmem:[#allocation4 + $0xc8] sm:$0xff] }
 0x8d6   :  { %8605 = vmatprep.mubr.msk.f32.mxu1 %vm3169_vm15, %v8967_v35  ;;  %v6324_v17 = vpop.permute.xlu0 %6323  ;;  %6515 = vst.msk [vmem:[#allocation5 + $0x18] sm:$0xff] %vm6511_vm11, %v6326_v0  ;;  %v8987_v35 = vld [vmem:[#allocation4 + $0xd0] sm:$0xff] }
 0x8d7   :  { %6514 = vst.msk [vmem:[#allocation5 + $0x10] sm:$0xff] %vm6511_vm11, %v6324_v17  ;;  %5829 = vrot.lane.b32.xlu1 %v16827_v18, %s9038_s25  ;;  %v16843_v18 = vld [vmem:[#allocation159_spill] sm:$0xff] }
 0x8d8   :  { %5827 = vrot.lane.b32.xlu0 %v16828_v9, %s9038_s25  ;;  %v8988_v9 = vld [vmem:[#allocation4 + $0xd8] sm:$0xff] }
 0x8d9   :  { %8606 = vmatmul.mubr.msk.f32.gmra.mrb[36].mxu1 %vm3169_vm15, %v8968_v1  ;;  %v5794_v40 = vpop.permute.xlu1 %5793  ;;  %v8989_v1 = vld [vmem:[#allocation4 + $0xe0] sm:$0xff] }
 0x8da   :  { %8608 = vmatprep.mubr.msk.f32.mxu1 %vm3169_vm15, %v8969_v44  ;;  %v5792_v41 = vpop.permute.xlu0 %5791  ;;  %5981 = vst.msk [vmem:[#allocation5 + $0x28] sm:$0xff] %vm5975_vm9, %v5794_v40 }
 0x8db   :  { %5980 = vst.msk [vmem:[#allocation5 + $0x20] sm:$0xff] %vm5975_vm9, %v5792_v41  ;;  %6098 = vrot.lane.b32.xlu1 %v16829_v14, %s9039_s30 }
 0x8dc   :  { %6096 = vrot.lane.b32.xlu0 %v16830_v56, %s9039_s30  ;;  %v16844_v56 = vld [vmem:[#allocation158_spill] sm:$0xff] }
 0x8dd   :  { %8609 = vmatmul.mubr.msk.f32.gmra.mrb[38].mxu1 %vm3169_vm15, %v8970_v60  ;;  %v6063_v4 = vpop.permute.xlu1 %6062  ;;  %v6579_v45 = vld [vmem:[#allocation5 + $0x18] sm:$0xff]  ;;  %v8990_v60 = vld [vmem:[#allocation4 + $0xe8] sm:$0xff] }
 0x8de   :  { %8611 = vmatprep.mubr.msk.f32.mxu1 %vm3169_vm15, %v8971_v37  ;;  %v6061_v55 = vpop.permute.xlu0 %6060  ;;  %v6578_v59 = vld [vmem:[#allocation5 + $0x10] sm:$0xff]  ;;  %6250 = vst.msk [vmem:[#allocation5 + $0x28] sm:$0xff] %vm6244_vm10, %v6063_v4 }
 0x8df   :  { %6249 = vst.msk [vmem:[#allocation5 + $0x20] sm:$0xff] %vm6244_vm10, %v6061_v55  ;;  %8493 = vmatprep.mubr.msk.f32.mxu0 %vm6656_vm13, %v6578_v59  ;;  %5570 = vrot.lane.b32.xlu1 %v16831_v6, %s9037_s2  ;;  %v8991_v37 = vld [vmem:[#allocation4 + $0xf0] sm:$0xff]  ;;  %v8992_v59 = vld [vmem:[#allocation3 + $0x188] sm:$0xff] }
 0x8e0   :  { %6363 = vrot.lane.b32.xlu0 %v16831_v6, %s9040_s24  ;;  %8494 = vmatmul.mubr.msk.f32.gmra.mrb[66].mxu0 %vm6656_vm13, %v6579_v45  ;;  %v8993_v45 = vld [vmem:[#allocation3 + $0x180] sm:$0xff]  ;;  %v8994_v6 = vld [vmem:[#allocation4 + $0xf8] sm:$0xff] }
 0x8e1   :  { %8612 = vmatmul.mubr.msk.f32.gmra.mrb[40].mxu1 %vm3169_vm15, %v8972_v32  ;;  %v6330_v12 = vpop.permute.xlu1 %6329  ;;  %v8995_v32 = vld [vmem:[#allocation4 + $0x100] sm:$0xff] }
 0x8e2   :  { %8614 = vmatprep.mubr.msk.f32.mxu1 %vm3169_vm15, %v8973_v27  ;;  %v6328_v49 = vpop.permute.xlu0 %6327  ;;  %6517 = vst.msk [vmem:[#allocation5 + $0x28] sm:$0xff] %vm6511_vm11, %v6330_v12 }
 0x8e3   :  { %6516 = vst.msk [vmem:[#allocation5 + $0x20] sm:$0xff] %vm6511_vm11, %v6328_v49  ;;  %5572 = vrot.lane.b32.xlu1 %v16832_v38, %s9037_s2  ;;  %v5513_v49 = vrot.slane %v8992_v59, 2 }
 0x8e4   :  { %6365 = vrot.lane.b32.xlu0 %v16832_v38, %s9040_s24  ;;  %v5512_v38 = vrot.slane %v8993_v45, 2 }
 0x8e5   :  { %8615 = vmatmul.mubr.msk.f32.gmra.mrb[42].mxu1 %vm3169_vm15, %v8974_v23  ;;  %v5798_v29 = vpop.permute.xlu1 %5797  ;;  %v16845_v23 = vld [vmem:[#allocation128_spill] sm:$0xff] }
 0x8e6   :  { %8617 = vmatprep.mubr.msk.f32.mxu1 %vm3169_vm15, %v8975_v25  ;;  %v5796_v22 = vpop.permute.xlu0 %5795  ;;  %5983 = vst.msk [vmem:[#allocation5 + $0x38] sm:$0xff] %vm5975_vm9, %v5798_v29  ;;  %v16846_v25 = vld [vmem:[#allocation133_spill] sm:$0xff]  ;;  %v8996_v29 = vld [vmem:[#allocation4 + $0x108] sm:$0xff] }
 0x8e7   :  { %5982 = vst.msk [vmem:[#allocation5 + $0x30] sm:$0xff] %vm5975_vm9, %v5796_v22  ;;  %5833 = vrot.lane.b32.xlu1 %v16833_v16, %s9038_s25  ;;  %v8997_v22 = vld [vmem:[#allocation4 + $0x110] sm:$0xff] }
 0x8e8   :  { %5831 = vrot.lane.b32.xlu0 %v16834_v24, %s9038_s25 }
 0x8e9   :  { %8618 = vmatmul.mubr.msk.f32.gmra.mrb[44].mxu1 %vm3169_vm15, %v8976_v11  ;;  %v6067_v15 = vpop.permute.xlu1 %6066  ;;  %v6581_v8 = vld [vmem:[#allocation5 + $0x28] sm:$0xff] }
 0x8ea   :  { %8620 = vmatprep.mubr.msk.f32.mxu1 %vm3169_vm15, %v8977_v52  ;;  %v6065_v21 = vpop.permute.xlu0 %6064  ;;  %v6580_v63 = vld [vmem:[#allocation5 + $0x20] sm:$0xff]  ;;  %6252 = vst.msk [vmem:[#allocation5 + $0x38] sm:$0xff] %vm6244_vm10, %v6067_v15  ;;  %v5514_v15 = vsel %vm1017_vm4, %v5512_v38, %v5513_v49  ;;  %v16851_v38 = vld [vmem:[#allocation75_spill] sm:$0xff] }
 0x8eb   :  { %6251 = vst.msk [vmem:[#allocation5 + $0x30] sm:$0xff] %vm6244_vm10, %v6065_v21  ;;  %8496 = vmatprep.mubr.msk.f32.mxu0 %vm6656_vm13, %v6580_v63  ;;  %6102 = vrot.lane.b32.xlu1 %v16835_v20, %s9039_s30  ;;  %v8998_v21 = vld [vmem:[#allocation3 + $0x190] sm:$0x3]  ;;  %v9000_v20 = vld [vmem:[#allocation4 + $0x120] sm:$0xff] }
 0x8ec   :  { %6100 = vrot.lane.b32.xlu0 %v16836_v28, %s9039_s30  ;;  %8497 = vmatmul.mubr.msk.f32.gmra.mrb[68].mxu0 %vm6656_vm13, %v6581_v8  ;;  %v5515_v63 = vrot.slane %v8998_v21, 2  ;;  %v8999_v8 = vld [vmem:[#allocation4 + $0x118] sm:$0xff] }
 0x8ed   :  { %8621 = vmatmul.mubr.msk.f32.gmra.mrb[46].mxu1 %vm3169_vm15, %v8978_v33  ;;  %v6334_v7 = vpop.permute.xlu1 %6333 }
 0x8ee   :  { %8623 = vmatprep.mubr.msk.f32.mxu1 %vm3169_vm15, %v8979_v30  ;;  %v6332_v53 = vpop.permute.xlu0 %6331  ;;  %6519 = vst.msk [vmem:[#allocation5 + $0x38] sm:$0xff] %vm6511_vm11, %v6334_v7  ;;  %v3932_v30 = vld [vmem:[#allocation3 + $0x1a0] sm:$0xff]  ;;  %v3931_v7 = vld [vmem:[#allocation3 + $0x198] sm:$0xff] }
 0x8ef   :  { %6518 = vst.msk [vmem:[#allocation5 + $0x30] sm:$0xff] %vm6511_vm11, %v6332_v53  ;;  %5574 = vrot.lane.b32.xlu1 %v16837_v57, %s9037_s2  ;;  %v3933_v53 = vld [vmem:[#allocation3 + $0x1a8] sm:$0x3] }
 0x8f0   :  { %6367 = vrot.lane.b32.xlu0 %v16837_v57, %s9040_s24  ;;  %v5516_v57 = vsel %vm1017_vm4, %v5513_v49, %v5515_v63 }
 0x8f1   :  { %8624 = vmatmul.mubr.msk.f32.gmra.mrb[48].mxu1 %vm3169_vm15, %v8980_v36  ;;  %v5802_v62 = vpop.permute.xlu1 %5801  ;;  %v9001_v36 = vld [vmem:[#allocation4 + $0x128] sm:$0xff] }
 0x8f2   :  { %8626 = vmatprep.mubr.msk.f32.mxu1 %vm3169_vm15, %v8981_v13  ;;  %v5800_v10 = vpop.permute.xlu0 %5799  ;;  %5985 = vst.msk [vmem:[#allocation5 + $0x48] sm:$0xff] %vm5975_vm9, %v5802_v62  ;;  %v6043_v13 = vrot.slane %v3932_v30, 1  ;;  %v6042_v62 = vrot.slane %v3931_v7, 1 }
 0x8f3   :  { %5984 = vst.msk [vmem:[#allocation5 + $0x40] sm:$0xff] %vm5975_vm9, %v5800_v10  ;;  %5576 = vrot.lane.b32.xlu1 %v16838_v61, %s9037_s2  ;;  %v6045_v10 = vrot.slane %v3933_v53, 1 }
 0x8f4   :  { %6369 = vrot.lane.b32.xlu0 %v16838_v61, %s9040_s24  ;;  %v9002_v61 = vld [vmem:[#allocation4 + $0x130] sm:$0xff] }
 0x8f5   :  { %8627 = vmatmul.mubr.msk.f32.gmra.mrb[50].mxu1 %vm3169_vm15, %v8982_v3  ;;  %v6071_v34 = vpop.permute.xlu1 %6070  ;;  %v6583_v48 = vld [vmem:[#allocation5 + $0x38] sm:$0xff] }
 0x8f6   :  { %8629 = vmatprep.mubr.msk.f32.mxu1 %vm3169_vm15, %v8983_v26  ;;  %v6069_v39 = vpop.permute.xlu0 %6068  ;;  %v6582_v51 = vld [vmem:[#allocation5 + $0x30] sm:$0xff]  ;;  %6254 = vst.msk [vmem:[#allocation5 + $0x48] sm:$0xff] %vm6244_vm10, %v6071_v34  ;;  %v6310_v34 = vrot.slane %v3932_v30, 2 }
 0x8f7   :  { %6253 = vst.msk [vmem:[#allocation5 + $0x40] sm:$0xff] %vm6244_vm10, %v6069_v39  ;;  %8499 = vmatprep.mubr.msk.f32.mxu0 %vm6656_vm13, %v6582_v51  ;;  %5837 = vrot.lane.b32.xlu1 %v16839_v54, %s9038_s25  ;;  %v9003_v39 = vld [vmem:[#allocation4 + $0x138] sm:$0xff]  ;;  %v6309_v51 = vrot.slane %v3931_v7, 2  ;;  %v6044_v54 = vsel %vm599_vm3, %v6042_v62, %v6043_v13 }
 0x8f8   :  { %5835 = vrot.lane.b32.xlu0 %v16840_v31, %s9038_s25  ;;  %8500 = vmatmul.mubr.msk.f32.gmra.mrb[70].mxu0 %vm6656_vm13, %v6583_v48  ;;  %v6046_v48 = vsel %vm599_vm3, %v6043_v13, %v6045_v10  ;;  %v9004_v31 = vld [vmem:[#allocation4 + $0x140] sm:$0xff] }
 0x8f9   :  { %8630 = vmatmul.mubr.msk.f32.gmra.mrb[52].mxu1 %vm3169_vm15, %v8984_v43  ;;  %v6338_v42 = vpop.permute.xlu1 %6337 }
 0x8fa   :  { %8632 = vmatprep.mubr.msk.f32.mxu1 %vm3169_vm15, %v8985_v47  ;;  %v6336_v46 = vpop.permute.xlu0 %6335  ;;  %6521 = vst.msk [vmem:[#allocation5 + $0x48] sm:$0xff] %vm6511_vm11, %v6338_v42 }
 0x8fb   :  { %6520 = vst.msk [vmem:[#allocation5 + $0x40] sm:$0xff] %vm6511_vm11, %v6336_v46  ;;  %6106 = vrot.lane.b32.xlu1 %v16841_v5, %s9039_s30  ;;  %v9005_v5 = vld [vmem:[#allocation4 + $0x148] sm:$0xff] }
 0x8fc   :  { %6104 = vrot.lane.b32.xlu0 %v16842_v19, %s9039_s30  ;;  %v6311_v19 = vsel %vm1017_vm4, %v6309_v51, %v6310_v34  ;;  %v9026_v51 = vld [vmem:[#allocation4 + $0x1f0] sm:$0xff] }
 0x8fd   :  { %8633 = vmatmul.mubr.msk.f32.gmra.mrb[54].mxu1 %vm3169_vm15, %v8986_v50  ;;  %v5806_v0 = vpop.permute.xlu1 %5805  ;;  %v6312_v50 = vrot.slane %v3933_v53, 2  ;;  %v9021_v53 = vld [vmem:[#allocation4 + $0x1c8] sm:$0xff] }
 0x8fe   :  { %8635 = vmatprep.mubr.msk.f32.mxu1 %vm3169_vm15, %v8987_v35  ;;  %v5804_v17 = vpop.permute.xlu0 %5803  ;;  %5987 = vst.msk [vmem:[#allocation5 + $0x58] sm:$0xff] %vm5975_vm9, %v5806_v0  ;;  %v9006_v35 = vld [vmem:[#allocation4 + $0x150] sm:$0xff] }
 0x8ff   :  { %5986 = vst.msk [vmem:[#allocation5 + $0x50] sm:$0xff] %vm5975_vm9, %v5804_v17  ;;  %5578 = vrot.lane.b32.xlu1 %v16843_v18, %s9037_s2 }
 0x900   :  { %6371 = vrot.lane.b32.xlu0 %v16843_v18, %s9040_s24  ;;  %v16847_v18 = vld [vmem:[#allocation161_spill] sm:$0xff] }
 0x901   :  { %8636 = vmatmul.mubr.msk.f32.gmra.mrb[56].mxu1 %vm3169_vm15, %v8988_v9  ;;  %v6075_v44 = vpop.permute.xlu1 %6074  ;;  %v6585_v14 = vld [vmem:[#allocation5 + $0x48] sm:$0xff]  ;;  %v9007_v9 = vld [vmem:[#allocation4 + $0x158] sm:$0xff] }
 0x902   :  { %8638 = vmatprep.mubr.msk.f32.mxu1 %vm3169_vm15, %v8989_v1  ;;  %v6073_v40 = vpop.permute.xlu0 %6072  ;;  %v6584_v41 = vld [vmem:[#allocation5 + $0x40] sm:$0xff]  ;;  %6256 = vst.msk [vmem:[#allocation5 + $0x58] sm:$0xff] %vm6244_vm10, %v6075_v44  ;;  %v6313_v1 = vsel %vm1017_vm4, %v6310_v34, %v6312_v50 }
 0x903   :  { %6255 = vst.msk [vmem:[#allocation5 + $0x50] sm:$0xff] %vm6244_vm10, %v6073_v40  ;;  %8502 = vmatprep.mubr.msk.f32.mxu0 %vm6656_vm13, %v6584_v41  ;;  %5580 = vrot.lane.b32.xlu1 %v16844_v56, %s9037_s2  ;;  %v9008_v44 = vld [vmem:[#allocation4 + $0x160] sm:$0xff] }
 0x904   :  { %6373 = vrot.lane.b32.xlu0 %v16844_v56, %s9040_s24  ;;  %8503 = vmatmul.mubr.msk.f32.gmra.mrb[72].mxu0 %vm6656_vm13, %v6585_v14  ;;  %v16848_v14 = vld [vmem:[#allocation160_spill] sm:$0xff]  ;;  %v9009_v56 = vld [vmem:[#allocation4 + $0x168] sm:$0xff] }
 0x905   :  { %8639 = vmatmul.mubr.msk.f32.gmra.mrb[58].mxu1 %vm3169_vm15, %v8990_v60  ;;  %v6342_v4 = vpop.permute.xlu1 %6341  ;;  %v9010_v60 = vld [vmem:[#allocation4 + $0x170] sm:$0xff] }
 0x906   :  { %8641 = vmatprep.mubr.msk.f32.mxu1 %vm3169_vm15, %v8991_v37  ;;  %v6340_v55 = vpop.permute.xlu0 %6339  ;;  %6523 = vst.msk [vmem:[#allocation5 + $0x58] sm:$0xff] %vm6511_vm11, %v6342_v4 }
 0x907   :  { %6522 = vst.msk [vmem:[#allocation5 + $0x50] sm:$0xff] %vm6511_vm11, %v6340_v55  ;;  %5841 = vrot.lane.b32.xlu1 %v8992_v59, %s9038_s25 }
 0x908   :  { %5839 = vrot.lane.b32.xlu0 %v8993_v45, %s9038_s25  ;;  %v16849_v45 = vld [vmem:[#allocation73_spill] sm:$0xff] }
 0x909   :  { %8642 = vmatmul.mubr.msk.f32.gmra.mrb[60].mxu1 %vm3169_vm15, %v8994_v6  ;;  %v5810_v27 = vpop.permute.xlu1 %5809  ;;  %v16850_v6 = vld [vmem:[#allocation74_spill] sm:$0xff] }
 0x90a   :  { %8644 = vmatprep.mubr.msk.f32.mxu1 %vm3169_vm15, %v8995_v32  ;;  %v5808_v12 = vpop.permute.xlu0 %5807  ;;  %5989 = vst.msk [vmem:[#allocation5 + $0x68] sm:$0xff] %vm5975_vm9, %v5810_v27  ;;  %v9011_v32 = vld [vmem:[#allocation4 + $0x178] sm:$0xff]  ;;  %v9012_v27 = vld [vmem:[#allocation4 + $0x180] sm:$0xff] }
 0x90b   :  { %5988 = vst.msk [vmem:[#allocation5 + $0x60] sm:$0xff] %vm5975_vm9, %v5808_v12  ;;  %6110 = vrot.lane.b32.xlu1 %v16845_v23, %s9039_s30  ;;  %v16852_v23 = vld [vmem:[#allocation11_spill] sm:$0xff] }
 0x90c   :  { %6108 = vrot.lane.b32.xlu0 %v16846_v25, %s9039_s30  ;;  %v9013_v25 = vld [vmem:[#allocation4 + $0x188] sm:$0xff] }
 0x90d   :  { %8645 = vmatmul.mubr.msk.f32.gmra.mrb[62].mxu1 %vm3169_vm15, %v8996_v29  ;;  %v6079_v16 = vpop.permute.xlu1 %6078  ;;  %v6587_v52 = vld [vmem:[#allocation5 + $0x58] sm:$0xff]  ;;  %v9014_v29 = vld [vmem:[#allocation4 + $0x190] sm:$0xff] }
 0x90e   :  { %8647 = vmatprep.mubr.msk.f32.mxu1 %vm3169_vm15, %v8997_v22  ;;  %v6077_v24 = vpop.permute.xlu0 %6076  ;;  %v6586_v11 = vld [vmem:[#allocation5 + $0x50] sm:$0xff]  ;;  %6258 = vst.msk [vmem:[#allocation5 + $0x68] sm:$0xff] %vm6244_vm10, %v6079_v16 }
 0x90f   :  { %6257 = vst.msk [vmem:[#allocation5 + $0x60] sm:$0xff] %vm6244_vm10, %v6077_v24  ;;  %8505 = vmatprep.mubr.msk.f32.mxu0 %vm6656_vm13, %v6586_v11  ;;  %5582 = vrot.lane.b32.xlu1 %v5514_v15, %s9037_s2  ;;  %v9015_v24 = vld [vmem:[#allocation4 + $0x198] sm:$0xff]  ;;  %v9016_v11 = vld [vmem:[#allocation4 + $0x1a0] sm:$0xff] }
 0x910   :  { %6375 = vrot.lane.b32.xlu0 %v5514_v15, %s9040_s24  ;;  %8506 = vmatmul.mubr.msk.f32.gmra.mrb[74].mxu0 %vm6656_vm13, %v6587_v52 }
 0x911   :  { %8648 = vmatmul.mubr.msk.f32.gmra.mrb[0].mxu1 %vm3169_vm15, %v8999_v8  ;;  %v6346_v28 = vpop.permute.xlu1 %6345 }
 0x912   :  { %8650 = vmatprep.mubr.msk.f32.mxu1 %vm3169_vm15, %v9000_v20  ;;  %v6344_v33 = vpop.permute.xlu0 %6343  ;;  %6525 = vst.msk [vmem:[#allocation5 + $0x68] sm:$0xff] %vm6511_vm11, %v6346_v28  ;;  %v9019_v28 = vld [vmem:[#allocation4 + $0x1b8] sm:$0xff] }
 0x913   :  { %6524 = vst.msk [vmem:[#allocation5 + $0x60] sm:$0xff] %vm6511_vm11, %v6344_v33  ;;  %5584 = vrot.lane.b32.xlu1 %v5516_v57, %s9037_s2  ;;  %v9020_v33 = vld [vmem:[#allocation4 + $0x1c0] sm:$0xff] }
 0x914   :  { %6377 = vrot.lane.b32.xlu0 %v5516_v57, %s9040_s24  ;;  %v9022_v57 = vld [vmem:[#allocation4 + $0x1d0] sm:$0xff] }
 0x915   :  { %8651 = vmatmul.mubr.msk.f32.gmra.mrb[2].mxu1 %vm3169_vm15, %v9001_v36  ;;  %v5814_v3 = vpop.permute.xlu1 %5813 }
 0x916   :  { %8653 = vmatprep.mubr.msk.f32.mxu1 %vm3169_vm15, %v9002_v61  ;;  %v5812_v26 = vpop.permute.xlu0 %5811  ;;  %5991 = vst.msk [vmem:[#allocation5 + $0x78] sm:$0xff] %vm5975_vm9, %v5814_v3  ;;  %v9023_v61 = vld [vmem:[#allocation4 + $0x1d8] sm:$0xff]  ;;  %v9024_v3 = vld [vmem:[#allocation4 + $0x1e0] sm:$0xff] }
 0x917   :  { %5990 = vst.msk [vmem:[#allocation5 + $0x70] sm:$0xff] %vm5975_vm9, %v5812_v26  ;;  %5845 = vrot.lane.b32.xlu1 %v3932_v30, %s9038_s25 }
 0x918   :  { %5843 = vrot.lane.b32.xlu0 %v3931_v7, %s9038_s25 }
 0x919   :  { %8654 = vmatmul.mubr.msk.f32.gmra.mrb[4].mxu1 %vm3169_vm15, %v9003_v39  ;;  %v6083_v43 = vpop.permute.xlu1 %6082  ;;  %v6589_v46 = vld [vmem:[#allocation5 + $0x68] sm:$0xff] }
 0x91a   :  { %8656 = vmatprep.mubr.msk.f32.mxu1 %vm3169_vm15, %v9004_v31  ;;  %v6081_v47 = vpop.permute.xlu0 %6080  ;;  %v6588_v42 = vld [vmem:[#allocation5 + $0x60] sm:$0xff]  ;;  %6260 = vst.msk [vmem:[#allocation5 + $0x78] sm:$0xff] %vm6244_vm10, %v6083_v43  ;;  %v9025_v39 = vld [vmem:[#allocation4 + $0x1e8] sm:$0xff]  ;;  %v9027_v31 = vld [vmem:[#allocation4 + $0x1f8] sm:$0xff] }
 0x91b   :  { %6259 = vst.msk [vmem:[#allocation5 + $0x70] sm:$0xff] %vm6244_vm10, %v6081_v47  ;;  %8508 = vmatprep.mubr.msk.f32.mxu0 %vm6656_vm13, %v6588_v42  ;;  %6114 = vrot.lane.b32.xlu1 %v6046_v48, %s9039_s30 }
 0x91c   :  { %6112 = vrot.lane.b32.xlu0 %v6044_v54, %s9039_s30  ;;  %8509 = vmatmul.mubr.msk.f32.gmra.mrb[76].mxu0 %vm6656_vm13, %v6589_v46 }
 0x91d   :  { %8657 = vmatmul.mubr.msk.f32.gmra.mrb[6].mxu1 %vm3169_vm15, %v9005_v5  ;;  %v6350_v0 = vpop.permute.xlu1 %6349 }
 0x91e   :  { %8659 = vmatprep.mubr.msk.f32.mxu1 %vm3169_vm15, %v9006_v35  ;;  %v6348_v17 = vpop.permute.xlu0 %6347  ;;  %6527 = vst.msk [vmem:[#allocation5 + $0x78] sm:$0xff] %vm6511_vm11, %v6350_v0 }
 0x91f   :  { %6526 = vst.msk [vmem:[#allocation5 + $0x70] sm:$0xff] %vm6511_vm11, %v6348_v17  ;;  %5586 = vrot.lane.b32.xlu1 %v16847_v18, %s9037_s2 }
 0x920   :  { %6379 = vrot.lane.b32.xlu0 %v6311_v19, %s9040_s24 }
 0x921   :  { %8660 = vmatmul.mubr.msk.f32.gmra.mrb[8].mxu1 %vm3169_vm15, %v9007_v9  ;;  %v5818_v40 = vpop.permute.xlu1 %5817 }
 0x922   :  { %8662 = vmatprep.mubr.msk.f32.mxu1 %vm3169_vm15, %v9008_v44  ;;  %v5816_v41 = vpop.permute.xlu0 %5815  ;;  %5993 = vst.msk [vmem:[#allocation5 + $0x88] sm:$0xff] %vm5975_vm9, %v5818_v40 }
 0x923   :  { %5992 = vst.msk [vmem:[#allocation5 + $0x80] sm:$0xff] %vm5975_vm9, %v5816_v41  ;;  %5588 = vrot.lane.b32.xlu1 %v16848_v14, %s9037_s2 }
 0x924   :  { %6381 = vrot.lane.b32.xlu0 %v6313_v1, %s9040_s24 }
 0x925   :  { %8663 = vmatmul.mubr.msk.f32.gmra.mrb[10].mxu1 %vm3169_vm15, %v9009_v56  ;;  %v6087_v37 = vpop.permute.xlu1 %6086  ;;  %v6591_v59 = vld [vmem:[#allocation5 + $0x78] sm:$0xff] }
 0x926   :  { %8665 = vmatprep.mubr.msk.f32.mxu1 %vm3169_vm15, %v9010_v60  ;;  %v6085_v4 = vpop.permute.xlu0 %6084  ;;  %v6590_v55 = vld [vmem:[#allocation5 + $0x70] sm:$0xff]  ;;  %6262 = vst.msk [vmem:[#allocation5 + $0x88] sm:$0xff] %vm6244_vm10, %v6087_v37 }
 0x927   :  { %6261 = vst.msk [vmem:[#allocation5 + $0x80] sm:$0xff] %vm6244_vm10, %v6085_v4  ;;  %8511 = vmatprep.mubr.msk.f32.mxu0 %vm6656_vm13, %v6590_v55  ;;  %5849 = vrot.lane.b32.xlu1 %v16849_v45, %s9038_s25 }
 0x928   :  { %5847 = vrot.lane.b32.xlu0 %v16850_v6, %s9038_s25  ;;  %8512 = vmatmul.mubr.msk.f32.gmra.mrb[78].mxu0 %vm6656_vm13, %v6591_v59 }
 0x929   :  { %8666 = vmatmul.mubr.msk.f32.gmra.mrb[12].mxu1 %vm3169_vm15, %v9011_v32  ;;  %v6354_v12 = vpop.permute.xlu1 %6353 }
 0x92a   :  { %8668 = vmatprep.mubr.msk.f32.mxu1 %vm3169_vm15, %v9012_v27  ;;  %v6352_v49 = vpop.permute.xlu0 %6351  ;;  %6529 = vst.msk [vmem:[#allocation5 + $0x88] sm:$0xff] %vm6511_vm11, %v6354_v12 }
 0x92b   :  { %6528 = vst.msk [vmem:[#allocation5 + $0x80] sm:$0xff] %vm6511_vm11, %v6352_v49  ;;  %6118 = vrot.lane.b32.xlu1 %v16851_v38, %s9039_s30 }
 0x92c   :  { %6116 = vrot.lane.b32.xlu0 %v16852_v23, %s9039_s30 }
 0x92d   :  { %8669 = vmatmul.mubr.msk.f32.gmra.mrb[14].mxu1 %vm3169_vm15, %v9013_v25  ;;  %v5822_v22 = vpop.permute.xlu1 %5821 }
 0x92e   :  { %8671 = vmatprep.mubr.msk.f32.mxu1 %vm3169_vm15, %v9014_v29  ;;  %v5820_v16 = vpop.permute.xlu0 %5819  ;;  %5995 = vst.msk [vmem:[#allocation5 + $0x98] sm:$0xff] %vm5975_vm9, %v5822_v22 }
 0x92f   :  { %5994 = vst.msk [vmem:[#allocation5 + $0x90] sm:$0xff] %vm5975_vm9, %v5820_v16  ;;  %6385 = vrot.lane.b32.xlu1 %v16733_v2, %s9040_s24  ;;  %v9017_v2 = vld [vmem:[#allocation4 + $0x1a8] sm:$0xff] }
 0x930   :  { %6383 = vrot.lane.b32.xlu0 %v16734_v58, %s9040_s24  ;;  %v9018_v58 = vld [vmem:[#allocation4 + $0x1b0] sm:$0xff] }
 0x931   :  { %8672 = vmatmul.mubr.msk.f32.gmra.mrb[16].mxu1 %vm3169_vm15, %v9015_v24  ;;  %v6091_v52 = vpop.permute.xlu1 %6090  ;;  %v6593_v63 = vld [vmem:[#allocation5 + $0x88] sm:$0xff] }
 0x932   :  { %8674 = vmatprep.mubr.msk.f32.mxu1 %vm3169_vm15, %v9016_v11  ;;  %v6089_v15 = vpop.permute.xlu0 %6088  ;;  %v6592_v21 = vld [vmem:[#allocation5 + $0x80] sm:$0xff]  ;;  %6264 = vst.msk [vmem:[#allocation5 + $0x98] sm:$0xff] %vm6244_vm10, %v6091_v52 }
 0x933   :  { %6263 = vst.msk [vmem:[#allocation5 + $0x90] sm:$0xff] %vm6244_vm10, %v6089_v15  ;;  %8514 = vmatprep.mubr.msk.f32.mxu0 %vm6656_vm13, %v6592_v21 }
 0x934   :  { %8515 = vmatmul.mubr.msk.f32.gmra.mrb[80].mxu0 %vm6656_vm13, %v6593_v63 }
 0x935   :  { %8675 = vmatmul.mubr.msk.f32.gmra.mrb[18].mxu1 %vm3169_vm15, %v9017_v2  ;;  %v6358_v8 = vpop.permute.xlu1 %6357 }
 0x936   :  { %8677 = vmatprep.mubr.msk.f32.mxu1 %vm3169_vm15, %v9018_v58  ;;  %v6356_v20 = vpop.permute.xlu0 %6355  ;;  %6531 = vst.msk [vmem:[#allocation5 + $0x98] sm:$0xff] %vm6511_vm11, %v6358_v8 }
 0x937   :  { %6530 = vst.msk [vmem:[#allocation5 + $0x90] sm:$0xff] %vm6511_vm11, %v6356_v20 }
 0x939   :  { %8678 = vmatmul.mubr.msk.f32.gmra.mrb[20].mxu1 %vm3169_vm15, %v9019_v28  ;;  %v5826_v30 = vpop.permute.xlu1 %5825 }
 0x93a   :  { %8680 = vmatprep.mubr.msk.f32.mxu1 %vm3169_vm15, %v9020_v33  ;;  %v5824_v7 = vpop.permute.xlu0 %5823  ;;  %5997 = vst.msk [vmem:[#allocation5 + $0xa8] sm:$0xff] %vm5975_vm9, %v5826_v30 }
 0x93b   :  { %5996 = vst.msk [vmem:[#allocation5 + $0xa0] sm:$0xff] %vm5975_vm9, %v5824_v7 }
 0x93d   :  { %8681 = vmatmul.mubr.msk.f32.gmra.mrb[22].mxu1 %vm3169_vm15, %v9021_v53  ;;  %v6095_v36 = vpop.permute.xlu1 %6094  ;;  %v6595_v10 = vld [vmem:[#allocation5 + $0x98] sm:$0xff] }
 0x93e   :  { %8683 = vmatprep.mubr.msk.f32.mxu1 %vm3169_vm15, %v9022_v57  ;;  %v6093_v13 = vpop.permute.xlu0 %6092  ;;  %v6594_v62 = vld [vmem:[#allocation5 + $0x90] sm:$0xff]  ;;  %6266 = vst.msk [vmem:[#allocation5 + $0xa8] sm:$0xff] %vm6244_vm10, %v6095_v36 }
 0x93f   :  { %6265 = vst.msk [vmem:[#allocation5 + $0xa0] sm:$0xff] %vm6244_vm10, %v6093_v13  ;;  %8517 = vmatprep.mubr.msk.f32.mxu0 %vm6656_vm13, %v6594_v62 }
 0x940   :  { %8518 = vmatmul.mubr.msk.f32.gmra.mrb[82].mxu0 %vm6656_vm13, %v6595_v10 }
 0x941   :  { %8684 = vmatmul.mubr.msk.f32.gmra.mrb[24].mxu1 %vm3169_vm15, %v9023_v61  ;;  %v5567_v26 = vpop.permute.xlu1 %5566 }
 0x942   :  { %8686 = vmatprep.mubr.msk.f32.mxu1 %vm3169_vm15, %v9024_v3  ;;  %v6360_v34 = vpop.permute.xlu0 %6359  ;;  %5737 = vst.msk [vmem:[#allocation5 + $0xb0] sm:$0xff] %vm5714_vm8, %v5567_v26 }
 0x943   :  { %6532 = vst.msk [vmem:[#allocation5 + $0xa0] sm:$0xff] %vm6511_vm11, %v6360_v34 }
 0x945   :  { %8687 = vmatmul.mubr.msk.f32.gmra.mrb[26].mxu1 %vm3169_vm15, %v9025_v39  ;;  %v5569_v48 = vpop.permute.xlu1 %5568 }
 0x946   :  { %8689 = vmatprep.mubr.msk.f32.mxu1 %vm3169_vm15, %v9026_v51  ;;  %v6362_v54 = vpop.permute.xlu0 %6361  ;;  %5738 = vst.msk [vmem:[#allocation5 + $0xb8] sm:$0xff] %vm5714_vm8, %v5569_v48 }
 0x947   :  { %6533 = vst.msk [vmem:[#allocation5 + $0xa8] sm:$0xff] %vm6511_vm11, %v6362_v54  ;;  %v14921_v54 = vld [vmem:[%s15365_s4] ss:$0 sm:$0xff] }
 0x949   :  { %8690 = vmatmul.mubr.msk.f32.gmra.mrb[28].mxu1 %vm3169_vm15, %v9027_v31  ;;  %v5830_v43 = vpop.permute.xlu1 %5829 }
 0x94a   :  { %v5828_v47 = vpop.permute.xlu0 %5827  ;;  %v6596_v42 = vld [vmem:[#allocation5 + $0xa0] sm:$0xff]  ;;  %5999 = vst.msk [vmem:[#allocation5 + $0xb8] sm:$0xff] %vm5975_vm9, %v5830_v43 }
 0x94b   :  { %5998 = vst.msk [vmem:[#allocation5 + $0xb0] sm:$0xff] %vm5975_vm9, %v5828_v47  ;;  %8520 = vmatprep.mubr.msk.f32.mxu0 %vm6656_vm13, %v6596_v42 }
 0x94d   :  { %v6099_v46 = vpop.permute.xlu1 %6098 }
 0x94e   :  { %v6097_v5 = vpop.permute.xlu0 %6096  ;;  %v6597_v19 = vld [vmem:[#allocation5 + $0xa8] sm:$0xff]  ;;  %6268 = vst.msk [vmem:[#allocation5 + $0xb8] sm:$0xff] %vm6244_vm10, %v6099_v46 }
 0x94f   :  { %6267 = vst.msk [vmem:[#allocation5 + $0xb0] sm:$0xff] %vm6244_vm10, %v6097_v5  ;;  %8521 = vmatmul.mubr.msk.f32.gmra.mrb[84].mxu0 %vm6656_vm13, %v6597_v19  ;;  %v14927_v5 = vld [vmem:[%s15366_s6] ss:$0 sm:$0xff] }
 0x951   :  { %v5571_v50 = vpop.permute.xlu1 %5570 }
 0x952   :  { %v6364_v35 = vpop.permute.xlu0 %6363  ;;  %5739 = vst.msk [vmem:[#allocation5 + $0xc0] sm:$0xff] %vm5714_vm8, %v5571_v50 }
 0x953   :  { %6534 = vst.msk [vmem:[#allocation5 + $0xb0] sm:$0xff] %vm6511_vm11, %v6364_v35 }
 0x955   :  { %v5573_v0 = vpop.permute.xlu1 %5572 }
 0x956   :  { %v6366_v17 = vpop.permute.xlu0 %6365  ;;  %5740 = vst.msk [vmem:[#allocation5 + $0xc8] sm:$0xff] %vm5714_vm8, %v5573_v0 }
 0x957   :  { %6535 = vst.msk [vmem:[#allocation5 + $0xb8] sm:$0xff] %vm6511_vm11, %v6366_v17 }
 0x959   :  { %v5834_v18 = vpop.permute.xlu1 %5833 }
 0x95a   :  { %v5832_v9 = vpop.permute.xlu0 %5831  ;;  %v6598_v1 = vld [vmem:[#allocation5 + $0xb0] sm:$0xff]  ;;  %6001 = vst.msk [vmem:[#allocation5 + $0xc8] sm:$0xff] %vm5975_vm9, %v5834_v18 }
 0x95b   :  { %6000 = vst.msk [vmem:[#allocation5 + $0xc0] sm:$0xff] %vm5975_vm9, %v5832_v9  ;;  %8523 = vmatprep.mubr.msk.f32.mxu0 %vm6656_vm13, %v6598_v1 }
 0x95d   :  { %v6103_v44 = vpop.permute.xlu1 %6102 }
 0x95e   :  { %v6101_v40 = vpop.permute.xlu0 %6100  ;;  %v6599_v41 = vld [vmem:[#allocation5 + $0xb8] sm:$0xff]  ;;  %6270 = vst.msk [vmem:[#allocation5 + $0xc8] sm:$0xff] %vm6244_vm10, %v6103_v44 }
 0x95f   :  { %6269 = vst.msk [vmem:[#allocation5 + $0xc0] sm:$0xff] %vm6244_vm10, %v6101_v40  ;;  %8524 = vmatmul.mubr.msk.f32.gmra.mrb[86].mxu0 %vm6656_vm13, %v6599_v41 }
 0x961   :  { %v5575_v14 = vpop.permute.xlu1 %5574 }
 0x962   :  { %v6368_v56 = vpop.permute.xlu0 %6367  ;;  %5741 = vst.msk [vmem:[#allocation5 + $0xd0] sm:$0xff] %vm5714_vm8, %v5575_v14 }
 0x963   :  { %6536 = vst.msk [vmem:[#allocation5 + $0xc0] sm:$0xff] %vm6511_vm11, %v6368_v56 }
 0x965   :  { %v5577_v60 = vpop.permute.xlu1 %5576 }
 0x966   :  { %v6370_v37 = vpop.permute.xlu0 %6369  ;;  %5742 = vst.msk [vmem:[#allocation5 + $0xd8] sm:$0xff] %vm5714_vm8, %v5577_v60 }
 0x967   :  { %6537 = vst.msk [vmem:[#allocation5 + $0xc8] sm:$0xff] %vm6511_vm11, %v6370_v37 }
 0x969   :  { %v5838_v4 = vpop.permute.xlu1 %5837 }
 0x96a   :  { %v5836_v55 = vpop.permute.xlu0 %5835  ;;  %v6600_v59 = vld [vmem:[#allocation5 + $0xc0] sm:$0xff]  ;;  %6003 = vst.msk [vmem:[#allocation5 + $0xd8] sm:$0xff] %vm5975_vm9, %v5838_v4 }
 0x96b   :  { %6002 = vst.msk [vmem:[#allocation5 + $0xd0] sm:$0xff] %vm5975_vm9, %v5836_v55  ;;  %8526 = vmatprep.mubr.msk.f32.mxu0 %vm6656_vm13, %v6600_v59 }
 0x96d   :  { %v6107_v45 = vpop.permute.xlu1 %6106 }
 0x96e   :  { %v6105_v6 = vpop.permute.xlu0 %6104  ;;  %v6601_v32 = vld [vmem:[#allocation5 + $0xc8] sm:$0xff]  ;;  %6272 = vst.msk [vmem:[#allocation5 + $0xd8] sm:$0xff] %vm6244_vm10, %v6107_v45 }
 0x96f   :  { %6271 = vst.msk [vmem:[#allocation5 + $0xd0] sm:$0xff] %vm6244_vm10, %v6105_v6  ;;  %8527 = vmatmul.mubr.msk.f32.gmra.mrb[88].mxu0 %vm6656_vm13, %v6601_v32 }
 0x971   :  { %v5579_v27 = vpop.permute.xlu1 %5578 }
 0x972   :  { %v6372_v12 = vpop.permute.xlu0 %6371  ;;  %5743 = vst.msk [vmem:[#allocation5 + $0xe0] sm:$0xff] %vm5714_vm8, %v5579_v27 }
 0x973   :  { %6538 = vst.msk [vmem:[#allocation5 + $0xd0] sm:$0xff] %vm6511_vm11, %v6372_v12 }
 0x975   :  { %v5581_v49 = vpop.permute.xlu1 %5580 }
 0x976   :  { %v6374_v38 = vpop.permute.xlu0 %6373  ;;  %5744 = vst.msk [vmem:[#allocation5 + $0xe8] sm:$0xff] %vm5714_vm8, %v5581_v49 }
 0x977   :  { %6539 = vst.msk [vmem:[#allocation5 + $0xd8] sm:$0xff] %vm6511_vm11, %v6374_v38 }
 0x979   :  { %v5842_v23 = vpop.permute.xlu1 %5841 }
 0x97a   :  { %v5840_v25 = vpop.permute.xlu0 %5839  ;;  %v6602_v29 = vld [vmem:[#allocation5 + $0xd0] sm:$0xff]  ;;  %6005 = vst.msk [vmem:[#allocation5 + $0xe8] sm:$0xff] %vm5975_vm9, %v5842_v23 }
 0x97b   :  { %6004 = vst.msk [vmem:[#allocation5 + $0xe0] sm:$0xff] %vm5975_vm9, %v5840_v25  ;;  %8529 = vmatprep.mubr.msk.f32.mxu0 %vm6656_vm13, %v6602_v29 }
 0x97d   :  { %v6111_v22 = vpop.permute.xlu1 %6110 }
 0x97e   :  { %v6109_v16 = vpop.permute.xlu0 %6108  ;;  %v6603_v24 = vld [vmem:[#allocation5 + $0xd8] sm:$0xff]  ;;  %6274 = vst.msk [vmem:[#allocation5 + $0xe8] sm:$0xff] %vm6244_vm10, %v6111_v22 }
 0x97f   :  { %6273 = vst.msk [vmem:[#allocation5 + $0xe0] sm:$0xff] %vm6244_vm10, %v6109_v16  ;;  %8530 = vmatmul.mubr.msk.f32.gmra.mrb[90].mxu0 %vm6656_vm13, %v6603_v24 }
 0x981   :  { %v5583_v11 = vpop.permute.xlu1 %5582 }
 0x982   :  { %v6376_v52 = vpop.permute.xlu0 %6375  ;;  %5745 = vst.msk [vmem:[#allocation5 + $0xf0] sm:$0xff] %vm5714_vm8, %v5583_v11 }
 0x983   :  { %6540 = vst.msk [vmem:[#allocation5 + $0xe0] sm:$0xff] %vm6511_vm11, %v6376_v52 }
 0x985   :  { %v5585_v15 = vpop.permute.xlu1 %5584 }
 0x986   :  { %v6378_v21 = vpop.permute.xlu0 %6377  ;;  %5746 = vst.msk [vmem:[#allocation5 + $0xf8] sm:$0xff] %vm5714_vm8, %v5585_v15 }
 0x987   :  { %6541 = vst.msk [vmem:[#allocation5 + $0xe8] sm:$0xff] %vm6511_vm11, %v6378_v21 }
 0x989   :  { %v5846_v63 = vpop.permute.xlu1 %5845 }
 0x98a   :  { %v5844_v2 = vpop.permute.xlu0 %5843  ;;  %v6604_v58 = vld [vmem:[#allocation5 + $0xe0] sm:$0xff]  ;;  %6007 = vst.msk [vmem:[#allocation5 + $0xf8] sm:$0xff] %vm5975_vm9, %v5846_v63 }
 0x98b   :  { %6006 = vst.msk [vmem:[#allocation5 + $0xf0] sm:$0xff] %vm5975_vm9, %v5844_v2  ;;  %8532 = vmatprep.mubr.msk.f32.mxu0 %vm6656_vm13, %v6604_v58 }
 0x98d   :  { %v6115_v8 = vpop.permute.xlu1 %6114 }
 0x98e   :  { %v6113_v20 = vpop.permute.xlu0 %6112  ;;  %v6605_v28 = vld [vmem:[#allocation5 + $0xe8] sm:$0xff]  ;;  %6276 = vst.msk [vmem:[#allocation5 + $0xf8] sm:$0xff] %vm6244_vm10, %v6115_v8 }
 0x98f   :  { %6275 = vst.msk [vmem:[#allocation5 + $0xf0] sm:$0xff] %vm6244_vm10, %v6113_v20  ;;  %8533 = vmatmul.mubr.msk.f32.gmra.mrb[92].mxu0 %vm6656_vm13, %v6605_v28 }
 0x991   :  { %v5587_v33 = vpop.permute.xlu1 %5586 }
 0x992   :  { %v6380_v30 = vpop.permute.xlu0 %6379  ;;  %5747 = vst.msk [vmem:[#allocation5 + $0x100] sm:$0xff] %vm5714_vm8, %v5587_v33 }
 0x993   :  { %6542 = vst.msk [vmem:[#allocation5 + $0xf0] sm:$0xff] %vm6511_vm11, %v6380_v30 }
 0x995   :  { %v5589_v7 = vpop.permute.xlu1 %5588 }
 0x996   :  { %v6382_v53 = vpop.permute.xlu0 %6381  ;;  %5748 = vst.msk [vmem:[#allocation5 + $0x108] sm:$0xff] %vm5714_vm8, %v5589_v7 }
 0x997   :  { %6543 = vst.msk [vmem:[#allocation5 + $0xf8] sm:$0xff] %vm6511_vm11, %v6382_v53 }
 0x999   :  { %v5850_v57 = vpop.permute.xlu1 %5849 }
 0x99a   :  { %v5848_v36 = vpop.permute.xlu0 %5847  ;;  %v6606_v13 = vld [vmem:[#allocation5 + $0xf0] sm:$0xff]  ;;  %6009 = vst.msk [vmem:[#allocation5 + $0x108] sm:$0xff] %vm5975_vm9, %v5850_v57 }
 0x99b   :  { %6008 = vst.msk [vmem:[#allocation5 + $0x100] sm:$0xff] %vm5975_vm9, %v5848_v36  ;;  %8535 = vmatprep.mubr.msk.f32.mxu0 %vm6656_vm13, %v6606_v13 }
 0x99d   :  { %v6119_v62 = vpop.permute.xlu1 %6118 }
 0x99e   :  { %v6117_v10 = vpop.permute.xlu0 %6116  ;;  %v6607_v61 = vld [vmem:[#allocation5 + $0xf8] sm:$0xff]  ;;  %6278 = vst.msk [vmem:[#allocation5 + $0x108] sm:$0xff] %vm6244_vm10, %v6119_v62 }
 0x99f   :  { %6277 = vst.msk [vmem:[#allocation5 + $0x100] sm:$0xff] %vm6244_vm10, %v6117_v10  ;;  %8536 = vmatmul.mubr.msk.f32.gmra.mrb[94].mxu0 %vm6656_vm13, %v6607_v61  ;;  %v8598_v3 = vpop.f32.mrb[30].mxu1 }
 0x9a0   :  { %v7507_v26 = vpop.f32.mrb[31].mxu1 }
 0x9a1   :  { %v6386_v34 = vpop.permute.xlu1 %6385 }
 0x9a2   :  { %v6384_v39 = vpop.permute.xlu0 %6383  ;;  %6545 = vst.msk [vmem:[#allocation5 + $0x108] sm:$0xff] %vm6511_vm11, %v6386_v34 }
 0x9a3   :  { %6544 = vst.msk [vmem:[#allocation5 + $0x100] sm:$0xff] %vm6511_vm11, %v6384_v39  ;;  %v8601_v51 = vpop.f32.mrb[32].mxu1 }
 0x9a4   :  { %v7517_v48 = vpop.f32.mrb[33].mxu1 }
 0x9a7   :  { %v8492_v31 = vpop.f32.mrb[64].mxu0 }
 0x9a8   :  { %v8604_v43 = vpop.f32.mrb[34].mxu1  ;;  %v6921_v47 = vadd.f32 %v8492_v31, %v14921_v54  ;;  %v6915_v42 = vpop.f32.mrb[65].mxu0 }
 0x9a9   :  { %v7527_v46 = vpop.f32.mrb[35].mxu1  ;;  %v6916_v19 = vadd.f32 %v14921_v54, %v6915_v42  ;;  %v6609_v35 = vld [vmem:[#allocation5 + $0x108] sm:$0xff] }
 0x9aa   :  { %v6608_v50 = vld [vmem:[#allocation5 + $0x100] sm:$0xff]  ;;  %v8735_v0 = vadd.f32 %v8598_v3, %v6921_v47 }
 0x9ab   :  { %8538 = vmatprep.mubr.msk.f32.mxu0 %vm6656_vm13, %v6608_v50  ;;  %v8738_v17 = vadd.f32 %v7507_v26, %v6916_v19 }
 0x9ac   :  { %v8607_v18 = vpop.f32.mrb[36].mxu1  ;;  %8539 = vmatmul.mubr.msk.f32.gmra.mrb[96].mxu0 %vm6656_vm13, %v6609_v35  ;;  %v8736_v9 = vadd.f32 %v8735_v0, %v14927_v5 }
 0x9ad   :  { %v7537_v1 = vpop.f32.mrb[37].mxu1  ;;  %v8739_v44 = vadd.f32 %v8738_v17, %v14927_v5 }
 0x9ae   :  { %7891 = vst.msk [vmem:[%s15367_s7 + $0x8] sm:$0xff] %vm114_vm14, %v8736_v9 }
 0x9af   :  { %7890 = vst.msk [vmem:[%s15367_s7] sm:$0xff] %vm114_vm14, %v8739_v44 }
 0x9b0   :  { %v8610_v40 = vpop.f32.mrb[38].mxu1 }
 0x9b1   :  { %v7547_v41 = vpop.f32.mrb[39].mxu1 }
 0x9b3   :  { %v8495_v14 = vpop.f32.mrb[66].mxu0 }
 0x9b4   :  { %v14942_v56 = vpop.f32.mrb[40].mxu1  ;;  %v6931_v60 = vadd.f32 %v8495_v14, %v14921_v54  ;;  %v6925_v37 = vpop.f32.mrb[67].mxu0 }
 0x9b5   :  { %v14945_v4 = vpop.f32.mrb[41].mxu1  ;;  %v6926_v55 = vadd.f32 %v14921_v54, %v6925_v37 }
 0x9b6   :  { %v8741_v59 = vadd.f32 %v14927_v5, %v6931_v60 }
 0x9b7   :  { %v8744_v45 = vadd.f32 %v14927_v5, %v6926_v55 }
 0x9b8   :  { %v14950_v6 = vpop.f32.mrb[42].mxu1  ;;  %v8742_v32 = vadd.f32 %v8741_v59, %v8601_v51 }
 0x9b9   :  { %v14952_v27 = vpop.f32.mrb[43].mxu1  ;;  %v8745_v12 = vadd.f32 %v8744_v45, %v7517_v48 }
 0x9ba   :  { %7893 = vst.msk [vmem:[%s15367_s7 + $0x18] sm:$0xff] %vm114_vm14, %v8742_v32 }
 0x9bb   :  { %7892 = vst.msk [vmem:[%s15367_s7 + $0x10] sm:$0xff] %vm114_vm14, %v8745_v12 }
 0x9bc   :  { %v14962_v49 = vpop.f32.mrb[44].mxu1 }
 0x9bd   :  { %v14964_v38 = vpop.f32.mrb[45].mxu1 }
 0x9bf   :  { %v8498_v23 = vpop.f32.mrb[68].mxu0 }
 0x9c0   :  { %v14966_v25 = vpop.f32.mrb[46].mxu1  ;;  %v6941_v29 = vadd.f32 %v8498_v23, %v14921_v54  ;;  %v6935_v22 = vpop.f32.mrb[69].mxu0 }
 0x9c1   :  { %v14969_v16 = vpop.f32.mrb[47].mxu1  ;;  %v6936_v24 = vadd.f32 %v14921_v54, %v6935_v22 }
 0x9c2   :  { %v8747_v11 = vadd.f32 %v14927_v5, %v6941_v29 }
 0x9c3   :  { %v8750_v52 = vadd.f32 %v14927_v5, %v6936_v24 }
 0x9c4   :  { %v14974_v15 = vpop.f32.mrb[48].mxu1  ;;  %v8748_v21 = vadd.f32 %v8747_v11, %v8604_v43 }
 0x9c5   :  { %v14976_v63 = vpop.f32.mrb[49].mxu1  ;;  %v8751_v2 = vadd.f32 %v8750_v52, %v7527_v46 }
 0x9c6   :  { %7895 = vst.msk [vmem:[%s15367_s7 + $0x28] sm:$0xff] %vm114_vm14, %v8748_v21 }
 0x9c7   :  { %7894 = vst.msk [vmem:[%s15367_s7 + $0x20] sm:$0xff] %vm114_vm14, %v8751_v2 }
 0x9c8   :  { %v14986_v58 = vpop.f32.mrb[50].mxu1 }
 0x9c9   :  { %v14988_v8 = vpop.f32.mrb[51].mxu1 }
 0x9cb   :  { %v8501_v20 = vpop.f32.mrb[70].mxu0 }
 0x9cc   :  { %v14990_v28 = vpop.f32.mrb[52].mxu1  ;;  %v6951_v33 = vadd.f32 %v8501_v20, %v14921_v54  ;;  %v6945_v30 = vpop.f32.mrb[71].mxu0 }
 0x9cd   :  { %v14993_v7 = vpop.f32.mrb[53].mxu1  ;;  %v6946_v53 = vadd.f32 %v14921_v54, %v6945_v30 }
 0x9ce   :  { %v8753_v57 = vadd.f32 %v14927_v5, %v6951_v33 }
 0x9cf   :  { %v8756_v36 = vadd.f32 %v14927_v5, %v6946_v53 }
 0x9d0   :  { %v14998_v13 = vpop.f32.mrb[54].mxu1  ;;  %v8754_v62 = vadd.f32 %v8753_v57, %v8607_v18  ;;  %v15040_v18 = vadd.f32 %v14927_v5, %v14921_v54 }
 0x9d1   :  { %v15000_v10 = vpop.f32.mrb[55].mxu1  ;;  %v8757_v61 = vadd.f32 %v8756_v36, %v7537_v1 }
 0x9d2   :  { %7897 = vst.msk [vmem:[%s15367_s7 + $0x38] sm:$0xff] %vm114_vm14, %v8754_v62 }
 0x9d3   :  { %7896 = vst.msk [vmem:[%s15367_s7 + $0x30] sm:$0xff] %vm114_vm14, %v8757_v61 }
 0x9d4   :  { %v15010_v3 = vpop.f32.mrb[56].mxu1 }
 0x9d5   :  { %v15012_v26 = vpop.f32.mrb[57].mxu1 }
 0x9d7   :  { %v8504_v34 = vpop.f32.mrb[72].mxu0 }
 0x9d8   :  { %v15014_v39 = vpop.f32.mrb[58].mxu1  ;;  %v6961_v51 = vadd.f32 %v8504_v34, %v14921_v54  ;;  %v6955_v48 = vpop.f32.mrb[73].mxu0 }
 0x9d9   :  { %v15017_v31 = vpop.f32.mrb[59].mxu1  ;;  %v6956_v43 = vadd.f32 %v14921_v54, %v6955_v48 }
 0x9da   :  { %v8759_v47 = vadd.f32 %v14927_v5, %v6961_v51 }
 0x9db   :  { %v8762_v42 = vadd.f32 %v14927_v5, %v6956_v43 }
 0x9dc   :  { %v15022_v46 = vpop.f32.mrb[60].mxu1  ;;  %v8760_v19 = vadd.f32 %v8759_v47, %v8610_v40 }
 0x9dd   :  { %v15024_v50 = vpop.f32.mrb[61].mxu1  ;;  %v8763_v35 = vadd.f32 %v8762_v42, %v7547_v41 }
 0x9de   :  { %7899 = vst.msk [vmem:[%s15367_s7 + $0x48] sm:$0xff] %vm114_vm14, %v8760_v19 }
 0x9df   :  { %7898 = vst.msk [vmem:[%s15367_s7 + $0x40] sm:$0xff] %vm114_vm14, %v8763_v35 }
 0x9e0   :  { %v15034_v0 = vpop.f32.mrb[62].mxu1 }
 0x9e1   :  { %v15036_v17 = vpop.f32.mrb[63].mxu1 }
 0x9e3   :  { %v8507_v9 = vpop.f32.mrb[74].mxu0 }
 0x9e4   :  { %v8649_v1 = vpop.f32.mrb[0].mxu1  ;;  %v6971_v44 = vadd.f32 %v8507_v9, %v14921_v54  ;;  %v6965_v41 = vpop.f32.mrb[75].mxu0 }
 0x9e5   :  { %v8837_v40 = vadd.f32 %v15040_v18, %v8649_v1  ;;  %v7677_v14 = vpop.f32.mrb[1].mxu1  ;;  %v6966_v60 = vadd.f32 %v14921_v54, %v6965_v41 }
 0x9e6   :  { %v8839_v37 = vadd.f32 %v15040_v18, %v7677_v14  ;;  %v8765_v55 = vadd.f32 %v14927_v5, %v6971_v44 }
 0x9e7   :  { %7925 = vst.msk [vmem:[%s15367_s7 + $0x118] sm:$0xff] %vm114_vm14, %v8837_v40  ;;  %v8768_v59 = vadd.f32 %v14927_v5, %v6966_v60 }
 0x9e8   :  { %7924 = vst.msk [vmem:[%s15367_s7 + $0x110] sm:$0xff] %vm114_vm14, %v8839_v37  ;;  %v8652_v45 = vpop.f32.mrb[2].mxu1  ;;  %v8766_v32 = vadd.f32 %v8765_v55, %v14942_v56 }
 0x9e9   :  { %v8841_v12 = vadd.f32 %v15040_v18, %v8652_v45  ;;  %v7687_v23 = vpop.f32.mrb[3].mxu1  ;;  %v8769_v29 = vadd.f32 %v8768_v59, %v14945_v4 }
 0x9ea   :  { %v8843_v22 = vadd.f32 %v15040_v18, %v7687_v23  ;;  %7901 = vst.msk [vmem:[%s15367_s7 + $0x58] sm:$0xff] %vm114_vm14, %v8766_v32 }
 0x9eb   :  { %7927 = vst.msk [vmem:[%s15367_s7 + $0x128] sm:$0xff] %vm114_vm14, %v8841_v12  ;;  %7900 = vst.msk [vmem:[%s15367_s7 + $0x50] sm:$0xff] %vm114_vm14, %v8769_v29 }
 0x9ec   :  { %7926 = vst.msk [vmem:[%s15367_s7 + $0x120] sm:$0xff] %vm114_vm14, %v8843_v22  ;;  %v8655_v56 = vpop.f32.mrb[4].mxu1 }
 0x9ed   :  { %v8845_v4 = vadd.f32 %v15040_v18, %v8655_v56  ;;  %v7697_v24 = vpop.f32.mrb[5].mxu1 }
 0x9ee   :  { %v8847_v11 = vadd.f32 %v15040_v18, %v7697_v24 }
 0x9ef   :  { %7929 = vst.msk [vmem:[%s15367_s7 + $0x138] sm:$0xff] %vm114_vm14, %v8845_v4  ;;  %v8510_v52 = vpop.f32.mrb[76].mxu0 }
 0x9f0   :  { %7928 = vst.msk [vmem:[%s15367_s7 + $0x130] sm:$0xff] %vm114_vm14, %v8847_v11  ;;  %v8658_v21 = vpop.f32.mrb[6].mxu1  ;;  %v6981_v2 = vadd.f32 %v8510_v52, %v14921_v54  ;;  %v6975_v33 = vpop.f32.mrb[77].mxu0 }
 0x9f1   :  { %v8849_v20 = vadd.f32 %v15040_v18, %v8658_v21  ;;  %v7707_v30 = vpop.f32.mrb[7].mxu1  ;;  %v6976_v53 = vadd.f32 %v14921_v54, %v6975_v33 }
 0x9f2   :  { %v8851_v57 = vadd.f32 %v15040_v18, %v7707_v30  ;;  %v8771_v36 = vadd.f32 %v14927_v5, %v6981_v2 }
 0x9f3   :  { %7931 = vst.msk [vmem:[%s15367_s7 + $0x148] sm:$0xff] %vm114_vm14, %v8849_v20  ;;  %v8774_v62 = vadd.f32 %v14927_v5, %v6976_v53 }
 0x9f4   :  { %7930 = vst.msk [vmem:[%s15367_s7 + $0x140] sm:$0xff] %vm114_vm14, %v8851_v57  ;;  %v8661_v61 = vpop.f32.mrb[8].mxu1  ;;  %v8772_v34 = vadd.f32 %v8771_v36, %v14950_v6 }
 0x9f5   :  { %v8853_v51 = vadd.f32 %v15040_v18, %v8661_v61  ;;  %v7717_v48 = vpop.f32.mrb[9].mxu1  ;;  %v8775_v43 = vadd.f32 %v8774_v62, %v14952_v27 }
 0x9f6   :  { %v8855_v47 = vadd.f32 %v15040_v18, %v7717_v48  ;;  %7903 = vst.msk [vmem:[%s15367_s7 + $0x68] sm:$0xff] %vm114_vm14, %v8772_v34 }
 0x9f7   :  { %7933 = vst.msk [vmem:[%s15367_s7 + $0x158] sm:$0xff] %vm114_vm14, %v8853_v51  ;;  %7902 = vst.msk [vmem:[%s15367_s7 + $0x60] sm:$0xff] %vm114_vm14, %v8775_v43 }
 0x9f8   :  { %7932 = vst.msk [vmem:[%s15367_s7 + $0x150] sm:$0xff] %vm114_vm14, %v8855_v47  ;;  %v8664_v6 = vpop.f32.mrb[10].mxu1 }
 0x9f9   :  { %v8857_v27 = vadd.f32 %v15040_v18, %v8664_v6  ;;  %v7727_v42 = vpop.f32.mrb[11].mxu1 }
 0x9fa   :  { %v8859_v19 = vadd.f32 %v15040_v18, %v7727_v42 }
 0x9fb   :  { %7935 = vst.msk [vmem:[%s15367_s7 + $0x168] sm:$0xff] %vm114_vm14, %v8857_v27  ;;  %v8513_v35 = vpop.f32.mrb[78].mxu0 }
 0x9fc   :  { %7934 = vst.msk [vmem:[%s15367_s7 + $0x160] sm:$0xff] %vm114_vm14, %v8859_v19  ;;  %v8667_v9 = vpop.f32.mrb[12].mxu1  ;;  %v6991_v1 = vadd.f32 %v8513_v35, %v14921_v54  ;;  %v6985_v40 = vpop.f32.mrb[79].mxu0 }
 0x9fd   :  { %v8861_v44 = vadd.f32 %v15040_v18, %v8667_v9  ;;  %v7737_v41 = vpop.f32.mrb[13].mxu1  ;;  %v6986_v14 = vadd.f32 %v14921_v54, %v6985_v40 }
 0x9fe   :  { %v8863_v60 = vadd.f32 %v15040_v18, %v7737_v41  ;;  %v8777_v37 = vadd.f32 %v14927_v5, %v6991_v1 }
 0x9ff   :  { %7937 = vst.msk [vmem:[%s15367_s7 + $0x178] sm:$0xff] %vm114_vm14, %v8861_v44  ;;  %v8780_v55 = vadd.f32 %v14927_v5, %v6986_v14 }
 0xa00   :  { %7936 = vst.msk [vmem:[%s15367_s7 + $0x170] sm:$0xff] %vm114_vm14, %v8863_v60  ;;  %v8670_v59 = vpop.f32.mrb[14].mxu1  ;;  %v8778_v45 = vadd.f32 %v8777_v37, %v14962_v49 }
 0xa01   :  { %v8865_v32 = vadd.f32 %v15040_v18, %v8670_v59  ;;  %v7747_v12 = vpop.f32.mrb[15].mxu1  ;;  %v8781_v23 = vadd.f32 %v8780_v55, %v14964_v38 }
 0xa02   :  { %v8867_v29 = vadd.f32 %v15040_v18, %v7747_v12  ;;  %7905 = vst.msk [vmem:[%s15367_s7 + $0x78] sm:$0xff] %vm114_vm14, %v8778_v45 }
 0xa03   :  { %7939 = vst.msk [vmem:[%s15367_s7 + $0x188] sm:$0xff] %vm114_vm14, %v8865_v32  ;;  %7904 = vst.msk [vmem:[%s15367_s7 + $0x70] sm:$0xff] %vm114_vm14, %v8781_v23 }
 0xa04   :  { %7938 = vst.msk [vmem:[%s15367_s7 + $0x180] sm:$0xff] %vm114_vm14, %v8867_v29  ;;  %v8673_v49 = vpop.f32.mrb[16].mxu1 }
 0xa05   :  { %v8869_v38 = vadd.f32 %v15040_v18, %v8673_v49  ;;  %v7757_v22 = vpop.f32.mrb[17].mxu1 }
 0xa06   :  { %v8871_v56 = vadd.f32 %v15040_v18, %v7757_v22 }
 0xa07   :  { %7941 = vst.msk [vmem:[%s15367_s7 + $0x198] sm:$0xff] %vm114_vm14, %v8869_v38  ;;  %v8516_v4 = vpop.f32.mrb[80].mxu0 }
 0xa08   :  { %7940 = vst.msk [vmem:[%s15367_s7 + $0x190] sm:$0xff] %vm114_vm14, %v8871_v56  ;;  %v7001_v24 = vadd.f32 %v8516_v4, %v14921_v54  ;;  %v8676_v11 = vpop.f32.mrb[18].mxu1  ;;  %v6995_v52 = vpop.f32.mrb[81].mxu0 }
 0xa09   :  { %v8873_v21 = vadd.f32 %v15040_v18, %v8676_v11  ;;  %v6996_v2 = vadd.f32 %v14921_v54, %v6995_v52  ;;  %v7767_v20 = vpop.f32.mrb[19].mxu1 }
 0xa0a   :  { %v8783_v33 = vadd.f32 %v14927_v5, %v7001_v24  ;;  %v8875_v30 = vadd.f32 %v15040_v18, %v7767_v20 }
 0xa0b   :  { %7943 = vst.msk [vmem:[%s15367_s7 + $0x1a8] sm:$0xff] %vm114_vm14, %v8873_v21  ;;  %v8786_v53 = vadd.f32 %v14927_v5, %v6996_v2 }
 0xa0c   :  { %v8784_v57 = vadd.f32 %v8783_v33, %v14966_v25  ;;  %7942 = vst.msk [vmem:[%s15367_s7 + $0x1a0] sm:$0xff] %vm114_vm14, %v8875_v30  ;;  %v8679_v36 = vpop.f32.mrb[20].mxu1 }
 0xa0d   :  { %v8787_v62 = vadd.f32 %v8786_v53, %v14969_v16  ;;  %v8877_v61 = vadd.f32 %v15040_v18, %v8679_v36  ;;  %v7777_v34 = vpop.f32.mrb[21].mxu1 }
 0xa0e   :  { %7907 = vst.msk [vmem:[%s15367_s7 + $0x88] sm:$0xff] %vm114_vm14, %v8784_v57  ;;  %v8879_v51 = vadd.f32 %v15040_v18, %v7777_v34 }
 0xa0f   :  { %7906 = vst.msk [vmem:[%s15367_s7 + $0x80] sm:$0xff] %vm114_vm14, %v8787_v62  ;;  %7945 = vst.msk [vmem:[%s15367_s7 + $0x1b8] sm:$0xff] %vm114_vm14, %v8877_v61 }
 0xa10   :  { %7944 = vst.msk [vmem:[%s15367_s7 + $0x1b0] sm:$0xff] %vm114_vm14, %v8879_v51  ;;  %v8682_v25 = vpop.f32.mrb[22].mxu1 }
 0xa11   :  { %v8881_v16 = vadd.f32 %v15040_v18, %v8682_v25  ;;  %v7787_v48 = vpop.f32.mrb[23].mxu1 }
 0xa12   :  { %v8883_v43 = vadd.f32 %v15040_v18, %v7787_v48 }
 0xa13   :  { %7947 = vst.msk [vmem:[%s15367_s7 + $0x1c8] sm:$0xff] %vm114_vm14, %v8881_v16  ;;  %v8519_v47 = vpop.f32.mrb[82].mxu0 }
 0xa14   :  { %7946 = vst.msk [vmem:[%s15367_s7 + $0x1c0] sm:$0xff] %vm114_vm14, %v8883_v43  ;;  %v7011_v6 = vadd.f32 %v8519_v47, %v14921_v54  ;;  %v8685_v27 = vpop.f32.mrb[24].mxu1  ;;  %v7005_v42 = vpop.f32.mrb[83].mxu0 }
 0xa15   :  { %v8885_v19 = vadd.f32 %v15040_v18, %v8685_v27  ;;  %v7006_v35 = vadd.f32 %v14921_v54, %v7005_v42  ;;  %v7797_v9 = vpop.f32.mrb[25].mxu1 }
 0xa16   :  { %v8789_v1 = vadd.f32 %v14927_v5, %v7011_v6  ;;  %v8887_v44 = vadd.f32 %v15040_v18, %v7797_v9 }
 0xa17   :  { %7949 = vst.msk [vmem:[%s15367_s7 + $0x1d8] sm:$0xff] %vm114_vm14, %v8885_v19  ;;  %v8792_v40 = vadd.f32 %v14927_v5, %v7006_v35 }
 0xa18   :  { %v8790_v41 = vadd.f32 %v8789_v1, %v14974_v15  ;;  %7948 = vst.msk [vmem:[%s15367_s7 + $0x1d0] sm:$0xff] %vm114_vm14, %v8887_v44  ;;  %v8688_v14 = vpop.f32.mrb[26].mxu1 }
 0xa19   :  { %v8793_v60 = vadd.f32 %v8792_v40, %v14976_v63  ;;  %v8889_v37 = vadd.f32 %v15040_v18, %v8688_v14  ;;  %v7807_v55 = vpop.f32.mrb[27].mxu1 }
 0xa1a   :  { %7909 = vst.msk [vmem:[%s15367_s7 + $0x98] sm:$0xff] %vm114_vm14, %v8790_v41  ;;  %v8891_v59 = vadd.f32 %v15040_v18, %v7807_v55 }
 0xa1b   :  { %7908 = vst.msk [vmem:[%s15367_s7 + $0x90] sm:$0xff] %vm114_vm14, %v8793_v60  ;;  %7951 = vst.msk [vmem:[%s15367_s7 + $0x1e8] sm:$0xff] %vm114_vm14, %v8889_v37 }
 0xa1c   :  { %7950 = vst.msk [vmem:[%s15367_s7 + $0x1e0] sm:$0xff] %vm114_vm14, %v8891_v59  ;;  %v8691_v15 = vpop.f32.mrb[28].mxu1 }
 0xa1d   :  { %v8893_v63 = vadd.f32 %v15040_v18, %v8691_v15  ;;  %v7817_v45 = vpop.f32.mrb[29].mxu1 }
 0xa1e   :  { %v8895_v32 = vadd.f32 %v15040_v18, %v7817_v45 }
 0xa1f   :  { %7953 = vst.msk [vmem:[%s15367_s7 + $0x1f8] sm:$0xff] %vm114_vm14, %v8893_v63 }
 0xa20   :  { %7952 = vst.msk [vmem:[%s15367_s7 + $0x1f0] sm:$0xff] %vm114_vm14, %v8895_v32 }
 0xa22   :  { %v8522_v12 = vpop.f32.mrb[84].mxu0 }
 0xa23   :  { %v7021_v23 = vadd.f32 %v8522_v12, %v14921_v54  ;;  %v7015_v29 = vpop.f32.mrb[85].mxu0 }
 0xa24   :  { %v7016_v49 = vadd.f32 %v14921_v54, %v7015_v29 }
 0xa25   :  { %v8795_v38 = vadd.f32 %v14927_v5, %v7021_v23 }
 0xa26   :  { %v8798_v18 = vadd.f32 %v14927_v5, %v7016_v49 }
 0xa27   :  { %v8796_v22 = vadd.f32 %v8795_v38, %v14986_v58 }
 0xa28   :  { %v8799_v56 = vadd.f32 %v8798_v18, %v14988_v8 }
 0xa29   :  { %7911 = vst.msk [vmem:[%s15367_s7 + $0xa8] sm:$0xff] %vm114_vm14, %v8796_v22 }
 0xa2a   :  { %7910 = vst.msk [vmem:[%s15367_s7 + $0xa0] sm:$0xff] %vm114_vm14, %v8799_v56 }
 0xa32   :  { %v8525_v4 = vpop.f32.mrb[86].mxu0 }
 0xa33   :  { %v7031_v24 = vadd.f32 %v8525_v4, %v14921_v54  ;;  %v7025_v11 = vpop.f32.mrb[87].mxu0 }
 0xa34   :  { %v7026_v52 = vadd.f32 %v14921_v54, %v7025_v11 }
 0xa35   :  { %v8801_v58 = vadd.f32 %v14927_v5, %v7031_v24 }
 0xa36   :  { %v8804_v8 = vadd.f32 %v14927_v5, %v7026_v52 }
 0xa37   :  { %v8802_v21 = vadd.f32 %v8801_v58, %v14990_v28 }
 0xa38   :  { %v8805_v2 = vadd.f32 %v8804_v8, %v14993_v7 }
 0xa39   :  { %7913 = vst.msk [vmem:[%s15367_s7 + $0xb8] sm:$0xff] %vm114_vm14, %v8802_v21 }
 0xa3a   :  { %7912 = vst.msk [vmem:[%s15367_s7 + $0xb0] sm:$0xff] %vm114_vm14, %v8805_v2 }
 0xa42   :  { %v8528_v20 = vpop.f32.mrb[88].mxu0 }
 0xa43   :  { %v7041_v33 = vadd.f32 %v8528_v20, %v14921_v54  ;;  %v7035_v30 = vpop.f32.mrb[89].mxu0 }
 0xa44   :  { %v7036_v53 = vadd.f32 %v14921_v54, %v7035_v30 }
 0xa45   :  { %v8807_v28 = vadd.f32 %v14927_v5, %v7041_v33 }
 0xa46   :  { %v8810_v7 = vadd.f32 %v14927_v5, %v7036_v53 }
 0xa47   :  { %v8808_v57 = vadd.f32 %v8807_v28, %v14998_v13 }
 0xa48   :  { %v8811_v36 = vadd.f32 %v8810_v7, %v15000_v10 }
 0xa49   :  { %7915 = vst.msk [vmem:[%s15367_s7 + $0xc8] sm:$0xff] %vm114_vm14, %v8808_v57 }
 0xa4a   :  { %7914 = vst.msk [vmem:[%s15367_s7 + $0xc0] sm:$0xff] %vm114_vm14, %v8811_v36 }
 0xa52   :  { %v8531_v62 = vpop.f32.mrb[90].mxu0 }
 0xa53   :  { %v7051_v61 = vadd.f32 %v8531_v62, %v14921_v54  ;;  %v7045_v34 = vpop.f32.mrb[91].mxu0 }
 0xa54   :  { %v7046_v51 = vadd.f32 %v14921_v54, %v7045_v34 }
 0xa55   :  { %v8813_v13 = vadd.f32 %v14927_v5, %v7051_v61 }
 0xa56   :  { %v8816_v10 = vadd.f32 %v14927_v5, %v7046_v51 }
 0xa57   :  { %v8814_v25 = vadd.f32 %v8813_v13, %v15010_v3 }
 0xa58   :  { %v8817_v16 = vadd.f32 %v8816_v10, %v15012_v26 }
 0xa59   :  { %7917 = vst.msk [vmem:[%s15367_s7 + $0xd8] sm:$0xff] %vm114_vm14, %v8814_v25 }
 0xa5a   :  { %7916 = vst.msk [vmem:[%s15367_s7 + $0xd0] sm:$0xff] %vm114_vm14, %v8817_v16 }
 0xa62   :  { %v8534_v48 = vpop.f32.mrb[92].mxu0 }
 0xa63   :  { %v7061_v43 = vadd.f32 %v8534_v48, %v14921_v54  ;;  %v7055_v47 = vpop.f32.mrb[93].mxu0 }
 0xa64   :  { %v7056_v6 = vadd.f32 %v14921_v54, %v7055_v47 }
 0xa65   :  { %v8819_v3 = vadd.f32 %v14927_v5, %v7061_v43 }
 0xa66   :  { %v8822_v26 = vadd.f32 %v14927_v5, %v7056_v6 }
 0xa67   :  { %v8820_v27 = vadd.f32 %v8819_v3, %v15014_v39 }
 0xa68   :  { %v8823_v42 = vadd.f32 %v8822_v26, %v15017_v31 }
 0xa69   :  { %7919 = vst.msk [vmem:[%s15367_s7 + $0xe8] sm:$0xff] %vm114_vm14, %v8820_v27 }
 0xa6a   :  { %7918 = vst.msk [vmem:[%s15367_s7 + $0xe0] sm:$0xff] %vm114_vm14, %v8823_v42 }
 0xa72   :  { %v8537_v19 = vpop.f32.mrb[94].mxu0 }
 0xa73   :  { %v7071_v35 = vadd.f32 %v8537_v19, %v14921_v54  ;;  %v7065_v9 = vpop.f32.mrb[95].mxu0 }
 0xa74   :  { %v7066_v1 = vadd.f32 %v14921_v54, %v7065_v9 }
 0xa75   :  { %v8825_v39 = vadd.f32 %v14927_v5, %v7071_v35 }
 0xa76   :  { %v8828_v31 = vadd.f32 %v14927_v5, %v7066_v1 }
 0xa77   :  { %v8826_v44 = vadd.f32 %v8825_v39, %v15022_v46 }
 0xa78   :  { %v8829_v40 = vadd.f32 %v8828_v31, %v15024_v50 }
 0xa79   :  { %7921 = vst.msk [vmem:[%s15367_s7 + $0xf8] sm:$0xff] %vm114_vm14, %v8826_v44 }
 0xa7a   :  { %7920 = vst.msk [vmem:[%s15367_s7 + $0xf0] sm:$0xff] %vm114_vm14, %v8829_v40 }
 0xa7f   :  { %v8540_v41 = vpop.f32.mrb[96].mxu0 }
 0xa80   :  { %v7081_v14 = vadd.f32 %v8540_v41, %v14921_v54  ;;  %v7075_v60 = vpop.f32.mrb[97].mxu0 }
 0xa81   :  { %v7076_v37 = vadd.f32 %v14921_v54, %v7075_v60 }
 0xa82   :  { %v8831_v46 = vadd.f32 %v14927_v5, %v7081_v14 }
 0xa83   :  { %v8834_v50 = vadd.f32 %v14927_v5, %v7076_v37 }
 0xa84   :  { %v8832_v55 = vadd.f32 %v8831_v46, %v15034_v0 }
 0xa85   :  { %v8835_v59 = vadd.f32 %v8834_v50, %v15036_v17 }
 0xa86   :  { %7923 = vst.msk [vmem:[%s15367_s7 + $0x108] sm:$0xff] %vm114_vm14, %v8832_v55 }
 0xa87   :  { %7922 = vst.msk [vmem:[%s15367_s7 + $0x100] sm:$0xff] %vm114_vm14, %v8835_v59 }

</bundles_post_ra>
